<compile_context>
chip_gen: v7x
topology: tpu7x:2x2x1
jax: 0.10.0
libtpu: 0.0.40
codegen_flags: <defaults>
</compile_context>

<pallas_src>
import functools

import numpy as np
import jax
import jax.numpy as jnp
from jax.experimental import pallas as pl
from jax.experimental.pallas import tpu as pltpu

BN_EPS = 1e-5
BN_SCALE = 1.0 / float(np.sqrt(1.0 + BN_EPS))   # eval-mode BatchNorm1d at init
LEAKY_SLOPE = 0.01                               # nn.LeakyReLU default
TEMP = 0.1                                       # RelaxedOneHotCategorical temperature


# ----------------------------------------------------------------------------
# Pallas kernel 1: fused 3-layer MLP.
# grid = (t1 + t2 + t3,)  — phase 1 streams w1 tiles, phase 2 w2, phase 3 w3.
# Hidden activations live in VMEM scratch shaped (n_tiles, B, tn) so every
# read/write uses static or leading-index addressing only.
# ----------------------------------------------------------------------------
def _mlp3_kernel(x_ref, w1_ref, b1_ref, w2_ref, b2_ref, w3_ref, b3_ref,
                 o_ref, h1_ref, h2_ref, *, t1, t2, tn1, tn2, final_act):
    t = pl.program_id(0)

    def leaky(v):
        return jnp.where(v >= 0, v, LEAKY_SLOPE * v)

    def chunked_dot(h_ref, n_chunks, chunk, w_ref):
        # h_ref: (n_chunks, B, chunk) f32 scratch; w_ref: (n_chunks*chunk, tn).
        acc = None
        for c in range(n_chunks):                      # static unroll
            p = jnp.dot(h_ref[c].astype(jnp.bfloat16),
                        w_ref[c * chunk:(c + 1) * chunk, :],
                        preferred_element_type=jnp.float32)
            acc = p if acc is None else acc + p
        return acc

    @pl.when(t < t1)
    def _layer1():
        h = jnp.dot(x_ref[...].astype(jnp.bfloat16), w1_ref[...],
                    preferred_element_type=jnp.float32) + b1_ref[...]
        h1_ref[t] = leaky(h)

    @pl.when(jnp.logical_and(t >= t1, t < t1 + t2))
    def _layer2():
        h = chunked_dot(h1_ref, t1, tn1, w2_ref) + b2_ref[...]
        h2_ref[t - t1] = leaky(h)

    @pl.when(t >= t1 + t2)
    def _layer3():
        o = chunked_dot(h2_ref, t2, tn2, w3_ref) + b3_ref[...]
        if final_act == "leaky":
            o = leaky(o)
        elif final_act == "sigmoid":
            o = 1.0 / (1.0 + jnp.exp(-o))             # exact: rec loss sensitive
        elif final_act == "softmax":
            o = o - jnp.max(o, axis=-1, keepdims=True)
            e = jnp.exp(o)
            o = e / jnp.sum(e, axis=-1, keepdims=True)
        # final_act == "none": raw affine output
        o_ref[...] = o


def _clip_idx(v, n):
    return jnp.minimum(jnp.maximum(v, 0), n - 1)


def _pick_tile(dim, target):
    """Largest multiple of 128 <= target dividing dim; full dim if small/unaligned."""
    if dim % 128 != 0 or dim <= target:
        return dim
    t = (target // 128) * 128
    while t >= 128 and dim % t != 0:
        t -= 128
    return t if t >= 128 else dim


def fused_mlp3(x, layers, *, final_act,
               tn_target=1024, weight_budget_bytes=24 * 1024 * 1024):
    (w1, b1), (w2, b2), (w3, b3) = layers
    d_in, nh = w1.shape
    d_out = w3.shape[1]
    assert w2.shape == (nh, nh) and w3.shape[0] == nh
    B = x.shape[0]

    x = x.astype(jnp.float32)
    if x.shape[1] < d_in:                 # zero-pad activation to padded fan-in
        x = jnp.pad(x, ((0, 0), (0, d_in - x.shape[1])))

    # Output-dim tiles for the three weight streams (full-K dots).  Shrink the
    # target until the double-buffered bf16 weight footprint fits the budget
    # (keeps v7x's 64 MiB VMEM safe).
    tgt = tn_target
    while True:
        tn1 = _pick_tile(nh, tgt)
        tn2 = _pick_tile(nh, tgt)
        tn3 = d_out if final_act == "softmax" else _pick_tile(d_out, tgt)
        wbytes = 2 * 2 * (d_in * tn1 + nh * tn2 + nh * tn3)
        if wbytes <= weight_budget_bytes or tgt <= 256:
            break
        tgt //= 2
    t1, t2, t3 = nh // tn1, nh // tn2, d_out // tn3

    est = (wbytes                                   # double-buffered bf16 weights
           + 2 * 4 * B * (d_in + tn3)               # x + out (f32, double-buffered)
           + 2 * 4 * (tn1 + tn2 + tn3)              # bias tiles
           + 4 * B * (t1 * tn1 + t2 * tn2)          # h1/h2 scratch
           + (2 << 20))
    vmem_limit = int(min(max(2 * est, 16 << 20), 48 << 20))

    im_x = lambda t: (0, 0)                              # resident activations
    im_1 = lambda t: (0, jnp.minimum(t, t1 - 1))         # w1 stream (phase 1)
    im_2 = lambda t: (0, _clip_idx(t - t1, t2))          # w2 stream (phase 2)
    im_3 = lambda t: (0, _clip_idx(t - t1 - t2, t3))     # w3 stream (phase 3)

    return pl.pallas_call(
        functools.partial(_mlp3_kernel, t1=t1, t2=t2, tn1=tn1, tn2=tn2,
                          final_act=final_act),
        out_shape=jax.ShapeDtypeStruct((B, d_out), jnp.float32),
        grid=(t1 + t2 + t3,),
        in_specs=[
            pl.BlockSpec((B, d_in), im_x),
            pl.BlockSpec((d_in, tn1), im_1),
            pl.BlockSpec((1, tn1), im_1),
            pl.BlockSpec((nh, tn2), im_2),
            pl.BlockSpec((1, tn2), im_2),
            pl.BlockSpec((nh, tn3), im_3),
            pl.BlockSpec((1, tn3), im_3),
        ],
        out_specs=pl.BlockSpec((B, tn3), im_3),
        scratch_shapes=[pltpu.VMEM((t1, B, tn1), jnp.float32),
                        pltpu.VMEM((t2, B, tn2), jnp.float32)],
        compiler_params=pltpu.CompilerParams(
            dimension_semantics=("arbitrary",),      # layer phases are sequential
            vmem_limit_bytes=vmem_limit),
    )(x, w1, b1, w2, b2, w3, b3)


# ----------------------------------------------------------------------------
# Pallas kernel 2: fused loss — emits the six scalar losses in one lane-dense
# (1, 128) output:  [rec, loss_z, loss_w, loss_l, loss_y, total_loss].
# ----------------------------------------------------------------------------
def _loss_kernel(x_ref, rec_ref, mu_w_ref, lv_w_ref, mu_z_ref, lv_z_ref,
                 mu_zw_ref, lv_zw_ref, qy_ref, out_ref, *, lp_y):
    diff = rec_ref[...] - x_ref[...]
    loss_rec = jnp.mean(jnp.sum(diff * diff, axis=-1, keepdims=True))

    mu_w = mu_w_ref[...]
    lv_w = lv_w_ref[...]
    kl_w = -0.5 * (1.0 + lv_w - mu_w * mu_w - jnp.exp(lv_w))
    loss_w = jnp.mean(jnp.sum(kl_w, axis=-1, keepdims=True))

    mu_z = mu_z_ref[...][:, None, :]
    lv_z = lv_z_ref[...][:, None, :]
    mu2 = mu_zw_ref[...]
    lv2 = lv_zw_ref[...]
    d = mu2 - mu_z
    kld = 0.5 * (-1.0 + lv2 - lv_z + jnp.exp(lv_z - lv2) + d * d * jnp.exp(-lv2))
    z_bk = jnp.sum(kld, axis=-1)                         # (B, nclasses)
    q = qy_ref[...]
    loss_z = jnp.mean(jnp.sum(q * z_bk, axis=-1, keepdims=True))

    qym = jnp.mean(q, axis=0, keepdims=True)             # (1, nclasses)
    loss_l = jnp.sum(qym * (jnp.log(qym) - lp_y))
    loss_y = -jnp.mean(jnp.max(q, axis=-1, keepdims=True))
    total = loss_rec + loss_z + loss_w + 10.0 * loss_l

    lane = jax.lax.broadcasted_iota(jnp.int32, out_ref.shape, 1)
    packed = jnp.zeros(out_ref.shape, jnp.float32)
    for i, v in enumerate((loss_rec, loss_z, loss_w, loss_l, loss_y, total)):
        packed = packed + jnp.where(lane == i, v, 0.0)
    out_ref[...] = packed


def _full_spec(shape):
    return pl.BlockSpec(shape, lambda i, _n=len(shape): (0,) * _n)


def loss_scalars(x, rec, mu_w, logvar_w, mu_z, logvar_z, mu_z_w, logvar_z_w,
                 q_y, *, nclasses):
    args = (x, rec, mu_w, logvar_w, mu_z, logvar_z, mu_z_w, logvar_z_w, q_y)
    return pl.pallas_call(
        functools.partial(_loss_kernel, lp_y=-float(np.log(nclasses))),
        out_shape=jax.ShapeDtypeStruct((1, 128), jnp.float32),
        grid=(1,),
        in_specs=[_full_spec(a.shape) for a in args],
        out_specs=_full_spec((1, 128)),
        compiler_params=pltpu.CompilerParams(
            dimension_semantics=("arbitrary",)),
    )(*args)


# ----------------------------------------------------------------------------
# Parameter init (torch.nn.Linear default U(-1/sqrt(fan_in), ..)), zero-padded
# to 128-multiples (exactly preserves the math), eval-BN scale folded in,
# weights stored bf16.
# ----------------------------------------------------------------------------
def _round128(d):
    return ((d + 127) // 128) * 128


def init_linear(key, fan_in, fan_out, pad_in, pad_out):
    kw, kb = jax.random.split(key)
    bound = 1.0 / np.sqrt(fan_in)
    w = jax.random.uniform(kw, (fan_in, fan_out), jnp.float32, -bound, bound)
    b = jax.random.uniform(kb, (1, fan_out), jnp.float32, -bound, bound)
    w = jnp.pad(w, ((0, pad_in - fan_in), (0, pad_out - fan_out)))
    b = jnp.pad(b, ((0, 0), (0, pad_out - fan_out)))
    return w, b


def init_mlp3(key, d_in, d_h, d_out, *, pad_head=True):
    d_in_p, d_h_p = _round128(d_in), _round128(d_h)
    d_out_p = _round128(d_out) if pad_head else d_out
    k1, k2, k3 = jax.random.split(key, 3)
    w1, b1 = init_linear(k1, d_in, d_h, d_in_p, d_h_p)
    w2, b2 = init_linear(k2, d_h, d_h, d_h_p, d_h_p)
    w3, b3 = init_linear(k3, d_h, d_out, d_h_p, d_out_p)
    # Fold eval-mode BatchNorm1d (mean=0, var=1, affine identity) into 1 and 2.
    return (((w1 * BN_SCALE).astype(jnp.bfloat16), b1 * BN_SCALE),
            ((w2 * BN_SCALE).astype(jnp.bfloat16), b2 * BN_SCALE),
            (w3.astype(jnp.bfloat16), b3))


def init_params(key, nx, nh, nz, nw, nclasses):
    kq, ky, kp, kz = jax.random.split(key, 4)
    return {
        "Qwz": init_mlp3(kq, nx, nh, 2 * (nw + nz)),
        "Qy": init_mlp3(ky, nw + nz, nh, nclasses, pad_head=False),  # softmax head
        "Px": init_mlp3(kp, nz, nh, nx),
        "Pz": init_mlp3(kz, nw, nh, 2 * nclasses * nz),
        "logsigma_x": jnp.zeros((nx,), jnp.float32),
    }


# ----------------------------------------------------------------------------
# Forward pass (mirrors VAE_Dilo3.forward, eval-mode)
# ----------------------------------------------------------------------------
def vae_dilo3_forward(params, image, rng, *, nx, nz, nw, nclasses):
    B = image.shape[0]
    x = image.reshape(B, -1).astype(jnp.float32)          # nn.Flatten()

    # TODO(synk): exact `ut.softclip` form unknown; sigma_x is unused downstream.
    logsigma_x = -2.0 + 4.0 * jax.nn.sigmoid(params["logsigma_x"])
    sigma_x = jnp.exp(logsigma_x)

    k_w, k_z, k_y = jax.random.split(rng, 3)

    # Q(w, z | x)
    wz = fused_mlp3(x, params["Qwz"], final_act="none")[:, :2 * (nz + nw)]
    wz = wz.reshape(B, 2, nz + nw)
    mu_w = wz[:, 0, :nw]
    logvar_w = jnp.tanh(wz[:, 1, :nw])
    std_w = jnp.exp(0.5 * logvar_w)
    w = mu_w + jax.random.normal(k_w, mu_w.shape, jnp.float32) * std_w
    mu_z = wz[:, 0, nw:]
    logvar_z = jnp.tanh(wz[:, 1, nw:])
    std_z = jnp.exp(0.5 * logvar_z)
    z = mu_z + jax.random.normal(k_z, mu_z.shape, jnp.float32) * std_z

    # Q(y | w, z): softmax fused in the kernel finalize -> q_y directly
    q_y = fused_mlp3(jnp.concatenate([w, z], axis=1), params["Qy"],
                     final_act="softmax")
    g = jax.random.gumbel(k_y, q_y.shape, jnp.float32)
    y = jax.nn.softmax((jnp.log(q_y) + g) / TEMP, axis=-1)   # relaxed OHC rsample

    # P(x | z)
    rec = fused_mlp3(z, params["Px"], final_act="sigmoid")[:, :nx]

    # P(z | w, y)
    z_w = fused_mlp3(w, params["Pz"], final_act="none")[:, :2 * nclasses * nz]
    z_w = z_w.reshape(B, nclasses, 2 * nz)
    mu_z_w = z_w[:, :, :nz]
    logvar_z_w = jnp.tanh(z_w[:, :, nz:])

    packed = loss_scalars(x, rec, mu_w, logvar_w, mu_z, logvar_z,
                          mu_z_w, logvar_z_w, q_y, nclasses=nclasses)[0]
    loss_rec, loss_z, loss_w = packed[0], packed[1], packed[2]
    loss_l, loss_y, total_loss = packed[3], packed[4], packed[5]

    losses = {"rec": loss_rec, "loss_z": loss_z, "loss_l": loss_l,
              "loss_y": loss_y, "loss_w": loss_w, "total_loss": total_loss}
    output = {"wz": wz, "mu_z": mu_z, "mu_w": mu_w, "logvar_z": logvar_z,
              "logvar_w": logvar_w, "q_y": q_y, "w": w, "z": z, "y": y,
              "rec": rec, "sigma_x": sigma_x, "losses": losses}
    return output


if __name__ == "__main__":
    # Small, 128-aligned shapes consistent with the module
    # (scaled down from nx=784, nh=3024, nz=200, nw=150; nclasses kept at 10).
    B, nx, nh, nz, nw, nclasses = 8, 256, 512, 128, 128, 10

    key = jax.random.PRNGKey(0)
    k_param, k_data, k_noise = jax.random.split(key, 3)

    params = init_params(k_param, nx, nh, nz, nw, nclasses)
    image = jax.random.uniform(k_data, (B, 1, 16, 16), jnp.float32)  # NCHW, [0,1]

    fwd = jax.jit(functools.partial(vae_dilo3_forward,
                                    nx=nx, nz=nz, nw=nw, nclasses=nclasses))
    out = fwd(params, image, k_noise)
    jax.block_until_ready(out)

    print("KERNEL_OK")
</pallas_src>

<mosaic_0001>
module attributes {stable_mosaic.version = 11 : i64} {
  func.func @_mlp3_kernel(%arg0: i32, %arg1: memref<8x256xf32, #tpu.memory_space<vmem>>, %arg2: memref<256x512xbf16, #tpu.memory_space<vmem>>, %arg3: memref<1x512xf32, #tpu.memory_space<vmem>>, %arg4: memref<512x512xbf16, #tpu.memory_space<vmem>>, %arg5: memref<1x512xf32, #tpu.memory_space<vmem>>, %arg6: memref<512x512xbf16, #tpu.memory_space<vmem>>, %arg7: memref<1x512xf32, #tpu.memory_space<vmem>>, %arg8: memref<8x512xf32, #tpu.memory_space<vmem>>, %arg9: memref<1x8x512xf32, #tpu.memory_space<vmem>>, %arg10: memref<1x8x512xf32, #tpu.memory_space<vmem>>) attributes {dimension_semantics = [#tpu.dimension_semantics<arbitrary>], iteration_bounds = array<i64: 3>, scalar_prefetch = 0 : i64, scratch_operands = 2 : i64, tpu.core_type = #tpu.core_type<tc>, window_params = [{pipeline_mode = #tpu.pipeline_mode<synchronous>, transform_indices = @transform_0, window_bounds = array<i64: 8, 256>}, {transform_indices = @transform_1, window_bounds = array<i64: 256, 512>}, {transform_indices = @transform_2, window_bounds = array<i64: 1, 512>}, {transform_indices = @transform_3, window_bounds = array<i64: 512, 512>}, {transform_indices = @transform_4, window_bounds = array<i64: 1, 512>}, {transform_indices = @transform_5, window_bounds = array<i64: 512, 512>}, {transform_indices = @transform_6, window_bounds = array<i64: 1, 512>}, {transform_indices = @transform_7, window_bounds = array<i64: 8, 512>}]} {
    %c1_i32 = arith.constant 1 : i32
    %0 = arith.cmpi slt, %arg0, %c1_i32 : i32
    %1 = arith.extui %0 : i1 to i32
    %c0_i32 = arith.constant 0 : i32
    %2 = arith.cmpi ne, %1, %c0_i32 : i32
    scf.if %2 {
      %c0 = arith.constant 0 : index
      %c0_4 = arith.constant 0 : index
      %11 = vector.load %arg1[%c0, %c0_4] : memref<8x256xf32, #tpu.memory_space<vmem>>, vector<8x256xf32>
      %12 = arith.truncf %11 : vector<8x256xf32> to vector<8x256xbf16>
      %c0_5 = arith.constant 0 : index
      %c0_6 = arith.constant 0 : index
      %13 = vector.load %arg2[%c0_5, %c0_6] : memref<256x512xbf16, #tpu.memory_space<vmem>>, vector<256x512xbf16>
      %cst = arith.constant dense<0.000000e+00> : vector<8x512xf32>
      %14 = tpu.matmul %12, %13, %cst {dimension_numbers = #tpu.dot_dimension_numbers<[1], [0], [0], [1], [0, 0, 1, 1], [], []>} : vector<8x256xbf16>, vector<256x512xbf16>, vector<8x512xf32> -> vector<8x512xf32>
      %c0_7 = arith.constant 0 : index
      %c0_8 = arith.constant 0 : index
      %15 = vector.load %arg3[%c0_7, %c0_8] : memref<1x512xf32, #tpu.memory_space<vmem>>, vector<1x512xf32>
      %16 = vector.broadcast %15 : vector<1x512xf32> to vector<8x512xf32>
      %17 = arith.addf %14, %16 : vector<8x512xf32>
      %cst_9 = arith.constant 0.000000e+00 : f32
      %18 = vector.broadcast %cst_9 : f32 to vector<8x512xf32>
      %19 = arith.cmpf oge, %17, %18 : vector<8x512xf32>
      %cst_10 = arith.constant 0.00999999977 : f32
      %20 = vector.broadcast %cst_10 : f32 to vector<8x512xf32>
      %21 = arith.mulf %20, %17 : vector<8x512xf32>
      %22 = arith.select %19, %17, %21 : vector<8x512xi1>, vector<8x512xf32>
      %23 = arith.index_cast %arg0 : i32 to index
      %c0_11 = arith.constant 0 : index
      %c0_12 = arith.constant 0 : index
      %24 = vector.load %arg9[%23, %c0_11, %c0_12] : memref<1x8x512xf32, #tpu.memory_space<vmem>>, vector<1x8x512xf32>
      %25 = vector.shape_cast %24 : vector<1x8x512xf32> to vector<8x512xf32>
      %26 = vector.shape_cast %22 : vector<8x512xf32> to vector<1x8x512xf32>
      tpu.vector_store %arg9[%23, %c0_11, %c0_12], %26 {strides = array<i32>} : memref<1x8x512xf32, #tpu.memory_space<vmem>>, vector<1x8x512xf32>,
    } else {
    }
    %c1_i32_0 = arith.constant 1 : i32
    %3 = arith.cmpi sge, %arg0, %c1_i32_0 : i32
    %c2_i32 = arith.constant 2 : i32
    %4 = arith.cmpi slt, %arg0, %c2_i32 : i32
    %5 = arith.andi %3, %4 : i1
    %6 = arith.extui %5 : i1 to i32
    %c0_i32_1 = arith.constant 0 : i32
    %7 = arith.cmpi ne, %6, %c0_i32_1 : i32
    scf.if %7 {
      %c0 = arith.constant 0 : index
      %c0_4 = arith.constant 0 : index
      %c0_5 = arith.constant 0 : index
      %11 = vector.load %arg9[%c0, %c0_4, %c0_5] : memref<1x8x512xf32, #tpu.memory_space<vmem>>, vector<1x8x512xf32>
      %12 = vector.shape_cast %11 : vector<1x8x512xf32> to vector<8x512xf32>
      %13 = arith.truncf %12 : vector<8x512xf32> to vector<8x512xbf16>
      %c0_6 = arith.constant 0 : index
      %c0_7 = arith.constant 0 : index
      %14 = vector.load %arg4[%c0_6, %c0_7] : memref<512x512xbf16, #tpu.memory_space<vmem>>, vector<512x512xbf16>
      %cst = arith.constant dense<0.000000e+00> : vector<8x512xf32>
      %15 = tpu.matmul %13, %14, %cst {dimension_numbers = #tpu.dot_dimension_numbers<[1], [0], [0], [1], [0, 0, 1, 1], [], []>} : vector<8x512xbf16>, vector<512x512xbf16>, vector<8x512xf32> -> vector<8x512xf32>
      %c0_8 = arith.constant 0 : index
      %c0_9 = arith.constant 0 : index
      %16 = vector.load %arg5[%c0_8, %c0_9] : memref<1x512xf32, #tpu.memory_space<vmem>>, vector<1x512xf32>
      %17 = vector.broadcast %16 : vector<1x512xf32> to vector<8x512xf32>
      %18 = arith.addf %15, %17 : vector<8x512xf32>
      %cst_10 = arith.constant 0.000000e+00 : f32
      %19 = vector.broadcast %cst_10 : f32 to vector<8x512xf32>
      %20 = arith.cmpf oge, %18, %19 : vector<8x512xf32>
      %cst_11 = arith.constant 0.00999999977 : f32
      %21 = vector.broadcast %cst_11 : f32 to vector<8x512xf32>
      %22 = arith.mulf %21, %18 : vector<8x512xf32>
      %23 = arith.select %20, %18, %22 : vector<8x512xi1>, vector<8x512xf32>
      %c1_i32_12 = arith.constant 1 : i32
      %24 = arith.subi %arg0, %c1_i32_12 : i32
      %25 = arith.index_cast %24 : i32 to index
      %c0_13 = arith.constant 0 : index
      %c0_14 = arith.constant 0 : index
      %26 = vector.load %arg10[%25, %c0_13, %c0_14] : memref<1x8x512xf32, #tpu.memory_space<vmem>>, vector<1x8x512xf32>
      %27 = vector.shape_cast %26 : vector<1x8x512xf32> to vector<8x512xf32>
      %28 = vector.shape_cast %23 : vector<8x512xf32> to vector<1x8x512xf32>
      tpu.vector_store %arg10[%25, %c0_13, %c0_14], %28 {strides = array<i32>} : memref<1x8x512xf32, #tpu.memory_space<vmem>>, vector<1x8x512xf32>,
    } else {
    }
    %c2_i32_2 = arith.constant 2 : i32
    %8 = arith.cmpi sge, %arg0, %c2_i32_2 : i32
    %9 = arith.extui %8 : i1 to i32
    %c0_i32_3 = arith.constant 0 : i32
    %10 = arith.cmpi ne, %9, %c0_i32_3 : i32
    scf.if %10 {
      %c0 = arith.constant 0 : index
      %c0_4 = arith.constant 0 : index
      %c0_5 = arith.constant 0 : index
      %11 = vector.load %arg10[%c0, %c0_4, %c0_5] : memref<1x8x512xf32, #tpu.memory_space<vmem>>, vector<1x8x512xf32>
      %12 = vector.shape_cast %11 : vector<1x8x512xf32> to vector<8x512xf32>
      %13 = arith.truncf %12 : vector<8x512xf32> to vector<8x512xbf16>
      %c0_6 = arith.constant 0 : index
      %c0_7 = arith.constant 0 : index
      %14 = vector.load %arg6[%c0_6, %c0_7] : memref<512x512xbf16, #tpu.memory_space<vmem>>, vector<512x512xbf16>
      %cst = arith.constant dense<0.000000e+00> : vector<8x512xf32>
      %15 = tpu.matmul %13, %14, %cst {dimension_numbers = #tpu.dot_dimension_numbers<[1], [0], [0], [1], [0, 0, 1, 1], [], []>} : vector<8x512xbf16>, vector<512x512xbf16>, vector<8x512xf32> -> vector<8x512xf32>
      %c0_8 = arith.constant 0 : index
      %c0_9 = arith.constant 0 : index
      %16 = vector.load %arg7[%c0_8, %c0_9] : memref<1x512xf32, #tpu.memory_space<vmem>>, vector<1x512xf32>
      %17 = vector.broadcast %16 : vector<1x512xf32> to vector<8x512xf32>
      %18 = arith.addf %15, %17 : vector<8x512xf32>
      %c0_10 = arith.constant 0 : index
      %c0_11 = arith.constant 0 : index
      %19 = vector.load %arg8[%c0_10, %c0_11] : memref<8x512xf32, #tpu.memory_space<vmem>>, vector<8x512xf32>
      tpu.vector_store %arg8[%c0_10, %c0_11], %18 {strides = array<i32>} : memref<8x512xf32, #tpu.memory_space<vmem>>, vector<8x512xf32>,
    } else {
    }
    return
  }
  func.func @transform_0(%arg0: i32) -> (i32, i32) {
    %c0_i32 = arith.constant 0 : i32
    %c0_i32_0 = arith.constant 0 : i32
    %c0_i32_1 = arith.constant 0 : i32
    return %c0_i32, %c0_i32_0 : i32, i32
  }
  func.func @transform_1(%arg0: i32) -> (i32, i32) {
    %c0_i32 = arith.constant 0 : i32
    %0 = arith.minsi %arg0, %c0_i32 : i32
    %c0_i32_0 = arith.constant 0 : i32
    %c0_i32_1 = arith.constant 0 : i32
    return %c0_i32_0, %0 : i32, i32
  }
  func.func @transform_2(%arg0: i32) -> (i32, i32) {
    %c0_i32 = arith.constant 0 : i32
    %0 = arith.minsi %arg0, %c0_i32 : i32
    %c0_i32_0 = arith.constant 0 : i32
    %c0_i32_1 = arith.constant 0 : i32
    return %c0_i32_0, %0 : i32, i32
  }
  func.func @transform_3(%arg0: i32) -> (i32, i32) {
    %c1_i32 = arith.constant 1 : i32
    %0 = arith.subi %arg0, %c1_i32 : i32
    %c0_i32 = arith.constant 0 : i32
    %1 = arith.maxsi %0, %c0_i32 : i32
    %c0_i32_0 = arith.constant 0 : i32
    %2 = arith.minsi %1, %c0_i32_0 : i32
    %c0_i32_1 = arith.constant 0 : i32
    %c0_i32_2 = arith.constant 0 : i32
    return %c0_i32_1, %2 : i32, i32
  }
  func.func @transform_4(%arg0: i32) -> (i32, i32) {
    %c1_i32 = arith.constant 1 : i32
    %0 = arith.subi %arg0, %c1_i32 : i32
    %c0_i32 = arith.constant 0 : i32
    %1 = arith.maxsi %0, %c0_i32 : i32
    %c0_i32_0 = arith.constant 0 : i32
    %2 = arith.minsi %1, %c0_i32_0 : i32
    %c0_i32_1 = arith.constant 0 : i32
    %c0_i32_2 = arith.constant 0 : i32
    return %c0_i32_1, %2 : i32, i32
  }
  func.func @transform_5(%arg0: i32) -> (i32, i32) {
    %c1_i32 = arith.constant 1 : i32
    %0 = arith.subi %arg0, %c1_i32 : i32
    %c1_i32_0 = arith.constant 1 : i32
    %1 = arith.subi %0, %c1_i32_0 : i32
    %c0_i32 = arith.constant 0 : i32
    %2 = arith.maxsi %1, %c0_i32 : i32
    %c0_i32_1 = arith.constant 0 : i32
    %3 = arith.minsi %2, %c0_i32_1 : i32
    %c0_i32_2 = arith.constant 0 : i32
    %c0_i32_3 = arith.constant 0 : i32
    return %c0_i32_2, %3 : i32, i32
  }
  func.func @transform_6(%arg0: i32) -> (i32, i32) {
    %c1_i32 = arith.constant 1 : i32
    %0 = arith.subi %arg0, %c1_i32 : i32
    %c1_i32_0 = arith.constant 1 : i32
    %1 = arith.subi %0, %c1_i32_0 : i32
    %c0_i32 = arith.constant 0 : i32
    %2 = arith.maxsi %1, %c0_i32 : i32
    %c0_i32_1 = arith.constant 0 : i32
    %3 = arith.minsi %2, %c0_i32_1 : i32
    %c0_i32_2 = arith.constant 0 : i32
    %c0_i32_3 = arith.constant 0 : i32
    return %c0_i32_2, %3 : i32, i32
  }
  func.func @transform_7(%arg0: i32) -> (i32, i32) {
    %c1_i32 = arith.constant 1 : i32
    %0 = arith.subi %arg0, %c1_i32 : i32
    %c1_i32_0 = arith.constant 1 : i32
    %1 = arith.subi %0, %c1_i32_0 : i32
    %c0_i32 = arith.constant 0 : i32
    %2 = arith.maxsi %1, %c0_i32 : i32
    %c0_i32_1 = arith.constant 0 : i32
    %3 = arith.minsi %2, %c0_i32_1 : i32
    %c0_i32_2 = arith.constant 0 : i32
    %c0_i32_3 = arith.constant 0 : i32
    return %c0_i32_2, %3 : i32, i32
  }
}

module attributes {stable_mosaic.version = 11 : i64} {
  func.func @_mlp3_kernel(%arg0: i32, %arg1: memref<8x256xf32, #tpu.memory_space<vmem>>, %arg2: memref<256x512xbf16, #tpu.memory_space<vmem>>, %arg3: memref<1x512xf32, #tpu.memory_space<vmem>>, %arg4: memref<512x512xbf16, #tpu.memory_space<vmem>>, %arg5: memref<1x512xf32, #tpu.memory_space<vmem>>, %arg6: memref<512x10xbf16, #tpu.memory_space<vmem>>, %arg7: memref<1x10xf32, #tpu.memory_space<vmem>>, %arg8: memref<8x10xf32, #tpu.memory_space<vmem>>, %arg9: memref<1x8x512xf32, #tpu.memory_space<vmem>>, %arg10: memref<1x8x512xf32, #tpu.memory_space<vmem>>) attributes {dimension_semantics = [#tpu.dimension_semantics<arbitrary>], iteration_bounds = array<i64: 3>, scalar_prefetch = 0 : i64, scratch_operands = 2 : i64, tpu.core_type = #tpu.core_type<tc>, window_params = [{pipeline_mode = #tpu.pipeline_mode<synchronous>, transform_indices = @transform_0, window_bounds = array<i64: 8, 256>}, {transform_indices = @transform_1, window_bounds = array<i64: 256, 512>}, {transform_indices = @transform_2, window_bounds = array<i64: 1, 512>}, {transform_indices = @transform_3, window_bounds = array<i64: 512, 512>}, {transform_indices = @transform_4, window_bounds = array<i64: 1, 512>}, {transform_indices = @transform_5, window_bounds = array<i64: 512, 10>}, {transform_indices = @transform_6, window_bounds = array<i64: 1, 10>}, {transform_indices = @transform_7, window_bounds = array<i64: 8, 10>}]} {
    %c1_i32 = arith.constant 1 : i32
    %0 = arith.cmpi slt, %arg0, %c1_i32 : i32
    %1 = arith.extui %0 : i1 to i32
    %c0_i32 = arith.constant 0 : i32
    %2 = arith.cmpi ne, %1, %c0_i32 : i32
    scf.if %2 {
      %c0 = arith.constant 0 : index
      %c0_4 = arith.constant 0 : index
      %11 = vector.load %arg1[%c0, %c0_4] : memref<8x256xf32, #tpu.memory_space<vmem>>, vector<8x256xf32>
      %12 = arith.truncf %11 : vector<8x256xf32> to vector<8x256xbf16>
      %c0_5 = arith.constant 0 : index
      %c0_6 = arith.constant 0 : index
      %13 = vector.load %arg2[%c0_5, %c0_6] : memref<256x512xbf16, #tpu.memory_space<vmem>>, vector<256x512xbf16>
      %cst = arith.constant dense<0.000000e+00> : vector<8x512xf32>
      %14 = tpu.matmul %12, %13, %cst {dimension_numbers = #tpu.dot_dimension_numbers<[1], [0], [0], [1], [0, 0, 1, 1], [], []>} : vector<8x256xbf16>, vector<256x512xbf16>, vector<8x512xf32> -> vector<8x512xf32>
      %c0_7 = arith.constant 0 : index
      %c0_8 = arith.constant 0 : index
      %15 = vector.load %arg3[%c0_7, %c0_8] : memref<1x512xf32, #tpu.memory_space<vmem>>, vector<1x512xf32>
      %16 = vector.broadcast %15 : vector<1x512xf32> to vector<8x512xf32>
      %17 = arith.addf %14, %16 : vector<8x512xf32>
      %cst_9 = arith.constant 0.000000e+00 : f32
      %18 = vector.broadcast %cst_9 : f32 to vector<8x512xf32>
      %19 = arith.cmpf oge, %17, %18 : vector<8x512xf32>
      %cst_10 = arith.constant 0.00999999977 : f32
      %20 = vector.broadcast %cst_10 : f32 to vector<8x512xf32>
      %21 = arith.mulf %20, %17 : vector<8x512xf32>
      %22 = arith.select %19, %17, %21 : vector<8x512xi1>, vector<8x512xf32>
      %23 = arith.index_cast %arg0 : i32 to index
      %c0_11 = arith.constant 0 : index
      %c0_12 = arith.constant 0 : index
      %24 = vector.load %arg9[%23, %c0_11, %c0_12] : memref<1x8x512xf32, #tpu.memory_space<vmem>>, vector<1x8x512xf32>
      %25 = vector.shape_cast %24 : vector<1x8x512xf32> to vector<8x512xf32>
      %26 = vector.shape_cast %22 : vector<8x512xf32> to vector<1x8x512xf32>
      tpu.vector_store %arg9[%23, %c0_11, %c0_12], %26 {strides = array<i32>} : memref<1x8x512xf32, #tpu.memory_space<vmem>>, vector<1x8x512xf32>,
    } else {
    }
    %c1_i32_0 = arith.constant 1 : i32
    %3 = arith.cmpi sge, %arg0, %c1_i32_0 : i32
    %c2_i32 = arith.constant 2 : i32
    %4 = arith.cmpi slt, %arg0, %c2_i32 : i32
    %5 = arith.andi %3, %4 : i1
    %6 = arith.extui %5 : i1 to i32
    %c0_i32_1 = arith.constant 0 : i32
    %7 = arith.cmpi ne, %6, %c0_i32_1 : i32
    scf.if %7 {
      %c0 = arith.constant 0 : index
      %c0_4 = arith.constant 0 : index
      %c0_5 = arith.constant 0 : index
      %11 = vector.load %arg9[%c0, %c0_4, %c0_5] : memref<1x8x512xf32, #tpu.memory_space<vmem>>, vector<1x8x512xf32>
      %12 = vector.shape_cast %11 : vector<1x8x512xf32> to vector<8x512xf32>
      %13 = arith.truncf %12 : vector<8x512xf32> to vector<8x512xbf16>
      %c0_6 = arith.constant 0 : index
      %c0_7 = arith.constant 0 : index
      %14 = vector.load %arg4[%c0_6, %c0_7] : memref<512x512xbf16, #tpu.memory_space<vmem>>, vector<512x512xbf16>
      %cst = arith.constant dense<0.000000e+00> : vector<8x512xf32>
      %15 = tpu.matmul %13, %14, %cst {dimension_numbers = #tpu.dot_dimension_numbers<[1], [0], [0], [1], [0, 0, 1, 1], [], []>} : vector<8x512xbf16>, vector<512x512xbf16>, vector<8x512xf32> -> vector<8x512xf32>
      %c0_8 = arith.constant 0 : index
      %c0_9 = arith.constant 0 : index
      %16 = vector.load %arg5[%c0_8, %c0_9] : memref<1x512xf32, #tpu.memory_space<vmem>>, vector<1x512xf32>
      %17 = vector.broadcast %16 : vector<1x512xf32> to vector<8x512xf32>
      %18 = arith.addf %15, %17 : vector<8x512xf32>
      %cst_10 = arith.constant 0.000000e+00 : f32
      %19 = vector.broadcast %cst_10 : f32 to vector<8x512xf32>
      %20 = arith.cmpf oge, %18, %19 : vector<8x512xf32>
      %cst_11 = arith.constant 0.00999999977 : f32
      %21 = vector.broadcast %cst_11 : f32 to vector<8x512xf32>
      %22 = arith.mulf %21, %18 : vector<8x512xf32>
      %23 = arith.select %20, %18, %22 : vector<8x512xi1>, vector<8x512xf32>
      %c1_i32_12 = arith.constant 1 : i32
      %24 = arith.subi %arg0, %c1_i32_12 : i32
      %25 = arith.index_cast %24 : i32 to index
      %c0_13 = arith.constant 0 : index
      %c0_14 = arith.constant 0 : index
      %26 = vector.load %arg10[%25, %c0_13, %c0_14] : memref<1x8x512xf32, #tpu.memory_space<vmem>>, vector<1x8x512xf32>
      %27 = vector.shape_cast %26 : vector<1x8x512xf32> to vector<8x512xf32>
      %28 = vector.shape_cast %23 : vector<8x512xf32> to vector<1x8x512xf32>
      tpu.vector_store %arg10[%25, %c0_13, %c0_14], %28 {strides = array<i32>} : memref<1x8x512xf32, #tpu.memory_space<vmem>>, vector<1x8x512xf32>,
    } else {
    }
    %c2_i32_2 = arith.constant 2 : i32
    %8 = arith.cmpi sge, %arg0, %c2_i32_2 : i32
    %9 = arith.extui %8 : i1 to i32
    %c0_i32_3 = arith.constant 0 : i32
    %10 = arith.cmpi ne, %9, %c0_i32_3 : i32
    scf.if %10 {
      %c0 = arith.constant 0 : index
      %c0_4 = arith.constant 0 : index
      %c0_5 = arith.constant 0 : index
      %11 = vector.load %arg10[%c0, %c0_4, %c0_5] : memref<1x8x512xf32, #tpu.memory_space<vmem>>, vector<1x8x512xf32>
      %12 = vector.shape_cast %11 : vector<1x8x512xf32> to vector<8x512xf32>
      %13 = arith.truncf %12 : vector<8x512xf32> to vector<8x512xbf16>
      %c0_6 = arith.constant 0 : index
      %c0_7 = arith.constant 0 : index
      %14 = vector.load %arg6[%c0_6, %c0_7] : memref<512x10xbf16, #tpu.memory_space<vmem>>, vector<512x10xbf16>
      %cst = arith.constant dense<0.000000e+00> : vector<8x10xf32>
      %15 = tpu.matmul %13, %14, %cst {dimension_numbers = #tpu.dot_dimension_numbers<[1], [0], [0], [1], [0, 0, 1, 1], [], []>} : vector<8x512xbf16>, vector<512x10xbf16>, vector<8x10xf32> -> vector<8x10xf32>
      %c0_8 = arith.constant 0 : index
      %c0_9 = arith.constant 0 : index
      %16 = vector.load %arg7[%c0_8, %c0_9] : memref<1x10xf32, #tpu.memory_space<vmem>>, vector<1x10xf32>
      %17 = vector.broadcast %16 : vector<1x10xf32> to vector<8x10xf32>
      %18 = arith.addf %15, %17 : vector<8x10xf32>
      %cst_10 = arith.constant dense<0xFF800000> : vector<8xf32>
      %19 = vector.multi_reduction <maximumf>, %18, %cst_10 [1] : vector<8x10xf32> to vector<8xf32>
      %20 = vector.shape_cast %19 : vector<8xf32> to vector<8x1xf32>
      %21 = vector.broadcast %20 : vector<8x1xf32> to vector<8x10xf32>
      %22 = arith.subf %18, %21 : vector<8x10xf32>
      %23 = math.exp %22 : vector<8x10xf32>
      %cst_11 = arith.constant dense<0.000000e+00> : vector<8xf32>
      %24 = vector.multi_reduction <add>, %23, %cst_11 [1] : vector<8x10xf32> to vector<8xf32>
      %25 = vector.shape_cast %24 : vector<8xf32> to vector<8x1xf32>
      %26 = vector.broadcast %25 : vector<8x1xf32> to vector<8x10xf32>
      %27 = arith.divf %23, %26 : vector<8x10xf32>
      %c0_12 = arith.constant 0 : index
      %c0_13 = arith.constant 0 : index
      %28 = vector.load %arg8[%c0_12, %c0_13] : memref<8x10xf32, #tpu.memory_space<vmem>>, vector<8x10xf32>
      tpu.vector_store %arg8[%c0_12, %c0_13], %27 {strides = array<i32>} : memref<8x10xf32, #tpu.memory_space<vmem>>, vector<8x10xf32>,
    } else {
    }
    return
  }
  func.func @transform_0(%arg0: i32) -> (i32, i32) {
    %c0_i32 = arith.constant 0 : i32
    %c0_i32_0 = arith.constant 0 : i32
    %c0_i32_1 = arith.constant 0 : i32
    return %c0_i32, %c0_i32_0 : i32, i32
  }
  func.func @transform_1(%arg0: i32) -> (i32, i32) {
    %c0_i32 = arith.constant 0 : i32
    %0 = arith.minsi %arg0, %c0_i32 : i32
    %c0_i32_0 = arith.constant 0 : i32
    %c0_i32_1 = arith.constant 0 : i32
    return %c0_i32_0, %0 : i32, i32
  }
  func.func @transform_2(%arg0: i32) -> (i32, i32) {
    %c0_i32 = arith.constant 0 : i32
    %0 = arith.minsi %arg0, %c0_i32 : i32
    %c0_i32_0 = arith.constant 0 : i32
    %c0_i32_1 = arith.constant 0 : i32
    return %c0_i32_0, %0 : i32, i32
  }
  func.func @transform_3(%arg0: i32) -> (i32, i32) {
    %c1_i32 = arith.constant 1 : i32
    %0 = arith.subi %arg0, %c1_i32 : i32
    %c0_i32 = arith.constant 0 : i32
    %1 = arith.maxsi %0, %c0_i32 : i32
    %c0_i32_0 = arith.constant 0 : i32
    %2 = arith.minsi %1, %c0_i32_0 : i32
    %c0_i32_1 = arith.constant 0 : i32
    %c0_i32_2 = arith.constant 0 : i32
    return %c0_i32_1, %2 : i32, i32
  }
  func.func @transform_4(%arg0: i32) -> (i32, i32) {
    %c1_i32 = arith.constant 1 : i32
    %0 = arith.subi %arg0, %c1_i32 : i32
    %c0_i32 = arith.constant 0 : i32
    %1 = arith.maxsi %0, %c0_i32 : i32
    %c0_i32_0 = arith.constant 0 : i32
    %2 = arith.minsi %1, %c0_i32_0 : i32
    %c0_i32_1 = arith.constant 0 : i32
    %c0_i32_2 = arith.constant 0 : i32
    return %c0_i32_1, %2 : i32, i32
  }
  func.func @transform_5(%arg0: i32) -> (i32, i32) {
    %c1_i32 = arith.constant 1 : i32
    %0 = arith.subi %arg0, %c1_i32 : i32
    %c1_i32_0 = arith.constant 1 : i32
    %1 = arith.subi %0, %c1_i32_0 : i32
    %c0_i32 = arith.constant 0 : i32
    %2 = arith.maxsi %1, %c0_i32 : i32
    %c0_i32_1 = arith.constant 0 : i32
    %3 = arith.minsi %2, %c0_i32_1 : i32
    %c0_i32_2 = arith.constant 0 : i32
    %c0_i32_3 = arith.constant 0 : i32
    return %c0_i32_2, %3 : i32, i32
  }
  func.func @transform_6(%arg0: i32) -> (i32, i32) {
    %c1_i32 = arith.constant 1 : i32
    %0 = arith.subi %arg0, %c1_i32 : i32
    %c1_i32_0 = arith.constant 1 : i32
    %1 = arith.subi %0, %c1_i32_0 : i32
    %c0_i32 = arith.constant 0 : i32
    %2 = arith.maxsi %1, %c0_i32 : i32
    %c0_i32_1 = arith.constant 0 : i32
    %3 = arith.minsi %2, %c0_i32_1 : i32
    %c0_i32_2 = arith.constant 0 : i32
    %c0_i32_3 = arith.constant 0 : i32
    return %c0_i32_2, %3 : i32, i32
  }
  func.func @transform_7(%arg0: i32) -> (i32, i32) {
    %c1_i32 = arith.constant 1 : i32
    %0 = arith.subi %arg0, %c1_i32 : i32
    %c1_i32_0 = arith.constant 1 : i32
    %1 = arith.subi %0, %c1_i32_0 : i32
    %c0_i32 = arith.constant 0 : i32
    %2 = arith.maxsi %1, %c0_i32 : i32
    %c0_i32_1 = arith.constant 0 : i32
    %3 = arith.minsi %2, %c0_i32_1 : i32
    %c0_i32_2 = arith.constant 0 : i32
    %c0_i32_3 = arith.constant 0 : i32
    return %c0_i32_2, %3 : i32, i32
  }
}

module attributes {stable_mosaic.version = 11 : i64} {
  func.func @_mlp3_kernel(%arg0: i32, %arg1: memref<8x128xf32, #tpu.memory_space<vmem>>, %arg2: memref<128x512xbf16, #tpu.memory_space<vmem>>, %arg3: memref<1x512xf32, #tpu.memory_space<vmem>>, %arg4: memref<512x512xbf16, #tpu.memory_space<vmem>>, %arg5: memref<1x512xf32, #tpu.memory_space<vmem>>, %arg6: memref<512x640xbf16, #tpu.memory_space<vmem>>, %arg7: memref<1x640xf32, #tpu.memory_space<vmem>>, %arg8: memref<8x640xf32, #tpu.memory_space<vmem>>, %arg9: memref<1x8x512xf32, #tpu.memory_space<vmem>>, %arg10: memref<1x8x512xf32, #tpu.memory_space<vmem>>) attributes {dimension_semantics = [#tpu.dimension_semantics<arbitrary>], iteration_bounds = array<i64: 6>, scalar_prefetch = 0 : i64, scratch_operands = 2 : i64, tpu.core_type = #tpu.core_type<tc>, window_params = [{pipeline_mode = #tpu.pipeline_mode<synchronous>, transform_indices = @transform_0, window_bounds = array<i64: 8, 128>}, {transform_indices = @transform_1, window_bounds = array<i64: 128, 512>}, {transform_indices = @transform_2, window_bounds = array<i64: 1, 512>}, {transform_indices = @transform_3, window_bounds = array<i64: 512, 512>}, {transform_indices = @transform_4, window_bounds = array<i64: 1, 512>}, {transform_indices = @transform_5, window_bounds = array<i64: 512, 640>}, {transform_indices = @transform_6, window_bounds = array<i64: 1, 640>}, {transform_indices = @transform_7, window_bounds = array<i64: 8, 640>}]} {
    %c1_i32 = arith.constant 1 : i32
    %0 = arith.cmpi slt, %arg0, %c1_i32 : i32
    %1 = arith.extui %0 : i1 to i32
    %c0_i32 = arith.constant 0 : i32
    %2 = arith.cmpi ne, %1, %c0_i32 : i32
    scf.if %2 {
      %c0 = arith.constant 0 : index
      %c0_4 = arith.constant 0 : index
      %11 = vector.load %arg1[%c0, %c0_4] : memref<8x128xf32, #tpu.memory_space<vmem>>, vector<8x128xf32>
      %12 = arith.truncf %11 : vector<8x128xf32> to vector<8x128xbf16>
      %c0_5 = arith.constant 0 : index
      %c0_6 = arith.constant 0 : index
      %13 = vector.load %arg2[%c0_5, %c0_6] : memref<128x512xbf16, #tpu.memory_space<vmem>>, vector<128x512xbf16>
      %cst = arith.constant dense<0.000000e+00> : vector<8x512xf32>
      %14 = tpu.matmul %12, %13, %cst {dimension_numbers = #tpu.dot_dimension_numbers<[1], [0], [0], [1], [0, 0, 1, 1], [], []>} : vector<8x128xbf16>, vector<128x512xbf16>, vector<8x512xf32> -> vector<8x512xf32>
      %c0_7 = arith.constant 0 : index
      %c0_8 = arith.constant 0 : index
      %15 = vector.load %arg3[%c0_7, %c0_8] : memref<1x512xf32, #tpu.memory_space<vmem>>, vector<1x512xf32>
      %16 = vector.broadcast %15 : vector<1x512xf32> to vector<8x512xf32>
      %17 = arith.addf %14, %16 : vector<8x512xf32>
      %cst_9 = arith.constant 0.000000e+00 : f32
      %18 = vector.broadcast %cst_9 : f32 to vector<8x512xf32>
      %19 = arith.cmpf oge, %17, %18 : vector<8x512xf32>
      %cst_10 = arith.constant 0.00999999977 : f32
      %20 = vector.broadcast %cst_10 : f32 to vector<8x512xf32>
      %21 = arith.mulf %20, %17 : vector<8x512xf32>
      %22 = arith.select %19, %17, %21 : vector<8x512xi1>, vector<8x512xf32>
      %23 = arith.index_cast %arg0 : i32 to index
      %c0_11 = arith.constant 0 : index
      %c0_12 = arith.constant 0 : index
      %24 = vector.load %arg9[%23, %c0_11, %c0_12] : memref<1x8x512xf32, #tpu.memory_space<vmem>>, vector<1x8x512xf32>
      %25 = vector.shape_cast %24 : vector<1x8x512xf32> to vector<8x512xf32>
      %26 = vector.shape_cast %22 : vector<8x512xf32> to vector<1x8x512xf32>
      tpu.vector_store %arg9[%23, %c0_11, %c0_12], %26 {strides = array<i32>} : memref<1x8x512xf32, #tpu.memory_space<vmem>>, vector<1x8x512xf32>,
    } else {
    }
    %c1_i32_0 = arith.constant 1 : i32
    %3 = arith.cmpi sge, %arg0, %c1_i32_0 : i32
    %c2_i32 = arith.constant 2 : i32
    %4 = arith.cmpi slt, %arg0, %c2_i32 : i32
    %5 = arith.andi %3, %4 : i1
    %6 = arith.extui %5 : i1 to i32
    %c0_i32_1 = arith.constant 0 : i32
    %7 = arith.cmpi ne, %6, %c0_i32_1 : i32
    scf.if %7 {
      %c0 = arith.constant 0 : index
      %c0_4 = arith.constant 0 : index
      %c0_5 = arith.constant 0 : index
      %11 = vector.load %arg9[%c0, %c0_4, %c0_5] : memref<1x8x512xf32, #tpu.memory_space<vmem>>, vector<1x8x512xf32>
      %12 = vector.shape_cast %11 : vector<1x8x512xf32> to vector<8x512xf32>
      %13 = arith.truncf %12 : vector<8x512xf32> to vector<8x512xbf16>
      %c0_6 = arith.constant 0 : index
      %c0_7 = arith.constant 0 : index
      %14 = vector.load %arg4[%c0_6, %c0_7] : memref<512x512xbf16, #tpu.memory_space<vmem>>, vector<512x512xbf16>
      %cst = arith.constant dense<0.000000e+00> : vector<8x512xf32>
      %15 = tpu.matmul %13, %14, %cst {dimension_numbers = #tpu.dot_dimension_numbers<[1], [0], [0], [1], [0, 0, 1, 1], [], []>} : vector<8x512xbf16>, vector<512x512xbf16>, vector<8x512xf32> -> vector<8x512xf32>
      %c0_8 = arith.constant 0 : index
      %c0_9 = arith.constant 0 : index
      %16 = vector.load %arg5[%c0_8, %c0_9] : memref<1x512xf32, #tpu.memory_space<vmem>>, vector<1x512xf32>
      %17 = vector.broadcast %16 : vector<1x512xf32> to vector<8x512xf32>
      %18 = arith.addf %15, %17 : vector<8x512xf32>
      %cst_10 = arith.constant 0.000000e+00 : f32
      %19 = vector.broadcast %cst_10 : f32 to vector<8x512xf32>
      %20 = arith.cmpf oge, %18, %19 : vector<8x512xf32>
      %cst_11 = arith.constant 0.00999999977 : f32
      %21 = vector.broadcast %cst_11 : f32 to vector<8x512xf32>
      %22 = arith.mulf %21, %18 : vector<8x512xf32>
      %23 = arith.select %20, %18, %22 : vector<8x512xi1>, vector<8x512xf32>
      %c1_i32_12 = arith.constant 1 : i32
      %24 = arith.subi %arg0, %c1_i32_12 : i32
      %25 = arith.index_cast %24 : i32 to index
      %c0_13 = arith.constant 0 : index
      %c0_14 = arith.constant 0 : index
      %26 = vector.load %arg10[%25, %c0_13, %c0_14] : memref<1x8x512xf32, #tpu.memory_space<vmem>>, vector<1x8x512xf32>
      %27 = vector.shape_cast %26 : vector<1x8x512xf32> to vector<8x512xf32>
      %28 = vector.shape_cast %23 : vector<8x512xf32> to vector<1x8x512xf32>
      tpu.vector_store %arg10[%25, %c0_13, %c0_14], %28 {strides = array<i32>} : memref<1x8x512xf32, #tpu.memory_space<vmem>>, vector<1x8x512xf32>,
    } else {
    }
    %c2_i32_2 = arith.constant 2 : i32
    %8 = arith.cmpi sge, %arg0, %c2_i32_2 : i32
    %9 = arith.extui %8 : i1 to i32
    %c0_i32_3 = arith.constant 0 : i32
    %10 = arith.cmpi ne, %9, %c0_i32_3 : i32
    scf.if %10 {
      %c0 = arith.constant 0 : index
      %c0_4 = arith.constant 0 : index
      %c0_5 = arith.constant 0 : index
      %11 = vector.load %arg10[%c0, %c0_4, %c0_5] : memref<1x8x512xf32, #tpu.memory_space<vmem>>, vector<1x8x512xf32>
      %12 = vector.shape_cast %11 : vector<1x8x512xf32> to vector<8x512xf32>
      %13 = arith.truncf %12 : vector<8x512xf32> to vector<8x512xbf16>
      %c0_6 = arith.constant 0 : index
      %c0_7 = arith.constant 0 : index
      %14 = vector.load %arg6[%c0_6, %c0_7] : memref<512x640xbf16, #tpu.memory_space<vmem>>, vector<512x640xbf16>
      %cst = arith.constant dense<0.000000e+00> : vector<8x640xf32>
      %15 = tpu.matmul %13, %14, %cst {dimension_numbers = #tpu.dot_dimension_numbers<[1], [0], [0], [1], [0, 0, 1, 1], [], []>} : vector<8x512xbf16>, vector<512x640xbf16>, vector<8x640xf32> -> vector<8x640xf32>
      %c0_8 = arith.constant 0 : index
      %c0_9 = arith.constant 0 : index
      %16 = vector.load %arg7[%c0_8, %c0_9] : memref<1x640xf32, #tpu.memory_space<vmem>>, vector<1x640xf32>
      %17 = vector.broadcast %16 : vector<1x640xf32> to vector<8x640xf32>
      %18 = arith.addf %15, %17 : vector<8x640xf32>
      %c0_10 = arith.constant 0 : index
      %c0_11 = arith.constant 0 : index
      %19 = vector.load %arg8[%c0_10, %c0_11] : memref<8x640xf32, #tpu.memory_space<vmem>>, vector<8x640xf32>
      tpu.vector_store %arg8[%c0_10, %c0_11], %18 {strides = array<i32>} : memref<8x640xf32, #tpu.memory_space<vmem>>, vector<8x640xf32>,
    } else {
    }
    return
  }
  func.func @transform_0(%arg0: i32) -> (i32, i32) {
    %c0_i32 = arith.constant 0 : i32
    %c0_i32_0 = arith.constant 0 : i32
    %c0_i32_1 = arith.constant 0 : i32
    return %c0_i32, %c0_i32_0 : i32, i32
  }
  func.func @transform_1(%arg0: i32) -> (i32, i32) {
    %c0_i32 = arith.constant 0 : i32
    %0 = arith.minsi %arg0, %c0_i32 : i32
    %c0_i32_0 = arith.constant 0 : i32
    %c0_i32_1 = arith.constant 0 : i32
    return %c0_i32_0, %0 : i32, i32
  }
  func.func @transform_2(%arg0: i32) -> (i32, i32) {
    %c0_i32 = arith.constant 0 : i32
    %0 = arith.minsi %arg0, %c0_i32 : i32
    %c0_i32_0 = arith.constant 0 : i32
    %c0_i32_1 = arith.constant 0 : i32
    return %c0_i32_0, %0 : i32, i32
  }
  func.func @transform_3(%arg0: i32) -> (i32, i32) {
    %c1_i32 = arith.constant 1 : i32
    %0 = arith.subi %arg0, %c1_i32 : i32
    %c0_i32 = arith.constant 0 : i32
    %1 = arith.maxsi %0, %c0_i32 : i32
    %c0_i32_0 = arith.constant 0 : i32
    %2 = arith.minsi %1, %c0_i32_0 : i32
    %c0_i32_1 = arith.constant 0 : i32
    %c0_i32_2 = arith.constant 0 : i32
    return %c0_i32_1, %2 : i32, i32
  }
  func.func @transform_4(%arg0: i32) -> (i32, i32) {
    %c1_i32 = arith.constant 1 : i32
    %0 = arith.subi %arg0, %c1_i32 : i32
    %c0_i32 = arith.constant 0 : i32
    %1 = arith.maxsi %0, %c0_i32 : i32
    %c0_i32_0 = arith.constant 0 : i32
    %2 = arith.minsi %1, %c0_i32_0 : i32
    %c0_i32_1 = arith.constant 0 : i32
    %c0_i32_2 = arith.constant 0 : i32
    return %c0_i32_1, %2 : i32, i32
  }
  func.func @transform_5(%arg0: i32) -> (i32, i32) {
    %c1_i32 = arith.constant 1 : i32
    %0 = arith.subi %arg0, %c1_i32 : i32
    %c1_i32_0 = arith.constant 1 : i32
    %1 = arith.subi %0, %c1_i32_0 : i32
    %c0_i32 = arith.constant 0 : i32
    %2 = arith.maxsi %1, %c0_i32 : i32
    %c3_i32 = arith.constant 3 : i32
    %3 = arith.minsi %2, %c3_i32 : i32
    %c0_i32_1 = arith.constant 0 : i32
    %c0_i32_2 = arith.constant 0 : i32
    return %c0_i32_1, %3 : i32, i32
  }
  func.func @transform_6(%arg0: i32) -> (i32, i32) {
    %c1_i32 = arith.constant 1 : i32
    %0 = arith.subi %arg0, %c1_i32 : i32
    %c1_i32_0 = arith.constant 1 : i32
    %1 = arith.subi %0, %c1_i32_0 : i32
    %c0_i32 = arith.constant 0 : i32
    %2 = arith.maxsi %1, %c0_i32 : i32
    %c3_i32 = arith.constant 3 : i32
    %3 = arith.minsi %2, %c3_i32 : i32
    %c0_i32_1 = arith.constant 0 : i32
    %c0_i32_2 = arith.constant 0 : i32
    return %c0_i32_1, %3 : i32, i32
  }
  func.func @transform_7(%arg0: i32) -> (i32, i32) {
    %c1_i32 = arith.constant 1 : i32
    %0 = arith.subi %arg0, %c1_i32 : i32
    %c1_i32_0 = arith.constant 1 : i32
    %1 = arith.subi %0, %c1_i32_0 : i32
    %c0_i32 = arith.constant 0 : i32
    %2 = arith.maxsi %1, %c0_i32 : i32
    %c3_i32 = arith.constant 3 : i32
    %3 = arith.minsi %2, %c3_i32 : i32
    %c0_i32_1 = arith.constant 0 : i32
    %c0_i32_2 = arith.constant 0 : i32
    return %c0_i32_1, %3 : i32, i32
  }
}

module attributes {stable_mosaic.version = 11 : i64} {
  func.func @_mlp3_kernel(%arg0: i32, %arg1: memref<8x128xf32, #tpu.memory_space<vmem>>, %arg2: memref<128x512xbf16, #tpu.memory_space<vmem>>, %arg3: memref<1x512xf32, #tpu.memory_space<vmem>>, %arg4: memref<512x512xbf16, #tpu.memory_space<vmem>>, %arg5: memref<1x512xf32, #tpu.memory_space<vmem>>, %arg6: memref<512x256xbf16, #tpu.memory_space<vmem>>, %arg7: memref<1x256xf32, #tpu.memory_space<vmem>>, %arg8: memref<8x256xf32, #tpu.memory_space<vmem>>, %arg9: memref<1x8x512xf32, #tpu.memory_space<vmem>>, %arg10: memref<1x8x512xf32, #tpu.memory_space<vmem>>) attributes {dimension_semantics = [#tpu.dimension_semantics<arbitrary>], iteration_bounds = array<i64: 3>, scalar_prefetch = 0 : i64, scratch_operands = 2 : i64, tpu.core_type = #tpu.core_type<tc>, window_params = [{pipeline_mode = #tpu.pipeline_mode<synchronous>, transform_indices = @transform_0, window_bounds = array<i64: 8, 128>}, {transform_indices = @transform_1, window_bounds = array<i64: 128, 512>}, {transform_indices = @transform_2, window_bounds = array<i64: 1, 512>}, {transform_indices = @transform_3, window_bounds = array<i64: 512, 512>}, {transform_indices = @transform_4, window_bounds = array<i64: 1, 512>}, {transform_indices = @transform_5, window_bounds = array<i64: 512, 256>}, {transform_indices = @transform_6, window_bounds = array<i64: 1, 256>}, {transform_indices = @transform_7, window_bounds = array<i64: 8, 256>}]} {
    %c1_i32 = arith.constant 1 : i32
    %0 = arith.cmpi slt, %arg0, %c1_i32 : i32
    %1 = arith.extui %0 : i1 to i32
    %c0_i32 = arith.constant 0 : i32
    %2 = arith.cmpi ne, %1, %c0_i32 : i32
    scf.if %2 {
      %c0 = arith.constant 0 : index
      %c0_4 = arith.constant 0 : index
      %11 = vector.load %arg1[%c0, %c0_4] : memref<8x128xf32, #tpu.memory_space<vmem>>, vector<8x128xf32>
      %12 = arith.truncf %11 : vector<8x128xf32> to vector<8x128xbf16>
      %c0_5 = arith.constant 0 : index
      %c0_6 = arith.constant 0 : index
      %13 = vector.load %arg2[%c0_5, %c0_6] : memref<128x512xbf16, #tpu.memory_space<vmem>>, vector<128x512xbf16>
      %cst = arith.constant dense<0.000000e+00> : vector<8x512xf32>
      %14 = tpu.matmul %12, %13, %cst {dimension_numbers = #tpu.dot_dimension_numbers<[1], [0], [0], [1], [0, 0, 1, 1], [], []>} : vector<8x128xbf16>, vector<128x512xbf16>, vector<8x512xf32> -> vector<8x512xf32>
      %c0_7 = arith.constant 0 : index
      %c0_8 = arith.constant 0 : index
      %15 = vector.load %arg3[%c0_7, %c0_8] : memref<1x512xf32, #tpu.memory_space<vmem>>, vector<1x512xf32>
      %16 = vector.broadcast %15 : vector<1x512xf32> to vector<8x512xf32>
      %17 = arith.addf %14, %16 : vector<8x512xf32>
      %cst_9 = arith.constant 0.000000e+00 : f32
      %18 = vector.broadcast %cst_9 : f32 to vector<8x512xf32>
      %19 = arith.cmpf oge, %17, %18 : vector<8x512xf32>
      %cst_10 = arith.constant 0.00999999977 : f32
      %20 = vector.broadcast %cst_10 : f32 to vector<8x512xf32>
      %21 = arith.mulf %20, %17 : vector<8x512xf32>
      %22 = arith.select %19, %17, %21 : vector<8x512xi1>, vector<8x512xf32>
      %23 = arith.index_cast %arg0 : i32 to index
      %c0_11 = arith.constant 0 : index
      %c0_12 = arith.constant 0 : index
      %24 = vector.load %arg9[%23, %c0_11, %c0_12] : memref<1x8x512xf32, #tpu.memory_space<vmem>>, vector<1x8x512xf32>
      %25 = vector.shape_cast %24 : vector<1x8x512xf32> to vector<8x512xf32>
      %26 = vector.shape_cast %22 : vector<8x512xf32> to vector<1x8x512xf32>
      tpu.vector_store %arg9[%23, %c0_11, %c0_12], %26 {strides = array<i32>} : memref<1x8x512xf32, #tpu.memory_space<vmem>>, vector<1x8x512xf32>,
    } else {
    }
    %c1_i32_0 = arith.constant 1 : i32
    %3 = arith.cmpi sge, %arg0, %c1_i32_0 : i32
    %c2_i32 = arith.constant 2 : i32
    %4 = arith.cmpi slt, %arg0, %c2_i32 : i32
    %5 = arith.andi %3, %4 : i1
    %6 = arith.extui %5 : i1 to i32
    %c0_i32_1 = arith.constant 0 : i32
    %7 = arith.cmpi ne, %6, %c0_i32_1 : i32
    scf.if %7 {
      %c0 = arith.constant 0 : index
      %c0_4 = arith.constant 0 : index
      %c0_5 = arith.constant 0 : index
      %11 = vector.load %arg9[%c0, %c0_4, %c0_5] : memref<1x8x512xf32, #tpu.memory_space<vmem>>, vector<1x8x512xf32>
      %12 = vector.shape_cast %11 : vector<1x8x512xf32> to vector<8x512xf32>
      %13 = arith.truncf %12 : vector<8x512xf32> to vector<8x512xbf16>
      %c0_6 = arith.constant 0 : index
      %c0_7 = arith.constant 0 : index
      %14 = vector.load %arg4[%c0_6, %c0_7] : memref<512x512xbf16, #tpu.memory_space<vmem>>, vector<512x512xbf16>
      %cst = arith.constant dense<0.000000e+00> : vector<8x512xf32>
      %15 = tpu.matmul %13, %14, %cst {dimension_numbers = #tpu.dot_dimension_numbers<[1], [0], [0], [1], [0, 0, 1, 1], [], []>} : vector<8x512xbf16>, vector<512x512xbf16>, vector<8x512xf32> -> vector<8x512xf32>
      %c0_8 = arith.constant 0 : index
      %c0_9 = arith.constant 0 : index
      %16 = vector.load %arg5[%c0_8, %c0_9] : memref<1x512xf32, #tpu.memory_space<vmem>>, vector<1x512xf32>
      %17 = vector.broadcast %16 : vector<1x512xf32> to vector<8x512xf32>
      %18 = arith.addf %15, %17 : vector<8x512xf32>
      %cst_10 = arith.constant 0.000000e+00 : f32
      %19 = vector.broadcast %cst_10 : f32 to vector<8x512xf32>
      %20 = arith.cmpf oge, %18, %19 : vector<8x512xf32>
      %cst_11 = arith.constant 0.00999999977 : f32
      %21 = vector.broadcast %cst_11 : f32 to vector<8x512xf32>
      %22 = arith.mulf %21, %18 : vector<8x512xf32>
      %23 = arith.select %20, %18, %22 : vector<8x512xi1>, vector<8x512xf32>
      %c1_i32_12 = arith.constant 1 : i32
      %24 = arith.subi %arg0, %c1_i32_12 : i32
      %25 = arith.index_cast %24 : i32 to index
      %c0_13 = arith.constant 0 : index
      %c0_14 = arith.constant 0 : index
      %26 = vector.load %arg10[%25, %c0_13, %c0_14] : memref<1x8x512xf32, #tpu.memory_space<vmem>>, vector<1x8x512xf32>
      %27 = vector.shape_cast %26 : vector<1x8x512xf32> to vector<8x512xf32>
      %28 = vector.shape_cast %23 : vector<8x512xf32> to vector<1x8x512xf32>
      tpu.vector_store %arg10[%25, %c0_13, %c0_14], %28 {strides = array<i32>} : memref<1x8x512xf32, #tpu.memory_space<vmem>>, vector<1x8x512xf32>,
    } else {
    }
    %c2_i32_2 = arith.constant 2 : i32
    %8 = arith.cmpi sge, %arg0, %c2_i32_2 : i32
    %9 = arith.extui %8 : i1 to i32
    %c0_i32_3 = arith.constant 0 : i32
    %10 = arith.cmpi ne, %9, %c0_i32_3 : i32
    scf.if %10 {
      %c0 = arith.constant 0 : index
      %c0_4 = arith.constant 0 : index
      %c0_5 = arith.constant 0 : index
      %11 = vector.load %arg10[%c0, %c0_4, %c0_5] : memref<1x8x512xf32, #tpu.memory_space<vmem>>, vector<1x8x512xf32>
      %12 = vector.shape_cast %11 : vector<1x8x512xf32> to vector<8x512xf32>
      %13 = arith.truncf %12 : vector<8x512xf32> to vector<8x512xbf16>
      %c0_6 = arith.constant 0 : index
      %c0_7 = arith.constant 0 : index
      %14 = vector.load %arg6[%c0_6, %c0_7] : memref<512x256xbf16, #tpu.memory_space<vmem>>, vector<512x256xbf16>
      %cst = arith.constant dense<0.000000e+00> : vector<8x256xf32>
      %15 = tpu.matmul %13, %14, %cst {dimension_numbers = #tpu.dot_dimension_numbers<[1], [0], [0], [1], [0, 0, 1, 1], [], []>} : vector<8x512xbf16>, vector<512x256xbf16>, vector<8x256xf32> -> vector<8x256xf32>
      %c0_8 = arith.constant 0 : index
      %c0_9 = arith.constant 0 : index
      %16 = vector.load %arg7[%c0_8, %c0_9] : memref<1x256xf32, #tpu.memory_space<vmem>>, vector<1x256xf32>
      %17 = vector.broadcast %16 : vector<1x256xf32> to vector<8x256xf32>
      %18 = arith.addf %15, %17 : vector<8x256xf32>
      %cst_10 = arith.constant 0.000000e+00 : f32
      %19 = vector.broadcast %cst_10 : f32 to vector<8x256xf32>
      %20 = arith.subf %19, %18 : vector<8x256xf32>
      %21 = math.exp %20 : vector<8x256xf32>
      %cst_11 = arith.constant 1.000000e+00 : f32
      %22 = vector.broadcast %cst_11 : f32 to vector<8x256xf32>
      %23 = arith.addf %22, %21 : vector<8x256xf32>
      %cst_12 = arith.constant 1.000000e+00 : f32
      %24 = vector.broadcast %cst_12 : f32 to vector<8x256xf32>
      %25 = arith.divf %24, %23 : vector<8x256xf32>
      %c0_13 = arith.constant 0 : index
      %c0_14 = arith.constant 0 : index
      %26 = vector.load %arg8[%c0_13, %c0_14] : memref<8x256xf32, #tpu.memory_space<vmem>>, vector<8x256xf32>
      tpu.vector_store %arg8[%c0_13, %c0_14], %25 {strides = array<i32>} : memref<8x256xf32, #tpu.memory_space<vmem>>, vector<8x256xf32>,
    } else {
    }
    return
  }
  func.func @transform_0(%arg0: i32) -> (i32, i32) {
    %c0_i32 = arith.constant 0 : i32
    %c0_i32_0 = arith.constant 0 : i32
    %c0_i32_1 = arith.constant 0 : i32
    return %c0_i32, %c0_i32_0 : i32, i32
  }
  func.func @transform_1(%arg0: i32) -> (i32, i32) {
    %c0_i32 = arith.constant 0 : i32
    %0 = arith.minsi %arg0, %c0_i32 : i32
    %c0_i32_0 = arith.constant 0 : i32
    %c0_i32_1 = arith.constant 0 : i32
    return %c0_i32_0, %0 : i32, i32
  }
  func.func @transform_2(%arg0: i32) -> (i32, i32) {
    %c0_i32 = arith.constant 0 : i32
    %0 = arith.minsi %arg0, %c0_i32 : i32
    %c0_i32_0 = arith.constant 0 : i32
    %c0_i32_1 = arith.constant 0 : i32
    return %c0_i32_0, %0 : i32, i32
  }
  func.func @transform_3(%arg0: i32) -> (i32, i32) {
    %c1_i32 = arith.constant 1 : i32
    %0 = arith.subi %arg0, %c1_i32 : i32
    %c0_i32 = arith.constant 0 : i32
    %1 = arith.maxsi %0, %c0_i32 : i32
    %c0_i32_0 = arith.constant 0 : i32
    %2 = arith.minsi %1, %c0_i32_0 : i32
    %c0_i32_1 = arith.constant 0 : i32
    %c0_i32_2 = arith.constant 0 : i32
    return %c0_i32_1, %2 : i32, i32
  }
  func.func @transform_4(%arg0: i32) -> (i32, i32) {
    %c1_i32 = arith.constant 1 : i32
    %0 = arith.subi %arg0, %c1_i32 : i32
    %c0_i32 = arith.constant 0 : i32
    %1 = arith.maxsi %0, %c0_i32 : i32
    %c0_i32_0 = arith.constant 0 : i32
    %2 = arith.minsi %1, %c0_i32_0 : i32
    %c0_i32_1 = arith.constant 0 : i32
    %c0_i32_2 = arith.constant 0 : i32
    return %c0_i32_1, %2 : i32, i32
  }
  func.func @transform_5(%arg0: i32) -> (i32, i32) {
    %c1_i32 = arith.constant 1 : i32
    %0 = arith.subi %arg0, %c1_i32 : i32
    %c1_i32_0 = arith.constant 1 : i32
    %1 = arith.subi %0, %c1_i32_0 : i32
    %c0_i32 = arith.constant 0 : i32
    %2 = arith.maxsi %1, %c0_i32 : i32
    %c0_i32_1 = arith.constant 0 : i32
    %3 = arith.minsi %2, %c0_i32_1 : i32
    %c0_i32_2 = arith.constant 0 : i32
    %c0_i32_3 = arith.constant 0 : i32
    return %c0_i32_2, %3 : i32, i32
  }
  func.func @transform_6(%arg0: i32) -> (i32, i32) {
    %c1_i32 = arith.constant 1 : i32
    %0 = arith.subi %arg0, %c1_i32 : i32
    %c1_i32_0 = arith.constant 1 : i32
    %1 = arith.subi %0, %c1_i32_0 : i32
    %c0_i32 = arith.constant 0 : i32
    %2 = arith.maxsi %1, %c0_i32 : i32
    %c0_i32_1 = arith.constant 0 : i32
    %3 = arith.minsi %2, %c0_i32_1 : i32
    %c0_i32_2 = arith.constant 0 : i32
    %c0_i32_3 = arith.constant 0 : i32
    return %c0_i32_2, %3 : i32, i32
  }
  func.func @transform_7(%arg0: i32) -> (i32, i32) {
    %c1_i32 = arith.constant 1 : i32
    %0 = arith.subi %arg0, %c1_i32 : i32
    %c1_i32_0 = arith.constant 1 : i32
    %1 = arith.subi %0, %c1_i32_0 : i32
    %c0_i32 = arith.constant 0 : i32
    %2 = arith.maxsi %1, %c0_i32 : i32
    %c0_i32_1 = arith.constant 0 : i32
    %3 = arith.minsi %2, %c0_i32_1 : i32
    %c0_i32_2 = arith.constant 0 : i32
    %c0_i32_3 = arith.constant 0 : i32
    return %c0_i32_2, %3 : i32, i32
  }
}

module attributes {stable_mosaic.version = 11 : i64} {
  func.func @_loss_kernel(%arg0: i32, %arg1: memref<8x256xf32, #tpu.memory_space<vmem>>, %arg2: memref<8x256xf32, #tpu.memory_space<vmem>>, %arg3: memref<8x128xf32, #tpu.memory_space<vmem>>, %arg4: memref<8x128xf32, #tpu.memory_space<vmem>>, %arg5: memref<8x128xf32, #tpu.memory_space<vmem>>, %arg6: memref<8x128xf32, #tpu.memory_space<vmem>>, %arg7: memref<8x10x128xf32, #tpu.memory_space<vmem>>, %arg8: memref<8x10x128xf32, #tpu.memory_space<vmem>>, %arg9: memref<8x10xf32, #tpu.memory_space<vmem>>, %arg10: memref<1x128xf32, #tpu.memory_space<vmem>>) attributes {dimension_semantics = [#tpu.dimension_semantics<arbitrary>], iteration_bounds = array<i64: 1>, scalar_prefetch = 0 : i64, scratch_operands = 0 : i64, tpu.core_type = #tpu.core_type<tc>, window_params = [{pipeline_mode = #tpu.pipeline_mode<synchronous>, transform_indices = @transform_0, window_bounds = array<i64: 8, 256>}, {pipeline_mode = #tpu.pipeline_mode<synchronous>, transform_indices = @transform_1, window_bounds = array<i64: 8, 256>}, {pipeline_mode = #tpu.pipeline_mode<synchronous>, transform_indices = @transform_2, window_bounds = array<i64: 8, 128>}, {pipeline_mode = #tpu.pipeline_mode<synchronous>, transform_indices = @transform_3, window_bounds = array<i64: 8, 128>}, {pipeline_mode = #tpu.pipeline_mode<synchronous>, transform_indices = @transform_4, window_bounds = array<i64: 8, 128>}, {pipeline_mode = #tpu.pipeline_mode<synchronous>, transform_indices = @transform_5, window_bounds = array<i64: 8, 128>}, {pipeline_mode = #tpu.pipeline_mode<synchronous>, transform_indices = @transform_6, window_bounds = array<i64: 8, 10, 128>}, {pipeline_mode = #tpu.pipeline_mode<synchronous>, transform_indices = @transform_7, window_bounds = array<i64: 8, 10, 128>}, {pipeline_mode = #tpu.pipeline_mode<synchronous>, transform_indices = @transform_8, window_bounds = array<i64: 8, 10>}, {pipeline_mode = #tpu.pipeline_mode<synchronous>, transform_indices = @transform_9, window_bounds = array<i64: 1, 128>}]} {
    %c0 = arith.constant 0 : index
    %c0_0 = arith.constant 0 : index
    %0 = vector.load %arg2[%c0, %c0_0] : memref<8x256xf32, #tpu.memory_space<vmem>>, vector<8x256xf32>
    %c0_1 = arith.constant 0 : index
    %c0_2 = arith.constant 0 : index
    %1 = vector.load %arg1[%c0_1, %c0_2] : memref<8x256xf32, #tpu.memory_space<vmem>>, vector<8x256xf32>
    %2 = arith.subf %0, %1 : vector<8x256xf32>
    %3 = arith.mulf %2, %2 : vector<8x256xf32>
    %cst = arith.constant dense<0.000000e+00> : vector<8xf32>
    %4 = vector.multi_reduction <add>, %3, %cst [1] : vector<8x256xf32> to vector<8xf32>
    %5 = vector.shape_cast %4 : vector<8xf32> to vector<8x1xf32>
    %6 = vector.shape_cast %5 : vector<8x1xf32> to vector<1x8x1xf32>
    %cst_3 = arith.constant dense<0.000000e+00> : vector<1xf32>
    %7 = vector.multi_reduction <add>, %6, %cst_3 [1, 2] : vector<1x8x1xf32> to vector<1xf32>
    %8 = vector.shape_cast %7 : vector<1xf32> to vector<1x1x1xf32>
    %9 = vector.extract %8[0, 0, 0] : f32 from vector<1x1x1xf32>
    %cst_4 = arith.constant 8.000000e+00 : f32
    %10 = arith.divf %9, %cst_4 : f32
    %c0_5 = arith.constant 0 : index
    %c0_6 = arith.constant 0 : index
    %11 = vector.load %arg3[%c0_5, %c0_6] : memref<8x128xf32, #tpu.memory_space<vmem>>, vector<8x128xf32>
    %c0_7 = arith.constant 0 : index
    %c0_8 = arith.constant 0 : index
    %12 = vector.load %arg4[%c0_7, %c0_8] : memref<8x128xf32, #tpu.memory_space<vmem>>, vector<8x128xf32>
    %cst_9 = arith.constant 1.000000e+00 : f32
    %13 = vector.broadcast %cst_9 : f32 to vector<8x128xf32>
    %14 = arith.addf %13, %12 : vector<8x128xf32>
    %15 = arith.mulf %11, %11 : vector<8x128xf32>
    %16 = arith.subf %14, %15 : vector<8x128xf32>
    %17 = math.exp %12 : vector<8x128xf32>
    %18 = arith.subf %16, %17 : vector<8x128xf32>
    %cst_10 = arith.constant -5.000000e-01 : f32
    %19 = vector.broadcast %cst_10 : f32 to vector<8x128xf32>
    %20 = arith.mulf %19, %18 : vector<8x128xf32>
    %cst_11 = arith.constant dense<0.000000e+00> : vector<8xf32>
    %21 = vector.multi_reduction <add>, %20, %cst_11 [1] : vector<8x128xf32> to vector<8xf32>
    %22 = vector.shape_cast %21 : vector<8xf32> to vector<8x1xf32>
    %23 = vector.shape_cast %22 : vector<8x1xf32> to vector<1x8x1xf32>
    %cst_12 = arith.constant dense<0.000000e+00> : vector<1xf32>
    %24 = vector.multi_reduction <add>, %23, %cst_12 [1, 2] : vector<1x8x1xf32> to vector<1xf32>
    %25 = vector.shape_cast %24 : vector<1xf32> to vector<1x1x1xf32>
    %26 = vector.extract %25[0, 0, 0] : f32 from vector<1x1x1xf32>
    %cst_13 = arith.constant 8.000000e+00 : f32
    %27 = arith.divf %26, %cst_13 : f32
    %c0_14 = arith.constant 0 : index
    %c0_15 = arith.constant 0 : index
    %28 = vector.load %arg5[%c0_14, %c0_15] : memref<8x128xf32, #tpu.memory_space<vmem>>, vector<8x128xf32>
    %29 = vector.shape_cast %28 : vector<8x128xf32> to vector<8x1x128xf32>
    %c0_16 = arith.constant 0 : index
    %c0_17 = arith.constant 0 : index
    %30 = vector.load %arg6[%c0_16, %c0_17] : memref<8x128xf32, #tpu.memory_space<vmem>>, vector<8x128xf32>
    %31 = vector.shape_cast %30 : vector<8x128xf32> to vector<8x1x128xf32>
    %c0_18 = arith.constant 0 : index
    %c0_19 = arith.constant 0 : index
    %c0_20 = arith.constant 0 : index
    %32 = vector.load %arg7[%c0_18, %c0_19, %c0_20] : memref<8x10x128xf32, #tpu.memory_space<vmem>>, vector<8x10x128xf32>
    %c0_21 = arith.constant 0 : index
    %c0_22 = arith.constant 0 : index
    %c0_23 = arith.constant 0 : index
    %33 = vector.load %arg8[%c0_21, %c0_22, %c0_23] : memref<8x10x128xf32, #tpu.memory_space<vmem>>, vector<8x10x128xf32>
    %34 = vector.broadcast %29 : vector<8x1x128xf32> to vector<8x10x128xf32>
    %35 = arith.subf %32, %34 : vector<8x10x128xf32>
    %cst_24 = arith.constant -1.000000e+00 : f32
    %36 = vector.broadcast %cst_24 : f32 to vector<8x10x128xf32>
    %37 = arith.addf %36, %33 : vector<8x10x128xf32>
    %38 = vector.broadcast %31 : vector<8x1x128xf32> to vector<8x10x128xf32>
    %39 = arith.subf %37, %38 : vector<8x10x128xf32>
    %40 = vector.broadcast %31 : vector<8x1x128xf32> to vector<8x10x128xf32>
    %41 = arith.subf %40, %33 : vector<8x10x128xf32>
    %42 = math.exp %41 : vector<8x10x128xf32>
    %43 = arith.addf %39, %42 : vector<8x10x128xf32>
    %44 = arith.mulf %35, %35 : vector<8x10x128xf32>
    %cst_25 = arith.constant 0.000000e+00 : f32
    %45 = vector.broadcast %cst_25 : f32 to vector<8x10x128xf32>
    %46 = arith.subf %45, %33 : vector<8x10x128xf32>
    %47 = math.exp %46 : vector<8x10x128xf32>
    %48 = arith.mulf %44, %47 : vector<8x10x128xf32>
    %49 = arith.addf %43, %48 : vector<8x10x128xf32>
    %cst_26 = arith.constant 5.000000e-01 : f32
    %50 = vector.broadcast %cst_26 : f32 to vector<8x10x128xf32>
    %51 = arith.mulf %50, %49 : vector<8x10x128xf32>
    %cst_27 = arith.constant dense<0.000000e+00> : vector<8x10xf32>
    %52 = vector.multi_reduction <add>, %51, %cst_27 [2] : vector<8x10x128xf32> to vector<8x10xf32>
    %c0_28 = arith.constant 0 : index
    %c0_29 = arith.constant 0 : index
    %53 = vector.load %arg9[%c0_28, %c0_29] : memref<8x10xf32, #tpu.memory_space<vmem>>, vector<8x10xf32>
    %54 = arith.mulf %53, %52 : vector<8x10xf32>
    %cst_30 = arith.constant dense<0.000000e+00> : vector<8xf32>
    %55 = vector.multi_reduction <add>, %54, %cst_30 [1] : vector<8x10xf32> to vector<8xf32>
    %56 = vector.shape_cast %55 : vector<8xf32> to vector<8x1xf32>
    %57 = vector.shape_cast %56 : vector<8x1xf32> to vector<1x8x1xf32>
    %cst_31 = arith.constant dense<0.000000e+00> : vector<1xf32>
    %58 = vector.multi_reduction <add>, %57, %cst_31 [1, 2] : vector<1x8x1xf32> to vector<1xf32>
    %59 = vector.shape_cast %58 : vector<1xf32> to vector<1x1x1xf32>
    %60 = vector.extract %59[0, 0, 0] : f32 from vector<1x1x1xf32>
    %cst_32 = arith.constant 8.000000e+00 : f32
    %61 = arith.divf %60, %cst_32 : f32
    %cst_33 = arith.constant dense<0.000000e+00> : vector<10xf32>
    %62 = vector.multi_reduction <add>, %53, %cst_33 [0] : vector<8x10xf32> to vector<10xf32>
    %63 = vector.shape_cast %62 : vector<10xf32> to vector<1x10xf32>
    %cst_34 = arith.constant 8.000000e+00 : f32
    %64 = vector.broadcast %cst_34 : f32 to vector<1x10xf32>
    %65 = arith.divf %63, %64 : vector<1x10xf32>
    %66 = math.log %65 : vector<1x10xf32>
    %cst_35 = arith.constant -2.30258512 : f32
    %67 = vector.broadcast %cst_35 : f32 to vector<1x10xf32>
    %68 = arith.subf %66, %67 : vector<1x10xf32>
    %69 = arith.mulf %65, %68 : vector<1x10xf32>
    %70 = vector.shape_cast %69 : vector<1x10xf32> to vector<1x1x10xf32>
    %cst_36 = arith.constant dense<0.000000e+00> : vector<1xf32>
    %71 = vector.multi_reduction <add>, %70, %cst_36 [1, 2] : vector<1x1x10xf32> to vector<1xf32>
    %72 = vector.shape_cast %71 : vector<1xf32> to vector<1x1x1xf32>
    %73 = vector.extract %72[0, 0, 0] : f32 from vector<1x1x1xf32>
    %cst_37 = arith.constant dense<0xFF800000> : vector<8xf32>
    %74 = vector.multi_reduction <maximumf>, %53, %cst_37 [1] : vector<8x10xf32> to vector<8xf32>
    %75 = vector.shape_cast %74 : vector<8xf32> to vector<8x1xf32>
    %76 = vector.shape_cast %75 : vector<8x1xf32> to vector<1x8x1xf32>
    %cst_38 = arith.constant dense<0.000000e+00> : vector<1xf32>
    %77 = vector.multi_reduction <add>, %76, %cst_38 [1, 2] : vector<1x8x1xf32> to vector<1xf32>
    %78 = vector.shape_cast %77 : vector<1xf32> to vector<1x1x1xf32>
    %79 = vector.extract %78[0, 0, 0] : f32 from vector<1x1x1xf32>
    %cst_39 = arith.constant 8.000000e+00 : f32
    %80 = arith.divf %79, %cst_39 : f32
    %cst_40 = arith.constant 0.000000e+00 : f32
    %81 = arith.subf %cst_40, %80 : f32
    %82 = arith.addf %10, %61 : f32
    %83 = arith.addf %82, %27 : f32
    %cst_41 = arith.constant 1.000000e+01 : f32
    %84 = arith.mulf %cst_41, %73 : f32
    %85 = arith.addf %83, %84 : f32
    %86 = tpu.iota {dimensions = array<i32: 1>} : vector<1x128xi32>
    %cst_42 = arith.constant 0.000000e+00 : f32
    %87 = vector.broadcast %cst_42 : f32 to vector<1x128xf32>
    %c0_i32 = arith.constant 0 : i32
    %88 = vector.broadcast %c0_i32 : i32 to vector<1x128xi32>
    %89 = arith.cmpi eq, %86, %88 : vector<1x128xi32>
    %cst_43 = arith.constant 0.000000e+00 : f32
    %90 = vector.broadcast %10 : f32 to vector<1x128xf32>
    %91 = vector.broadcast %cst_43 : f32 to vector<1x128xf32>
    %92 = arith.select %89, %90, %91 : vector<1x128xi1>, vector<1x128xf32>
    %93 = arith.addf %87, %92 : vector<1x128xf32>
    %c1_i32 = arith.constant 1 : i32
    %94 = vector.broadcast %c1_i32 : i32 to vector<1x128xi32>
    %95 = arith.cmpi eq, %86, %94 : vector<1x128xi32>
    %cst_44 = arith.constant 0.000000e+00 : f32
    %96 = vector.broadcast %61 : f32 to vector<1x128xf32>
    %97 = vector.broadcast %cst_44 : f32 to vector<1x128xf32>
    %98 = arith.select %95, %96, %97 : vector<1x128xi1>, vector<1x128xf32>
    %99 = arith.addf %93, %98 : vector<1x128xf32>
    %c2_i32 = arith.constant 2 : i32
    %100 = vector.broadcast %c2_i32 : i32 to vector<1x128xi32>
    %101 = arith.cmpi eq, %86, %100 : vector<1x128xi32>
    %cst_45 = arith.constant 0.000000e+00 : f32
    %102 = vector.broadcast %27 : f32 to vector<1x128xf32>
    %103 = vector.broadcast %cst_45 : f32 to vector<1x128xf32>
    %104 = arith.select %101, %102, %103 : vector<1x128xi1>, vector<1x128xf32>
    %105 = arith.addf %99, %104 : vector<1x128xf32>
    %c3_i32 = arith.constant 3 : i32
    %106 = vector.broadcast %c3_i32 : i32 to vector<1x128xi32>
    %107 = arith.cmpi eq, %86, %106 : vector<1x128xi32>
    %cst_46 = arith.constant 0.000000e+00 : f32
    %108 = vector.broadcast %73 : f32 to vector<1x128xf32>
    %109 = vector.broadcast %cst_46 : f32 to vector<1x128xf32>
    %110 = arith.select %107, %108, %109 : vector<1x128xi1>, vector<1x128xf32>
    %111 = arith.addf %105, %110 : vector<1x128xf32>
    %c4_i32 = arith.constant 4 : i32
    %112 = vector.broadcast %c4_i32 : i32 to vector<1x128xi32>
    %113 = arith.cmpi eq, %86, %112 : vector<1x128xi32>
    %cst_47 = arith.constant 0.000000e+00 : f32
    %114 = vector.broadcast %81 : f32 to vector<1x128xf32>
    %115 = vector.broadcast %cst_47 : f32 to vector<1x128xf32>
    %116 = arith.select %113, %114, %115 : vector<1x128xi1>, vector<1x128xf32>
    %117 = arith.addf %111, %116 : vector<1x128xf32>
    %c5_i32 = arith.constant 5 : i32
    %118 = vector.broadcast %c5_i32 : i32 to vector<1x128xi32>
    %119 = arith.cmpi eq, %86, %118 : vector<1x128xi32>
    %cst_48 = arith.constant 0.000000e+00 : f32
    %120 = vector.broadcast %85 : f32 to vector<1x128xf32>
    %121 = vector.broadcast %cst_48 : f32 to vector<1x128xf32>
    %122 = arith.select %119, %120, %121 : vector<1x128xi1>, vector<1x128xf32>
    %123 = arith.addf %117, %122 : vector<1x128xf32>
    %c0_49 = arith.constant 0 : index
    %c0_50 = arith.constant 0 : index
    %124 = vector.load %arg10[%c0_49, %c0_50] : memref<1x128xf32, #tpu.memory_space<vmem>>, vector<1x128xf32>
    tpu.vector_store %arg10[%c0_49, %c0_50], %123 {strides = array<i32>} : memref<1x128xf32, #tpu.memory_space<vmem>>, vector<1x128xf32>,
    return
  }
  func.func @transform_0(%arg0: i32) -> (i32, i32) {
    %c0_i32 = arith.constant 0 : i32
    %c0_i32_0 = arith.constant 0 : i32
    %c0_i32_1 = arith.constant 0 : i32
    return %c0_i32, %c0_i32_0 : i32, i32
  }
  func.func @transform_1(%arg0: i32) -> (i32, i32) {
    %c0_i32 = arith.constant 0 : i32
    %c0_i32_0 = arith.constant 0 : i32
    %c0_i32_1 = arith.constant 0 : i32
    return %c0_i32, %c0_i32_0 : i32, i32
  }
  func.func @transform_2(%arg0: i32) -> (i32, i32) {
    %c0_i32 = arith.constant 0 : i32
    %c0_i32_0 = arith.constant 0 : i32
    %c0_i32_1 = arith.constant 0 : i32
    return %c0_i32, %c0_i32_0 : i32, i32
  }
  func.func @transform_3(%arg0: i32) -> (i32, i32) {
    %c0_i32 = arith.constant 0 : i32
    %c0_i32_0 = arith.constant 0 : i32
    %c0_i32_1 = arith.constant 0 : i32
    return %c0_i32, %c0_i32_0 : i32, i32
  }
  func.func @transform_4(%arg0: i32) -> (i32, i32) {
    %c0_i32 = arith.constant 0 : i32
    %c0_i32_0 = arith.constant 0 : i32
    %c0_i32_1 = arith.constant 0 : i32
    return %c0_i32, %c0_i32_0 : i32, i32
  }
  func.func @transform_5(%arg0: i32) -> (i32, i32) {
    %c0_i32 = arith.constant 0 : i32
    %c0_i32_0 = arith.constant 0 : i32
    %c0_i32_1 = arith.constant 0 : i32
    return %c0_i32, %c0_i32_0 : i32, i32
  }
  func.func @transform_6(%arg0: i32) -> (i32, i32, i32) {
    %c0_i32 = arith.constant 0 : i32
    %c0_i32_0 = arith.constant 0 : i32
    %c0_i32_1 = arith.constant 0 : i32
    %c0_i32_2 = arith.constant 0 : i32
    return %c0_i32, %c0_i32_0, %c0_i32_1 : i32, i32, i32
  }
  func.func @transform_7(%arg0: i32) -> (i32, i32, i32) {
    %c0_i32 = arith.constant 0 : i32
    %c0_i32_0 = arith.constant 0 : i32
    %c0_i32_1 = arith.constant 0 : i32
    %c0_i32_2 = arith.constant 0 : i32
    return %c0_i32, %c0_i32_0, %c0_i32_1 : i32, i32, i32
  }
  func.func @transform_8(%arg0: i32) -> (i32, i32) {
    %c0_i32 = arith.constant 0 : i32
    %c0_i32_0 = arith.constant 0 : i32
    %c0_i32_1 = arith.constant 0 : i32
    return %c0_i32, %c0_i32_0 : i32, i32
  }
  func.func @transform_9(%arg0: i32) -> (i32, i32) {
    %c0_i32 = arith.constant 0 : i32
    %c0_i32_0 = arith.constant 0 : i32
    %c0_i32_1 = arith.constant 0 : i32
    return %c0_i32, %c0_i32_0 : i32, i32
  }
}

</mosaic_0001>

<bundles_post_ra>
// kernel: vae_dilo3_forward.10
= control target key start
LH: loop header
LB: loop body
LE: loop exit
PB: predicated region body
PF: predicated region fallthrough
CT: control target
= control target key end

     0   :  { %s4134_s0 = inlined_call_operand.vmem [shape: f32[8,256], index: 0, kind: input, shape index: {}]   ;;  %s4135_s1 = inlined_call_operand.hbm [shape: bf16[256,512], index: 1, kind: input, shape index: {}]   ;;  %s4136_s2 = inlined_call_operand.hbm [shape: f32[1,512], index: 2, kind: input, shape index: {}]   ;;  %s4137_s3 = inlined_call_operand.hbm [shape: bf16[512,512], index: 3, kind: input, shape index: {}]   ;;  %s4138_s4 = inlined_call_operand.hbm [shape: f32[1,512], index: 4, kind: input, shape index: {}]   ;;  %s4139_s5 = inlined_call_operand.vmem [shape: bf16[512,10], index: 5, kind: input, shape index: {}]   ;;  %s4140_s6 = inlined_call_operand.hbm [shape: f32[1,10], index: 6, kind: input, shape index: {}]   ;;  %s4141_s7 = inlined_call_operand.vmem [shape: f32[8,10], index: 7, kind: output, shape index: {}]  }
   0x1   :  { %4151 = sst [smem:[#allocation17_spill]] %s4135_s1 }
   0x2   :  { %4152 = sst [smem:[#allocation18_spill]] %s4136_s2 }
   0x3   :  { %4153 = sst [smem:[#allocation19_spill]] %s4138_s4 }
   0x4   :  { %12 = vsyncpa [#allocation5], 0 }
   0x5   :  { %14 = vsyncpa [#allocation5 + $0x1], 0 }
   0x6   :  { %15 = vsyncpa [#allocation7], 0 }
   0x7   :  { %17 = vsyncpa [#allocation7 + $0x1], 0 }
   0x8   :  { %18 = vsyncpa [#allocation10], 0 }
   0x9   :  { %20 = vsyncpa [#allocation10 + $0x1], 0  ;;  %s3683_s24 = smov 0   ;;  %s3685_s25 = smov 0  }
   0xa   :  { %s3687_s26 = smov 0   ;;  %s3689_s27 = smov 0  }
   0xb LB: > { %s3702_s28 = sadd.s32 4294967295, %s3634_s27   ;;  %s3705_s29 = sadd.s32 1, %s3634_s27   ;;  %s3634_s27 = sphi %s3689_s27, %s4181_s27   ;;  %s3630_s26 = sphi %s3687_s26, %s4180_s26   ;;  %s3626_s25 = sphi %s3685_s25, %s4179_s25   ;;  %s3622_s24 = sphi %s3683_s24, %s4178_s24  }
   0xc   : > { %p51_p0 = scmp.lt.s32.totalorder %s3634_s27, 0  ;;  %p53_p1 = scmp.lt.s32.totalorder %s3705_s29, 0 }
   0xd   : > { %s58_s30 = sadd.s32 1, %s3630_s26  ;;  %p65_p2 = scmp.ne.s32.totalorder %s3630_s26, %s3626_s25 }
   0xe   : > { %s3713_s8 = scalar_select %p51_p0, %s3634_s27, 0 }
   0xf   : > { %s54_s9 = scalar_select %p53_p1, %s3705_s29, 0 }
  0x10   : > { %p4144_p3 = scmp.eq.s32.totalorder %s3634_s27, 0  ;;  %p71_p4 = scmp.ne.s32.totalorder %s3626_s25, %s3622_s24 }
  0x11   : > { %s55_s10 = ssub.s32 %s3713_s8, %s54_s9  ;;  %p4142_p5 = scmp.eq.s32.totalorder %s3702_s28, 0 }
  0x12   : > { %p56_p6 = scmp.eq.s32.totalorder %s55_s10, 0  ;;  %p67_p7 = por %p4144_p3, %p65_p2 }
  0x13   : > { %p3724_p8 = por %p4142_p5, %p71_p4  ;;  %p4143_p9 = scmp.lt.s32.totalorder %s3634_s27, 3 }
  0x14   : > { %s3729_s12 = scalar_select %p56_p6, %s3630_s26, %s58_s30  }
  0x15   : > { %s4154_s11 = scalar_select %p3724_p8, 1, 0 }
  0x16   : > { %4155 = sst [smem:[#allocation16_spill]] %s3729_s12  ;;  %s3733_s13 = sand.u32 1, %s3630_s26  }
  0x17   : > { %s331_s15 = sand.u32 1, %s3634_s27   ;;  %p3739_p10 = pnand %p4143_p9, %p67_p7 }
  0x18   : > { %s2715_s17 = sshll.u32 %s3733_s13, 2  ;;  %s2997_s18 = sshll.u32 %s3713_s8, 6 }
  0x19   : > { %s4156_s16 = scalar_select %p3739_p10, 1, 0 }
  0x1a   : > { %s4157_s2 = sld [smem:[#allocation18_spill]]  ;;  %s335_s22 = scalar_lea.vmem [#allocation6], %s2715_s17 }
  0x1b   : > { %s345_s23 = sshll.u32 %s335_s22, 4  ;;  %s3755_s24 = scalar_lea.sflag [#allocation7], %s331_s15  ;;  %s3750_s23 = int_to_ptr.vmem [resolvable:$true] %s345_s23 }
  0x1c   : > { %p4145_p13 = pneg %p3739_p10 }
  0x20   : > { %s3748_s21 = scalar_lea.hbm %s4157_s2, %s2997_s18  ;;  %s3449_s18 = scalar_lea.hbm %s4157_s2, 64 }
  0x21   : > { %s3444_s30 = scalar_lea.hbm %s3748_s21, 64  ;;  %p3450_p2 = scmp.lt.u32.totalorder %s3748_s21, %s4157_s2 }
  0x22   : > { %p3445_p12 = scmp.ne.s32.totalorder %s3748_s21, %s3444_s30  ;;  %p3451_p4 = scmp.lt.u32.totalorder %s3449_s18, %s3444_s30 }
  0x23   : > { %p3453_p7 = scmp.lt.u32.totalorder %s3444_s30, %s3748_s21 }
  0x24   : > { %p3447_p0 = pnand %p4145_p13, %p3445_p12  ;;  %p3452_p6 = por %p3451_p4, %p3450_p2 }
  0x26   : > { %p3448_p1 = pneg %p3447_p0  ;;  %p3454_p5 = por %p3453_p7, %p3452_p6 }
  0x28   : > { %p3455_p11 = pnand %p3454_p5, %p3448_p1 }
  0x2a   : > { %3458 = shalt.err (!%p3455_p11)
}
  0x2b   : > { %s3459_s20 = scalar_lea.vmem %s3750_s23, 64  ;;  %s3636_s22 = smov [#allocation6]  }
  0x2c   : > { %p3460_p12 = scmp.ne.s32.totalorder %s3750_s23, %s3459_s20  ;;  %s3464_s9 = sshll.u32 %s3636_s22, 4  ;;  %s3465_s9 = int_to_ptr.vmem [resolvable:$false] %s3464_s9 }
  0x2d   : > { %s3466_s10 = scalar_lea.vmem %s3465_s9, 128  ;;  %p3467_p3 = scmp.lt.s32.totalorder %s3750_s23, %s3465_s9 }
  0x2e   : > { %p3462_p0 = pnand %p3460_p12, %p4145_p13  ;;  %p3468_p2 = scmp.lt.s32.totalorder %s3466_s10, %s3459_s20 }
  0x30   : > { %p3463_p9 = pneg %p3462_p0  ;;  %p3469_p4 = por %p3468_p2, %p3467_p3 }
  0x32   : > { %p3470_p6 = pnand %p3469_p4, %p3463_p9 }
  0x34   : > { %3473 = shalt.err (!%p3470_p6)
}
  0x35   : > { %3072 = dma.hbm_to_vmem [thread:$0]  (!%p3739_p10), %s3748_s21, 64, %s3750_s23, %s3755_s24  }
  0x36   : > { %p439_p5 = scmp.lt.s32.totalorder %s3634_s27, 4  ;;  %p4158_p11 = scmp.eq.s32.totalorder %s3634_s27, 0 }
  0x37   : > { %p4159_p1 = scmp.lt.s32.totalorder %s3634_s27, 3  ;;  %p4161_p3 = scmp.ge.s32.totalorder %s3634_s27, 1 }
  0x38   : > { %s3637_s17 = smov [#allocation9]   ;;  %s3800_s20 = scalar_lea.sflag [#allocation10], %s331_s15 }
  0x39   : > { %p3788_p7 = pnand %p4159_p1, %p4158_p11  ;;  %p3794_p9 = pnand %p4161_p3, %p439_p5 }
  0x3a   : > { %s395_s19 = sshll.u32 %s3637_s17, 4  ;;  %s4163_s4 = sld [smem:[#allocation19_spill]]  ;;  %s396_s19 = int_to_ptr.vmem [resolvable:$true] %s395_s19 }
  0x3b   : > { %s4160_s30 = scalar_select %p3788_p7, 1, 0 }
  0x3c   : > { %s4162_s18 = scalar_select %p3794_p9, 1, 0 }
  0x3d   : > { %p3810_p0 = pneg %p3788_p7 }
  0x40   : > { %s3474_s22 = scalar_lea.hbm %s4163_s4, 64 }
  0x41   : > { %p3475_p12 = scmp.ne.s32.totalorder %s4163_s4, %s3474_s22  ;;  %p3481_p6 = scmp.lt.u32.totalorder %s3474_s22, %s4163_s4 }
  0x43   : > { %p3477_p2 = pnand %p3810_p0, %p3475_p12 }
  0x45   : > { %p3478_p4 = pneg %p3477_p2 }
  0x47   : > { %p3483_p5 = pnand %p3481_p6, %p3478_p4 }
  0x49   : > { %3486 = shalt.err (!%p3483_p5)
}
  0x4a   : > { %s3487_s17 = scalar_lea.vmem %s396_s19, 64  ;;  %s3494_s21 = scalar_lea.vmem %s396_s19, 128 }
  0x4b   : > { %p3488_p11 = scmp.ne.s32.totalorder %s396_s19, %s3487_s17  ;;  %p3495_p13 = scmp.lt.s32.totalorder %s396_s19, %s396_s19 }
  0x4c   : > { %p3496_p8 = scmp.lt.s32.totalorder %s3494_s21, %s3487_s17 }
  0x4d   : > { %p3490_p1 = pnand %p3488_p11, %p3810_p0 }
  0x4e   : > { %p3497_p9 = por %p3496_p8, %p3495_p13 }
  0x4f   : > { %p3491_p3 = pneg %p3490_p1 }
  0x51   : > { %p3498_p10 = pnand %p3497_p9, %p3491_p3 }
  0x53   : > { %3501 = shalt.err (!%p3498_p10)
}
  0x54   : > { %3078 = dma.hbm_to_vmem [thread:$0]  (!%p3788_p7), %s4163_s4, 64, %s396_s19, %s3800_s20  }
  0x55   : > { %s2996_s22 = sshll.u32 %s3713_s8, 8  ;;  %s4165_s10 = sshll.u32 %s3733_s13, 9 }
  0x56   : > { %s312_s27 = scalar_lea.vmem [#allocation4], %s4165_s10  ;;  %s4166_s1 = sld [smem:[#allocation17_spill]] }
  0x57   : > { %s321_s15 = sshll.u32 %s312_s27, 4  ;;  %s309_s23 = scalar_lea.sflag [#allocation5], %s3733_s13  ;;  %s3835_s15 = int_to_ptr.vmem [resolvable:$true] %s321_s15 }
  0x58   : > { %p4167_p10 = scmp.ne.s32.totalorder %s4156_s16, 0 }
  0x5a   : > { %p4168_p13 = pneg %p4167_p10 }
  0x5c   : > { %s3833_s21 = scalar_lea.hbm %s4166_s1, %s2996_s22  ;;  %s3507_s10 = scalar_lea.hbm %s4166_s1, 8192 }
  0x5d   : > { %s3502_s9 = scalar_lea.hbm %s3833_s21, 8192  ;;  %p3508_p2 = scmp.lt.u32.totalorder %s3833_s21, %s4166_s1 }
  0x5e   : > { %p3503_p8 = scmp.ne.s32.totalorder %s3833_s21, %s3502_s9  ;;  %p3509_p4 = scmp.lt.u32.totalorder %s3507_s10, %s3502_s9 }
  0x5f   : > { %p3511_p5 = scmp.lt.u32.totalorder %s3502_s9, %s3833_s21 }
  0x60   : > { %p3505_p9 = pnand %p3503_p8, %p4168_p13  ;;  %p3510_p6 = por %p3509_p4, %p3508_p2 }
  0x62   : > { %p3506_p12 = pneg %p3505_p9  ;;  %p3512_p11 = por %p3511_p5, %p3510_p6 }
  0x64   : > { %p3513_p1 = pnand %p3512_p11, %p3506_p12 }
  0x66   : > { %3516 = shalt.err (!%p3513_p1)
}
  0x67   : > { %s3517_s27 = scalar_lea.vmem %s3835_s15, 8192  ;;  %p4169_p8 = pmov %p4168_p13 }
  0x68   : > { %p3518_p3 = scmp.ne.s32.totalorder %s3835_s15, %s3517_s27  ;;  %s3638_s17 = smov [#allocation4]  }
  0x69   : > { %s3522_s8 = sshll.u32 %s3638_s17, 4  ;;  %s3523_s8 = int_to_ptr.vmem [resolvable:$false] %s3522_s8 }
  0x6a   : > { %p3520_p13 = pnand %p3518_p3, %p4169_p8  ;;  %s3524_s19 = scalar_lea.vmem %s3523_s8, 16384 }
  0x6b   : > { %p3525_p7 = scmp.lt.s32.totalorder %s3835_s15, %s3523_s8  ;;  %p3526_p2 = scmp.lt.s32.totalorder %s3524_s19, %s3517_s27 }
  0x6c   : > { %p3521_p9 = pneg %p3520_p13 }
  0x6d   : > { %p3527_p4 = por %p3526_p2, %p3525_p7 }
  0x6f   : > { %p3528_p6 = pnand %p3527_p4, %p3521_p9 }
  0x71   : > { %3531 = shalt.err (!%p3528_p6)
}
  0x72   : > { %s3639_s9 = smov 256   ;;  %s3640_s10 = smov 16  }
  0x73   : > { %3069 = dma.hbm_to_vmem [thread:$0]  (!%p4167_p10), %s3833_s21, 8192, %s3835_s15, %s309_s23, %s3639_s9, %s3639_s9, %s3640_s10  }
  0x74   : > { %s3641_s2 = smov [#allocation8]   ;;  %s3642_s17 = smov [#allocation11]  }
  0x75   : > { %s368_s22 = sshll.u32 %s3641_s2, 4  ;;  %s434_s27 = sshll.u32 %s3642_s17, 4  ;;  %s369_s22 = int_to_ptr.vmem [resolvable:$true] %s368_s22  ;;  %s3866_s27 = int_to_ptr.vmem [resolvable:$true] %s434_s27 }
  0x76   : > { %s3532_s1 = scalar_lea.hbm %s4137_s3, 16384 }
  0x77   : > { %p3533_p7 = scmp.ne.s32.totalorder %s4137_s3, %s3532_s1  ;;  %p3539_p10 = scmp.lt.u32.totalorder %s3532_s1, %s4137_s3 }
  0x79   : > { %p3535_p12 = pnand %p3533_p7, %p3810_p0 }
  0x7b   : > { %p3536_p5 = pneg %p3535_p12 }
  0x7d   : > { %p3541_p11 = pnand %p3539_p10, %p3536_p5 }
  0x7f   : > { %3544 = shalt.err (!%p3541_p11)
}
  0x80   : > { %s3545_s15 = scalar_lea.vmem %s369_s22, 16384  ;;  %s3552_s21 = scalar_lea.vmem %s369_s22, 32768 }
  0x81   : > { %p3546_p1 = scmp.ne.s32.totalorder %s369_s22, %s3545_s15  ;;  %p3553_p13 = scmp.lt.s32.totalorder %s369_s22, %s369_s22 }
  0x82   : > { %p3554_p9 = scmp.lt.s32.totalorder %s3552_s21, %s3545_s15 }
  0x83   : > { %p3548_p3 = pnand %p3546_p1, %p3810_p0 }
  0x84   : > { %p3555_p2 = por %p3554_p9, %p3553_p13 }
  0x85   : > { %p3549_p8 = pneg %p3548_p3 }
  0x87   : > { %p3556_p4 = pnand %p3555_p2, %p3549_p8 }
  0x89   : > { %3559 = shalt.err (!%p3556_p4)
}
  0x8a   : > { %p4170_p6 = scmp.ne.s32.totalorder %s4160_s30, 0  ;;  %s3560_s2 = scalar_lea.hbm %s4140_s6, 16 }
  0x8b   : > { %p3561_p7 = scmp.ne.s32.totalorder %s4140_s6, %s3560_s2  ;;  %p3567_p10 = scmp.lt.u32.totalorder %s3560_s2, %s4140_s6 }
  0x8c   : > { %3075 = dma.hbm_to_vmem [thread:$0]  (!%p4170_p6), %s4137_s3, 16384, %s369_s22, %s3755_s24, %s3639_s9, %s3639_s9, %s3640_s10  }
  0x8d   : > { %p3563_p12 = pnand %p3561_p7, %p3810_p0 }
  0x8f   : > { %p3564_p5 = pneg %p3563_p12 }
  0x91   : > { %p3569_p11 = pnand %p3567_p10, %p3564_p5 }
  0x93   : > { %3572 = shalt.err (!%p3569_p11)
}
  0x94   : > { %s3573_s24 = scalar_lea.vmem %s3866_s27, 16  ;;  %s3580_s9 = scalar_lea.vmem %s3866_s27, 32 }
  0x95   : > { %p3574_p1 = scmp.ne.s32.totalorder %s3866_s27, %s3573_s24  ;;  %p3581_p13 = scmp.lt.s32.totalorder %s3866_s27, %s3866_s27 }
  0x96   : > { %p3582_p9 = scmp.lt.s32.totalorder %s3580_s9, %s3573_s24 }
  0x97   : > { %p3576_p3 = pnand %p3574_p1, %p3810_p0 }
  0x98   : > { %p3583_p2 = por %p3582_p9, %p3581_p13 }
  0x99   : > { %p3577_p8 = pneg %p3576_p3 }
  0x9b   : > { %p3584_p4 = pnand %p3583_p2, %p3577_p8 }
  0x9d   : > { %3587 = shalt.err (!%p3584_p4)
}
  0x9e   : > { %3081 = dma.hbm_to_vmem [thread:$0]  (!%p4170_p6), %s4140_s6, 16, %s3866_s27, %s3800_s20  }
  0x9f   : > { %p4171_p7 = scmp.ne.s32.totalorder %s4162_s18, 0 }
  0xa0   : > { %s445_s14 = sand.u32 (!%p4171_p7), 1, %s3626_s25   ;;  %p4172_p0 = scmp.ne.s32.totalorder (!%p4171_p7), %s4154_s11, 0 }
  0xa1   : > { %443 = sbr.rel (%p4171_p7) target bundleno = 1382 (0x566), region = 48  ;;  %s2744_s16 = sshll.u32 (!%p4171_p7), %s445_s14, 9 }
  0xa2   : > { %s446_s15 = scalar_lea.sflag (!%p4171_p7), [#allocation5], %s445_s14  ;;  %s3918_s21 = scalar_lea.vmem (!%p4171_p7), [#allocation4], %s2744_s16 }
  0xa8   : > { %3605 = dma.done.wait (%p4172_p0), %s446_s15, 8192  }
  0xa9   : > { %3607 = vsyncadd (%p4172_p0), %s446_s15, 4294959104  ;;  %s454_s30 = sand.u32 1, %s3702_s28   ;;  %s2745_s1 = sshll.u32 %s445_s14, 2 }
  0xaa   : > { %s455_s20 = scalar_lea.sflag [#allocation7], %s454_s30  ;;  %s3925_s27 = scalar_lea.vmem [#allocation6], %s2745_s1 }
  0xab   : > { %3609 = dma.done.wait (%p4172_p0), %s455_s20, 64  }
  0xac   : > { %3611 = vsyncadd (%p4172_p0), %s455_s20, 4294967232  ;;  %p4173_p6 = scmp.eq.s32.totalorder %s3702_s28, 0 }
  0xae   : > { %3613 = dma.done.wait (%p4173_p6), %s455_s20, 16384   ;;  %p4174_p12 = pmov %p4173_p6 }
  0xaf   : > { %s473_s18 = scalar_lea.sflag [#allocation10], %s454_s30  ;;  %p4175_p5 = pmov %p4173_p6 }
  0xb0   : > { %3615 = vsyncadd (%p4174_p12), %s455_s20, 4294950912 }
  0xb1   : > { %3617 = dma.done.wait (%p4175_p5), %s473_s18, 80   ;;  %p4176_p10 = pmov %p4175_p5 }
  0xb2   : > { %p2762_p11 = scmp.ge.s32.totalorder %s3702_s28, 1 }
  0xb3   : > { %3619 = vsyncadd (%p4176_p10), %s473_s18, 4294967216  ;;  %v3120_v0 = vld [vmem:[%s3918_s21 + $0x4] ss:$16 sps:$4 sm:$0xff] (!%p2762_p11)   ;;  %v3122_v1 = vld [vmem:[%s3918_s21 + $0xc] ss:$16 sps:$4 sm:$0xff] (!%p2762_p11)   ;;  %s2998_s2 = sshll.u32 (!%p2762_p11), %s3702_s28, 5 }
  0xb4   : > { %602 = sbr.rel (%p2762_p11) target bundleno = 463 (0x1cf), region = 72  ;;  %1013 = vmatprep.subr.bf16.mxu0 (!%p2762_p11), %v3120_v0  ;;  %v3124_v2 = vld [vmem:[%s3918_s21] ss:$16 sps:$4 sm:$0xff] (!%p2762_p11)   ;;  %v3125_v3 = vld [vmem:[%s3918_s21 + $0x8] ss:$16 sps:$4 sm:$0xff] (!%p2762_p11)   ;;  %1054 = vmatprep.subr.bf16.mxu1 (!%p2762_p11), %v3122_v1  ;;  %s1109_s17 = scalar_lea.vmem (!%p2762_p11), [#allocation2], %s2998_s2 }
  0xb5   : > { %v3126_v4 = vld [vmem:[%s3918_s21 + $0x24] ss:$16 sps:$4 sm:$0xff] (!%p2762_p11)   ;;  %1014 = vmatpush1.bf16.msra.mxu0 (!%p2762_p11), %v3124_v2  ;;  %1055 = vmatpush1.bf16.msra.mxu1 (!%p2762_p11), %v3125_v3  ;;  %v3128_v5 = vld [vmem:[%s3918_s21 + $0x2c] ss:$16 sps:$4 sm:$0xff] (!%p2762_p11)   ;;  %v3130_v6 = vld [vmem:[%s3918_s21 + $0x20] ss:$16 sps:$4 sm:$0xff] (!%p2762_p11)  }
  0xb6   : > { %1015 = vmatprep.subr.bf16.mxu0 (!%p2762_p11), %v3126_v4  ;;  %v3131_v7 = vld [vmem:[%s3918_s21 + $0x28] ss:$16 sps:$4 sm:$0xff] (!%p2762_p11)   ;;  %1056 = vmatprep.subr.bf16.mxu1 (!%p2762_p11), %v3128_v5  ;;  %v3132_v8 = vld [vmem:[%s3918_s21 + $0x44] ss:$16 sps:$4 sm:$0xff] (!%p2762_p11)   ;;  %v3134_v9 = vld [vmem:[%s3918_s21 + $0x4c] ss:$16 sps:$4 sm:$0xff] (!%p2762_p11)   ;;  %v673_v4 = vlaneseq (!%p2762_p11) }
  0xb7   : > { %v3136_v10 = vld [vmem:[%s3918_s21 + $0x40] ss:$16 sps:$4 sm:$0xff] (!%p2762_p11)   ;;  %v3137_v11 = vld [vmem:[%s3918_s21 + $0x48] ss:$16 sps:$4 sm:$0xff] (!%p2762_p11)   ;;  %v3138_v12 = vld [vmem:[%s3918_s21 + $0x64] ss:$16 sps:$4 sm:$0xff] (!%p2762_p11)  }
  0xb8   : > { %v3140_v13 = vld [vmem:[%s3918_s21 + $0x6c] ss:$16 sps:$4 sm:$0xff] (!%p2762_p11)   ;;  %v3142_v14 = vld [vmem:[%s3918_s21 + $0x60] ss:$16 sps:$4 sm:$0xff] (!%p2762_p11)   ;;  %v3143_v15 = vld [vmem:[%s3918_s21 + $0x68] ss:$16 sps:$4 sm:$0xff] (!%p2762_p11)  }
  0xb9   : > { %1016 = vmatpush1.bf16.msra.mxu0 (!%p2762_p11), %v3130_v6  ;;  %1057 = vmatpush1.bf16.msra.mxu1 (!%p2762_p11), %v3131_v7  ;;  %v3144_v16 = vld [vmem:[%s3918_s21 + $0x84] ss:$16 sps:$4 sm:$0xff] (!%p2762_p11)   ;;  %v3146_v17 = vld [vmem:[%s3918_s21 + $0x8c] ss:$16 sps:$4 sm:$0xff] (!%p2762_p11)   ;;  %v3148_v18 = vld [vmem:[%s3918_s21 + $0x80] ss:$16 sps:$4 sm:$0xff] (!%p2762_p11)  }
  0xba   : > { %1017 = vmatprep.subr.bf16.mxu0 (!%p2762_p11), %v3132_v8  ;;  %1058 = vmatprep.subr.bf16.mxu1 (!%p2762_p11), %v3134_v9  ;;  %v3149_v19 = vld [vmem:[%s3918_s21 + $0x88] ss:$16 sps:$4 sm:$0xff] (!%p2762_p11)   ;;  %v3150_v20 = vld [vmem:[%s3918_s21 + $0xa4] ss:$16 sps:$4 sm:$0xff] (!%p2762_p11)   ;;  %v3152_v21 = vld [vmem:[%s3918_s21 + $0xac] ss:$16 sps:$4 sm:$0xff] (!%p2762_p11)  }
  0xbb   : > { %v3154_v22 = vld [vmem:[%s3918_s21 + $0xa0] ss:$16 sps:$4 sm:$0xff]   ;;  %v3155_v23 = vld [vmem:[%s3918_s21 + $0xa8] ss:$16 sps:$4 sm:$0xff]   ;;  %v3156_v24 = vld [vmem:[%s3918_s21 + $0xc4] ss:$16 sps:$4 sm:$0xff]  }
  0xbc   : > { %v3158_v25 = vld [vmem:[%s3918_s21 + $0xcc] ss:$16 sps:$4 sm:$0xff]   ;;  %v3160_v26 = vld [vmem:[%s3918_s21 + $0xc0] ss:$16 sps:$4 sm:$0xff]   ;;  %v3161_v27 = vld [vmem:[%s3918_s21 + $0xc8] ss:$16 sps:$4 sm:$0xff]  }
  0xbd   : > { %1018 = vmatpush1.bf16.msra.mxu0 %v3136_v10  ;;  %1059 = vmatpush1.bf16.msra.mxu1 %v3137_v11  ;;  %v3162_v28 = vld [vmem:[%s3918_s21 + $0xe4] ss:$16 sps:$4 sm:$0xff]   ;;  %v3164_v29 = vld [vmem:[%s3918_s21 + $0xec] ss:$16 sps:$4 sm:$0xff]   ;;  %v3166_v30 = vld [vmem:[%s3918_s21 + $0xe0] ss:$16 sps:$4 sm:$0xff]  }
  0xbe   : > { %1019 = vmatprep.subr.bf16.mxu0 %v3138_v12  ;;  %1060 = vmatprep.subr.bf16.mxu1 %v3140_v13  ;;  %v3167_v31 = vld [vmem:[%s3918_s21 + $0xe8] ss:$16 sps:$4 sm:$0xff]   ;;  %v3168_v32 = vld [vmem:[%s3918_s21 + $0x104] ss:$16 sps:$4 sm:$0xff]   ;;  %v3170_v33 = vld [vmem:[%s3918_s21 + $0x10c] ss:$16 sps:$4 sm:$0xff]  }
  0xbf   : > { %v3172_v34 = vld [vmem:[%s3918_s21 + $0x100] ss:$16 sps:$4 sm:$0xff]   ;;  %v3173_v35 = vld [vmem:[%s3918_s21 + $0x108] ss:$16 sps:$4 sm:$0xff]   ;;  %v3174_v36 = vld [vmem:[%s3918_s21 + $0x124] ss:$16 sps:$4 sm:$0xff]  }
  0xc0   : > { %v3176_v37 = vld [vmem:[%s3918_s21 + $0x12c] ss:$16 sps:$4 sm:$0xff]   ;;  %v3178_v38 = vld [vmem:[%s3918_s21 + $0x120] ss:$16 sps:$4 sm:$0xff]   ;;  %v3179_v39 = vld [vmem:[%s3918_s21 + $0x128] ss:$16 sps:$4 sm:$0xff]  }
  0xc1   : > { %1020 = vmatpush1.bf16.msra.mxu0 %v3142_v14  ;;  %1061 = vmatpush1.bf16.msra.mxu1 %v3143_v15  ;;  %v3180_v40 = vld [vmem:[%s3918_s21 + $0x144] ss:$16 sps:$4 sm:$0xff]   ;;  %v3182_v41 = vld [vmem:[%s3918_s21 + $0x14c] ss:$16 sps:$4 sm:$0xff]   ;;  %v3184_v42 = vld [vmem:[%s3918_s21 + $0x140] ss:$16 sps:$4 sm:$0xff]  }
  0xc2   : > { %1021 = vmatprep.subr.bf16.mxu0 %v3144_v16  ;;  %1062 = vmatprep.subr.bf16.mxu1 %v3146_v17  ;;  %v3185_v43 = vld [vmem:[%s3918_s21 + $0x148] ss:$16 sps:$4 sm:$0xff]   ;;  %v3186_v44 = vld [vmem:[%s3918_s21 + $0x164] ss:$16 sps:$4 sm:$0xff]   ;;  %v3188_v45 = vld [vmem:[%s3918_s21 + $0x16c] ss:$16 sps:$4 sm:$0xff]  }
  0xc3   : > { %v604_v46 = vld [vmem:[%s4134_s0 + $0x8] sm:$0xff]  ;;  %v3190_v48 = vld [vmem:[%s3918_s21 + $0x160] ss:$16 sps:$4 sm:$0xff]   ;;  %v3192_v50 = vld [vmem:[%s3918_s21 + $0x184] ss:$16 sps:$4 sm:$0xff]   ;;  %v674_v5 = vshrl.u32 %v673_v4, 7 }
  0xc4   : > { %v606_v47 = vpack.c.bf16 %v604_v46, %v604_v46  ;;  %v3191_v49 = vld [vmem:[%s3918_s21 + $0x168] ss:$16 sps:$4 sm:$0xff]   ;;  %v3194_v51 = vld [vmem:[%s3918_s21 + $0x18c] ss:$16 sps:$4 sm:$0xff]   ;;  %v3196_v52 = vld [vmem:[%s3918_s21 + $0x180] ss:$16 sps:$4 sm:$0xff]  }
  0xc5   : > { %1022 = vmatpush1.bf16.msra.mxu0 %v3148_v18  ;;  %1063 = vmatpush1.bf16.msra.mxu1 %v3149_v19  ;;  %v3197_v53 = vld [vmem:[%s3918_s21 + $0x188] ss:$16 sps:$4 sm:$0xff]   ;;  %v3198_v54 = vld [vmem:[%s3918_s21 + $0x1a4] ss:$16 sps:$4 sm:$0xff]   ;;  %v3200_v55 = vld [vmem:[%s3918_s21 + $0x1ac] ss:$16 sps:$4 sm:$0xff]  }
  0xc6   : > { %1023 = vmatprep.subr.bf16.mxu0 %v3150_v20  ;;  %1064 = vmatprep.subr.bf16.mxu1 %v3152_v21  ;;  %v3202_v56 = vld [vmem:[%s3918_s21 + $0x1a0] ss:$16 sps:$4 sm:$0xff]   ;;  %v3203_v57 = vld [vmem:[%s3918_s21 + $0x1a8] ss:$16 sps:$4 sm:$0xff]   ;;  %v3204_v58 = vld [vmem:[%s3918_s21 + $0x1c4] ss:$16 sps:$4 sm:$0xff]  }
  0xc7   : > { %1045 = vmatprep.mubr.bf16.mxu0 %v606_v47  ;;  %1086 = vmatprep.mubr.bf16.mxu1 %v606_v47  ;;  %v3206_v59 = vld [vmem:[%s3918_s21 + $0x1cc] ss:$16 sps:$4 sm:$0xff]   ;;  %v3208_v60 = vld [vmem:[%s3918_s21 + $0x1c0] ss:$16 sps:$4 sm:$0xff]   ;;  %v3209_v61 = vld [vmem:[%s3918_s21 + $0x1c8] ss:$16 sps:$4 sm:$0xff]  }
  0xc8   : > { %v3210_v62 = vld [vmem:[%s3918_s21 + $0x1e4] ss:$16 sps:$4 sm:$0xff]   ;;  %v3212_v63 = vld [vmem:[%s3918_s21 + $0x1ec] ss:$16 sps:$4 sm:$0xff]   ;;  %v3214_v0 = vld [vmem:[%s3918_s21 + $0x1e0] ss:$16 sps:$4 sm:$0xff]  }
  0xc9   : > { %1024 = vmatpush1.bf16.msra.mxu0 %v3154_v22  ;;  %1065 = vmatpush1.bf16.msra.mxu1 %v3155_v23  ;;  %v3215_v1 = vld [vmem:[%s3918_s21 + $0x1e8] ss:$16 sps:$4 sm:$0xff]   ;;  %v603_v2 = vld [vmem:[%s4134_s0] sm:$0xff]  ;;  %v675_v6 = vsub.s32 0, %v674_v5  ;;  %v683_v7 = vsub.s32 2, %v674_v5  ;;  %v679_v9 = vsub.s32 1, %v674_v5 }
  0xca   : > { %1025 = vmatprep.subr.bf16.mxu0 %v3156_v24  ;;  %1066 = vmatprep.subr.bf16.mxu1 %v3158_v25  ;;  %v605_v3 = vpack.c.bf16 %v603_v2, %v603_v2  ;;  %v671_v8 = vld [vmem:[%s3925_s27] sm:$0xf]  ;;  %v687_v10 = vsub.s32 3, %v674_v5 }
  0xcb   : > { %v676_v11 = vrot.slane %v671_v8, %v675_v6  ;;  %v684_v12 = vrot.slane %v671_v8, %v683_v7  ;;  %v680_v13 = vrot.slane %v671_v8, %v679_v9 }
  0xcc   : > { %v688_v14 = vrot.slane %v671_v8, %v687_v10 }
  0xcd   : > { %1026 = vmatpush1.bf16.msra.mxu0 %v3160_v26  ;;  %1067 = vmatpush1.bf16.msra.mxu1 %v3161_v27 }
  0xce   : > { %1027 = vmatprep.subr.bf16.mxu0 %v3162_v28  ;;  %1068 = vmatprep.subr.bf16.mxu1 %v3164_v29 }
  0xd1   : > { %1028 = vmatpush1.bf16.msra.mxu0 %v3166_v30  ;;  %1069 = vmatpush1.bf16.msra.mxu1 %v3167_v31 }
  0xd2   : > { %1029 = vmatprep.subr.bf16.mxu0 %v3168_v32  ;;  %1070 = vmatprep.subr.bf16.mxu1 %v3170_v33 }
  0xd5   : > { %1030 = vmatpush1.bf16.msra.mxu0 %v3172_v34  ;;  %1071 = vmatpush1.bf16.msra.mxu1 %v3173_v35 }
  0xd6   : > { %1031 = vmatprep.subr.bf16.mxu0 %v3174_v36  ;;  %1072 = vmatprep.subr.bf16.mxu1 %v3176_v37 }
  0xd9   : > { %1032 = vmatpush1.bf16.msra.mxu0 %v3178_v38  ;;  %1073 = vmatpush1.bf16.msra.mxu1 %v3179_v39 }
  0xda   : > { %1033 = vmatprep.subr.bf16.mxu0 %v3180_v40  ;;  %1074 = vmatprep.subr.bf16.mxu1 %v3182_v41 }
  0xdd   : > { %1034 = vmatpush1.bf16.msra.mxu0 %v3184_v42  ;;  %1075 = vmatpush1.bf16.msra.mxu1 %v3185_v43 }
  0xde   : > { %1035 = vmatprep.subr.bf16.mxu0 %v3186_v44  ;;  %1076 = vmatprep.subr.bf16.mxu1 %v3188_v45 }
  0xe1   : > { %1036 = vmatpush1.bf16.msra.mxu0 %v3190_v48  ;;  %1077 = vmatpush1.bf16.msra.mxu1 %v3191_v49 }
  0xe2   : > { %1037 = vmatprep.subr.bf16.mxu0 %v3192_v50  ;;  %1078 = vmatprep.subr.bf16.mxu1 %v3194_v51 }
  0xe5   : > { %1038 = vmatpush1.bf16.msra.mxu0 %v3196_v52  ;;  %1079 = vmatpush1.bf16.msra.mxu1 %v3197_v53 }
  0xe6   : > { %1039 = vmatprep.subr.bf16.mxu0 %v3198_v54  ;;  %1080 = vmatprep.subr.bf16.mxu1 %v3200_v55 }
  0xe9   : > { %1040 = vmatpush1.bf16.msra.mxu0 %v3202_v56  ;;  %1081 = vmatpush1.bf16.msra.mxu1 %v3203_v57 }
  0xea   : > { %1041 = vmatprep.subr.bf16.mxu0 %v3204_v58  ;;  %1082 = vmatprep.subr.bf16.mxu1 %v3206_v59 }
  0xed   : > { %1042 = vmatpush1.bf16.msra.mxu0 %v3208_v60  ;;  %1083 = vmatpush1.bf16.msra.mxu1 %v3209_v61 }
  0xee   : > { %1043 = vmatprep.subr.bf16.mxu0 %v3210_v62  ;;  %1084 = vmatprep.subr.bf16.mxu1 %v3212_v63 }
  0xf1   : > { %1044 = vmatpush1.bf16.msra.mxu0 %v3214_v0  ;;  %1085 = vmatpush1.bf16.msra.mxu1 %v3215_v1 }
  0xf4   : > { %1046 = vmatmul.mubr.bf16.vlgmr.msra.gmra.mrb[0].mxu0 %v605_v3  ;;  %1087 = vmatmul.mubr.bf16.vlgmr.msra.gmra.mrb[0].mxu1 %v605_v3 }
 0x1c7   : > { %v1047_v15 = vpop.f32.mrb[0].mxu0  ;;  %v1088_v16 = vpop.f32.mrb[0].mxu1 }
 0x1c8   : > { %v1048_v17 = vadd.f32 %v1047_v15, %v676_v11  ;;  %v1089_v18 = vadd.f32 %v1088_v16, %v684_v12  ;;  %v1049_v19 = vpop.f32.mrb[1].mxu0  ;;  %v1090_v20 = vpop.f32.mrb[1].mxu1 }
 0x1c9   : > { %v1050_v21 = vadd.f32 %v1049_v19, %v680_v13  ;;  %v1091_v22 = vadd.f32 %v1090_v20, %v688_v14  ;;  %v1051_v23 = vpop.f32.mrb[2].mxu0  ;;  %v1092_v24 = vpop.f32.mrb[2].mxu1 }
 0x1ca   : > { %vm1095_vm0 = vcmp.ge.f32.partialorder %v1048_v17, 0.0  ;;  %v1099_v25 = vmul.f32 0.01, %v1048_v17  ;;  %vm1097_vm1 = vcmp.ge.f32.partialorder %v1089_v18, 0.0  ;;  %v1101_v26 = vmul.f32 0.01, %v1089_v18 }
 0x1cb   : > { %vm1096_vm2 = vcmp.ge.f32.partialorder %v1050_v21, 0.0  ;;  %v1100_v27 = vmul.f32 0.01, %v1050_v21  ;;  %vm1098_vm3 = vcmp.ge.f32.partialorder %v1091_v22, 0.0  ;;  %v1102_v28 = vmul.f32 0.01, %v1091_v22 }
 0x1cc   : > { %v1103_v29 = vsel %vm1095_vm0, %v1048_v17, %v1099_v25  ;;  %v1105_v30 = vsel %vm1097_vm1, %v1089_v18, %v1101_v26  ;;  %v1052_v31 = vpop.f32.mrb[3].mxu0  ;;  %v1093_v32 = vpop.f32.mrb[3].mxu1 }
 0x1cd   : > { %1110 = vst [vmem:[%s1109_s17] sm:$0xff] %v1103_v29  ;;  %1112 = vst [vmem:[%s1109_s17 + $0x10] sm:$0xff] %v1105_v30  ;;  %v1104_v33 = vsel %vm1096_vm2, %v1050_v21, %v1100_v27  ;;  %v1106_v34 = vsel %vm1098_vm3, %v1091_v22, %v1102_v28 }
 0x1ce   : > { %1111 = vst [vmem:[%s1109_s17 + $0x8] sm:$0xff] %v1104_v33  ;;  %1113 = vst [vmem:[%s1109_s17 + $0x18] sm:$0xff] %v1106_v34 }
 0x1cf PF: > { %p1115_p1 = scmp.lt.s32.totalorder %s3702_s28, 2 }
 0x1d1   : > { %p1116_p3 = pnand %p2762_p11, %p1115_p1 }
 0x1d2   : > { %v3216_v35 = vld [vmem:[#allocation8 + $0x4] ss:$16 sps:$4 sm:$0xff] (!%p1116_p3)   ;;  %v3218_v36 = vld [vmem:[#allocation8 + $0xc] ss:$16 sps:$4 sm:$0xff] (!%p1116_p3)   ;;  %v3220_v37 = vld [vmem:[#allocation8] ss:$16 sps:$4 sm:$0xff] (!%p1116_p3)  }
 0x1d3   : > { %1119 = sbr.rel (%p1116_p3) target bundleno = 814 (0x32e), region = 76  ;;  %1918 = vmatprep.subr.bf16.mxu0 (!%p1116_p3), %v3216_v35  ;;  %v3221_v38 = vld [vmem:[#allocation8 + $0x8] ss:$16 sps:$4 sm:$0xff] (!%p1116_p3)   ;;  %2000 = vmatprep.subr.bf16.mxu1 (!%p1116_p3), %v3218_v36  ;;  %v3222_v39 = vld [vmem:[#allocation8 + $0x24] ss:$16 sps:$4 sm:$0xff] (!%p1116_p3)   ;;  %s2957_s8 = sadd.s32 (!%p1116_p3), 4294967295, %s3702_s28 }
 0x1d4   : > { %1919 = vmatpush1.bf16.msra.mxu0 (!%p1116_p3), %v3220_v37  ;;  %2001 = vmatpush1.bf16.msra.mxu1 (!%p1116_p3), %v3221_v38  ;;  %v3224_v40 = vld [vmem:[#allocation8 + $0x2c] ss:$16 sps:$4 sm:$0xff] (!%p1116_p3)   ;;  %v3226_v41 = vld [vmem:[#allocation8 + $0x20] ss:$16 sps:$4 sm:$0xff] (!%p1116_p3)   ;;  %v3227_v42 = vld [vmem:[#allocation8 + $0x28] ss:$16 sps:$4 sm:$0xff] (!%p1116_p3)  }
 0x1d5   : > { %1920 = vmatprep.subr.bf16.mxu0 (!%p1116_p3), %v3222_v39  ;;  %2002 = vmatprep.subr.bf16.mxu1 (!%p1116_p3), %v3224_v40  ;;  %v3228_v43 = vld [vmem:[#allocation8 + $0x44] ss:$16 sps:$4 sm:$0xff] (!%p1116_p3)   ;;  %v3230_v44 = vld [vmem:[#allocation8 + $0x4c] ss:$16 sps:$4 sm:$0xff] (!%p1116_p3)   ;;  %v3232_v45 = vld [vmem:[#allocation8 + $0x40] ss:$16 sps:$4 sm:$0xff] (!%p1116_p3)  }
 0x1d6   : > { %v3233_v46 = vld [vmem:[#allocation8 + $0x48] ss:$16 sps:$4 sm:$0xff] (!%p1116_p3)   ;;  %v3234_v47 = vld [vmem:[#allocation8 + $0x64] ss:$16 sps:$4 sm:$0xff] (!%p1116_p3)   ;;  %v3236_v48 = vld [vmem:[#allocation8 + $0x6c] ss:$16 sps:$4 sm:$0xff] (!%p1116_p3)  }
 0x1d7   : > { %v3238_v49 = vld [vmem:[#allocation8 + $0x60] ss:$16 sps:$4 sm:$0xff] (!%p1116_p3)   ;;  %v3239_v50 = vld [vmem:[#allocation8 + $0x68] ss:$16 sps:$4 sm:$0xff] (!%p1116_p3)   ;;  %v3240_v51 = vld [vmem:[#allocation8 + $0x84] ss:$16 sps:$4 sm:$0xff] (!%p1116_p3)  }
 0x1d8   : > { %1921 = vmatpush1.bf16.msra.mxu0 (!%p1116_p3), %v3226_v41  ;;  %2003 = vmatpush1.bf16.msra.mxu1 (!%p1116_p3), %v3227_v42  ;;  %v3242_v52 = vld [vmem:[#allocation8 + $0x8c] ss:$16 sps:$4 sm:$0xff] (!%p1116_p3)   ;;  %v3244_v53 = vld [vmem:[#allocation8 + $0x80] ss:$16 sps:$4 sm:$0xff] (!%p1116_p3)   ;;  %v3245_v54 = vld [vmem:[#allocation8 + $0x88] ss:$16 sps:$4 sm:$0xff] (!%p1116_p3)  }
 0x1d9   : > { %1922 = vmatprep.subr.bf16.mxu0 (!%p1116_p3), %v3228_v43  ;;  %2004 = vmatprep.subr.bf16.mxu1 (!%p1116_p3), %v3230_v44  ;;  %v3246_v55 = vld [vmem:[#allocation8 + $0xa4] ss:$16 sps:$4 sm:$0xff] (!%p1116_p3)   ;;  %v3248_v56 = vld [vmem:[#allocation8 + $0xac] ss:$16 sps:$4 sm:$0xff] (!%p1116_p3)   ;;  %v3250_v57 = vld [vmem:[#allocation8 + $0xa0] ss:$16 sps:$4 sm:$0xff] (!%p1116_p3)  }
 0x1da   : > { %v3251_v58 = vld [vmem:[#allocation8 + $0xa8] ss:$16 sps:$4 sm:$0xff]   ;;  %v3252_v59 = vld [vmem:[#allocation8 + $0xc4] ss:$16 sps:$4 sm:$0xff]   ;;  %v3254_v60 = vld [vmem:[#allocation8 + $0xcc] ss:$16 sps:$4 sm:$0xff]  }
 0x1db   : > { %v3256_v61 = vld [vmem:[#allocation8 + $0xc0] ss:$16 sps:$4 sm:$0xff]   ;;  %v3257_v62 = vld [vmem:[#allocation8 + $0xc8] ss:$16 sps:$4 sm:$0xff]   ;;  %v3258_v63 = vld [vmem:[#allocation8 + $0xe4] ss:$16 sps:$4 sm:$0xff]  }
 0x1dc   : > { %1923 = vmatpush1.bf16.msra.mxu0 %v3232_v45  ;;  %2005 = vmatpush1.bf16.msra.mxu1 %v3233_v46  ;;  %v3260_v0 = vld [vmem:[#allocation8 + $0xec] ss:$16 sps:$4 sm:$0xff]   ;;  %v3262_v1 = vld [vmem:[#allocation8 + $0xe0] ss:$16 sps:$4 sm:$0xff]   ;;  %v3263_v2 = vld [vmem:[#allocation8 + $0xe8] ss:$16 sps:$4 sm:$0xff]  }
 0x1dd   : > { %1924 = vmatprep.subr.bf16.mxu0 %v3234_v47  ;;  %2006 = vmatprep.subr.bf16.mxu1 %v3236_v48  ;;  %v3264_v3 = vld [vmem:[#allocation8 + $0x104] ss:$16 sps:$4 sm:$0xff]   ;;  %v3266_v4 = vld [vmem:[#allocation8 + $0x10c] ss:$16 sps:$4 sm:$0xff]   ;;  %v3268_v5 = vld [vmem:[#allocation8 + $0x100] ss:$16 sps:$4 sm:$0xff]  }
 0x1de   : > { %v3269_v6 = vld [vmem:[#allocation8 + $0x108] ss:$16 sps:$4 sm:$0xff]   ;;  %v3270_v7 = vld [vmem:[#allocation8 + $0x124] ss:$16 sps:$4 sm:$0xff]   ;;  %v3272_v8 = vld [vmem:[#allocation8 + $0x12c] ss:$16 sps:$4 sm:$0xff]  }
 0x1df   : > { %v3274_v9 = vld [vmem:[#allocation8 + $0x120] ss:$16 sps:$4 sm:$0xff]   ;;  %v3275_v10 = vld [vmem:[#allocation8 + $0x128] ss:$16 sps:$4 sm:$0xff]   ;;  %v3276_v11 = vld [vmem:[#allocation8 + $0x144] ss:$16 sps:$4 sm:$0xff]  }
 0x1e0   : > { %1925 = vmatpush1.bf16.msra.mxu0 %v3238_v49  ;;  %2007 = vmatpush1.bf16.msra.mxu1 %v3239_v50  ;;  %v3278_v12 = vld [vmem:[#allocation8 + $0x14c] ss:$16 sps:$4 sm:$0xff]   ;;  %v3280_v13 = vld [vmem:[#allocation8 + $0x140] ss:$16 sps:$4 sm:$0xff]   ;;  %v3281_v14 = vld [vmem:[#allocation8 + $0x148] ss:$16 sps:$4 sm:$0xff]  }
 0x1e1   : > { %1926 = vmatprep.subr.bf16.mxu0 %v3240_v51  ;;  %2008 = vmatprep.subr.bf16.mxu1 %v3242_v52  ;;  %v3282_v15 = vld [vmem:[#allocation8 + $0x164] ss:$16 sps:$4 sm:$0xff]   ;;  %v3284_v16 = vld [vmem:[#allocation8 + $0x16c] ss:$16 sps:$4 sm:$0xff]   ;;  %v3286_v18 = vld [vmem:[#allocation8 + $0x160] ss:$16 sps:$4 sm:$0xff]  }
 0x1e2   : > { %v1121_v17 = vld [vmem:[#allocation2 + $0x8] sm:$0xff]  ;;  %v3287_v20 = vld [vmem:[#allocation8 + $0x168] ss:$16 sps:$4 sm:$0xff]   ;;  %v3290_v22 = vld [vmem:[#allocation8 + $0x18c] ss:$16 sps:$4 sm:$0xff]   ;;  %s2999_s19 = sshll.u32 %s2957_s8, 5 }
 0x1e3   : > { %v1125_v19 = vpack.c.bf16 %v1121_v17, %v1121_v17  ;;  %v3288_v21 = vld [vmem:[#allocation8 + $0x184] ss:$16 sps:$4 sm:$0xff]   ;;  %v3292_v23 = vld [vmem:[#allocation8 + $0x180] ss:$16 sps:$4 sm:$0xff]   ;;  %v3293_v24 = vld [vmem:[#allocation8 + $0x188] ss:$16 sps:$4 sm:$0xff]  }
 0x1e4   : > { %1927 = vmatpush1.bf16.msra.mxu0 %v3244_v53  ;;  %2009 = vmatpush1.bf16.msra.mxu1 %v3245_v54  ;;  %v3294_v25 = vld [vmem:[#allocation8 + $0x1a4] ss:$16 sps:$4 sm:$0xff]   ;;  %v3296_v26 = vld [vmem:[#allocation8 + $0x1ac] ss:$16 sps:$4 sm:$0xff]   ;;  %v3298_v27 = vld [vmem:[#allocation8 + $0x1a0] ss:$16 sps:$4 sm:$0xff]  }
 0x1e5   : > { %1928 = vmatprep.subr.bf16.mxu0 %v3246_v55  ;;  %2010 = vmatprep.subr.bf16.mxu1 %v3248_v56  ;;  %v3299_v28 = vld [vmem:[#allocation8 + $0x1a8] ss:$16 sps:$4 sm:$0xff]   ;;  %v3300_v29 = vld [vmem:[#allocation8 + $0x1c4] ss:$16 sps:$4 sm:$0xff]   ;;  %v3302_v30 = vld [vmem:[#allocation8 + $0x1cc] ss:$16 sps:$4 sm:$0xff]  }
 0x1e6   : > { %1950 = vmatprep.mubr.bf16.mxu0 %v1125_v19  ;;  %2032 = vmatprep.mubr.bf16.mxu1 %v1125_v19  ;;  %v3304_v31 = vld [vmem:[#allocation8 + $0x1c0] ss:$16 sps:$4 sm:$0xff]   ;;  %v3305_v32 = vld [vmem:[#allocation8 + $0x1c8] ss:$16 sps:$4 sm:$0xff]   ;;  %v3306_v33 = vld [vmem:[#allocation8 + $0x1e4] ss:$16 sps:$4 sm:$0xff]  }
 0x1e7   : > { %v3308_v34 = vld [vmem:[#allocation8 + $0x1ec] ss:$16 sps:$4 sm:$0xff]   ;;  %v3310_v35 = vld [vmem:[#allocation8 + $0x1e0] ss:$16 sps:$4 sm:$0xff]   ;;  %v3311_v36 = vld [vmem:[#allocation8 + $0x1e8] ss:$16 sps:$4 sm:$0xff]  }
 0x1e8   : > { %1929 = vmatpush1.bf16.msra.mxu0 %v3250_v57  ;;  %2011 = vmatpush1.bf16.msra.mxu1 %v3251_v58  ;;  %v1120_v37 = vld [vmem:[#allocation2] sm:$0xff]  ;;  %v3314_v38 = vld [vmem:[#allocation8 + $0x204] ss:$16 sps:$4 sm:$0xff]   ;;  %v3312_v41 = vld [vmem:[#allocation8 + $0x200] ss:$16 sps:$4 sm:$0xff]   ;;  %s2097_s13 = scalar_lea.vmem [#allocation3], %s2999_s19 }
 0x1e9   : > { %1930 = vmatprep.subr.bf16.mxu0 %v3252_v59  ;;  %2012 = vmatprep.subr.bf16.mxu1 %v3254_v60  ;;  %v3317_v39 = vld [vmem:[#allocation8 + $0x20c] ss:$16 sps:$4 sm:$0xff]   ;;  %v1124_v40 = vpack.c.bf16 %v1120_v37, %v1120_v37  ;;  %v3315_v42 = vld [vmem:[#allocation8 + $0x208] ss:$16 sps:$4 sm:$0xff]   ;;  %v3320_v43 = vld [vmem:[#allocation8 + $0x224] ss:$16 sps:$4 sm:$0xff]  }
 0x1ea   : > { %v3323_v44 = vld [vmem:[#allocation8 + $0x22c] ss:$16 sps:$4 sm:$0xff]   ;;  %v3318_v45 = vld [vmem:[#allocation8 + $0x220] ss:$16 sps:$4 sm:$0xff]   ;;  %v3321_v46 = vld [vmem:[#allocation8 + $0x228] ss:$16 sps:$4 sm:$0xff]  }
 0x1eb   : > { %v3326_v47 = vld [vmem:[#allocation8 + $0x244] ss:$16 sps:$4 sm:$0xff]   ;;  %v3329_v48 = vld [vmem:[#allocation8 + $0x24c] ss:$16 sps:$4 sm:$0xff]   ;;  %v3324_v49 = vld [vmem:[#allocation8 + $0x240] ss:$16 sps:$4 sm:$0xff]  }
 0x1ec   : > { %1931 = vmatpush1.bf16.msra.mxu0 %v3256_v61  ;;  %2013 = vmatpush1.bf16.msra.mxu1 %v3257_v62  ;;  %v3327_v50 = vld [vmem:[#allocation8 + $0x248] ss:$16 sps:$4 sm:$0xff]   ;;  %v3332_v51 = vld [vmem:[#allocation8 + $0x264] ss:$16 sps:$4 sm:$0xff]   ;;  %v3335_v52 = vld [vmem:[#allocation8 + $0x26c] ss:$16 sps:$4 sm:$0xff]  }
 0x1ed   : > { %1932 = vmatprep.subr.bf16.mxu0 %v3258_v63  ;;  %2014 = vmatprep.subr.bf16.mxu1 %v3260_v0  ;;  %v3330_v53 = vld [vmem:[#allocation8 + $0x260] ss:$16 sps:$4 sm:$0xff]   ;;  %v3333_v54 = vld [vmem:[#allocation8 + $0x268] ss:$16 sps:$4 sm:$0xff]   ;;  %v3338_v55 = vld [vmem:[#allocation8 + $0x284] ss:$16 sps:$4 sm:$0xff]  }
 0x1ee   : > { %v3341_v56 = vld [vmem:[#allocation8 + $0x28c] ss:$16 sps:$4 sm:$0xff]   ;;  %v3336_v57 = vld [vmem:[#allocation8 + $0x280] ss:$16 sps:$4 sm:$0xff]   ;;  %v3339_v58 = vld [vmem:[#allocation8 + $0x288] ss:$16 sps:$4 sm:$0xff]  }
 0x1ef   : > { %v3344_v59 = vld [vmem:[#allocation8 + $0x2a4] ss:$16 sps:$4 sm:$0xff]   ;;  %v3347_v60 = vld [vmem:[#allocation8 + $0x2ac] ss:$16 sps:$4 sm:$0xff]   ;;  %v3342_v61 = vld [vmem:[#allocation8 + $0x2a0] ss:$16 sps:$4 sm:$0xff]  }
 0x1f0   : > { %1933 = vmatpush1.bf16.msra.mxu0 %v3262_v1  ;;  %2015 = vmatpush1.bf16.msra.mxu1 %v3263_v2  ;;  %v3345_v62 = vld [vmem:[#allocation8 + $0x2a8] ss:$16 sps:$4 sm:$0xff]   ;;  %v3350_v63 = vld [vmem:[#allocation8 + $0x2c4] ss:$16 sps:$4 sm:$0xff]   ;;  %v3353_v0 = vld [vmem:[#allocation8 + $0x2cc] ss:$16 sps:$4 sm:$0xff]  }
 0x1f1   : > { %1934 = vmatprep.subr.bf16.mxu0 %v3264_v3  ;;  %2016 = vmatprep.subr.bf16.mxu1 %v3266_v4  ;;  %v1123_v1 = vld [vmem:[#allocation2 + $0x18] sm:$0xff]  ;;  %v3351_v4 = vld [vmem:[#allocation8 + $0x2c8] ss:$16 sps:$4 sm:$0xff]  }
 0x1f2   : > { %v1127_v2 = vpack.c.bf16 %v1123_v1, %v1123_v1  ;;  %v3348_v3 = vld [vmem:[#allocation8 + $0x2c0] ss:$16 sps:$4 sm:$0xff]   ;;  %v3374_v17 = vld [vmem:[#allocation8 + $0x344] ss:$16 sps:$4 sm:$0xff]  }
 0x1f3   : > { %v3372_v19 = vld [vmem:[#allocation8 + $0x340] ss:$16 sps:$4 sm:$0xff]   ;;  %v3404_v37 = vld [vmem:[#allocation8 + $0x3e4] ss:$16 sps:$4 sm:$0xff]  }
 0x1f4   : > { %1935 = vmatpush1.bf16.msra.mxu0 %v3268_v5  ;;  %2017 = vmatpush1.bf16.msra.mxu1 %v3269_v6  ;;  %v3356_v5 = vld [vmem:[#allocation8 + $0x2e4] ss:$16 sps:$4 sm:$0xff]   ;;  %v3359_v6 = vld [vmem:[#allocation8 + $0x2ec] ss:$16 sps:$4 sm:$0xff]  }
 0x1f5   : > { %1936 = vmatprep.subr.bf16.mxu0 %v3270_v7  ;;  %2018 = vmatprep.subr.bf16.mxu1 %v3272_v8  ;;  %v3354_v7 = vld [vmem:[#allocation8 + $0x2e0] ss:$16 sps:$4 sm:$0xff]   ;;  %v3357_v8 = vld [vmem:[#allocation8 + $0x2e8] ss:$16 sps:$4 sm:$0xff]  }
 0x1f8   : > { %1937 = vmatpush1.bf16.msra.mxu0 %v3274_v9  ;;  %2019 = vmatpush1.bf16.msra.mxu1 %v3275_v10  ;;  %v3362_v9 = vld [vmem:[#allocation8 + $0x304] ss:$16 sps:$4 sm:$0xff]   ;;  %v3365_v10 = vld [vmem:[#allocation8 + $0x30c] ss:$16 sps:$4 sm:$0xff]  }
 0x1f9   : > { %1938 = vmatprep.subr.bf16.mxu0 %v3276_v11  ;;  %2020 = vmatprep.subr.bf16.mxu1 %v3278_v12  ;;  %v3360_v11 = vld [vmem:[#allocation8 + $0x300] ss:$16 sps:$4 sm:$0xff]   ;;  %v3363_v12 = vld [vmem:[#allocation8 + $0x308] ss:$16 sps:$4 sm:$0xff]  }
 0x1fc   : > { %1939 = vmatpush1.bf16.msra.mxu0 %v3280_v13  ;;  %2021 = vmatpush1.bf16.msra.mxu1 %v3281_v14  ;;  %v3368_v13 = vld [vmem:[#allocation8 + $0x324] ss:$16 sps:$4 sm:$0xff]   ;;  %v3371_v14 = vld [vmem:[#allocation8 + $0x32c] ss:$16 sps:$4 sm:$0xff]  }
 0x1fd   : > { %1940 = vmatprep.subr.bf16.mxu0 %v3282_v15  ;;  %2022 = vmatprep.subr.bf16.mxu1 %v3284_v16  ;;  %v3366_v15 = vld [vmem:[#allocation8 + $0x320] ss:$16 sps:$4 sm:$0xff]   ;;  %v3369_v16 = vld [vmem:[#allocation8 + $0x328] ss:$16 sps:$4 sm:$0xff]  }
 0x200   : > { %1941 = vmatpush1.bf16.msra.mxu0 %v3286_v18  ;;  %2023 = vmatpush1.bf16.msra.mxu1 %v3287_v20  ;;  %v3377_v18 = vld [vmem:[#allocation8 + $0x34c] ss:$16 sps:$4 sm:$0xff]   ;;  %v3375_v20 = vld [vmem:[#allocation8 + $0x348] ss:$16 sps:$4 sm:$0xff]  }
 0x201   : > { %1942 = vmatprep.subr.bf16.mxu0 %v3288_v21  ;;  %2024 = vmatprep.subr.bf16.mxu1 %v3290_v22  ;;  %v3380_v21 = vld [vmem:[#allocation8 + $0x364] ss:$16 sps:$4 sm:$0xff]   ;;  %v3383_v22 = vld [vmem:[#allocation8 + $0x36c] ss:$16 sps:$4 sm:$0xff]  }
 0x204   : > { %1943 = vmatpush1.bf16.msra.mxu0 %v3292_v23  ;;  %2025 = vmatpush1.bf16.msra.mxu1 %v3293_v24  ;;  %v3378_v23 = vld [vmem:[#allocation8 + $0x360] ss:$16 sps:$4 sm:$0xff]   ;;  %v3381_v24 = vld [vmem:[#allocation8 + $0x368] ss:$16 sps:$4 sm:$0xff]  }
 0x205   : > { %1944 = vmatprep.subr.bf16.mxu0 %v3294_v25  ;;  %2026 = vmatprep.subr.bf16.mxu1 %v3296_v26  ;;  %v3386_v25 = vld [vmem:[#allocation8 + $0x384] ss:$16 sps:$4 sm:$0xff]   ;;  %v3389_v26 = vld [vmem:[#allocation8 + $0x38c] ss:$16 sps:$4 sm:$0xff]  }
 0x208   : > { %1945 = vmatpush1.bf16.msra.mxu0 %v3298_v27  ;;  %2027 = vmatpush1.bf16.msra.mxu1 %v3299_v28  ;;  %v3384_v27 = vld [vmem:[#allocation8 + $0x380] ss:$16 sps:$4 sm:$0xff]   ;;  %v3387_v28 = vld [vmem:[#allocation8 + $0x388] ss:$16 sps:$4 sm:$0xff]  }
 0x209   : > { %1946 = vmatprep.subr.bf16.mxu0 %v3300_v29  ;;  %2028 = vmatprep.subr.bf16.mxu1 %v3302_v30  ;;  %v3392_v29 = vld [vmem:[#allocation8 + $0x3a4] ss:$16 sps:$4 sm:$0xff]   ;;  %v3395_v30 = vld [vmem:[#allocation8 + $0x3ac] ss:$16 sps:$4 sm:$0xff]  }
 0x20c   : > { %1947 = vmatpush1.bf16.msra.mxu0 %v3304_v31  ;;  %2029 = vmatpush1.bf16.msra.mxu1 %v3305_v32  ;;  %v3390_v31 = vld [vmem:[#allocation8 + $0x3a0] ss:$16 sps:$4 sm:$0xff]   ;;  %v3393_v32 = vld [vmem:[#allocation8 + $0x3a8] ss:$16 sps:$4 sm:$0xff]  }
 0x20d   : > { %1948 = vmatprep.subr.bf16.mxu0 %v3306_v33  ;;  %2030 = vmatprep.subr.bf16.mxu1 %v3308_v34  ;;  %v3398_v33 = vld [vmem:[#allocation8 + $0x3c4] ss:$16 sps:$4 sm:$0xff]   ;;  %v3401_v34 = vld [vmem:[#allocation8 + $0x3cc] ss:$16 sps:$4 sm:$0xff]  }
 0x210   : > { %1949 = vmatpush1.bf16.msra.mxu0 %v3310_v35  ;;  %2031 = vmatpush1.bf16.msra.mxu1 %v3311_v36  ;;  %v3396_v35 = vld [vmem:[#allocation8 + $0x3c0] ss:$16 sps:$4 sm:$0xff]   ;;  %v3399_v36 = vld [vmem:[#allocation8 + $0x3c8] ss:$16 sps:$4 sm:$0xff]  }
 0x211   : > { %1959 = vmatprep.subr.bf16.mxu0 %v3314_v38  ;;  %2041 = vmatprep.subr.bf16.mxu1 %v3317_v39  ;;  %v3407_v38 = vld [vmem:[#allocation8 + $0x3ec] ss:$16 sps:$4 sm:$0xff]   ;;  %v3402_v39 = vld [vmem:[#allocation8 + $0x3e0] ss:$16 sps:$4 sm:$0xff]  }
 0x213   : > { %1951 = vmatmul.mubr.bf16.vlgmr.msra.gmra.mrb[0].mxu0 %v1124_v40  ;;  %2033 = vmatmul.mubr.bf16.vlgmr.msra.gmra.mrb[0].mxu1 %v1124_v40  ;;  %v3405_v40 = vld [vmem:[#allocation8 + $0x3e8] ss:$16 sps:$4 sm:$0xff]  }
 0x214   : > { %1960 = vmatpush1.bf16.msra.mxu0 %v3312_v41  ;;  %2042 = vmatpush1.bf16.msra.mxu1 %v3315_v42  ;;  %v1122_v41 = vld [vmem:[#allocation2 + $0x10] sm:$0xff] }
 0x215   : > { %1961 = vmatprep.subr.bf16.mxu0 %v3320_v43  ;;  %2043 = vmatprep.subr.bf16.mxu1 %v3323_v44  ;;  %v1126_v42 = vpack.c.bf16 %v1122_v41, %v1122_v41  ;;  %v1258_v43 = vlaneseq }
 0x216   : > { %1991 = vmatprep.mubr.bf16.mxu0 %v1127_v2  ;;  %2073 = vmatprep.mubr.bf16.mxu1 %v1127_v2 }
 0x217   : > { %v1259_v44 = vshrl.u32 %v1258_v43, 7 }
 0x218   : > { %1962 = vmatpush1.bf16.msra.mxu0 %v3318_v45  ;;  %2044 = vmatpush1.bf16.msra.mxu1 %v3321_v46 }
 0x219   : > { %1963 = vmatprep.subr.bf16.mxu0 %v3326_v47  ;;  %2045 = vmatprep.subr.bf16.mxu1 %v3329_v48  ;;  %v1260_v45 = vsub.s32 0, %v1259_v44  ;;  %v1268_v46 = vsub.s32 2, %v1259_v44  ;;  %v1256_v47 = vld [vmem:[#allocation9] sm:$0xf]  ;;  %v1264_v48 = vsub.s32 1, %v1259_v44 }
 0x21c   : > { %1964 = vmatpush1.bf16.msra.mxu0 %v3324_v49  ;;  %2046 = vmatpush1.bf16.msra.mxu1 %v3327_v50  ;;  %v1272_v49 = vsub.s32 3, %v1259_v44  ;;  %v1261_v50 = vrot.slane %v1256_v47, %v1260_v45 }
 0x21d   : > { %1965 = vmatprep.subr.bf16.mxu0 %v3332_v51  ;;  %2047 = vmatprep.subr.bf16.mxu1 %v3335_v52  ;;  %v1269_v51 = vrot.slane %v1256_v47, %v1268_v46  ;;  %v1265_v52 = vrot.slane %v1256_v47, %v1264_v48 }
 0x220   : > { %1966 = vmatpush1.bf16.msra.mxu0 %v3330_v53  ;;  %2048 = vmatpush1.bf16.msra.mxu1 %v3333_v54  ;;  %v1273_v53 = vrot.slane %v1256_v47, %v1272_v49 }
 0x221   : > { %1967 = vmatprep.subr.bf16.mxu0 %v3338_v55  ;;  %2049 = vmatprep.subr.bf16.mxu1 %v3341_v56 }
 0x224   : > { %1968 = vmatpush1.bf16.msra.mxu0 %v3336_v57  ;;  %2050 = vmatpush1.bf16.msra.mxu1 %v3339_v58 }
 0x225   : > { %1969 = vmatprep.subr.bf16.mxu0 %v3344_v59  ;;  %2051 = vmatprep.subr.bf16.mxu1 %v3347_v60 }
 0x228   : > { %1970 = vmatpush1.bf16.msra.mxu0 %v3342_v61  ;;  %2052 = vmatpush1.bf16.msra.mxu1 %v3345_v62 }
 0x229   : > { %1971 = vmatprep.subr.bf16.mxu0 %v3350_v63  ;;  %2053 = vmatprep.subr.bf16.mxu1 %v3353_v0 }
 0x22c   : > { %1972 = vmatpush1.bf16.msra.mxu0 %v3348_v3  ;;  %2054 = vmatpush1.bf16.msra.mxu1 %v3351_v4 }
 0x22d   : > { %1973 = vmatprep.subr.bf16.mxu0 %v3356_v5  ;;  %2055 = vmatprep.subr.bf16.mxu1 %v3359_v6 }
 0x230   : > { %1974 = vmatpush1.bf16.msra.mxu0 %v3354_v7  ;;  %2056 = vmatpush1.bf16.msra.mxu1 %v3357_v8 }
 0x231   : > { %1975 = vmatprep.subr.bf16.mxu0 %v3362_v9  ;;  %2057 = vmatprep.subr.bf16.mxu1 %v3365_v10 }
 0x234   : > { %1976 = vmatpush1.bf16.msra.mxu0 %v3360_v11  ;;  %2058 = vmatpush1.bf16.msra.mxu1 %v3363_v12 }
 0x235   : > { %1977 = vmatprep.subr.bf16.mxu0 %v3368_v13  ;;  %2059 = vmatprep.subr.bf16.mxu1 %v3371_v14 }
 0x238   : > { %1978 = vmatpush1.bf16.msra.mxu0 %v3366_v15  ;;  %2060 = vmatpush1.bf16.msra.mxu1 %v3369_v16 }
 0x239   : > { %1979 = vmatprep.subr.bf16.mxu0 %v3374_v17  ;;  %2061 = vmatprep.subr.bf16.mxu1 %v3377_v18 }
 0x23c   : > { %1980 = vmatpush1.bf16.msra.mxu0 %v3372_v19  ;;  %2062 = vmatpush1.bf16.msra.mxu1 %v3375_v20 }
 0x23d   : > { %1981 = vmatprep.subr.bf16.mxu0 %v3380_v21  ;;  %2063 = vmatprep.subr.bf16.mxu1 %v3383_v22 }
 0x240   : > { %1982 = vmatpush1.bf16.msra.mxu0 %v3378_v23  ;;  %2064 = vmatpush1.bf16.msra.mxu1 %v3381_v24 }
 0x241   : > { %1983 = vmatprep.subr.bf16.mxu0 %v3386_v25  ;;  %2065 = vmatprep.subr.bf16.mxu1 %v3389_v26 }
 0x244   : > { %1984 = vmatpush1.bf16.msra.mxu0 %v3384_v27  ;;  %2066 = vmatpush1.bf16.msra.mxu1 %v3387_v28 }
 0x245   : > { %1985 = vmatprep.subr.bf16.mxu0 %v3392_v29  ;;  %2067 = vmatprep.subr.bf16.mxu1 %v3395_v30 }
 0x248   : > { %1986 = vmatpush1.bf16.msra.mxu0 %v3390_v31  ;;  %2068 = vmatpush1.bf16.msra.mxu1 %v3393_v32 }
 0x249   : > { %1987 = vmatprep.subr.bf16.mxu0 %v3398_v33  ;;  %2069 = vmatprep.subr.bf16.mxu1 %v3401_v34 }
 0x24c   : > { %1988 = vmatpush1.bf16.msra.mxu0 %v3396_v35  ;;  %2070 = vmatpush1.bf16.msra.mxu1 %v3399_v36 }
 0x24d   : > { %1989 = vmatprep.subr.bf16.mxu0 %v3404_v37  ;;  %2071 = vmatprep.subr.bf16.mxu1 %v3407_v38 }
 0x250   : > { %1990 = vmatpush1.bf16.msra.mxu0 %v3402_v39  ;;  %2072 = vmatpush1.bf16.msra.mxu1 %v3405_v40 }
 0x253   : > { %1992 = vmatmul.mubr.bf16.vlgmr.msra.gmra.mrb[0].mxu0 %v1126_v42  ;;  %2074 = vmatmul.mubr.bf16.vlgmr.msra.gmra.mrb[0].mxu1 %v1126_v42 }
 0x326   : > { %v1993_v54 = vpop.f32.mrb[0].mxu0  ;;  %v2075_v55 = vpop.f32.mrb[0].mxu1 }
 0x327   : > { %v3044_v56 = vadd.f32 %v1993_v54, %v1261_v50  ;;  %v3046_v57 = vadd.f32 %v2075_v55, %v1269_v51  ;;  %v1995_v58 = vpop.f32.mrb[1].mxu0  ;;  %v2077_v59 = vpop.f32.mrb[1].mxu1 }
 0x328   : > { %v3045_v60 = vadd.f32 %v1995_v58, %v1265_v52  ;;  %v3047_v61 = vadd.f32 %v2077_v59, %v1273_v53  ;;  %v1997_v62 = vpop.f32.mrb[2].mxu0  ;;  %v2079_v63 = vpop.f32.mrb[2].mxu1 }
 0x329   : > { %vm2082_vm4 = vcmp.ge.f32.partialorder %v3044_v56, 0.0  ;;  %v2086_v0 = vmul.f32 0.01, %v3044_v56  ;;  %vm2084_vm5 = vcmp.ge.f32.partialorder %v3046_v57, 0.0  ;;  %v2088_v1 = vmul.f32 0.01, %v3046_v57 }
 0x32a   : > { %vm2083_vm6 = vcmp.ge.f32.partialorder %v3045_v60, 0.0  ;;  %v2087_v2 = vmul.f32 0.01, %v3045_v60  ;;  %vm2085_vm7 = vcmp.ge.f32.partialorder %v3047_v61, 0.0  ;;  %v2089_v3 = vmul.f32 0.01, %v3047_v61 }
 0x32b   : > { %v2090_v4 = vsel %vm2082_vm4, %v3044_v56, %v2086_v0  ;;  %v2092_v5 = vsel %vm2084_vm5, %v3046_v57, %v2088_v1  ;;  %v1998_v6 = vpop.f32.mrb[3].mxu0  ;;  %v2080_v7 = vpop.f32.mrb[3].mxu1 }
 0x32c   : > { %2098 = vst [vmem:[%s2097_s13] sm:$0xff] %v2090_v4  ;;  %2100 = vst [vmem:[%s2097_s13 + $0x10] sm:$0xff] %v2092_v5  ;;  %v2091_v8 = vsel %vm2083_vm6, %v3045_v60, %v2087_v2  ;;  %v2093_v9 = vsel %vm2085_vm7, %v3047_v61, %v2089_v3 }
 0x32d   : > { %2099 = vst [vmem:[%s2097_s13 + $0x8] sm:$0xff] %v2091_v8  ;;  %2101 = vst [vmem:[%s2097_s13 + $0x18] sm:$0xff] %v2093_v9 }
 0x32e PF: > { %2105 = sbr.rel (%p1115_p1) target bundleno = 1382 (0x566), region = 80  ;;  %v3408_v10 = vld [vmem:[%s4139_s5 + $0x40] sm:$0xff] (!%p1115_p1)   ;;  %v3412_v14 = vld [vmem:[%s4139_s5 + $0x48] sm:$0xff] (!%p1115_p1)   ;;  %v3416_v18 = vld [vmem:[%s4139_s5 + $0x50] sm:$0xff] (!%p1115_p1)   ;;  %vm2457_vm8 = vcmask (!%p1115_p1), 80896  }
 0x32f   : > { %v3409_v11 = vld [vmem:[%s4139_s5 + $0xc0] sm:$0xff] (!%p1115_p1)   ;;  %3000 = vmatprep.subr.bf16.mxu0 (!%p1115_p1), %v3408_v10  ;;  %v3413_v15 = vld [vmem:[%s4139_s5 + $0xc8] sm:$0xff] (!%p1115_p1)   ;;  %v3417_v19 = vld [vmem:[%s4139_s5 + $0xd0] sm:$0xff] (!%p1115_p1)  }
 0x330   : > { %v3410_v12 = vld [vmem:[%s4139_s5] sm:$0xff] (!%p1115_p1)   ;;  %3022 = vmatprep.subr.bf16.mxu1 (!%p1115_p1), %v3409_v11  ;;  %v3414_v16 = vld [vmem:[%s4139_s5 + $0x8] sm:$0xff] (!%p1115_p1)   ;;  %v3418_v20 = vld [vmem:[%s4139_s5 + $0x10] sm:$0xff] (!%p1115_p1)  }
 0x331   : > { %v3411_v13 = vld [vmem:[%s4139_s5 + $0x80] sm:$0xff] (!%p1115_p1)   ;;  %3001 = vmatpush3.bf16.msra.mxu0 (!%p1115_p1), %v3410_v12  ;;  %v3415_v17 = vld [vmem:[%s4139_s5 + $0x88] sm:$0xff] (!%p1115_p1)   ;;  %v3419_v21 = vld [vmem:[%s4139_s5 + $0x90] sm:$0xff] (!%p1115_p1)  }
 0x332   : > { %3023 = vmatpush3.bf16.msra.mxu1 (!%p1115_p1), %v3411_v13  ;;  %3002 = vmatprep.subr.bf16.mxu0 (!%p1115_p1), %v3412_v14  ;;  %v3420_v22 = vld [vmem:[%s4139_s5 + $0x58] sm:$0xff] (!%p1115_p1)   ;;  %v3424_v26 = vld [vmem:[%s4139_s5 + $0x60] sm:$0xff] (!%p1115_p1)   ;;  %v3428_v30 = vld [vmem:[%s4139_s5 + $0x68] sm:$0xff] (!%p1115_p1)  }
 0x333   : > { %3024 = vmatprep.subr.bf16.mxu1 (!%p1115_p1), %v3413_v15  ;;  %v3421_v23 = vld [vmem:[%s4139_s5 + $0xd8] sm:$0xff] (!%p1115_p1)   ;;  %v3425_v27 = vld [vmem:[%s4139_s5 + $0xe0] sm:$0xff] (!%p1115_p1)   ;;  %v3429_v31 = vld [vmem:[%s4139_s5 + $0xe8] sm:$0xff] (!%p1115_p1)  }
 0x334   : > { %v3422_v24 = vld [vmem:[%s4139_s5 + $0x18] sm:$0xff] (!%p1115_p1)   ;;  %v3426_v28 = vld [vmem:[%s4139_s5 + $0x20] sm:$0xff] (!%p1115_p1)   ;;  %v3430_v32 = vld [vmem:[%s4139_s5 + $0x28] sm:$0xff] (!%p1115_p1)  }
 0x335   : > { %3003 = vmatpush3.bf16.msra.mxu0 %v3414_v16  ;;  %v3423_v25 = vld [vmem:[%s4139_s5 + $0x98] sm:$0xff]   ;;  %v3427_v29 = vld [vmem:[%s4139_s5 + $0xa0] sm:$0xff]   ;;  %v3431_v33 = vld [vmem:[%s4139_s5 + $0xa8] sm:$0xff]  }
 0x336   : > { %3025 = vmatpush3.bf16.msra.mxu1 %v3415_v17  ;;  %3004 = vmatprep.subr.bf16.mxu0 %v3416_v18  ;;  %v3432_v34 = vld [vmem:[%s4139_s5 + $0x70] sm:$0xff]   ;;  %v3436_v38 = vld [vmem:[%s4139_s5 + $0x78] sm:$0xff]   ;;  %v2107_v42 = vld [vmem:[#allocation3 + $0x8] sm:$0xff] }
 0x337   : > { %3026 = vmatprep.subr.bf16.mxu1 %v3417_v19  ;;  %v3433_v35 = vld [vmem:[%s4139_s5 + $0xf0] sm:$0xff]   ;;  %v3437_v39 = vld [vmem:[%s4139_s5 + $0xf8] sm:$0xff]   ;;  %v2106_v44 = vld [vmem:[#allocation3] sm:$0xff]  ;;  %v2111_v45 = vpack.c.bf16 %v2107_v42, %v2107_v42 }
 0x338   : > { %v3434_v36 = vld [vmem:[%s4139_s5 + $0x30] sm:$0xff]   ;;  %v3438_v40 = vld [vmem:[%s4139_s5 + $0x38] sm:$0xff]   ;;  %v2110_v47 = vpack.c.bf16 %v2106_v44, %v2106_v44 }
 0x339   : > { %3005 = vmatpush3.bf16.msra.mxu0 %v3418_v20  ;;  %v3435_v37 = vld [vmem:[%s4139_s5 + $0xb0] sm:$0xff]   ;;  %v3439_v41 = vld [vmem:[%s4139_s5 + $0xb8] sm:$0xff]   ;;  %2409 = vmatprep.mubr.bf16.mxu0 %v2111_v45 }
 0x33a   : > { %3027 = vmatpush3.bf16.msra.mxu1 %v3419_v21  ;;  %3006 = vmatprep.subr.bf16.mxu0 %v3420_v22  ;;  %v2109_v43 = vld [vmem:[#allocation3 + $0x18] sm:$0xff]  ;;  %v2108_v48 = vld [vmem:[#allocation3 + $0x10] sm:$0xff] }
 0x33b   : > { %3028 = vmatprep.subr.bf16.mxu1 %v3421_v23  ;;  %v2113_v46 = vpack.c.bf16 %v2109_v43, %v2109_v43  ;;  %v2112_v49 = vpack.c.bf16 %v2108_v48, %v2108_v48  ;;  %v2961_v52 = vld [vmem:[#allocation11] ss:$0 sm:$0xff] }
 0x33d   : > { %3007 = vmatpush3.bf16.msra.mxu0 %v3422_v24  ;;  %2449 = vmatprep.mubr.bf16.mxu1 %v2113_v46 }
 0x33e   : > { %3029 = vmatpush3.bf16.msra.mxu1 %v3423_v25  ;;  %3008 = vmatprep.subr.bf16.mxu0 %v3424_v26 }
 0x33f   : > { %3030 = vmatprep.subr.bf16.mxu1 %v3425_v27 }
 0x341   : > { %3009 = vmatpush3.bf16.msra.mxu0 %v3426_v28 }
 0x342   : > { %3031 = vmatpush3.bf16.msra.mxu1 %v3427_v29  ;;  %3010 = vmatprep.subr.bf16.mxu0 %v3428_v30 }
 0x343   : > { %3032 = vmatprep.subr.bf16.mxu1 %v3429_v31 }
 0x345   : > { %3011 = vmatpush3.bf16.msra.mxu0 %v3430_v32 }
 0x346   : > { %3033 = vmatpush3.bf16.msra.mxu1 %v3431_v33  ;;  %3012 = vmatprep.subr.bf16.mxu0 %v3432_v34 }
 0x347   : > { %3034 = vmatprep.subr.bf16.mxu1 %v3433_v35 }
 0x349   : > { %3013 = vmatpush3.bf16.msra.mxu0 %v3434_v36 }
 0x34a   : > { %3035 = vmatpush3.bf16.msra.mxu1 %v3435_v37  ;;  %3014 = vmatprep.subr.bf16.mxu0 %v3436_v38 }
 0x34b   : > { %3036 = vmatprep.subr.bf16.mxu1 %v3437_v39 }
 0x34d   : > { %3015 = vmatpush3.bf16.msra.mxu0 %v3438_v40 }
 0x34e   : > { %3037 = vmatpush3.bf16.msra.mxu1 %v3439_v41 }
 0x350   : > { %2410 = vmatmul.mubr.bf16.vlgmr.msra.gmra.mrb[0].mxu0 %v2110_v47 }
 0x351   : > { %2450 = vmatmul.mubr.bf16.vlgmr.msra.gmra.mrb[0].mxu1 %v2112_v49 }
 0x423   : > { %v3016_v50 = vpop.f32.mrb[0].mxu0 }
 0x424   : > { %v3038_v51 = vpop.f32.mrb[0].mxu1  ;;  %v3017_v53 = vpop.f32.mrb[1].mxu0 }
 0x425   : > { %v3039_v54 = vpop.f32.mrb[1].mxu1  ;;  %v3018_v55 = vadd.f32 %v3017_v53, %v3016_v50  ;;  %v3019_v57 = vpop.f32.mrb[2].mxu0 }
 0x426   : > { %v3040_v56 = vadd.f32 %v3039_v54, %v3038_v51  ;;  %v3041_v58 = vpop.f32.mrb[2].mxu1  ;;  %v3020_v59 = vpop.f32.mrb[3].mxu0 }
 0x427   : > { %v3042_v60 = vpop.f32.mrb[3].mxu1  ;;  %v2412_v61 = vadd.f32 %v3018_v55, %v2961_v52 }
 0x429   : > { %v2452_v62 = vadd.f32 %v3040_v56, %v2412_v61 }
 0x42b   : > { %v2458_v63 = vsel %vm2457_vm8, %v2452_v62, -inf }
 0x42c   : > { %2459 = vmax.xlane.f32.xlu0 %v2458_v63 }
 0x4b9   : > { %v2460_v0 = vpop.xlane.xlu0 %2459 }
 0x4ba   : > { %v2461_v1 = vsub.f32 %v2452_v62, %v2460_v0 }
 0x4bc   : > { %v2462_v2 = vmul.f32 1.442695, %v2461_v1 }
 0x4be   : > { %3440 = vpow2.f32 %v2462_v2 }
 0x4c8   : > { %v3441_v3 = vpop.eup %3440 }
 0x4c9   : > { %v2464_v4 = vsel %vm2457_vm8, %v3441_v3, 0.0 }
 0x4ca   : > { %2465 = vadd.xlane.f32.xlu0 %v2464_v4 }
 0x557   : > { %v2466_v5 = vpop.xlane.xlu0 %2465 }
 0x558   : > { %3442 = vrcp.f32 %v2466_v5 }
 0x562   : > { %v3443_v6 = vpop.eup %3442 }
 0x563   : > { %v2468_v7 = vmul.f32 %v3443_v6, %v3441_v3 }
 0x565   : > { %2469 = vst.msk [vmem:[%s4141_s7] sm:$0xff] %vm2457_vm8, %v2468_v7 }
 0x566 PF: > { %s4177_s8 = sld [smem:[#allocation16_spill]]  ;;  %p23_p8 = scmp.ge.s32.totalorder %s3705_s29, 5  }
 0x567   : > { %s4178_s24 = smov %s3626_s25  ;;  %s4179_s25 = smov %s3630_s26 }
 0x568   : > { %s4181_s27 = smov %s3705_s29  ;;  %25 = sbr.rel (!%p23_p8) target bundleno = 11 (0xb), region = 153 }
 0x56c   : > { %s4180_s26 = smov %s4177_s8 }
 0x56f   :  { %2504 = vsyncpa [#allocation5], 1 }
 0x570   :  { %2506 = vsyncpa [#allocation5 + $0x1], 1 }
 0x571   :  { %2507 = vsyncpa [#allocation7], 1 }
 0x572   :  { %2509 = vsyncpa [#allocation7 + $0x1], 1 }
 0x573   :  { %2510 = vsyncpa [#allocation10], 1 }
 0x574   :  { %2512 = vsyncpa [#allocation10 + $0x1], 1 }

// kernel: vae_dilo3_forward.9
= control target key start
LH: loop header
LB: loop body
LE: loop exit
PB: predicated region body
PF: predicated region fallthrough
CT: control target
= control target key end

     0   :  { %s5926_s0 = inlined_call_operand.vmem [shape: f32[8,128], index: 0, kind: input, shape index: {}]   ;;  %s5927_s1 = inlined_call_operand.hbm [shape: bf16[128,512], index: 1, kind: input, shape index: {}]   ;;  %s5928_s2 = inlined_call_operand.vmem [shape: f32[1,512], index: 2, kind: input, shape index: {}]   ;;  %s5929_s3 = inlined_call_operand.hbm [shape: bf16[512,512], index: 3, kind: input, shape index: {}]   ;;  %s5930_s4 = inlined_call_operand.vmem [shape: f32[1,512], index: 4, kind: input, shape index: {}]   ;;  %s5931_s5 = inlined_call_operand.vmem [shape: bf16[512,2560], index: 5, kind: input, shape index: {}]   ;;  %s5932_s6 = inlined_call_operand.vmem [shape: f32[1,2560], index: 6, kind: input, shape index: {}]   ;;  %s5933_s7 = inlined_call_operand.vmem [shape: f32[8,2560], index: 7, kind: output, shape index: {}]  }
   0x1   :  { %5938 = sst [smem:[#allocation14_spill]] %s5927_s1 }
   0x2   :  { %12 = vsyncpa [#allocation5], 0 }
   0x3   :  { %14 = vsyncpa [#allocation5 + $0x1], 0 }
   0x4   :  { %15 = vsyncpa [#allocation7], 0 }
   0x5   :  { %17 = vsyncpa [#allocation7 + $0x1], 0  ;;  %s5099_s24 = smov 0   ;;  %s5101_s25 = smov 0  }
   0x6   :  { %s5103_s26 = smov 0   ;;  %s5105_s27 = smov 0  }
   0x7   :  { %s5107_s28 = smov 0   ;;  %s5109_s29 = smov 0  }
   0x8 LB: > { %5939 = sst [smem:[#allocation11_spill]] %s5048_s28  ;;  %s5128_s30 = sadd.s32 4294967295, %s5052_s29   ;;  %s5052_s29 = sphi %s5109_s29, %s5960_s29   ;;  %s5048_s28 = sphi %s5107_s28, %s5955_s28   ;;  %s5044_s27 = sphi %s5105_s27, %s5959_s27   ;;  %s5040_s26 = sphi %s5103_s26, %s5958_s26   ;;  %s5036_s25 = sphi %s5101_s25, %s5957_s25   ;;  %s5032_s24 = sphi %s5099_s24, %s5956_s24  }
   0x9   : > { %s5131_s8 = sadd.s32 1, %s5052_s29   ;;  %p48_p0 = scmp.lt.s32.totalorder %s5052_s29, 0 }
   0xa   : > { %p50_p1 = scmp.lt.s32.totalorder %s5131_s8, 0  ;;  %s55_s9 = sadd.s32 1, %s5048_s28 }
   0xb   : > { %p62_p2 = scmp.ne.s32.totalorder %s5048_s28, %s5044_s27  ;;  %p5936_p3 = scmp.eq.s32.totalorder %s5052_s29, 0 }
   0xc   : > { %s5139_s10 = scalar_select %p48_p0, %s5052_s29, 0 }
   0xd   : > { %s51_s11 = scalar_select %p50_p1, %s5131_s8, 0 }
   0xe   : > { %p68_p4 = scmp.ne.s32.totalorder %s5044_s27, %s5040_s26  ;;  %p5935_p5 = scmp.eq.s32.totalorder %s5128_s30, 0 }
   0xf   : > { %s52_s12 = ssub.s32 %s5139_s10, %s51_s11  ;;  %p5148_p7 = por %p5936_p3, %p62_p2 }
  0x10   : > { %p53_p6 = scmp.eq.s32.totalorder %s52_s12, 0  ;;  %p5154_p8 = por %p5935_p5, %p68_p4 }
  0x11   : > { %s3794_s15 = sadd.s32 4294967294, %s5052_s29  ;;  %s3800_s17 = sadd.s32 4294967294, %s5131_s8 }
  0x12   : > { %s5941_s14 = scalar_select %p5154_p8, 1, 0 }
  0x13   : > { %s5160_s16 = scalar_select %p53_p6, %s5048_s28, %s55_s9  }
  0x14   : > { %p181_p9 = scmp.gt.s32.totalorder %s3794_s15, 0  ;;  %p3795_p10 = scmp.lt.s32.totalorder %s3794_s15, 3 }
  0x15   : > { %5942 = sst [smem:[#allocation12_spill]] %s5160_s16  ;;  %p186_p11 = scmp.gt.s32.totalorder %s3800_s17, 0 }
  0x16   : > { %s5962_s15 = smov (!%p181_p9, %s3794_s15), 0  ;;  %p3801_p12 = scmp.lt.s32.totalorder %s3800_s17, 3 }
  0x17   : > { %s5964_s15 = smov (!%p3795_p10, %s5962_s15), 3  ;;  %s5966_s17 = smov (!%p186_p11, %s3800_s17), 0 }
  0x18   : > { %p200_p13 = scmp.ne.s32.totalorder %s5036_s25, %s5032_s24  ;;  %s5968_s17 = smov (!%p3801_p12, %s5966_s17), 3 }
  0x19   : > { %s190_s19 = ssub.s32 %s5964_s15, %s5968_s17  ;;  %s193_s20 = sadd.s32 1, %s5036_s25 }
  0x1a   : > { %p5169_p0 = por %p200_p13, %p5936_p3  ;;  %p191_p1 = scmp.eq.s32.totalorder %s190_s19, 0 }
  0x1b   : > { %p3831_p2 = scmp.ge.s32.totalorder %s5052_s29, 6 }
  0x1c   : > { %s5943_s18 = scalar_select %p5169_p0, 1, 0 }
  0x1d   : > { %s5176_s21 = scalar_select %p191_p1, %s5036_s25, %s193_s20  }
  0x1e   : > { %301 = sbr.rel (%p3831_p2) target bundleno = 193 (0xc1), region = 20  ;;  %s305_s22 = sand.u32 (!%p3831_p2), 1, %s5048_s28  }
  0x1f   : > { %5944 = sst [smem:[#allocation13_spill]] %s5176_s21  ;;  %s4344_s23 = sshll.u32 (!%p3831_p2), %s5139_s10, 8 }
  0x20   : > { %s3832_s26 = sshll.u32 (!%p3831_p2), %s305_s22, 8  ;;  %s5945_s1 = sld [smem:[#allocation14_spill]] (!%p3831_p2) }
  0x21   : > { %s309_s17 = scalar_lea.vmem (!%p3831_p2), [#allocation4], %s3832_s26  ;;  %s5188_s20 = scalar_lea.sflag (!%p3831_p2), [#allocation5], %s305_s22 }
  0x22   : > { %s318_s19 = sshll.u32 (!%p3831_p2), %s309_s17, 4  ;;  %s5186_s19 = int_to_ptr.vmem [resolvable:$true] %s318_s19 }
  0x26   : > { %s5184_s12 = scalar_lea.hbm %s5945_s1, %s4344_s23  ;;  %s4948_s23 = scalar_lea.hbm %s5945_s1, 4096 }
  0x27   : > { %s4944_s16 = scalar_lea.hbm %s5184_s12, 4096  ;;  %p4949_p10 = scmp.lt.u32.totalorder %s5184_s12, %s5945_s1 }
  0x28   : > { %p4945_p4 = scmp.ne.s32.totalorder %s5184_s12, %s4944_s16  ;;  %p4950_p11 = scmp.lt.u32.totalorder %s4948_s23, %s4944_s16 }
  0x29   : > { %p4952_p13 = scmp.lt.u32.totalorder %s4944_s16, %s5184_s12 }
  0x2a   : > { %p4946_p6 = pnand %p4945_p4, %p5148_p7  ;;  %p4951_p12 = por %p4950_p11, %p4949_p10 }
  0x2c   : > { %p4947_p9 = pneg %p4946_p6  ;;  %p4953_p1 = por %p4952_p13, %p4951_p12 }
  0x2e   : > { %p4954_p2 = pnand %p4953_p1, %p4947_p9 }
  0x30   : > { %4957 = shalt.err (!%p4954_p2)
}
  0x31   : > { %s4958_s22 = scalar_lea.vmem %s5186_s19, 4096  ;;  %s5054_s28 = smov [#allocation4]  }
  0x32   : > { %p4959_p4 = scmp.ne.s32.totalorder %s5186_s19, %s4958_s22  ;;  %s4962_s26 = sshll.u32 %s5054_s28, 4  ;;  %s4963_s26 = int_to_ptr.vmem [resolvable:$false] %s4962_s26 }
  0x33   : > { %s4964_s17 = scalar_lea.vmem %s4963_s26, 8192  ;;  %p4965_p3 = scmp.lt.s32.totalorder %s5186_s19, %s4963_s26 }
  0x34   : > { %p4960_p6 = pnand %p4959_p4, %p5148_p7  ;;  %p4966_p8 = scmp.lt.s32.totalorder %s4964_s17, %s4958_s22 }
  0x36   : > { %p4961_p5 = pneg %p4960_p6  ;;  %p4967_p10 = por %p4966_p8, %p4965_p3 }
  0x38   : > { %p4968_p11 = pnand %p4967_p10, %p4961_p5 }
  0x3a   : > { %4971 = shalt.err (!%p4968_p11)
}
  0x3b   : > { %s5055_s16 = smov 256   ;;  %s5056_s10 = smov 16  }
  0x3c   : > { %4424 = dma.hbm_to_vmem [thread:$0]  (%p5148_p7), %s5184_s12, 4096, %s5186_s19, %s5188_s20, %s5055_s16, %s5055_s16, %s5056_s10  }
  0x3d   : > { %s5057_s23 = smov [#allocation6]   ;;  %s4972_s26 = scalar_lea.hbm %s5929_s3, 16384 }
  0x3e   : > { %s356_s9 = sshll.u32 %s5057_s23, 4  ;;  %p4973_p3 = scmp.ne.s32.totalorder %s5929_s3, %s4972_s26  ;;  %s357_s9 = int_to_ptr.vmem [resolvable:$true] %s356_s9 }
  0x3f   : > { %p5946_p5 = scmp.eq.s32.totalorder %s5052_s29, 0  ;;  %p4978_p12 = scmp.lt.u32.totalorder %s4972_s26, %s5929_s3 }
  0x41   : > { %p4974_p8 = pnand %p4973_p3, %p5946_p5 }
  0x43   : > { %p4975_p9 = pneg %p4974_p8 }
  0x45   : > { %p4980_p13 = pnand %p4978_p12, %p4975_p9 }
  0x47   : > { %4983 = shalt.err (!%p4980_p13)
}
  0x48   : > { %s4984_s13 = scalar_lea.vmem %s357_s9, 16384  ;;  %p5947_p1 = pmov %p5946_p5 }
  0x49   : > { %p4985_p7 = scmp.ne.s32.totalorder %s357_s9, %s4984_s13  ;;  %s4990_s12 = scalar_lea.vmem %s357_s9, 32768 }
  0x4a   : > { %p4991_p6 = scmp.lt.s32.totalorder %s357_s9, %s357_s9  ;;  %p4992_p10 = scmp.lt.s32.totalorder %s4990_s12, %s4984_s13 }
  0x4b   : > { %p4986_p2 = pnand %p4985_p7, %p5947_p1 }
  0x4c   : > { %p4993_p11 = por %p4992_p10, %p4991_p6 }
  0x4d   : > { %p4987_p4 = pneg %p4986_p2 }
  0x4f   : > { %p4994_p0 = pnand %p4993_p11, %p4987_p4 }
  0x51   : > { %4997 = shalt.err (!%p4994_p0)
}
  0x52   : > { %p5948_p3 = pmov %p5947_p1  ;;  %p5949_p5 = scmp.ne.s32.totalorder %s5943_s18, 0 }
  0x53   : > { %s385_s1 = sand.u32 (%p5949_p5), 1, %s5036_s25   ;;  %s4347_s21 = smul.u32 (%p5949_p5), 20, %s5964_s15 }
  0x54   : > { %4425 = dma.hbm_to_vmem [thread:$0]  (%p5948_p3), %s5929_s3, 16384, %s357_s9, [#allocation7], %s5055_s16, %s5055_s16, %s5056_s10  }
  0x55   : > { %383 = sbr.rel (!%p5949_p5) target bundleno = 193 (0xc1), region = 40  ;;  %s5237_s26 = scalar_lea.vmem (%p5949_p5), %s5931_s5, %s4347_s21 }
  0x56   : > { %s4422_s23 = smul.u32 (%p5949_p5), 1280, %s385_s1  ;;  %v410_v0 = vld [vmem:[%s5237_s26] sm:$0xff] (%p5949_p5)  ;;  %v412_v1 = vld [vmem:[%s5237_s26 + $0x8] sm:$0xff] (%p5949_p5)  ;;  %v414_v2 = vld [vmem:[%s5237_s26 + $0x50] sm:$0xff] (%p5949_p5) }
  0x57   : > { %v416_v3 = vld [vmem:[%s5237_s26 + $0x58] sm:$0xff] (%p5949_p5)  ;;  %v418_v4 = vld [vmem:[%s5237_s26 + $0xa0] sm:$0xff] (%p5949_p5)  ;;  %v420_v5 = vld [vmem:[%s5237_s26 + $0xa8] sm:$0xff] (%p5949_p5) }
  0x58   : > { %s5242_s18 = scalar_lea.vmem (%p5949_p5), [#allocation8], %s4422_s23  ;;  %v422_v6 = vld [vmem:[%s5237_s26 + $0xf0] sm:$0xff] (%p5949_p5)  ;;  %v424_v7 = vld [vmem:[%s5237_s26 + $0xf8] sm:$0xff] (%p5949_p5)  ;;  %v426_v8 = vld [vmem:[%s5237_s26 + $0x140] sm:$0xff] (%p5949_p5) }
  0x59   : > { %411 = vst [vmem:[%s5242_s18] sm:$0xff] (%p5949_p5), %v410_v0  ;;  %413 = vst [vmem:[%s5242_s18 + $0x8] sm:$0xff] (%p5949_p5), %v412_v1  ;;  %v428_v9 = vld [vmem:[%s5237_s26 + $0x148] sm:$0xff] (%p5949_p5)  ;;  %v430_v10 = vld [vmem:[%s5237_s26 + $0x190] sm:$0xff] (%p5949_p5) }
  0x5a   : > { %415 = vst [vmem:[%s5242_s18 + $0x14] sm:$0xff] (%p5949_p5), %v414_v2  ;;  %417 = vst [vmem:[%s5242_s18 + $0x1c] sm:$0xff] (%p5949_p5), %v416_v3  ;;  %v432_v11 = vld [vmem:[%s5237_s26 + $0x198] sm:$0xff] (%p5949_p5)  ;;  %v434_v12 = vld [vmem:[%s5237_s26 + $0x1e0] sm:$0xff] (%p5949_p5) }
  0x5b   : > { %419 = vst [vmem:[%s5242_s18 + $0x28] sm:$0xff] (%p5949_p5), %v418_v4  ;;  %421 = vst [vmem:[%s5242_s18 + $0x30] sm:$0xff] (%p5949_p5), %v420_v5  ;;  %v436_v13 = vld [vmem:[%s5237_s26 + $0x1e8] sm:$0xff] (%p5949_p5)  ;;  %v438_v14 = vld [vmem:[%s5237_s26 + $0x230] sm:$0xff] (%p5949_p5) }
  0x5c   : > { %423 = vst [vmem:[%s5242_s18 + $0x3c] sm:$0xff] %v422_v6  ;;  %425 = vst [vmem:[%s5242_s18 + $0x44] sm:$0xff] %v424_v7  ;;  %v440_v15 = vld [vmem:[%s5237_s26 + $0x238] sm:$0xff]  ;;  %v442_v16 = vld [vmem:[%s5237_s26 + $0x280] sm:$0xff] }
  0x5d   : > { %427 = vst [vmem:[%s5242_s18 + $0x50] sm:$0xff] %v426_v8  ;;  %429 = vst [vmem:[%s5242_s18 + $0x58] sm:$0xff] %v428_v9  ;;  %v444_v17 = vld [vmem:[%s5237_s26 + $0x288] sm:$0xff]  ;;  %v446_v18 = vld [vmem:[%s5237_s26 + $0x2d0] sm:$0xff] }
  0x5e   : > { %431 = vst [vmem:[%s5242_s18 + $0x64] sm:$0xff] %v430_v10  ;;  %433 = vst [vmem:[%s5242_s18 + $0x6c] sm:$0xff] %v432_v11  ;;  %v448_v19 = vld [vmem:[%s5237_s26 + $0x2d8] sm:$0xff]  ;;  %v450_v20 = vld [vmem:[%s5237_s26 + $0x320] sm:$0xff] }
  0x5f   : > { %435 = vst [vmem:[%s5242_s18 + $0x78] sm:$0xff] %v434_v12  ;;  %437 = vst [vmem:[%s5242_s18 + $0x80] sm:$0xff] %v436_v13  ;;  %v452_v21 = vld [vmem:[%s5237_s26 + $0x328] sm:$0xff]  ;;  %v454_v22 = vld [vmem:[%s5237_s26 + $0x370] sm:$0xff] }
  0x60   : > { %439 = vst [vmem:[%s5242_s18 + $0x8c] sm:$0xff] %v438_v14  ;;  %441 = vst [vmem:[%s5242_s18 + $0x94] sm:$0xff] %v440_v15  ;;  %v456_v23 = vld [vmem:[%s5237_s26 + $0x378] sm:$0xff]  ;;  %v458_v24 = vld [vmem:[%s5237_s26 + $0x3c0] sm:$0xff] }
  0x61   : > { %443 = vst [vmem:[%s5242_s18 + $0xa0] sm:$0xff] %v442_v16  ;;  %445 = vst [vmem:[%s5242_s18 + $0xa8] sm:$0xff] %v444_v17  ;;  %v460_v25 = vld [vmem:[%s5237_s26 + $0x3c8] sm:$0xff]  ;;  %v462_v26 = vld [vmem:[%s5237_s26 + $0x410] sm:$0xff] }
  0x62   : > { %447 = vst [vmem:[%s5242_s18 + $0xb4] sm:$0xff] %v446_v18  ;;  %449 = vst [vmem:[%s5242_s18 + $0xbc] sm:$0xff] %v448_v19  ;;  %v464_v27 = vld [vmem:[%s5237_s26 + $0x418] sm:$0xff]  ;;  %v466_v28 = vld [vmem:[%s5237_s26 + $0x460] sm:$0xff] }
  0x63   : > { %451 = vst [vmem:[%s5242_s18 + $0xc8] sm:$0xff] %v450_v20  ;;  %453 = vst [vmem:[%s5242_s18 + $0xd0] sm:$0xff] %v452_v21  ;;  %v468_v29 = vld [vmem:[%s5237_s26 + $0x468] sm:$0xff]  ;;  %v470_v30 = vld [vmem:[%s5237_s26 + $0x4b0] sm:$0xff] }
  0x64   : > { %455 = vst [vmem:[%s5242_s18 + $0xdc] sm:$0xff] %v454_v22  ;;  %457 = vst [vmem:[%s5242_s18 + $0xe4] sm:$0xff] %v456_v23  ;;  %v472_v31 = vld [vmem:[%s5237_s26 + $0x4b8] sm:$0xff]  ;;  %v474_v32 = vld [vmem:[%s5237_s26 + $0x500] sm:$0xff] }
  0x65   : > { %459 = vst [vmem:[%s5242_s18 + $0xf0] sm:$0xff] %v458_v24  ;;  %461 = vst [vmem:[%s5242_s18 + $0xf8] sm:$0xff] %v460_v25  ;;  %v476_v33 = vld [vmem:[%s5237_s26 + $0x508] sm:$0xff]  ;;  %v478_v34 = vld [vmem:[%s5237_s26 + $0x550] sm:$0xff] }
  0x66   : > { %463 = vst [vmem:[%s5242_s18 + $0x104] sm:$0xff] %v462_v26  ;;  %465 = vst [vmem:[%s5242_s18 + $0x10c] sm:$0xff] %v464_v27  ;;  %v480_v35 = vld [vmem:[%s5237_s26 + $0x558] sm:$0xff]  ;;  %v482_v36 = vld [vmem:[%s5237_s26 + $0x5a0] sm:$0xff] }
  0x67   : > { %467 = vst [vmem:[%s5242_s18 + $0x118] sm:$0xff] %v466_v28  ;;  %469 = vst [vmem:[%s5242_s18 + $0x120] sm:$0xff] %v468_v29  ;;  %v484_v37 = vld [vmem:[%s5237_s26 + $0x5a8] sm:$0xff]  ;;  %v486_v38 = vld [vmem:[%s5237_s26 + $0x5f0] sm:$0xff] }
  0x68   : > { %471 = vst [vmem:[%s5242_s18 + $0x12c] sm:$0xff] %v470_v30  ;;  %473 = vst [vmem:[%s5242_s18 + $0x134] sm:$0xff] %v472_v31  ;;  %v488_v39 = vld [vmem:[%s5237_s26 + $0x5f8] sm:$0xff]  ;;  %v490_v40 = vld [vmem:[%s5237_s26 + $0x640] sm:$0xff] }
  0x69   : > { %475 = vst [vmem:[%s5242_s18 + $0x140] sm:$0xff] %v474_v32  ;;  %477 = vst [vmem:[%s5242_s18 + $0x148] sm:$0xff] %v476_v33  ;;  %v492_v41 = vld [vmem:[%s5237_s26 + $0x648] sm:$0xff]  ;;  %v494_v42 = vld [vmem:[%s5237_s26 + $0x690] sm:$0xff] }
  0x6a   : > { %479 = vst [vmem:[%s5242_s18 + $0x154] sm:$0xff] %v478_v34  ;;  %481 = vst [vmem:[%s5242_s18 + $0x15c] sm:$0xff] %v480_v35  ;;  %v496_v43 = vld [vmem:[%s5237_s26 + $0x698] sm:$0xff]  ;;  %v498_v44 = vld [vmem:[%s5237_s26 + $0x6e0] sm:$0xff] }
  0x6b   : > { %483 = vst [vmem:[%s5242_s18 + $0x168] sm:$0xff] %v482_v36  ;;  %485 = vst [vmem:[%s5242_s18 + $0x170] sm:$0xff] %v484_v37  ;;  %v500_v45 = vld [vmem:[%s5237_s26 + $0x6e8] sm:$0xff]  ;;  %v502_v46 = vld [vmem:[%s5237_s26 + $0x730] sm:$0xff] }
  0x6c   : > { %487 = vst [vmem:[%s5242_s18 + $0x17c] sm:$0xff] %v486_v38  ;;  %489 = vst [vmem:[%s5242_s18 + $0x184] sm:$0xff] %v488_v39  ;;  %v504_v47 = vld [vmem:[%s5237_s26 + $0x738] sm:$0xff]  ;;  %v506_v48 = vld [vmem:[%s5237_s26 + $0x780] sm:$0xff] }
  0x6d   : > { %491 = vst [vmem:[%s5242_s18 + $0x190] sm:$0xff] %v490_v40  ;;  %493 = vst [vmem:[%s5242_s18 + $0x198] sm:$0xff] %v492_v41  ;;  %v508_v49 = vld [vmem:[%s5237_s26 + $0x788] sm:$0xff]  ;;  %v510_v50 = vld [vmem:[%s5237_s26 + $0x7d0] sm:$0xff] }
  0x6e   : > { %495 = vst [vmem:[%s5242_s18 + $0x1a4] sm:$0xff] %v494_v42  ;;  %497 = vst [vmem:[%s5242_s18 + $0x1ac] sm:$0xff] %v496_v43  ;;  %v512_v51 = vld [vmem:[%s5237_s26 + $0x7d8] sm:$0xff]  ;;  %v514_v52 = vld [vmem:[%s5237_s26 + $0x820] sm:$0xff] }
  0x6f   : > { %499 = vst [vmem:[%s5242_s18 + $0x1b8] sm:$0xff] %v498_v44  ;;  %501 = vst [vmem:[%s5242_s18 + $0x1c0] sm:$0xff] %v500_v45  ;;  %v516_v53 = vld [vmem:[%s5237_s26 + $0x828] sm:$0xff]  ;;  %v518_v54 = vld [vmem:[%s5237_s26 + $0x870] sm:$0xff] }
  0x70   : > { %503 = vst [vmem:[%s5242_s18 + $0x1cc] sm:$0xff] %v502_v46  ;;  %505 = vst [vmem:[%s5242_s18 + $0x1d4] sm:$0xff] %v504_v47  ;;  %v520_v55 = vld [vmem:[%s5237_s26 + $0x878] sm:$0xff]  ;;  %v522_v56 = vld [vmem:[%s5237_s26 + $0x8c0] sm:$0xff] }
  0x71   : > { %507 = vst [vmem:[%s5242_s18 + $0x1e0] sm:$0xff] %v506_v48  ;;  %509 = vst [vmem:[%s5242_s18 + $0x1e8] sm:$0xff] %v508_v49  ;;  %v524_v57 = vld [vmem:[%s5237_s26 + $0x8c8] sm:$0xff]  ;;  %v526_v58 = vld [vmem:[%s5237_s26 + $0x910] sm:$0xff] }
  0x72   : > { %511 = vst [vmem:[%s5242_s18 + $0x1f4] sm:$0xff] %v510_v50  ;;  %513 = vst [vmem:[%s5242_s18 + $0x1fc] sm:$0xff] %v512_v51  ;;  %v528_v59 = vld [vmem:[%s5237_s26 + $0x918] sm:$0xff]  ;;  %v530_v60 = vld [vmem:[%s5237_s26 + $0x960] sm:$0xff] }
  0x73   : > { %515 = vst [vmem:[%s5242_s18 + $0x208] sm:$0xff] %v514_v52  ;;  %517 = vst [vmem:[%s5242_s18 + $0x210] sm:$0xff] %v516_v53  ;;  %v532_v61 = vld [vmem:[%s5237_s26 + $0x968] sm:$0xff]  ;;  %v534_v62 = vld [vmem:[%s5237_s26 + $0x9b0] sm:$0xff] }
  0x74   : > { %519 = vst [vmem:[%s5242_s18 + $0x21c] sm:$0xff] %v518_v54  ;;  %521 = vst [vmem:[%s5242_s18 + $0x224] sm:$0xff] %v520_v55  ;;  %v536_v63 = vld [vmem:[%s5237_s26 + $0x9b8] sm:$0xff]  ;;  %v538_v0 = vld [vmem:[%s5237_s26 + $0xa00] sm:$0xff] }
  0x75   : > { %523 = vst [vmem:[%s5242_s18 + $0x230] sm:$0xff] %v522_v56  ;;  %525 = vst [vmem:[%s5242_s18 + $0x238] sm:$0xff] %v524_v57  ;;  %v540_v1 = vld [vmem:[%s5237_s26 + $0xa08] sm:$0xff]  ;;  %v542_v2 = vld [vmem:[%s5237_s26 + $0xa50] sm:$0xff] }
  0x76   : > { %527 = vst [vmem:[%s5242_s18 + $0x244] sm:$0xff] %v526_v58  ;;  %529 = vst [vmem:[%s5242_s18 + $0x24c] sm:$0xff] %v528_v59  ;;  %v544_v3 = vld [vmem:[%s5237_s26 + $0xa58] sm:$0xff]  ;;  %v546_v4 = vld [vmem:[%s5237_s26 + $0xaa0] sm:$0xff] }
  0x77   : > { %531 = vst [vmem:[%s5242_s18 + $0x258] sm:$0xff] %v530_v60  ;;  %533 = vst [vmem:[%s5242_s18 + $0x260] sm:$0xff] %v532_v61  ;;  %v548_v5 = vld [vmem:[%s5237_s26 + $0xaa8] sm:$0xff]  ;;  %v550_v6 = vld [vmem:[%s5237_s26 + $0xaf0] sm:$0xff] }
  0x78   : > { %535 = vst [vmem:[%s5242_s18 + $0x26c] sm:$0xff] %v534_v62  ;;  %537 = vst [vmem:[%s5242_s18 + $0x274] sm:$0xff] %v536_v63  ;;  %v552_v7 = vld [vmem:[%s5237_s26 + $0xaf8] sm:$0xff]  ;;  %v554_v8 = vld [vmem:[%s5237_s26 + $0xb40] sm:$0xff] }
  0x79   : > { %539 = vst [vmem:[%s5242_s18 + $0x280] sm:$0xff] %v538_v0  ;;  %541 = vst [vmem:[%s5242_s18 + $0x288] sm:$0xff] %v540_v1  ;;  %v556_v9 = vld [vmem:[%s5237_s26 + $0xb48] sm:$0xff]  ;;  %v558_v10 = vld [vmem:[%s5237_s26 + $0xb90] sm:$0xff] }
  0x7a   : > { %543 = vst [vmem:[%s5242_s18 + $0x294] sm:$0xff] %v542_v2  ;;  %545 = vst [vmem:[%s5242_s18 + $0x29c] sm:$0xff] %v544_v3  ;;  %v560_v11 = vld [vmem:[%s5237_s26 + $0xb98] sm:$0xff]  ;;  %v562_v12 = vld [vmem:[%s5237_s26 + $0xbe0] sm:$0xff] }
  0x7b   : > { %547 = vst [vmem:[%s5242_s18 + $0x2a8] sm:$0xff] %v546_v4  ;;  %549 = vst [vmem:[%s5242_s18 + $0x2b0] sm:$0xff] %v548_v5  ;;  %v564_v13 = vld [vmem:[%s5237_s26 + $0xbe8] sm:$0xff]  ;;  %v566_v14 = vld [vmem:[%s5237_s26 + $0xc30] sm:$0xff] }
  0x7c   : > { %551 = vst [vmem:[%s5242_s18 + $0x2bc] sm:$0xff] %v550_v6  ;;  %553 = vst [vmem:[%s5242_s18 + $0x2c4] sm:$0xff] %v552_v7  ;;  %v568_v15 = vld [vmem:[%s5237_s26 + $0xc38] sm:$0xff]  ;;  %v570_v16 = vld [vmem:[%s5237_s26 + $0xc80] sm:$0xff] }
  0x7d   : > { %555 = vst [vmem:[%s5242_s18 + $0x2d0] sm:$0xff] %v554_v8  ;;  %557 = vst [vmem:[%s5242_s18 + $0x2d8] sm:$0xff] %v556_v9  ;;  %v572_v17 = vld [vmem:[%s5237_s26 + $0xc88] sm:$0xff]  ;;  %v574_v18 = vld [vmem:[%s5237_s26 + $0xcd0] sm:$0xff] }
  0x7e   : > { %559 = vst [vmem:[%s5242_s18 + $0x2e4] sm:$0xff] %v558_v10  ;;  %561 = vst [vmem:[%s5242_s18 + $0x2ec] sm:$0xff] %v560_v11  ;;  %v576_v19 = vld [vmem:[%s5237_s26 + $0xcd8] sm:$0xff]  ;;  %v578_v20 = vld [vmem:[%s5237_s26 + $0xd20] sm:$0xff] }
  0x7f   : > { %563 = vst [vmem:[%s5242_s18 + $0x2f8] sm:$0xff] %v562_v12  ;;  %565 = vst [vmem:[%s5242_s18 + $0x300] sm:$0xff] %v564_v13  ;;  %v580_v21 = vld [vmem:[%s5237_s26 + $0xd28] sm:$0xff]  ;;  %v582_v22 = vld [vmem:[%s5237_s26 + $0xd70] sm:$0xff] }
  0x80   : > { %567 = vst [vmem:[%s5242_s18 + $0x30c] sm:$0xff] %v566_v14  ;;  %569 = vst [vmem:[%s5242_s18 + $0x314] sm:$0xff] %v568_v15  ;;  %v584_v23 = vld [vmem:[%s5237_s26 + $0xd78] sm:$0xff]  ;;  %v586_v24 = vld [vmem:[%s5237_s26 + $0xdc0] sm:$0xff] }
  0x81   : > { %571 = vst [vmem:[%s5242_s18 + $0x320] sm:$0xff] %v570_v16  ;;  %573 = vst [vmem:[%s5242_s18 + $0x328] sm:$0xff] %v572_v17  ;;  %v588_v25 = vld [vmem:[%s5237_s26 + $0xdc8] sm:$0xff]  ;;  %v590_v26 = vld [vmem:[%s5237_s26 + $0xe10] sm:$0xff] }
  0x82   : > { %575 = vst [vmem:[%s5242_s18 + $0x334] sm:$0xff] %v574_v18  ;;  %577 = vst [vmem:[%s5242_s18 + $0x33c] sm:$0xff] %v576_v19  ;;  %v592_v27 = vld [vmem:[%s5237_s26 + $0xe18] sm:$0xff]  ;;  %v594_v28 = vld [vmem:[%s5237_s26 + $0xe60] sm:$0xff] }
  0x83   : > { %579 = vst [vmem:[%s5242_s18 + $0x348] sm:$0xff] %v578_v20  ;;  %581 = vst [vmem:[%s5242_s18 + $0x350] sm:$0xff] %v580_v21  ;;  %v596_v29 = vld [vmem:[%s5237_s26 + $0xe68] sm:$0xff]  ;;  %v598_v30 = vld [vmem:[%s5237_s26 + $0xeb0] sm:$0xff] }
  0x84   : > { %583 = vst [vmem:[%s5242_s18 + $0x35c] sm:$0xff] %v582_v22  ;;  %585 = vst [vmem:[%s5242_s18 + $0x364] sm:$0xff] %v584_v23  ;;  %v600_v31 = vld [vmem:[%s5237_s26 + $0xeb8] sm:$0xff]  ;;  %v602_v32 = vld [vmem:[%s5237_s26 + $0xf00] sm:$0xff] }
  0x85   : > { %587 = vst [vmem:[%s5242_s18 + $0x370] sm:$0xff] %v586_v24  ;;  %589 = vst [vmem:[%s5242_s18 + $0x378] sm:$0xff] %v588_v25  ;;  %v604_v33 = vld [vmem:[%s5237_s26 + $0xf08] sm:$0xff]  ;;  %v606_v34 = vld [vmem:[%s5237_s26 + $0xf50] sm:$0xff] }
  0x86   : > { %591 = vst [vmem:[%s5242_s18 + $0x384] sm:$0xff] %v590_v26  ;;  %593 = vst [vmem:[%s5242_s18 + $0x38c] sm:$0xff] %v592_v27  ;;  %v608_v35 = vld [vmem:[%s5237_s26 + $0xf58] sm:$0xff]  ;;  %v610_v36 = vld [vmem:[%s5237_s26 + $0xfa0] sm:$0xff] }
  0x87   : > { %595 = vst [vmem:[%s5242_s18 + $0x398] sm:$0xff] %v594_v28  ;;  %597 = vst [vmem:[%s5242_s18 + $0x3a0] sm:$0xff] %v596_v29  ;;  %v612_v37 = vld [vmem:[%s5237_s26 + $0xfa8] sm:$0xff]  ;;  %v614_v38 = vld [vmem:[%s5237_s26 + $0xff0] sm:$0xff] }
  0x88   : > { %599 = vst [vmem:[%s5242_s18 + $0x3ac] sm:$0xff] %v598_v30  ;;  %601 = vst [vmem:[%s5242_s18 + $0x3b4] sm:$0xff] %v600_v31  ;;  %v616_v39 = vld [vmem:[%s5237_s26 + $0xff8] sm:$0xff]  ;;  %v618_v40 = vld [vmem:[%s5237_s26 + $0x1040] sm:$0xff] }
  0x89   : > { %603 = vst [vmem:[%s5242_s18 + $0x3c0] sm:$0xff] %v602_v32  ;;  %605 = vst [vmem:[%s5242_s18 + $0x3c8] sm:$0xff] %v604_v33  ;;  %v620_v41 = vld [vmem:[%s5237_s26 + $0x1048] sm:$0xff]  ;;  %v622_v42 = vld [vmem:[%s5237_s26 + $0x1090] sm:$0xff] }
  0x8a   : > { %607 = vst [vmem:[%s5242_s18 + $0x3d4] sm:$0xff] %v606_v34  ;;  %609 = vst [vmem:[%s5242_s18 + $0x3dc] sm:$0xff] %v608_v35  ;;  %v624_v43 = vld [vmem:[%s5237_s26 + $0x1098] sm:$0xff]  ;;  %v626_v44 = vld [vmem:[%s5237_s26 + $0x10e0] sm:$0xff] }
  0x8b   : > { %611 = vst [vmem:[%s5242_s18 + $0x3e8] sm:$0xff] %v610_v36  ;;  %613 = vst [vmem:[%s5242_s18 + $0x3f0] sm:$0xff] %v612_v37  ;;  %v628_v45 = vld [vmem:[%s5237_s26 + $0x10e8] sm:$0xff]  ;;  %v630_v46 = vld [vmem:[%s5237_s26 + $0x1130] sm:$0xff] }
  0x8c   : > { %615 = vst [vmem:[%s5242_s18 + $0x3fc] sm:$0xff] %v614_v38  ;;  %617 = vst [vmem:[%s5242_s18 + $0x404] sm:$0xff] %v616_v39  ;;  %v632_v47 = vld [vmem:[%s5237_s26 + $0x1138] sm:$0xff]  ;;  %v634_v48 = vld [vmem:[%s5237_s26 + $0x1180] sm:$0xff] }
  0x8d   : > { %619 = vst [vmem:[%s5242_s18 + $0x410] sm:$0xff] %v618_v40  ;;  %621 = vst [vmem:[%s5242_s18 + $0x418] sm:$0xff] %v620_v41  ;;  %v636_v49 = vld [vmem:[%s5237_s26 + $0x1188] sm:$0xff]  ;;  %v638_v50 = vld [vmem:[%s5237_s26 + $0x11d0] sm:$0xff] }
  0x8e   : > { %623 = vst [vmem:[%s5242_s18 + $0x424] sm:$0xff] %v622_v42  ;;  %625 = vst [vmem:[%s5242_s18 + $0x42c] sm:$0xff] %v624_v43  ;;  %v640_v51 = vld [vmem:[%s5237_s26 + $0x11d8] sm:$0xff]  ;;  %v642_v52 = vld [vmem:[%s5237_s26 + $0x1220] sm:$0xff] }
  0x8f   : > { %627 = vst [vmem:[%s5242_s18 + $0x438] sm:$0xff] %v626_v44  ;;  %629 = vst [vmem:[%s5242_s18 + $0x440] sm:$0xff] %v628_v45  ;;  %v644_v53 = vld [vmem:[%s5237_s26 + $0x1228] sm:$0xff]  ;;  %v646_v54 = vld [vmem:[%s5237_s26 + $0x1270] sm:$0xff] }
  0x90   : > { %631 = vst [vmem:[%s5242_s18 + $0x44c] sm:$0xff] %v630_v46  ;;  %633 = vst [vmem:[%s5242_s18 + $0x454] sm:$0xff] %v632_v47  ;;  %v648_v55 = vld [vmem:[%s5237_s26 + $0x1278] sm:$0xff]  ;;  %v650_v56 = vld [vmem:[%s5237_s26 + $0x12c0] sm:$0xff] }
  0x91   : > { %635 = vst [vmem:[%s5242_s18 + $0x460] sm:$0xff] %v634_v48  ;;  %637 = vst [vmem:[%s5242_s18 + $0x468] sm:$0xff] %v636_v49  ;;  %v652_v57 = vld [vmem:[%s5237_s26 + $0x12c8] sm:$0xff]  ;;  %v654_v58 = vld [vmem:[%s5237_s26 + $0x1310] sm:$0xff] }
  0x92   : > { %639 = vst [vmem:[%s5242_s18 + $0x474] sm:$0xff] %v638_v50  ;;  %641 = vst [vmem:[%s5242_s18 + $0x47c] sm:$0xff] %v640_v51  ;;  %v656_v59 = vld [vmem:[%s5237_s26 + $0x1318] sm:$0xff]  ;;  %v658_v60 = vld [vmem:[%s5237_s26 + $0x1360] sm:$0xff] }
  0x93   : > { %643 = vst [vmem:[%s5242_s18 + $0x488] sm:$0xff] %v642_v52  ;;  %645 = vst [vmem:[%s5242_s18 + $0x490] sm:$0xff] %v644_v53  ;;  %v660_v61 = vld [vmem:[%s5237_s26 + $0x1368] sm:$0xff]  ;;  %v662_v62 = vld [vmem:[%s5237_s26 + $0x13b0] sm:$0xff] }
  0x94   : > { %647 = vst [vmem:[%s5242_s18 + $0x49c] sm:$0xff] %v646_v54  ;;  %649 = vst [vmem:[%s5242_s18 + $0x4a4] sm:$0xff] %v648_v55  ;;  %v664_v63 = vld [vmem:[%s5237_s26 + $0x13b8] sm:$0xff]  ;;  %v3851_v0 = vld [vmem:[%s5237_s26 + $0x10] sm:$0xf] }
  0x95   : > { %651 = vst [vmem:[%s5242_s18 + $0x4b0] sm:$0xff] %v650_v56  ;;  %653 = vst [vmem:[%s5242_s18 + $0x4b8] sm:$0xff] %v652_v57  ;;  %v3853_v1 = vld [vmem:[%s5237_s26 + $0x60] sm:$0xf]  ;;  %v3855_v2 = vld [vmem:[%s5237_s26 + $0xb0] sm:$0xf] }
  0x96   : > { %655 = vst [vmem:[%s5242_s18 + $0x4c4] sm:$0xff] %v654_v58  ;;  %657 = vst [vmem:[%s5242_s18 + $0x4cc] sm:$0xff] %v656_v59  ;;  %v3857_v3 = vld [vmem:[%s5237_s26 + $0x100] sm:$0xf]  ;;  %v3859_v4 = vld [vmem:[%s5237_s26 + $0x150] sm:$0xf] }
  0x97   : > { %659 = vst [vmem:[%s5242_s18 + $0x4d8] sm:$0xff] %v658_v60  ;;  %661 = vst [vmem:[%s5242_s18 + $0x4e0] sm:$0xff] %v660_v61  ;;  %v3861_v5 = vld [vmem:[%s5237_s26 + $0x1a0] sm:$0xf]  ;;  %v3863_v6 = vld [vmem:[%s5237_s26 + $0x1f0] sm:$0xf] }
  0x98   : > { %663 = vst [vmem:[%s5242_s18 + $0x4ec] sm:$0xff] %v662_v62  ;;  %665 = vst [vmem:[%s5242_s18 + $0x4f4] sm:$0xff] %v664_v63  ;;  %v3865_v7 = vld [vmem:[%s5237_s26 + $0x240] sm:$0xf]  ;;  %v3867_v8 = vld [vmem:[%s5237_s26 + $0x290] sm:$0xf] }
  0x99   : > { %3852 = vst [vmem:[%s5242_s18 + $0x10] sm:$0xf] %v3851_v0  ;;  %3854 = vst [vmem:[%s5242_s18 + $0x24] sm:$0xf] %v3853_v1  ;;  %v3869_v9 = vld [vmem:[%s5237_s26 + $0x2e0] sm:$0xf] }
  0x9a   : > { %3856 = vst [vmem:[%s5242_s18 + $0x38] sm:$0xf] %v3855_v2  ;;  %3858 = vst [vmem:[%s5242_s18 + $0x4c] sm:$0xf] %v3857_v3  ;;  %v3871_v10 = vld [vmem:[%s5237_s26 + $0x330] sm:$0xf] }
  0x9b   : > { %3860 = vst [vmem:[%s5242_s18 + $0x60] sm:$0xf] %v3859_v4  ;;  %3862 = vst [vmem:[%s5242_s18 + $0x74] sm:$0xf] %v3861_v5  ;;  %v3873_v11 = vld [vmem:[%s5237_s26 + $0x380] sm:$0xf] }
  0x9c   : > { %3864 = vst [vmem:[%s5242_s18 + $0x88] sm:$0xf] %v3863_v6  ;;  %3866 = vst [vmem:[%s5242_s18 + $0x9c] sm:$0xf] %v3865_v7  ;;  %v3875_v12 = vld [vmem:[%s5237_s26 + $0x3d0] sm:$0xf] }
  0x9d   : > { %3868 = vst [vmem:[%s5242_s18 + $0xb0] sm:$0xf] %v3867_v8  ;;  %3870 = vst [vmem:[%s5242_s18 + $0xc4] sm:$0xf] %v3869_v9  ;;  %v3877_v13 = vld [vmem:[%s5237_s26 + $0x420] sm:$0xf] }
  0x9e   : > { %3872 = vst [vmem:[%s5242_s18 + $0xd8] sm:$0xf] %v3871_v10  ;;  %3874 = vst [vmem:[%s5242_s18 + $0xec] sm:$0xf] %v3873_v11  ;;  %v3879_v14 = vld [vmem:[%s5237_s26 + $0x470] sm:$0xf] }
  0x9f   : > { %3876 = vst [vmem:[%s5242_s18 + $0x100] sm:$0xf] %v3875_v12  ;;  %v3881_v15 = vld [vmem:[%s5237_s26 + $0x4c0] sm:$0xf]  ;;  %3878 = vst [vmem:[%s5242_s18 + $0x114] sm:$0xf] %v3877_v13 }
  0xa0   : > { %3880 = vst [vmem:[%s5242_s18 + $0x128] sm:$0xf] %v3879_v14  ;;  %3882 = vst [vmem:[%s5242_s18 + $0x13c] sm:$0xf] %v3881_v15  ;;  %v3883_v16 = vld [vmem:[%s5237_s26 + $0x510] sm:$0xf] }
  0xa1   : > { %v3885_v17 = vld [vmem:[%s5237_s26 + $0x560] sm:$0xf]  ;;  %v3887_v18 = vld [vmem:[%s5237_s26 + $0x5b0] sm:$0xf]  ;;  %3884 = vst [vmem:[%s5242_s18 + $0x150] sm:$0xf] %v3883_v16 }
  0xa2   : > { %3886 = vst [vmem:[%s5242_s18 + $0x164] sm:$0xf] %v3885_v17  ;;  %3888 = vst [vmem:[%s5242_s18 + $0x178] sm:$0xf] %v3887_v18  ;;  %v3889_v19 = vld [vmem:[%s5237_s26 + $0x600] sm:$0xf] }
  0xa3   : > { %v3891_v20 = vld [vmem:[%s5237_s26 + $0x650] sm:$0xf]  ;;  %v3893_v21 = vld [vmem:[%s5237_s26 + $0x6a0] sm:$0xf]  ;;  %3890 = vst [vmem:[%s5242_s18 + $0x18c] sm:$0xf] %v3889_v19 }
  0xa4   : > { %3892 = vst [vmem:[%s5242_s18 + $0x1a0] sm:$0xf] %v3891_v20  ;;  %3894 = vst [vmem:[%s5242_s18 + $0x1b4] sm:$0xf] %v3893_v21  ;;  %v3895_v22 = vld [vmem:[%s5237_s26 + $0x6f0] sm:$0xf] }
  0xa5   : > { %v3897_v23 = vld [vmem:[%s5237_s26 + $0x740] sm:$0xf]  ;;  %v3899_v24 = vld [vmem:[%s5237_s26 + $0x790] sm:$0xf]  ;;  %3896 = vst [vmem:[%s5242_s18 + $0x1c8] sm:$0xf] %v3895_v22 }
  0xa6   : > { %3898 = vst [vmem:[%s5242_s18 + $0x1dc] sm:$0xf] %v3897_v23  ;;  %3900 = vst [vmem:[%s5242_s18 + $0x1f0] sm:$0xf] %v3899_v24  ;;  %v3901_v25 = vld [vmem:[%s5237_s26 + $0x7e0] sm:$0xf] }
  0xa7   : > { %v3903_v26 = vld [vmem:[%s5237_s26 + $0x830] sm:$0xf]  ;;  %v3905_v27 = vld [vmem:[%s5237_s26 + $0x880] sm:$0xf]  ;;  %3902 = vst [vmem:[%s5242_s18 + $0x204] sm:$0xf] %v3901_v25 }
  0xa8   : > { %3904 = vst [vmem:[%s5242_s18 + $0x218] sm:$0xf] %v3903_v26  ;;  %3906 = vst [vmem:[%s5242_s18 + $0x22c] sm:$0xf] %v3905_v27  ;;  %v3907_v28 = vld [vmem:[%s5237_s26 + $0x8d0] sm:$0xf] }
  0xa9   : > { %v3909_v29 = vld [vmem:[%s5237_s26 + $0x920] sm:$0xf]  ;;  %v3911_v30 = vld [vmem:[%s5237_s26 + $0x970] sm:$0xf]  ;;  %3908 = vst [vmem:[%s5242_s18 + $0x240] sm:$0xf] %v3907_v28 }
  0xaa   : > { %3910 = vst [vmem:[%s5242_s18 + $0x254] sm:$0xf] %v3909_v29  ;;  %3912 = vst [vmem:[%s5242_s18 + $0x268] sm:$0xf] %v3911_v30  ;;  %v3913_v31 = vld [vmem:[%s5237_s26 + $0x9c0] sm:$0xf] }
  0xab   : > { %v3915_v32 = vld [vmem:[%s5237_s26 + $0xa10] sm:$0xf]  ;;  %v3917_v33 = vld [vmem:[%s5237_s26 + $0xa60] sm:$0xf]  ;;  %3914 = vst [vmem:[%s5242_s18 + $0x27c] sm:$0xf] %v3913_v31 }
  0xac   : > { %3916 = vst [vmem:[%s5242_s18 + $0x290] sm:$0xf] %v3915_v32  ;;  %3918 = vst [vmem:[%s5242_s18 + $0x2a4] sm:$0xf] %v3917_v33  ;;  %v3919_v34 = vld [vmem:[%s5237_s26 + $0xab0] sm:$0xf] }
  0xad   : > { %v3921_v35 = vld [vmem:[%s5237_s26 + $0xb00] sm:$0xf]  ;;  %v3923_v36 = vld [vmem:[%s5237_s26 + $0xb50] sm:$0xf]  ;;  %3920 = vst [vmem:[%s5242_s18 + $0x2b8] sm:$0xf] %v3919_v34 }
  0xae   : > { %3922 = vst [vmem:[%s5242_s18 + $0x2cc] sm:$0xf] %v3921_v35  ;;  %3924 = vst [vmem:[%s5242_s18 + $0x2e0] sm:$0xf] %v3923_v36  ;;  %v3925_v37 = vld [vmem:[%s5237_s26 + $0xba0] sm:$0xf] }
  0xaf   : > { %v3927_v38 = vld [vmem:[%s5237_s26 + $0xbf0] sm:$0xf]  ;;  %v3929_v39 = vld [vmem:[%s5237_s26 + $0xc40] sm:$0xf]  ;;  %3926 = vst [vmem:[%s5242_s18 + $0x2f4] sm:$0xf] %v3925_v37 }
  0xb0   : > { %3928 = vst [vmem:[%s5242_s18 + $0x308] sm:$0xf] %v3927_v38  ;;  %3930 = vst [vmem:[%s5242_s18 + $0x31c] sm:$0xf] %v3929_v39  ;;  %v3931_v40 = vld [vmem:[%s5237_s26 + $0xc90] sm:$0xf] }
  0xb1   : > { %v3933_v41 = vld [vmem:[%s5237_s26 + $0xce0] sm:$0xf]  ;;  %v3935_v42 = vld [vmem:[%s5237_s26 + $0xd30] sm:$0xf]  ;;  %3932 = vst [vmem:[%s5242_s18 + $0x330] sm:$0xf] %v3931_v40 }
  0xb2   : > { %3934 = vst [vmem:[%s5242_s18 + $0x344] sm:$0xf] %v3933_v41  ;;  %3936 = vst [vmem:[%s5242_s18 + $0x358] sm:$0xf] %v3935_v42  ;;  %v3937_v43 = vld [vmem:[%s5237_s26 + $0xd80] sm:$0xf] }
  0xb3   : > { %v3939_v44 = vld [vmem:[%s5237_s26 + $0xdd0] sm:$0xf]  ;;  %v3941_v45 = vld [vmem:[%s5237_s26 + $0xe20] sm:$0xf]  ;;  %3938 = vst [vmem:[%s5242_s18 + $0x36c] sm:$0xf] %v3937_v43 }
  0xb4   : > { %3940 = vst [vmem:[%s5242_s18 + $0x380] sm:$0xf] %v3939_v44  ;;  %3942 = vst [vmem:[%s5242_s18 + $0x394] sm:$0xf] %v3941_v45  ;;  %v3943_v46 = vld [vmem:[%s5237_s26 + $0xe70] sm:$0xf] }
  0xb5   : > { %v3945_v47 = vld [vmem:[%s5237_s26 + $0xec0] sm:$0xf]  ;;  %v3947_v48 = vld [vmem:[%s5237_s26 + $0xf10] sm:$0xf]  ;;  %3944 = vst [vmem:[%s5242_s18 + $0x3a8] sm:$0xf] %v3943_v46 }
  0xb6   : > { %3946 = vst [vmem:[%s5242_s18 + $0x3bc] sm:$0xf] %v3945_v47  ;;  %3948 = vst [vmem:[%s5242_s18 + $0x3d0] sm:$0xf] %v3947_v48  ;;  %v3949_v49 = vld [vmem:[%s5237_s26 + $0xf60] sm:$0xf] }
  0xb7   : > { %v3951_v50 = vld [vmem:[%s5237_s26 + $0xfb0] sm:$0xf]  ;;  %v3953_v51 = vld [vmem:[%s5237_s26 + $0x1000] sm:$0xf]  ;;  %3950 = vst [vmem:[%s5242_s18 + $0x3e4] sm:$0xf] %v3949_v49 }
  0xb8   : > { %3952 = vst [vmem:[%s5242_s18 + $0x3f8] sm:$0xf] %v3951_v50  ;;  %3954 = vst [vmem:[%s5242_s18 + $0x40c] sm:$0xf] %v3953_v51  ;;  %v3955_v52 = vld [vmem:[%s5237_s26 + $0x1050] sm:$0xf] }
  0xb9   : > { %v3957_v53 = vld [vmem:[%s5237_s26 + $0x10a0] sm:$0xf]  ;;  %v3959_v54 = vld [vmem:[%s5237_s26 + $0x10f0] sm:$0xf]  ;;  %3956 = vst [vmem:[%s5242_s18 + $0x420] sm:$0xf] %v3955_v52 }
  0xba   : > { %3958 = vst [vmem:[%s5242_s18 + $0x434] sm:$0xf] %v3957_v53  ;;  %3960 = vst [vmem:[%s5242_s18 + $0x448] sm:$0xf] %v3959_v54  ;;  %v3961_v55 = vld [vmem:[%s5237_s26 + $0x1140] sm:$0xf] }
  0xbb   : > { %v3963_v56 = vld [vmem:[%s5237_s26 + $0x1190] sm:$0xf]  ;;  %v3965_v57 = vld [vmem:[%s5237_s26 + $0x11e0] sm:$0xf]  ;;  %3962 = vst [vmem:[%s5242_s18 + $0x45c] sm:$0xf] %v3961_v55 }
  0xbc   : > { %3964 = vst [vmem:[%s5242_s18 + $0x470] sm:$0xf] %v3963_v56  ;;  %3966 = vst [vmem:[%s5242_s18 + $0x484] sm:$0xf] %v3965_v57  ;;  %v3967_v58 = vld [vmem:[%s5237_s26 + $0x1230] sm:$0xf] }
  0xbd   : > { %v3969_v59 = vld [vmem:[%s5237_s26 + $0x1280] sm:$0xf]  ;;  %v3971_v60 = vld [vmem:[%s5237_s26 + $0x12d0] sm:$0xf]  ;;  %3968 = vst [vmem:[%s5242_s18 + $0x498] sm:$0xf] %v3967_v58 }
  0xbe   : > { %3970 = vst [vmem:[%s5242_s18 + $0x4ac] sm:$0xf] %v3969_v59  ;;  %3972 = vst [vmem:[%s5242_s18 + $0x4c0] sm:$0xf] %v3971_v60  ;;  %v3973_v61 = vld [vmem:[%s5237_s26 + $0x1320] sm:$0xf] }
  0xbf   : > { %v3975_v62 = vld [vmem:[%s5237_s26 + $0x1370] sm:$0xf]  ;;  %v3977_v63 = vld [vmem:[%s5237_s26 + $0x13c0] sm:$0xf]  ;;  %3974 = vst [vmem:[%s5242_s18 + $0x4d4] sm:$0xf] %v3973_v61 }
  0xc0   : > { %3976 = vst [vmem:[%s5242_s18 + $0x4e8] sm:$0xf] %v3975_v62  ;;  %3978 = vst [vmem:[%s5242_s18 + $0x4fc] sm:$0xf] %v3977_v63 }
  0xc1 PF: > { %p3979_p0 = scmp.ge.s32.totalorder %s5052_s29, 1  ;;  %p823_p8 = scmp.lt.s32.totalorder %s5052_s29, 7 }
  0xc3   : > { %p824_p9 = pnand %p3979_p0, %p823_p8 }
  0xc4   : > { %s829_s15 = sand.u32 (!%p824_p9), 1, %s5044_s27   ;;  %p5950_p12 = scmp.ne.s32.totalorder (!%p824_p9), %s5941_s14, 0 }
  0xc5   : > { %827 = sbr.rel (%p824_p9) target bundleno = 1200 (0x4b0), region = 70  ;;  %s3980_s16 = sshll.u32 (!%p824_p9), %s829_s15, 8 }
  0xc6   : > { %s830_s10 = scalar_lea.sflag (!%p824_p9), [#allocation5], %s829_s15  ;;  %s5628_s9 = scalar_lea.vmem (!%p824_p9), [#allocation4], %s3980_s16 }
  0xcc   : > { %5023 = dma.done.wait (%p5950_p12), %s830_s10, 4096  }
  0xcd   : > { %5025 = vsyncadd (%p5950_p12), %s830_s10, 4294963200  ;;  %p5951_p13 = scmp.eq.s32.totalorder %s5128_s30, 0 }
  0xcf   : > { %5027 = dma.done.wait (%p5951_p13), [#allocation7], 16384   ;;  %p5952_p7 = pmov %p5951_p13 }
  0xd0   : > { %s848_s29 = sand.u32 1, %s5032_s24   ;;  %p921_p1 = scmp.lt.s32.totalorder %s5128_s30, 0 }
  0xd1   : > { %5029 = vsyncadd (%p5952_p7), [#allocation7], 4294950912  ;;  %s4423_s22 = smul.u32 1280, %s848_s29  ;;  %s3990_s17 = sadd.s32 4294967294, %s5128_s30 }
  0xd2   : > { %s922_s13 = scalar_select %p921_p1, %s5128_s30, 0 }
  0xd3   : > { %p958_p2 = scmp.gt.s32.totalorder %s3990_s17, 0  ;;  %p3991_p4 = scmp.lt.s32.totalorder %s3990_s17, 3 }
  0xd4   : > { %s3982_s12 = sshll.u32 %s922_s13, 2  ;;  %s5660_s15 = scalar_lea.vmem [#allocation8], %s4423_s22 }
  0xd5   : > { %p924_p6 = scmp.lt.s32.totalorder %s3982_s12, 3  ;;  %s5970_s17 = smov (!%p958_p2, %s3990_s17), 0 }
  0xd6   : > { %s5974_s17 = smov (!%p3991_p4, %s5970_s17), 3  ;;  %p4003_p11 = scmp.ge.s32.totalorder %s5128_s30, 1 }
  0xd7   : > { %s5972_s12 = smov (!%p924_p6, %s3982_s12), 3  ;;  %s962_s1 = smul.u32 5, %s5974_s17  ;;  %v4480_v0 = vld [vmem:[%s5628_s9 + $0x4] ss:$16 sps:$4 sm:$0xff] (!%p4003_p11)   ;;  %v4482_v1 = vld [vmem:[%s5628_s9 + $0xc] ss:$16 sps:$4 sm:$0xff] (!%p4003_p11)   ;;  %v1029_v35 = vlaneseq (!%p4003_p11) }
  0xd8   : > { %s926_s20 = scalar_lea.vmem %s5928_s2, %s5972_s12  ;;  %992 = sbr.rel (%p4003_p11) target bundleno = 468 (0x1d4), region = 86  ;;  %v5058_v2 = vmov (!%p4003_p11), 0   ;;  %1209 = vmatprep.subr.bf16.mxu0 (!%p4003_p11), %v4480_v0  ;;  %v4484_v3 = vld [vmem:[%s5628_s9] ss:$16 sps:$4 sm:$0xff] (!%p4003_p11)   ;;  %v4485_v4 = vld [vmem:[%s5628_s9 + $0x8] ss:$16 sps:$4 sm:$0xff] (!%p4003_p11)   ;;  %1250 = vmatprep.subr.bf16.mxu1 (!%p4003_p11), %v4482_v1 }
  0xd9   : > { %p963_p10 = scmp.lt.s32.totalorder %s962_s1, 19  ;;  %1241 = vmatprep.mubr.bf16.mxu0 (!%p4003_p11), %v5058_v2  ;;  %1282 = vmatprep.mubr.bf16.mxu1 (!%p4003_p11), %v5058_v2  ;;  %v4486_v5 = vld [vmem:[%s5628_s9 + $0x24] ss:$16 sps:$4 sm:$0xff] (!%p4003_p11)   ;;  %v4488_v6 = vld [vmem:[%s5628_s9 + $0x2c] ss:$16 sps:$4 sm:$0xff] (!%p4003_p11)   ;;  %v1030_v36 = vshrl.u32 (!%p4003_p11), %v1029_v35, 7 }
  0xda   : > { %1210 = vmatpush1.bf16.msra.mxu0 (!%p4003_p11), %v4484_v3  ;;  %1251 = vmatpush1.bf16.msra.mxu1 (!%p4003_p11), %v4485_v4  ;;  %v4490_v7 = vld [vmem:[%s5628_s9 + $0x20] ss:$16 sps:$4 sm:$0xff] (!%p4003_p11)   ;;  %v4491_v8 = vld [vmem:[%s5628_s9 + $0x28] ss:$16 sps:$4 sm:$0xff] (!%p4003_p11)   ;;  %v4492_v9 = vld [vmem:[%s5628_s9 + $0x44] ss:$16 sps:$4 sm:$0xff] (!%p4003_p11)  }
  0xdb   : > { %s5976_s1 = smov (!%p963_p10, %s962_s1), 19  ;;  %1211 = vmatprep.subr.bf16.mxu0 (!%p4003_p11), %v4486_v5  ;;  %1252 = vmatprep.subr.bf16.mxu1 (!%p4003_p11), %v4488_v6  ;;  %v4494_v10 = vld [vmem:[%s5628_s9 + $0x4c] ss:$16 sps:$4 sm:$0xff] (!%p4003_p11)   ;;  %v4496_v11 = vld [vmem:[%s5628_s9 + $0x40] ss:$16 sps:$4 sm:$0xff] (!%p4003_p11)   ;;  %v1031_v37 = vsub.s32 (!%p4003_p11), 0, %v1030_v36 }
  0xdc   : > { %s965_s23 = scalar_lea.vmem %s5932_s6, %s5976_s1  ;;  %s4002_s11 = sshll.u32 %s5976_s1, 3  ;;  %v4497_v12 = vld [vmem:[%s5628_s9 + $0x48] ss:$16 sps:$4 sm:$0xff] (!%p4003_p11)   ;;  %v4498_v13 = vld [vmem:[%s5628_s9 + $0x64] ss:$16 sps:$4 sm:$0xff] (!%p4003_p11)   ;;  %v1039_v38 = vsub.s32 (!%p4003_p11), 2, %v1030_v36 }
  0xdd   : > { %s5658_s18 = scalar_lea.vmem %s5933_s7, %s4002_s11  ;;  %v4500_v14 = vld [vmem:[%s5628_s9 + $0x6c] ss:$16 sps:$4 sm:$0xff] (!%p4003_p11)   ;;  %v4502_v15 = vld [vmem:[%s5628_s9 + $0x60] ss:$16 sps:$4 sm:$0xff] (!%p4003_p11)   ;;  %v4503_v16 = vld [vmem:[%s5628_s9 + $0x68] ss:$16 sps:$4 sm:$0xff] (!%p4003_p11)  }
  0xde   : > { %1212 = vmatpush1.bf16.msra.mxu0 (!%p4003_p11), %v4490_v7  ;;  %1253 = vmatpush1.bf16.msra.mxu1 (!%p4003_p11), %v4491_v8  ;;  %v4504_v17 = vld [vmem:[%s5628_s9 + $0x84] ss:$16 sps:$4 sm:$0xff] (!%p4003_p11)   ;;  %v4506_v18 = vld [vmem:[%s5628_s9 + $0x8c] ss:$16 sps:$4 sm:$0xff] (!%p4003_p11)   ;;  %v4508_v19 = vld [vmem:[%s5628_s9 + $0x80] ss:$16 sps:$4 sm:$0xff] (!%p4003_p11)  }
  0xdf   : > { %1213 = vmatprep.subr.bf16.mxu0 %v4492_v9  ;;  %1254 = vmatprep.subr.bf16.mxu1 %v4494_v10  ;;  %v4509_v20 = vld [vmem:[%s5628_s9 + $0x88] ss:$16 sps:$4 sm:$0xff]   ;;  %v4510_v21 = vld [vmem:[%s5628_s9 + $0xa4] ss:$16 sps:$4 sm:$0xff]   ;;  %v4512_v22 = vld [vmem:[%s5628_s9 + $0xac] ss:$16 sps:$4 sm:$0xff]  }
  0xe0   : > { %v4514_v23 = vld [vmem:[%s5628_s9 + $0xa0] ss:$16 sps:$4 sm:$0xff]   ;;  %v4515_v24 = vld [vmem:[%s5628_s9 + $0xa8] ss:$16 sps:$4 sm:$0xff]   ;;  %v4516_v25 = vld [vmem:[%s5628_s9 + $0xc4] ss:$16 sps:$4 sm:$0xff]  }
  0xe1   : > { %v4518_v26 = vld [vmem:[%s5628_s9 + $0xcc] ss:$16 sps:$4 sm:$0xff]   ;;  %v4520_v27 = vld [vmem:[%s5628_s9 + $0xc0] ss:$16 sps:$4 sm:$0xff]   ;;  %v4521_v28 = vld [vmem:[%s5628_s9 + $0xc8] ss:$16 sps:$4 sm:$0xff]  }
  0xe2   : > { %1214 = vmatpush1.bf16.msra.mxu0 %v4496_v11  ;;  %1255 = vmatpush1.bf16.msra.mxu1 %v4497_v12  ;;  %v4522_v29 = vld [vmem:[%s5628_s9 + $0xe4] ss:$16 sps:$4 sm:$0xff]   ;;  %v4524_v30 = vld [vmem:[%s5628_s9 + $0xec] ss:$16 sps:$4 sm:$0xff]   ;;  %v4526_v31 = vld [vmem:[%s5628_s9 + $0xe0] ss:$16 sps:$4 sm:$0xff]  }
  0xe3   : > { %1215 = vmatprep.subr.bf16.mxu0 %v4498_v13  ;;  %1256 = vmatprep.subr.bf16.mxu1 %v4500_v14  ;;  %v4527_v32 = vld [vmem:[%s5628_s9 + $0xe8] ss:$16 sps:$4 sm:$0xff]   ;;  %v993_v33 = vld [vmem:[%s5926_s0] sm:$0xff]  ;;  %v1035_v40 = vsub.s32 1, %v1030_v36  ;;  %v1043_v41 = vsub.s32 3, %v1030_v36  ;;  %s4352_s9 = sshll.u32 %s5128_s30, 5 }
  0xe4   : > { %v994_v34 = vpack.c.bf16 %v993_v33, %v993_v33  ;;  %v1027_v39 = vld [vmem:[%s926_s20] sm:$0xf]  ;;  %s1305_s17 = scalar_lea.vmem [#allocation2], %s4352_s9 }
  0xe5   : > { %v1032_v42 = vrot.slane %v1027_v39, %v1031_v37  ;;  %v1040_v43 = vrot.slane %v1027_v39, %v1039_v38  ;;  %v1036_v44 = vrot.slane %v1027_v39, %v1035_v40  ;;  %v1044_v45 = vrot.slane %v1027_v39, %v1043_v41 }
  0xe6   : > { %1216 = vmatpush1.bf16.msra.mxu0 %v4502_v15  ;;  %1257 = vmatpush1.bf16.msra.mxu1 %v4503_v16 }
  0xe7   : > { %1217 = vmatprep.subr.bf16.mxu0 %v4504_v17  ;;  %1258 = vmatprep.subr.bf16.mxu1 %v4506_v18 }
  0xea   : > { %1218 = vmatpush1.bf16.msra.mxu0 %v4508_v19  ;;  %1259 = vmatpush1.bf16.msra.mxu1 %v4509_v20 }
  0xeb   : > { %1219 = vmatprep.subr.bf16.mxu0 %v4510_v21  ;;  %1260 = vmatprep.subr.bf16.mxu1 %v4512_v22 }
  0xee   : > { %1220 = vmatpush1.bf16.msra.mxu0 %v4514_v23  ;;  %1261 = vmatpush1.bf16.msra.mxu1 %v4515_v24 }
  0xef   : > { %1221 = vmatprep.subr.bf16.mxu0 %v4516_v25  ;;  %1262 = vmatprep.subr.bf16.mxu1 %v4518_v26 }
  0xf2   : > { %1222 = vmatpush1.bf16.msra.mxu0 %v4520_v27  ;;  %1263 = vmatpush1.bf16.msra.mxu1 %v4521_v28 }
  0xf3   : > { %1223 = vmatprep.subr.bf16.mxu0 %v4522_v29  ;;  %1264 = vmatprep.subr.bf16.mxu1 %v4524_v30 }
  0xf6   : > { %1224 = vmatpush1.bf16.msra.mxu0 %v4526_v31  ;;  %1265 = vmatpush1.bf16.msra.mxu1 %v4527_v32 }
  0xf9   : > { %1242 = vmatmul.mubr.bf16.vlgmr.msra.gmra.mrb[0].mxu0 %v994_v34  ;;  %1283 = vmatmul.mubr.bf16.vlgmr.msra.gmra.mrb[0].mxu1 %v994_v34 }
 0x1cc   : > { %v1243_v46 = vpop.f32.mrb[0].mxu0  ;;  %v1284_v47 = vpop.f32.mrb[0].mxu1 }
 0x1cd   : > { %v1244_v48 = vadd.f32 %v1243_v46, %v1032_v42  ;;  %v1285_v49 = vadd.f32 %v1284_v47, %v1040_v43  ;;  %v1245_v50 = vpop.f32.mrb[1].mxu0  ;;  %v1286_v51 = vpop.f32.mrb[1].mxu1 }
 0x1ce   : > { %v1246_v52 = vadd.f32 %v1245_v50, %v1036_v44  ;;  %v1287_v53 = vadd.f32 %v1286_v51, %v1044_v45  ;;  %v1247_v54 = vpop.f32.mrb[2].mxu0  ;;  %v1288_v55 = vpop.f32.mrb[2].mxu1 }
 0x1cf   : > { %vm1291_vm0 = vcmp.ge.f32.partialorder %v1244_v48, 0.0  ;;  %v1295_v56 = vmul.f32 0.01, %v1244_v48  ;;  %vm1293_vm1 = vcmp.ge.f32.partialorder %v1285_v49, 0.0  ;;  %v1297_v57 = vmul.f32 0.01, %v1285_v49 }
 0x1d0   : > { %vm1292_vm2 = vcmp.ge.f32.partialorder %v1246_v52, 0.0  ;;  %v1296_v58 = vmul.f32 0.01, %v1246_v52  ;;  %vm1294_vm3 = vcmp.ge.f32.partialorder %v1287_v53, 0.0  ;;  %v1298_v59 = vmul.f32 0.01, %v1287_v53 }
 0x1d1   : > { %v1299_v60 = vsel %vm1291_vm0, %v1244_v48, %v1295_v56  ;;  %v1301_v61 = vsel %vm1293_vm1, %v1285_v49, %v1297_v57  ;;  %v1248_v62 = vpop.f32.mrb[3].mxu0  ;;  %v1289_v63 = vpop.f32.mrb[3].mxu1 }
 0x1d2   : > { %1306 = vst [vmem:[%s1305_s17] sm:$0xff] %v1299_v60  ;;  %1308 = vst [vmem:[%s1305_s17 + $0x10] sm:$0xff] %v1301_v61  ;;  %v1300_v0 = vsel %vm1292_vm2, %v1246_v52, %v1296_v58  ;;  %v1302_v1 = vsel %vm1294_vm3, %v1287_v53, %v1298_v59 }
 0x1d3   : > { %1307 = vst [vmem:[%s1305_s17 + $0x8] sm:$0xff] %v1300_v0  ;;  %1309 = vst [vmem:[%s1305_s17 + $0x18] sm:$0xff] %v1302_v1 }
 0x1d4 PF: > { %p1311_p3 = scmp.lt.s32.totalorder %s5128_s30, 2 }
 0x1d6   : > { %p1312_p5 = pnand %p4003_p11, %p1311_p3 }
 0x1d7   : > { %v4528_v2 = vld [vmem:[#allocation6 + $0x4] ss:$16 sps:$4 sm:$0xff] (!%p1312_p5)   ;;  %v4530_v3 = vld [vmem:[#allocation6 + $0xc] ss:$16 sps:$4 sm:$0xff] (!%p1312_p5)   ;;  %v4532_v4 = vld [vmem:[#allocation6] ss:$16 sps:$4 sm:$0xff] (!%p1312_p5)  }
 0x1d8   : > { %1315 = sbr.rel (%p1312_p5) target bundleno = 819 (0x333), region = 90  ;;  %2114 = vmatprep.subr.bf16.mxu0 (!%p1312_p5), %v4528_v2  ;;  %v4533_v5 = vld [vmem:[#allocation6 + $0x8] ss:$16 sps:$4 sm:$0xff] (!%p1312_p5)   ;;  %2196 = vmatprep.subr.bf16.mxu1 (!%p1312_p5), %v4530_v3  ;;  %v4534_v6 = vld [vmem:[#allocation6 + $0x24] ss:$16 sps:$4 sm:$0xff] (!%p1312_p5)   ;;  %s4166_s14 = sadd.s32 (!%p1312_p5), 4294967295, %s5128_s30 }
 0x1d9   : > { %2115 = vmatpush1.bf16.msra.mxu0 (!%p1312_p5), %v4532_v4  ;;  %2197 = vmatpush1.bf16.msra.mxu1 (!%p1312_p5), %v4533_v5  ;;  %v4536_v7 = vld [vmem:[#allocation6 + $0x2c] ss:$16 sps:$4 sm:$0xff] (!%p1312_p5)   ;;  %v4538_v8 = vld [vmem:[#allocation6 + $0x20] ss:$16 sps:$4 sm:$0xff] (!%p1312_p5)   ;;  %v4539_v9 = vld [vmem:[#allocation6 + $0x28] ss:$16 sps:$4 sm:$0xff] (!%p1312_p5)  }
 0x1da   : > { %2116 = vmatprep.subr.bf16.mxu0 (!%p1312_p5), %v4534_v6  ;;  %2198 = vmatprep.subr.bf16.mxu1 (!%p1312_p5), %v4536_v7  ;;  %v4540_v10 = vld [vmem:[#allocation6 + $0x44] ss:$16 sps:$4 sm:$0xff] (!%p1312_p5)   ;;  %v4542_v11 = vld [vmem:[#allocation6 + $0x4c] ss:$16 sps:$4 sm:$0xff] (!%p1312_p5)   ;;  %v4544_v12 = vld [vmem:[#allocation6 + $0x40] ss:$16 sps:$4 sm:$0xff] (!%p1312_p5)  }
 0x1db   : > { %v4545_v13 = vld [vmem:[#allocation6 + $0x48] ss:$16 sps:$4 sm:$0xff] (!%p1312_p5)   ;;  %v4546_v14 = vld [vmem:[#allocation6 + $0x64] ss:$16 sps:$4 sm:$0xff] (!%p1312_p5)   ;;  %v4548_v15 = vld [vmem:[#allocation6 + $0x6c] ss:$16 sps:$4 sm:$0xff] (!%p1312_p5)  }
 0x1dc   : > { %v4550_v16 = vld [vmem:[#allocation6 + $0x60] ss:$16 sps:$4 sm:$0xff] (!%p1312_p5)   ;;  %v4551_v17 = vld [vmem:[#allocation6 + $0x68] ss:$16 sps:$4 sm:$0xff] (!%p1312_p5)   ;;  %v4552_v18 = vld [vmem:[#allocation6 + $0x84] ss:$16 sps:$4 sm:$0xff] (!%p1312_p5)  }
 0x1dd   : > { %2117 = vmatpush1.bf16.msra.mxu0 (!%p1312_p5), %v4538_v8  ;;  %2199 = vmatpush1.bf16.msra.mxu1 (!%p1312_p5), %v4539_v9  ;;  %v4554_v19 = vld [vmem:[#allocation6 + $0x8c] ss:$16 sps:$4 sm:$0xff] (!%p1312_p5)   ;;  %v4556_v20 = vld [vmem:[#allocation6 + $0x80] ss:$16 sps:$4 sm:$0xff] (!%p1312_p5)   ;;  %v4557_v21 = vld [vmem:[#allocation6 + $0x88] ss:$16 sps:$4 sm:$0xff] (!%p1312_p5)  }
 0x1de   : > { %2118 = vmatprep.subr.bf16.mxu0 (!%p1312_p5), %v4540_v10  ;;  %2200 = vmatprep.subr.bf16.mxu1 (!%p1312_p5), %v4542_v11  ;;  %v4558_v22 = vld [vmem:[#allocation6 + $0xa4] ss:$16 sps:$4 sm:$0xff] (!%p1312_p5)   ;;  %v4560_v23 = vld [vmem:[#allocation6 + $0xac] ss:$16 sps:$4 sm:$0xff] (!%p1312_p5)   ;;  %v4562_v24 = vld [vmem:[#allocation6 + $0xa0] ss:$16 sps:$4 sm:$0xff] (!%p1312_p5)  }
 0x1df   : > { %v4563_v25 = vld [vmem:[#allocation6 + $0xa8] ss:$16 sps:$4 sm:$0xff]   ;;  %v4564_v26 = vld [vmem:[#allocation6 + $0xc4] ss:$16 sps:$4 sm:$0xff]   ;;  %v4566_v27 = vld [vmem:[#allocation6 + $0xcc] ss:$16 sps:$4 sm:$0xff]  }
 0x1e0   : > { %v4568_v28 = vld [vmem:[#allocation6 + $0xc0] ss:$16 sps:$4 sm:$0xff]   ;;  %v4569_v29 = vld [vmem:[#allocation6 + $0xc8] ss:$16 sps:$4 sm:$0xff]   ;;  %v4570_v30 = vld [vmem:[#allocation6 + $0xe4] ss:$16 sps:$4 sm:$0xff]  }
 0x1e1   : > { %2119 = vmatpush1.bf16.msra.mxu0 %v4544_v12  ;;  %2201 = vmatpush1.bf16.msra.mxu1 %v4545_v13  ;;  %v4572_v31 = vld [vmem:[#allocation6 + $0xec] ss:$16 sps:$4 sm:$0xff]   ;;  %v4574_v32 = vld [vmem:[#allocation6 + $0xe0] ss:$16 sps:$4 sm:$0xff]   ;;  %v4575_v33 = vld [vmem:[#allocation6 + $0xe8] ss:$16 sps:$4 sm:$0xff]  }
 0x1e2   : > { %2120 = vmatprep.subr.bf16.mxu0 %v4546_v14  ;;  %2202 = vmatprep.subr.bf16.mxu1 %v4548_v15  ;;  %v4576_v34 = vld [vmem:[#allocation6 + $0x104] ss:$16 sps:$4 sm:$0xff]   ;;  %v4578_v35 = vld [vmem:[#allocation6 + $0x10c] ss:$16 sps:$4 sm:$0xff]   ;;  %v4580_v36 = vld [vmem:[#allocation6 + $0x100] ss:$16 sps:$4 sm:$0xff]  }
 0x1e3   : > { %v4581_v37 = vld [vmem:[#allocation6 + $0x108] ss:$16 sps:$4 sm:$0xff]   ;;  %v4582_v38 = vld [vmem:[#allocation6 + $0x124] ss:$16 sps:$4 sm:$0xff]   ;;  %v4584_v39 = vld [vmem:[#allocation6 + $0x12c] ss:$16 sps:$4 sm:$0xff]  }
 0x1e4   : > { %v4586_v40 = vld [vmem:[#allocation6 + $0x120] ss:$16 sps:$4 sm:$0xff]   ;;  %v4587_v41 = vld [vmem:[#allocation6 + $0x128] ss:$16 sps:$4 sm:$0xff]   ;;  %v4588_v42 = vld [vmem:[#allocation6 + $0x144] ss:$16 sps:$4 sm:$0xff]  }
 0x1e5   : > { %2121 = vmatpush1.bf16.msra.mxu0 %v4550_v16  ;;  %2203 = vmatpush1.bf16.msra.mxu1 %v4551_v17  ;;  %v4590_v43 = vld [vmem:[#allocation6 + $0x14c] ss:$16 sps:$4 sm:$0xff]   ;;  %v4592_v44 = vld [vmem:[#allocation6 + $0x140] ss:$16 sps:$4 sm:$0xff]   ;;  %v4593_v45 = vld [vmem:[#allocation6 + $0x148] ss:$16 sps:$4 sm:$0xff]  }
 0x1e6   : > { %2122 = vmatprep.subr.bf16.mxu0 %v4552_v18  ;;  %2204 = vmatprep.subr.bf16.mxu1 %v4554_v19  ;;  %v4594_v46 = vld [vmem:[#allocation6 + $0x164] ss:$16 sps:$4 sm:$0xff]   ;;  %v4596_v47 = vld [vmem:[#allocation6 + $0x16c] ss:$16 sps:$4 sm:$0xff]   ;;  %v4598_v49 = vld [vmem:[#allocation6 + $0x160] ss:$16 sps:$4 sm:$0xff]  }
 0x1e7   : > { %v1317_v48 = vld [vmem:[#allocation2 + $0x8] sm:$0xff]  ;;  %v4600_v52 = vld [vmem:[#allocation6 + $0x184] ss:$16 sps:$4 sm:$0xff]   ;;  %v4604_v54 = vld [vmem:[#allocation6 + $0x180] ss:$16 sps:$4 sm:$0xff]   ;;  %s4353_s19 = sshll.u32 %s4166_s14, 5 }
 0x1e8   : > { %v1321_v50 = vpack.c.bf16 %v1317_v48, %v1317_v48  ;;  %v4599_v51 = vld [vmem:[#allocation6 + $0x168] ss:$16 sps:$4 sm:$0xff]   ;;  %v4602_v53 = vld [vmem:[#allocation6 + $0x18c] ss:$16 sps:$4 sm:$0xff]   ;;  %v4606_v56 = vld [vmem:[#allocation6 + $0x1a4] ss:$16 sps:$4 sm:$0xff]  }
 0x1e9   : > { %2123 = vmatpush1.bf16.msra.mxu0 %v4556_v20  ;;  %2205 = vmatpush1.bf16.msra.mxu1 %v4557_v21  ;;  %v4605_v55 = vld [vmem:[#allocation6 + $0x188] ss:$16 sps:$4 sm:$0xff]   ;;  %v4608_v57 = vld [vmem:[#allocation6 + $0x1ac] ss:$16 sps:$4 sm:$0xff]   ;;  %v4610_v58 = vld [vmem:[#allocation6 + $0x1a0] ss:$16 sps:$4 sm:$0xff]  }
 0x1ea   : > { %2124 = vmatprep.subr.bf16.mxu0 %v4558_v22  ;;  %2206 = vmatprep.subr.bf16.mxu1 %v4560_v23  ;;  %v4611_v59 = vld [vmem:[#allocation6 + $0x1a8] ss:$16 sps:$4 sm:$0xff]   ;;  %v4612_v60 = vld [vmem:[#allocation6 + $0x1c4] ss:$16 sps:$4 sm:$0xff]   ;;  %v4614_v61 = vld [vmem:[#allocation6 + $0x1cc] ss:$16 sps:$4 sm:$0xff]  }
 0x1eb   : > { %2146 = vmatprep.mubr.bf16.mxu0 %v1321_v50  ;;  %2228 = vmatprep.mubr.bf16.mxu1 %v1321_v50  ;;  %v4616_v62 = vld [vmem:[#allocation6 + $0x1c0] ss:$16 sps:$4 sm:$0xff]   ;;  %v4617_v63 = vld [vmem:[#allocation6 + $0x1c8] ss:$16 sps:$4 sm:$0xff]   ;;  %v4618_v0 = vld [vmem:[#allocation6 + $0x1e4] ss:$16 sps:$4 sm:$0xff]  }
 0x1ec   : > { %v4620_v1 = vld [vmem:[#allocation6 + $0x1ec] ss:$16 sps:$4 sm:$0xff]   ;;  %v4622_v2 = vld [vmem:[#allocation6 + $0x1e0] ss:$16 sps:$4 sm:$0xff]   ;;  %v4623_v3 = vld [vmem:[#allocation6 + $0x1e8] ss:$16 sps:$4 sm:$0xff]  }
 0x1ed   : > { %2125 = vmatpush1.bf16.msra.mxu0 %v4562_v24  ;;  %2207 = vmatpush1.bf16.msra.mxu1 %v4563_v25  ;;  %v1316_v4 = vld [vmem:[#allocation2] sm:$0xff]  ;;  %v4629_v6 = vld [vmem:[#allocation6 + $0x20c] ss:$16 sps:$4 sm:$0xff]   ;;  %v4627_v9 = vld [vmem:[#allocation6 + $0x208] ss:$16 sps:$4 sm:$0xff]   ;;  %s2293_s20 = scalar_lea.vmem [#allocation3], %s4353_s19 }
 0x1ee   : > { %2126 = vmatprep.subr.bf16.mxu0 %v4564_v26  ;;  %2208 = vmatprep.subr.bf16.mxu1 %v4566_v27  ;;  %v4626_v5 = vld [vmem:[#allocation6 + $0x204] ss:$16 sps:$4 sm:$0xff]   ;;  %v1320_v7 = vpack.c.bf16 %v1316_v4, %v1316_v4  ;;  %v4624_v8 = vld [vmem:[#allocation6 + $0x200] ss:$16 sps:$4 sm:$0xff]   ;;  %v4635_v11 = vld [vmem:[#allocation6 + $0x22c] ss:$16 sps:$4 sm:$0xff]  }
 0x1ef   : > { %v4632_v10 = vld [vmem:[#allocation6 + $0x224] ss:$16 sps:$4 sm:$0xff]   ;;  %v4630_v12 = vld [vmem:[#allocation6 + $0x220] ss:$16 sps:$4 sm:$0xff]   ;;  %v4633_v13 = vld [vmem:[#allocation6 + $0x228] ss:$16 sps:$4 sm:$0xff]  }
 0x1f0   : > { %v4638_v14 = vld [vmem:[#allocation6 + $0x244] ss:$16 sps:$4 sm:$0xff]   ;;  %v4641_v15 = vld [vmem:[#allocation6 + $0x24c] ss:$16 sps:$4 sm:$0xff]   ;;  %v4636_v16 = vld [vmem:[#allocation6 + $0x240] ss:$16 sps:$4 sm:$0xff]  }
 0x1f1   : > { %2127 = vmatpush1.bf16.msra.mxu0 %v4568_v28  ;;  %2209 = vmatpush1.bf16.msra.mxu1 %v4569_v29  ;;  %v4639_v17 = vld [vmem:[#allocation6 + $0x248] ss:$16 sps:$4 sm:$0xff]   ;;  %v4644_v18 = vld [vmem:[#allocation6 + $0x264] ss:$16 sps:$4 sm:$0xff]   ;;  %v4647_v19 = vld [vmem:[#allocation6 + $0x26c] ss:$16 sps:$4 sm:$0xff]  }
 0x1f2   : > { %2128 = vmatprep.subr.bf16.mxu0 %v4570_v30  ;;  %2210 = vmatprep.subr.bf16.mxu1 %v4572_v31  ;;  %v4642_v20 = vld [vmem:[#allocation6 + $0x260] ss:$16 sps:$4 sm:$0xff]   ;;  %v4645_v21 = vld [vmem:[#allocation6 + $0x268] ss:$16 sps:$4 sm:$0xff]   ;;  %v4650_v22 = vld [vmem:[#allocation6 + $0x284] ss:$16 sps:$4 sm:$0xff]  }
 0x1f3   : > { %v4653_v23 = vld [vmem:[#allocation6 + $0x28c] ss:$16 sps:$4 sm:$0xff]   ;;  %v4648_v24 = vld [vmem:[#allocation6 + $0x280] ss:$16 sps:$4 sm:$0xff]   ;;  %v4651_v25 = vld [vmem:[#allocation6 + $0x288] ss:$16 sps:$4 sm:$0xff]  }
 0x1f4   : > { %v4656_v26 = vld [vmem:[#allocation6 + $0x2a4] ss:$16 sps:$4 sm:$0xff]   ;;  %v4659_v27 = vld [vmem:[#allocation6 + $0x2ac] ss:$16 sps:$4 sm:$0xff]   ;;  %v4654_v28 = vld [vmem:[#allocation6 + $0x2a0] ss:$16 sps:$4 sm:$0xff]  }
 0x1f5   : > { %2129 = vmatpush1.bf16.msra.mxu0 %v4574_v32  ;;  %2211 = vmatpush1.bf16.msra.mxu1 %v4575_v33  ;;  %v4657_v29 = vld [vmem:[#allocation6 + $0x2a8] ss:$16 sps:$4 sm:$0xff]   ;;  %v4662_v30 = vld [vmem:[#allocation6 + $0x2c4] ss:$16 sps:$4 sm:$0xff]   ;;  %v4665_v31 = vld [vmem:[#allocation6 + $0x2cc] ss:$16 sps:$4 sm:$0xff]  }
 0x1f6   : > { %2130 = vmatprep.subr.bf16.mxu0 %v4576_v34  ;;  %2212 = vmatprep.subr.bf16.mxu1 %v4578_v35  ;;  %v1319_v32 = vld [vmem:[#allocation2 + $0x18] sm:$0xff]  ;;  %v4660_v34 = vld [vmem:[#allocation6 + $0x2c0] ss:$16 sps:$4 sm:$0xff]   ;;  %v4686_v48 = vld [vmem:[#allocation6 + $0x344] ss:$16 sps:$4 sm:$0xff]  }
 0x1f7   : > { %v1323_v33 = vpack.c.bf16 %v1319_v32, %v1319_v32  ;;  %v4663_v35 = vld [vmem:[#allocation6 + $0x2c8] ss:$16 sps:$4 sm:$0xff]   ;;  %v4684_v50 = vld [vmem:[#allocation6 + $0x340] ss:$16 sps:$4 sm:$0xff]   ;;  %v4716_v4 = vld [vmem:[#allocation6 + $0x3e4] ss:$16 sps:$4 sm:$0xff]  }
 0x1f9   : > { %2131 = vmatpush1.bf16.msra.mxu0 %v4580_v36  ;;  %2213 = vmatpush1.bf16.msra.mxu1 %v4581_v37  ;;  %v4668_v36 = vld [vmem:[#allocation6 + $0x2e4] ss:$16 sps:$4 sm:$0xff]   ;;  %v4671_v37 = vld [vmem:[#allocation6 + $0x2ec] ss:$16 sps:$4 sm:$0xff]  }
 0x1fa   : > { %2132 = vmatprep.subr.bf16.mxu0 %v4582_v38  ;;  %2214 = vmatprep.subr.bf16.mxu1 %v4584_v39  ;;  %v4666_v38 = vld [vmem:[#allocation6 + $0x2e0] ss:$16 sps:$4 sm:$0xff]   ;;  %v4669_v39 = vld [vmem:[#allocation6 + $0x2e8] ss:$16 sps:$4 sm:$0xff]  }
 0x1fd   : > { %2133 = vmatpush1.bf16.msra.mxu0 %v4586_v40  ;;  %2215 = vmatpush1.bf16.msra.mxu1 %v4587_v41  ;;  %v4674_v40 = vld [vmem:[#allocation6 + $0x304] ss:$16 sps:$4 sm:$0xff]   ;;  %v4677_v41 = vld [vmem:[#allocation6 + $0x30c] ss:$16 sps:$4 sm:$0xff]  }
 0x1fe   : > { %2134 = vmatprep.subr.bf16.mxu0 %v4588_v42  ;;  %2216 = vmatprep.subr.bf16.mxu1 %v4590_v43  ;;  %v4672_v42 = vld [vmem:[#allocation6 + $0x300] ss:$16 sps:$4 sm:$0xff]   ;;  %v4675_v43 = vld [vmem:[#allocation6 + $0x308] ss:$16 sps:$4 sm:$0xff]  }
 0x201   : > { %2135 = vmatpush1.bf16.msra.mxu0 %v4592_v44  ;;  %2217 = vmatpush1.bf16.msra.mxu1 %v4593_v45  ;;  %v4680_v44 = vld [vmem:[#allocation6 + $0x324] ss:$16 sps:$4 sm:$0xff]   ;;  %v4683_v45 = vld [vmem:[#allocation6 + $0x32c] ss:$16 sps:$4 sm:$0xff]  }
 0x202   : > { %2136 = vmatprep.subr.bf16.mxu0 %v4594_v46  ;;  %2218 = vmatprep.subr.bf16.mxu1 %v4596_v47  ;;  %v4678_v46 = vld [vmem:[#allocation6 + $0x320] ss:$16 sps:$4 sm:$0xff]   ;;  %v4681_v47 = vld [vmem:[#allocation6 + $0x328] ss:$16 sps:$4 sm:$0xff]  }
 0x205   : > { %2137 = vmatpush1.bf16.msra.mxu0 %v4598_v49  ;;  %2219 = vmatpush1.bf16.msra.mxu1 %v4599_v51  ;;  %v4689_v49 = vld [vmem:[#allocation6 + $0x34c] ss:$16 sps:$4 sm:$0xff]   ;;  %v4687_v51 = vld [vmem:[#allocation6 + $0x348] ss:$16 sps:$4 sm:$0xff]  }
 0x206   : > { %2138 = vmatprep.subr.bf16.mxu0 %v4600_v52  ;;  %2220 = vmatprep.subr.bf16.mxu1 %v4602_v53  ;;  %v4692_v52 = vld [vmem:[#allocation6 + $0x364] ss:$16 sps:$4 sm:$0xff]   ;;  %v4695_v53 = vld [vmem:[#allocation6 + $0x36c] ss:$16 sps:$4 sm:$0xff]  }
 0x209   : > { %2139 = vmatpush1.bf16.msra.mxu0 %v4604_v54  ;;  %2221 = vmatpush1.bf16.msra.mxu1 %v4605_v55  ;;  %v4690_v54 = vld [vmem:[#allocation6 + $0x360] ss:$16 sps:$4 sm:$0xff]   ;;  %v4693_v55 = vld [vmem:[#allocation6 + $0x368] ss:$16 sps:$4 sm:$0xff]  }
 0x20a   : > { %2140 = vmatprep.subr.bf16.mxu0 %v4606_v56  ;;  %2222 = vmatprep.subr.bf16.mxu1 %v4608_v57  ;;  %v4698_v56 = vld [vmem:[#allocation6 + $0x384] ss:$16 sps:$4 sm:$0xff]   ;;  %v4701_v57 = vld [vmem:[#allocation6 + $0x38c] ss:$16 sps:$4 sm:$0xff]  }
 0x20d   : > { %2141 = vmatpush1.bf16.msra.mxu0 %v4610_v58  ;;  %2223 = vmatpush1.bf16.msra.mxu1 %v4611_v59  ;;  %v4696_v58 = vld [vmem:[#allocation6 + $0x380] ss:$16 sps:$4 sm:$0xff]   ;;  %v4699_v59 = vld [vmem:[#allocation6 + $0x388] ss:$16 sps:$4 sm:$0xff]  }
 0x20e   : > { %2142 = vmatprep.subr.bf16.mxu0 %v4612_v60  ;;  %2224 = vmatprep.subr.bf16.mxu1 %v4614_v61  ;;  %v4704_v60 = vld [vmem:[#allocation6 + $0x3a4] ss:$16 sps:$4 sm:$0xff]   ;;  %v4707_v61 = vld [vmem:[#allocation6 + $0x3ac] ss:$16 sps:$4 sm:$0xff]  }
 0x211   : > { %2143 = vmatpush1.bf16.msra.mxu0 %v4616_v62  ;;  %2225 = vmatpush1.bf16.msra.mxu1 %v4617_v63  ;;  %v4702_v62 = vld [vmem:[#allocation6 + $0x3a0] ss:$16 sps:$4 sm:$0xff]   ;;  %v4705_v63 = vld [vmem:[#allocation6 + $0x3a8] ss:$16 sps:$4 sm:$0xff]  }
 0x212   : > { %2144 = vmatprep.subr.bf16.mxu0 %v4618_v0  ;;  %2226 = vmatprep.subr.bf16.mxu1 %v4620_v1  ;;  %v4710_v0 = vld [vmem:[#allocation6 + $0x3c4] ss:$16 sps:$4 sm:$0xff]   ;;  %v4713_v1 = vld [vmem:[#allocation6 + $0x3cc] ss:$16 sps:$4 sm:$0xff]  }
 0x215   : > { %2145 = vmatpush1.bf16.msra.mxu0 %v4622_v2  ;;  %2227 = vmatpush1.bf16.msra.mxu1 %v4623_v3  ;;  %v4708_v2 = vld [vmem:[#allocation6 + $0x3c0] ss:$16 sps:$4 sm:$0xff]   ;;  %v4711_v3 = vld [vmem:[#allocation6 + $0x3c8] ss:$16 sps:$4 sm:$0xff]  }
 0x216   : > { %2155 = vmatprep.subr.bf16.mxu0 %v4626_v5  ;;  %2237 = vmatprep.subr.bf16.mxu1 %v4629_v6  ;;  %v4719_v5 = vld [vmem:[#allocation6 + $0x3ec] ss:$16 sps:$4 sm:$0xff]   ;;  %v4714_v6 = vld [vmem:[#allocation6 + $0x3e0] ss:$16 sps:$4 sm:$0xff]  }
 0x218   : > { %2147 = vmatmul.mubr.bf16.vlgmr.msra.gmra.mrb[0].mxu0 %v1320_v7  ;;  %2229 = vmatmul.mubr.bf16.vlgmr.msra.gmra.mrb[0].mxu1 %v1320_v7  ;;  %v4717_v7 = vld [vmem:[#allocation6 + $0x3e8] ss:$16 sps:$4 sm:$0xff]  }
 0x219   : > { %2156 = vmatpush1.bf16.msra.mxu0 %v4624_v8  ;;  %2238 = vmatpush1.bf16.msra.mxu1 %v4627_v9  ;;  %v1318_v8 = vld [vmem:[#allocation2 + $0x10] sm:$0xff] }
 0x21a   : > { %2157 = vmatprep.subr.bf16.mxu0 %v4632_v10  ;;  %2239 = vmatprep.subr.bf16.mxu1 %v4635_v11  ;;  %v1322_v9 = vpack.c.bf16 %v1318_v8, %v1318_v8  ;;  %v1454_v10 = vlaneseq }
 0x21b   : > { %2187 = vmatprep.mubr.bf16.mxu0 %v1323_v33  ;;  %2269 = vmatprep.mubr.bf16.mxu1 %v1323_v33 }
 0x21c   : > { %v1455_v11 = vshrl.u32 %v1454_v10, 7 }
 0x21d   : > { %2158 = vmatpush1.bf16.msra.mxu0 %v4630_v12  ;;  %2240 = vmatpush1.bf16.msra.mxu1 %v4633_v13 }
 0x21e   : > { %2159 = vmatprep.subr.bf16.mxu0 %v4638_v14  ;;  %2241 = vmatprep.subr.bf16.mxu1 %v4641_v15  ;;  %v1456_v12 = vsub.s32 0, %v1455_v11  ;;  %v1464_v13 = vsub.s32 2, %v1455_v11  ;;  %v1452_v14 = vld [vmem:[%s5930_s4] sm:$0xf]  ;;  %v1460_v15 = vsub.s32 1, %v1455_v11 }
 0x221   : > { %2160 = vmatpush1.bf16.msra.mxu0 %v4636_v16  ;;  %2242 = vmatpush1.bf16.msra.mxu1 %v4639_v17  ;;  %v1468_v16 = vsub.s32 3, %v1455_v11  ;;  %v1457_v17 = vrot.slane %v1452_v14, %v1456_v12 }
 0x222   : > { %2161 = vmatprep.subr.bf16.mxu0 %v4644_v18  ;;  %2243 = vmatprep.subr.bf16.mxu1 %v4647_v19  ;;  %v1465_v18 = vrot.slane %v1452_v14, %v1464_v13  ;;  %v1461_v19 = vrot.slane %v1452_v14, %v1460_v15 }
 0x225   : > { %2162 = vmatpush1.bf16.msra.mxu0 %v4642_v20  ;;  %2244 = vmatpush1.bf16.msra.mxu1 %v4645_v21  ;;  %v1469_v20 = vrot.slane %v1452_v14, %v1468_v16 }
 0x226   : > { %2163 = vmatprep.subr.bf16.mxu0 %v4650_v22  ;;  %2245 = vmatprep.subr.bf16.mxu1 %v4653_v23 }
 0x229   : > { %2164 = vmatpush1.bf16.msra.mxu0 %v4648_v24  ;;  %2246 = vmatpush1.bf16.msra.mxu1 %v4651_v25 }
 0x22a   : > { %2165 = vmatprep.subr.bf16.mxu0 %v4656_v26  ;;  %2247 = vmatprep.subr.bf16.mxu1 %v4659_v27 }
 0x22d   : > { %2166 = vmatpush1.bf16.msra.mxu0 %v4654_v28  ;;  %2248 = vmatpush1.bf16.msra.mxu1 %v4657_v29 }
 0x22e   : > { %2167 = vmatprep.subr.bf16.mxu0 %v4662_v30  ;;  %2249 = vmatprep.subr.bf16.mxu1 %v4665_v31 }
 0x231   : > { %2168 = vmatpush1.bf16.msra.mxu0 %v4660_v34  ;;  %2250 = vmatpush1.bf16.msra.mxu1 %v4663_v35 }
 0x232   : > { %2169 = vmatprep.subr.bf16.mxu0 %v4668_v36  ;;  %2251 = vmatprep.subr.bf16.mxu1 %v4671_v37 }
 0x235   : > { %2170 = vmatpush1.bf16.msra.mxu0 %v4666_v38  ;;  %2252 = vmatpush1.bf16.msra.mxu1 %v4669_v39 }
 0x236   : > { %2171 = vmatprep.subr.bf16.mxu0 %v4674_v40  ;;  %2253 = vmatprep.subr.bf16.mxu1 %v4677_v41 }
 0x239   : > { %2172 = vmatpush1.bf16.msra.mxu0 %v4672_v42  ;;  %2254 = vmatpush1.bf16.msra.mxu1 %v4675_v43 }
 0x23a   : > { %2173 = vmatprep.subr.bf16.mxu0 %v4680_v44  ;;  %2255 = vmatprep.subr.bf16.mxu1 %v4683_v45 }
 0x23d   : > { %2174 = vmatpush1.bf16.msra.mxu0 %v4678_v46  ;;  %2256 = vmatpush1.bf16.msra.mxu1 %v4681_v47 }
 0x23e   : > { %2175 = vmatprep.subr.bf16.mxu0 %v4686_v48  ;;  %2257 = vmatprep.subr.bf16.mxu1 %v4689_v49 }
 0x241   : > { %2176 = vmatpush1.bf16.msra.mxu0 %v4684_v50  ;;  %2258 = vmatpush1.bf16.msra.mxu1 %v4687_v51 }
 0x242   : > { %2177 = vmatprep.subr.bf16.mxu0 %v4692_v52  ;;  %2259 = vmatprep.subr.bf16.mxu1 %v4695_v53 }
 0x245   : > { %2178 = vmatpush1.bf16.msra.mxu0 %v4690_v54  ;;  %2260 = vmatpush1.bf16.msra.mxu1 %v4693_v55 }
 0x246   : > { %2179 = vmatprep.subr.bf16.mxu0 %v4698_v56  ;;  %2261 = vmatprep.subr.bf16.mxu1 %v4701_v57 }
 0x249   : > { %2180 = vmatpush1.bf16.msra.mxu0 %v4696_v58  ;;  %2262 = vmatpush1.bf16.msra.mxu1 %v4699_v59 }
 0x24a   : > { %2181 = vmatprep.subr.bf16.mxu0 %v4704_v60  ;;  %2263 = vmatprep.subr.bf16.mxu1 %v4707_v61 }
 0x24d   : > { %2182 = vmatpush1.bf16.msra.mxu0 %v4702_v62  ;;  %2264 = vmatpush1.bf16.msra.mxu1 %v4705_v63 }
 0x24e   : > { %2183 = vmatprep.subr.bf16.mxu0 %v4710_v0  ;;  %2265 = vmatprep.subr.bf16.mxu1 %v4713_v1 }
 0x251   : > { %2184 = vmatpush1.bf16.msra.mxu0 %v4708_v2  ;;  %2266 = vmatpush1.bf16.msra.mxu1 %v4711_v3 }
 0x252   : > { %2185 = vmatprep.subr.bf16.mxu0 %v4716_v4  ;;  %2267 = vmatprep.subr.bf16.mxu1 %v4719_v5 }
 0x255   : > { %2186 = vmatpush1.bf16.msra.mxu0 %v4714_v6  ;;  %2268 = vmatpush1.bf16.msra.mxu1 %v4717_v7 }
 0x258   : > { %2188 = vmatmul.mubr.bf16.vlgmr.msra.gmra.mrb[0].mxu0 %v1322_v9  ;;  %2270 = vmatmul.mubr.bf16.vlgmr.msra.gmra.mrb[0].mxu1 %v1322_v9 }
 0x32b   : > { %v2189_v21 = vpop.f32.mrb[0].mxu0  ;;  %v2271_v22 = vpop.f32.mrb[0].mxu1 }
 0x32c   : > { %v4398_v23 = vadd.f32 %v2189_v21, %v1457_v17  ;;  %v4400_v24 = vadd.f32 %v2271_v22, %v1465_v18  ;;  %v2191_v25 = vpop.f32.mrb[1].mxu0  ;;  %v2273_v26 = vpop.f32.mrb[1].mxu1 }
 0x32d   : > { %v4399_v27 = vadd.f32 %v2191_v25, %v1461_v19  ;;  %v4401_v28 = vadd.f32 %v2273_v26, %v1469_v20  ;;  %v2193_v29 = vpop.f32.mrb[2].mxu0  ;;  %v2275_v30 = vpop.f32.mrb[2].mxu1 }
 0x32e   : > { %vm2278_vm4 = vcmp.ge.f32.partialorder %v4398_v23, 0.0  ;;  %v2282_v31 = vmul.f32 0.01, %v4398_v23  ;;  %vm2280_vm5 = vcmp.ge.f32.partialorder %v4400_v24, 0.0  ;;  %v2284_v32 = vmul.f32 0.01, %v4400_v24 }
 0x32f   : > { %vm2279_vm6 = vcmp.ge.f32.partialorder %v4399_v27, 0.0  ;;  %v2283_v33 = vmul.f32 0.01, %v4399_v27  ;;  %vm2281_vm7 = vcmp.ge.f32.partialorder %v4401_v28, 0.0  ;;  %v2285_v34 = vmul.f32 0.01, %v4401_v28 }
 0x330   : > { %v2286_v35 = vsel %vm2278_vm4, %v4398_v23, %v2282_v31  ;;  %v2288_v36 = vsel %vm2280_vm5, %v4400_v24, %v2284_v32  ;;  %v2194_v37 = vpop.f32.mrb[3].mxu0  ;;  %v2276_v38 = vpop.f32.mrb[3].mxu1 }
 0x331   : > { %2294 = vst [vmem:[%s2293_s20] sm:$0xff] %v2286_v35  ;;  %2296 = vst [vmem:[%s2293_s20 + $0x10] sm:$0xff] %v2288_v36  ;;  %v2287_v39 = vsel %vm2279_vm6, %v4399_v27, %v2283_v33  ;;  %v2289_v40 = vsel %vm2281_vm7, %v4401_v28, %v2285_v34 }
 0x332   : > { %2295 = vst [vmem:[%s2293_s20 + $0x8] sm:$0xff] %v2287_v39  ;;  %2297 = vst [vmem:[%s2293_s20 + $0x18] sm:$0xff] %v2289_v40 }
 0x333 PF: > { %2301 = sbr.rel (%p1311_p3) target bundleno = 1200 (0x4b0), region = 94  ;;  %v4720_v41 = vld [vmem:[%s5660_s15 + $0x4] ss:$20 sps:$4 sm:$0xff] (!%p1311_p3)   ;;  %v4722_v42 = vld [vmem:[%s5660_s15 + $0xc] ss:$20 sps:$4 sm:$0xff] (!%p1311_p3)  }
 0x334   : > { %3361 = vmatprep.subr.bf16.mxu0 (!%p1311_p3), %v4720_v41  ;;  %v4724_v43 = vld [vmem:[%s5660_s15] ss:$20 sps:$4 sm:$0xff] (!%p1311_p3)   ;;  %v4725_v44 = vld [vmem:[%s5660_s15 + $0x8] ss:$20 sps:$4 sm:$0xff] (!%p1311_p3)   ;;  %3443 = vmatprep.subr.bf16.mxu1 (!%p1311_p3), %v4722_v42  ;;  %v4731_v48 = vld [vmem:[%s5660_s15 + $0x30] ss:$20 sps:$4 sm:$0xff] (!%p1311_p3)  }
 0x335   : > { %v4726_v45 = vld [vmem:[%s5660_s15 + $0x2c] ss:$20 sps:$4 sm:$0xff] (!%p1311_p3)   ;;  %3362 = vmatpush1.bf16.msra.mxu0 (!%p1311_p3), %v4724_v43  ;;  %3444 = vmatpush1.bf16.msra.mxu1 (!%p1311_p3), %v4725_v44  ;;  %v4728_v46 = vld [vmem:[%s5660_s15 + $0x34] ss:$20 sps:$4 sm:$0xff] (!%p1311_p3)   ;;  %v4734_v50 = vld [vmem:[%s5660_s15 + $0x5c] ss:$20 sps:$4 sm:$0xff] (!%p1311_p3)  }
 0x336   : > { %v4730_v47 = vld [vmem:[%s5660_s15 + $0x28] ss:$20 sps:$4 sm:$0xff] (!%p1311_p3)   ;;  %3363 = vmatprep.subr.bf16.mxu0 (!%p1311_p3), %v4726_v45  ;;  %3445 = vmatprep.subr.bf16.mxu1 (!%p1311_p3), %v4728_v46  ;;  %v4736_v51 = vld [vmem:[%s5660_s15 + $0x50] ss:$20 sps:$4 sm:$0xff] (!%p1311_p3)   ;;  %v4737_v52 = vld [vmem:[%s5660_s15 + $0x58] ss:$20 sps:$4 sm:$0xff] (!%p1311_p3)  }
 0x337   : > { %v4732_v49 = vld [vmem:[%s5660_s15 + $0x54] ss:$20 sps:$4 sm:$0xff] (!%p1311_p3)   ;;  %v4738_v53 = vld [vmem:[%s5660_s15 + $0x7c] ss:$20 sps:$4 sm:$0xff] (!%p1311_p3)   ;;  %v4740_v54 = vld [vmem:[%s5660_s15 + $0x84] ss:$20 sps:$4 sm:$0xff] (!%p1311_p3)  }
 0x338   : > { %v4742_v55 = vld [vmem:[%s5660_s15 + $0x78] ss:$20 sps:$4 sm:$0xff] (!%p1311_p3)   ;;  %v4743_v56 = vld [vmem:[%s5660_s15 + $0x80] ss:$20 sps:$4 sm:$0xff] (!%p1311_p3)   ;;  %v4749_v60 = vld [vmem:[%s5660_s15 + $0xa8] ss:$20 sps:$4 sm:$0xff] (!%p1311_p3)  }
 0x339   : > { %3364 = vmatpush1.bf16.msra.mxu0 (!%p1311_p3), %v4730_v47  ;;  %3446 = vmatpush1.bf16.msra.mxu1 (!%p1311_p3), %v4731_v48  ;;  %v4744_v57 = vld [vmem:[%s5660_s15 + $0xa4] ss:$20 sps:$4 sm:$0xff] (!%p1311_p3)   ;;  %v4746_v58 = vld [vmem:[%s5660_s15 + $0xac] ss:$20 sps:$4 sm:$0xff] (!%p1311_p3)   ;;  %v4752_v62 = vld [vmem:[%s5660_s15 + $0xd4] ss:$20 sps:$4 sm:$0xff] (!%p1311_p3)  }
 0x33a   : > { %3365 = vmatprep.subr.bf16.mxu0 %v4732_v49  ;;  %3447 = vmatprep.subr.bf16.mxu1 %v4734_v50  ;;  %v4748_v59 = vld [vmem:[%s5660_s15 + $0xa0] ss:$20 sps:$4 sm:$0xff]   ;;  %v4754_v63 = vld [vmem:[%s5660_s15 + $0xc8] ss:$20 sps:$4 sm:$0xff]   ;;  %v4755_v0 = vld [vmem:[%s5660_s15 + $0xd0] ss:$20 sps:$4 sm:$0xff]  }
 0x33b   : > { %v4750_v61 = vld [vmem:[%s5660_s15 + $0xcc] ss:$20 sps:$4 sm:$0xff]   ;;  %v4756_v1 = vld [vmem:[%s5660_s15 + $0xf4] ss:$20 sps:$4 sm:$0xff]   ;;  %v4758_v2 = vld [vmem:[%s5660_s15 + $0xfc] ss:$20 sps:$4 sm:$0xff]  }
 0x33c   : > { %v4760_v3 = vld [vmem:[%s5660_s15 + $0xf0] ss:$20 sps:$4 sm:$0xff]   ;;  %v4761_v4 = vld [vmem:[%s5660_s15 + $0xf8] ss:$20 sps:$4 sm:$0xff]   ;;  %v4767_v8 = vld [vmem:[%s5660_s15 + $0x120] ss:$20 sps:$4 sm:$0xff]  }
 0x33d   : > { %3366 = vmatpush1.bf16.msra.mxu0 %v4736_v51  ;;  %3448 = vmatpush1.bf16.msra.mxu1 %v4737_v52  ;;  %v4762_v5 = vld [vmem:[%s5660_s15 + $0x11c] ss:$20 sps:$4 sm:$0xff]   ;;  %v4764_v6 = vld [vmem:[%s5660_s15 + $0x124] ss:$20 sps:$4 sm:$0xff]   ;;  %v4770_v10 = vld [vmem:[%s5660_s15 + $0x14c] ss:$20 sps:$4 sm:$0xff]  }
 0x33e   : > { %3367 = vmatprep.subr.bf16.mxu0 %v4738_v53  ;;  %3449 = vmatprep.subr.bf16.mxu1 %v4740_v54  ;;  %v4766_v7 = vld [vmem:[%s5660_s15 + $0x118] ss:$20 sps:$4 sm:$0xff]   ;;  %v4772_v11 = vld [vmem:[%s5660_s15 + $0x140] ss:$20 sps:$4 sm:$0xff]   ;;  %v4773_v12 = vld [vmem:[%s5660_s15 + $0x148] ss:$20 sps:$4 sm:$0xff]  }
 0x33f   : > { %v4768_v9 = vld [vmem:[%s5660_s15 + $0x144] ss:$20 sps:$4 sm:$0xff]   ;;  %v4774_v13 = vld [vmem:[%s5660_s15 + $0x16c] ss:$20 sps:$4 sm:$0xff]   ;;  %v4776_v14 = vld [vmem:[%s5660_s15 + $0x174] ss:$20 sps:$4 sm:$0xff]  }
 0x340   : > { %v4778_v15 = vld [vmem:[%s5660_s15 + $0x168] ss:$20 sps:$4 sm:$0xff]   ;;  %v4779_v16 = vld [vmem:[%s5660_s15 + $0x170] ss:$20 sps:$4 sm:$0xff]   ;;  %v4785_v20 = vld [vmem:[%s5660_s15 + $0x198] ss:$20 sps:$4 sm:$0xff]  }
 0x341   : > { %3368 = vmatpush1.bf16.msra.mxu0 %v4742_v55  ;;  %3450 = vmatpush1.bf16.msra.mxu1 %v4743_v56  ;;  %v4780_v17 = vld [vmem:[%s5660_s15 + $0x194] ss:$20 sps:$4 sm:$0xff]   ;;  %v4782_v18 = vld [vmem:[%s5660_s15 + $0x19c] ss:$20 sps:$4 sm:$0xff]   ;;  %v4788_v22 = vld [vmem:[%s5660_s15 + $0x1c4] ss:$20 sps:$4 sm:$0xff]  }
 0x342   : > { %3369 = vmatprep.subr.bf16.mxu0 %v4744_v57  ;;  %3451 = vmatprep.subr.bf16.mxu1 %v4746_v58  ;;  %v4784_v19 = vld [vmem:[%s5660_s15 + $0x190] ss:$20 sps:$4 sm:$0xff]   ;;  %v2303_v23 = vld [vmem:[#allocation3 + $0x8] sm:$0xff]  ;;  %v4791_v26 = vld [vmem:[%s5660_s15 + $0x1c0] ss:$20 sps:$4 sm:$0xff]  }
 0x343   : > { %v4786_v21 = vld [vmem:[%s5660_s15 + $0x1bc] ss:$20 sps:$4 sm:$0xff]   ;;  %v4790_v24 = vld [vmem:[%s5660_s15 + $0x1b8] ss:$20 sps:$4 sm:$0xff]   ;;  %v5764_v25 = vpack.c.bf16 %v2303_v23, %v2303_v23  ;;  %v4796_v29 = vld [vmem:[%s5660_s15 + $0x1e0] ss:$20 sps:$4 sm:$0xff]  }
 0x344   : > { %v4792_v27 = vld [vmem:[%s5660_s15 + $0x1e4] ss:$20 sps:$4 sm:$0xff]   ;;  %v4794_v28 = vld [vmem:[%s5660_s15 + $0x1ec] ss:$20 sps:$4 sm:$0xff]   ;;  %v4797_v30 = vld [vmem:[%s5660_s15 + $0x1e8] ss:$20 sps:$4 sm:$0xff]  }
 0x345   : > { %3370 = vmatpush1.bf16.msra.mxu0 %v4748_v59  ;;  %3452 = vmatpush1.bf16.msra.mxu1 %v4749_v60  ;;  %v4798_v31 = vld [vmem:[%s5660_s15 + $0x20c] ss:$20 sps:$4 sm:$0xff]   ;;  %v4800_v32 = vld [vmem:[%s5660_s15 + $0x214] ss:$20 sps:$4 sm:$0xff]   ;;  %v4803_v34 = vld [vmem:[%s5660_s15 + $0x210] ss:$20 sps:$4 sm:$0xff]  }
 0x346   : > { %3371 = vmatprep.subr.bf16.mxu0 %v4750_v61  ;;  %3453 = vmatprep.subr.bf16.mxu1 %v4752_v62  ;;  %v4802_v33 = vld [vmem:[%s5660_s15 + $0x208] ss:$20 sps:$4 sm:$0xff]   ;;  %v4808_v37 = vld [vmem:[%s5660_s15 + $0x230] ss:$20 sps:$4 sm:$0xff]   ;;  %v4809_v38 = vld [vmem:[%s5660_s15 + $0x238] ss:$20 sps:$4 sm:$0xff]  }
 0x347   : > { %3393 = vmatprep.mubr.bf16.mxu0 %v5764_v25  ;;  %3475 = vmatprep.mubr.bf16.mxu1 %v5764_v25  ;;  %v4804_v35 = vld [vmem:[%s5660_s15 + $0x234] ss:$20 sps:$4 sm:$0xff]   ;;  %v4806_v36 = vld [vmem:[%s5660_s15 + $0x23c] ss:$20 sps:$4 sm:$0xff]   ;;  %v4812_v40 = vld [vmem:[%s5660_s15 + $0x264] ss:$20 sps:$4 sm:$0xff]  }
 0x348   : > { %v4810_v39 = vld [vmem:[%s5660_s15 + $0x25c] ss:$20 sps:$4 sm:$0xff]   ;;  %v4814_v41 = vld [vmem:[%s5660_s15 + $0x258] ss:$20 sps:$4 sm:$0xff]   ;;  %v4815_v42 = vld [vmem:[%s5660_s15 + $0x260] ss:$20 sps:$4 sm:$0xff]  }
 0x349   : > { %3372 = vmatpush1.bf16.msra.mxu0 %v4754_v63  ;;  %3454 = vmatpush1.bf16.msra.mxu1 %v4755_v0  ;;  %v2302_v43 = vld [vmem:[#allocation3] sm:$0xff]  ;;  %v4819_v48 = vld [vmem:[%s5660_s15 + $0x288] ss:$20 sps:$4 sm:$0xff]   ;;  %v4831_v56 = vld [vmem:[%s5660_s15 + $0x2d8] ss:$20 sps:$4 sm:$0xff]  }
 0x34a   : > { %3373 = vmatprep.subr.bf16.mxu0 %v4756_v1  ;;  %3455 = vmatprep.subr.bf16.mxu1 %v4758_v2  ;;  %v4818_v44 = vld [vmem:[%s5660_s15 + $0x284] ss:$20 sps:$4 sm:$0xff]   ;;  %v4821_v45 = vld [vmem:[%s5660_s15 + $0x28c] ss:$20 sps:$4 sm:$0xff]   ;;  %v5787_v46 = vpack.c.bf16 %v2302_v43, %v2302_v43  ;;  %v4827_v50 = vld [vmem:[%s5660_s15 + $0x2b4] ss:$20 sps:$4 sm:$0xff]  }
 0x34b   : > { %v4816_v47 = vld [vmem:[%s5660_s15 + $0x280] ss:$20 sps:$4 sm:$0xff]   ;;  %v4822_v51 = vld [vmem:[%s5660_s15 + $0x2a8] ss:$20 sps:$4 sm:$0xff]   ;;  %v4825_v52 = vld [vmem:[%s5660_s15 + $0x2b0] ss:$20 sps:$4 sm:$0xff]  }
 0x34c   : > { %v4824_v49 = vld [vmem:[%s5660_s15 + $0x2ac] ss:$20 sps:$4 sm:$0xff]   ;;  %v4830_v53 = vld [vmem:[%s5660_s15 + $0x2d4] ss:$20 sps:$4 sm:$0xff]   ;;  %v4833_v54 = vld [vmem:[%s5660_s15 + $0x2dc] ss:$20 sps:$4 sm:$0xff]  }
 0x34d   : > { %3374 = vmatpush1.bf16.msra.mxu0 %v4760_v3  ;;  %3456 = vmatpush1.bf16.msra.mxu1 %v4761_v4  ;;  %v4828_v55 = vld [vmem:[%s5660_s15 + $0x2d0] ss:$20 sps:$4 sm:$0xff]   ;;  %v4834_v59 = vld [vmem:[%s5660_s15 + $0x2f8] ss:$20 sps:$4 sm:$0xff]   ;;  %v4837_v60 = vld [vmem:[%s5660_s15 + $0x300] ss:$20 sps:$4 sm:$0xff]  }
 0x34e   : > { %3375 = vmatprep.subr.bf16.mxu0 %v4762_v5  ;;  %3457 = vmatprep.subr.bf16.mxu1 %v4764_v6  ;;  %v4836_v57 = vld [vmem:[%s5660_s15 + $0x2fc] ss:$20 sps:$4 sm:$0xff]   ;;  %v4839_v58 = vld [vmem:[%s5660_s15 + $0x304] ss:$20 sps:$4 sm:$0xff]   ;;  %v4845_v62 = vld [vmem:[%s5660_s15 + $0x32c] ss:$20 sps:$4 sm:$0xff]  }
 0x34f   : > { %v4842_v61 = vld [vmem:[%s5660_s15 + $0x324] ss:$20 sps:$4 sm:$0xff]   ;;  %v4840_v63 = vld [vmem:[%s5660_s15 + $0x320] ss:$20 sps:$4 sm:$0xff]   ;;  %v4843_v0 = vld [vmem:[%s5660_s15 + $0x328] ss:$20 sps:$4 sm:$0xff]  }
 0x350   : > { %v4848_v1 = vld [vmem:[%s5660_s15 + $0x34c] ss:$20 sps:$4 sm:$0xff]   ;;  %v4851_v2 = vld [vmem:[%s5660_s15 + $0x354] ss:$20 sps:$4 sm:$0xff]   ;;  %v4849_v4 = vld [vmem:[%s5660_s15 + $0x350] ss:$20 sps:$4 sm:$0xff]  }
 0x351   : > { %3376 = vmatpush1.bf16.msra.mxu0 %v4766_v7  ;;  %3458 = vmatpush1.bf16.msra.mxu1 %v4767_v8  ;;  %v4846_v3 = vld [vmem:[%s5660_s15 + $0x348] ss:$20 sps:$4 sm:$0xff]   ;;  %v4852_v7 = vld [vmem:[%s5660_s15 + $0x370] ss:$20 sps:$4 sm:$0xff]   ;;  %v4903_v43 = vld [vmem:[%s5660_s15 + $0x4b8] ss:$20 sps:$4 sm:$0xff]  }
 0x352   : > { %3377 = vmatprep.subr.bf16.mxu0 %v4768_v9  ;;  %3459 = vmatprep.subr.bf16.mxu1 %v4770_v10  ;;  %v4854_v5 = vld [vmem:[%s5660_s15 + $0x374] ss:$20 sps:$4 sm:$0xff]   ;;  %v4857_v6 = vld [vmem:[%s5660_s15 + $0x37c] ss:$20 sps:$4 sm:$0xff]   ;;  %v4855_v9 = vld [vmem:[%s5660_s15 + $0x378] ss:$20 sps:$4 sm:$0xff]  }
 0x353   : > { %v2305_v8 = vld [vmem:[#allocation3 + $0x18] sm:$0xff]  ;;  %v4878_v23 = vld [vmem:[%s5660_s15 + $0x414] ss:$20 sps:$4 sm:$0xff]  }
 0x354   : > { %v5817_v10 = vpack.c.bf16 %v2305_v8, %v2305_v8  ;;  %v4934_v8 = vld [vmem:[%s5660_s15 + $0xd8] ss:$20 sps:$4 sm:$0xff]  }
 0x355   : > { %3378 = vmatpush1.bf16.msra.mxu0 %v4772_v11  ;;  %3460 = vmatpush1.bf16.msra.mxu1 %v4773_v12  ;;  %v4860_v11 = vld [vmem:[%s5660_s15 + $0x39c] ss:$20 sps:$4 sm:$0xff]   ;;  %v4863_v12 = vld [vmem:[%s5660_s15 + $0x3a4] ss:$20 sps:$4 sm:$0xff]  }
 0x356   : > { %3379 = vmatprep.subr.bf16.mxu0 %v4774_v13  ;;  %3461 = vmatprep.subr.bf16.mxu1 %v4776_v14  ;;  %v4858_v13 = vld [vmem:[%s5660_s15 + $0x398] ss:$20 sps:$4 sm:$0xff]   ;;  %v4861_v14 = vld [vmem:[%s5660_s15 + $0x3a0] ss:$20 sps:$4 sm:$0xff]  }
 0x359   : > { %3380 = vmatpush1.bf16.msra.mxu0 %v4778_v15  ;;  %3462 = vmatpush1.bf16.msra.mxu1 %v4779_v16  ;;  %v4866_v15 = vld [vmem:[%s5660_s15 + $0x3c4] ss:$20 sps:$4 sm:$0xff]   ;;  %v4869_v16 = vld [vmem:[%s5660_s15 + $0x3cc] ss:$20 sps:$4 sm:$0xff]  }
 0x35a   : > { %3381 = vmatprep.subr.bf16.mxu0 %v4780_v17  ;;  %3463 = vmatprep.subr.bf16.mxu1 %v4782_v18  ;;  %v4864_v17 = vld [vmem:[%s5660_s15 + $0x3c0] ss:$20 sps:$4 sm:$0xff]   ;;  %v4867_v18 = vld [vmem:[%s5660_s15 + $0x3c8] ss:$20 sps:$4 sm:$0xff]  }
 0x35d   : > { %3382 = vmatpush1.bf16.msra.mxu0 %v4784_v19  ;;  %3464 = vmatpush1.bf16.msra.mxu1 %v4785_v20  ;;  %v4872_v19 = vld [vmem:[%s5660_s15 + $0x3ec] ss:$20 sps:$4 sm:$0xff]   ;;  %v4875_v20 = vld [vmem:[%s5660_s15 + $0x3f4] ss:$20 sps:$4 sm:$0xff]  }
 0x35e   : > { %3383 = vmatprep.subr.bf16.mxu0 %v4786_v21  ;;  %3465 = vmatprep.subr.bf16.mxu1 %v4788_v22  ;;  %v4870_v21 = vld [vmem:[%s5660_s15 + $0x3e8] ss:$20 sps:$4 sm:$0xff]   ;;  %v4873_v22 = vld [vmem:[%s5660_s15 + $0x3f0] ss:$20 sps:$4 sm:$0xff]  }
 0x361   : > { %3384 = vmatpush1.bf16.msra.mxu0 %v4790_v24  ;;  %3466 = vmatpush1.bf16.msra.mxu1 %v4791_v26  ;;  %v4881_v24 = vld [vmem:[%s5660_s15 + $0x41c] ss:$20 sps:$4 sm:$0xff]  }
 0x362   : > { %3385 = vmatprep.subr.bf16.mxu0 %v4792_v27  ;;  %3467 = vmatprep.subr.bf16.mxu1 %v4794_v28  ;;  %v4876_v26 = vld [vmem:[%s5660_s15 + $0x410] ss:$20 sps:$4 sm:$0xff]   ;;  %v4879_v27 = vld [vmem:[%s5660_s15 + $0x418] ss:$20 sps:$4 sm:$0xff]  }
 0x363   : > { %v4884_v28 = vld [vmem:[%s5660_s15 + $0x43c] ss:$20 sps:$4 sm:$0xff]  }
 0x365   : > { %3386 = vmatpush1.bf16.msra.mxu0 %v4796_v29  ;;  %3468 = vmatpush1.bf16.msra.mxu1 %v4797_v30  ;;  %v4887_v29 = vld [vmem:[%s5660_s15 + $0x444] ss:$20 sps:$4 sm:$0xff]  }
 0x366   : > { %3387 = vmatprep.subr.bf16.mxu0 %v4798_v31  ;;  %3469 = vmatprep.subr.bf16.mxu1 %v4800_v32  ;;  %v4882_v30 = vld [vmem:[%s5660_s15 + $0x438] ss:$20 sps:$4 sm:$0xff]   ;;  %v4885_v31 = vld [vmem:[%s5660_s15 + $0x440] ss:$20 sps:$4 sm:$0xff]  }
 0x367   : > { %v4890_v32 = vld [vmem:[%s5660_s15 + $0x464] ss:$20 sps:$4 sm:$0xff]  }
 0x369   : > { %3388 = vmatpush1.bf16.msra.mxu0 %v4802_v33  ;;  %3470 = vmatpush1.bf16.msra.mxu1 %v4803_v34  ;;  %v4893_v33 = vld [vmem:[%s5660_s15 + $0x46c] ss:$20 sps:$4 sm:$0xff]  }
 0x36a   : > { %3389 = vmatprep.subr.bf16.mxu0 %v4804_v35  ;;  %3471 = vmatprep.subr.bf16.mxu1 %v4806_v36  ;;  %v4888_v34 = vld [vmem:[%s5660_s15 + $0x460] ss:$20 sps:$4 sm:$0xff]   ;;  %v4891_v35 = vld [vmem:[%s5660_s15 + $0x468] ss:$20 sps:$4 sm:$0xff]  }
 0x36b   : > { %v4896_v36 = vld [vmem:[%s5660_s15 + $0x48c] ss:$20 sps:$4 sm:$0xff]  }
 0x36d   : > { %3390 = vmatpush1.bf16.msra.mxu0 %v4808_v37  ;;  %3472 = vmatpush1.bf16.msra.mxu1 %v4809_v38  ;;  %v4899_v37 = vld [vmem:[%s5660_s15 + $0x494] ss:$20 sps:$4 sm:$0xff]  }
 0x36e   : > { %3391 = vmatprep.subr.bf16.mxu0 %v4810_v39  ;;  %3473 = vmatprep.subr.bf16.mxu1 %v4812_v40  ;;  %v4894_v38 = vld [vmem:[%s5660_s15 + $0x488] ss:$20 sps:$4 sm:$0xff]   ;;  %v4897_v39 = vld [vmem:[%s5660_s15 + $0x490] ss:$20 sps:$4 sm:$0xff]  }
 0x36f   : > { %v4902_v40 = vld [vmem:[%s5660_s15 + $0x4b4] ss:$20 sps:$4 sm:$0xff]  }
 0x371   : > { %3392 = vmatpush1.bf16.msra.mxu0 %v4814_v41  ;;  %3474 = vmatpush1.bf16.msra.mxu1 %v4815_v42  ;;  %v4905_v41 = vld [vmem:[%s5660_s15 + $0x4bc] ss:$20 sps:$4 sm:$0xff]  }
 0x372   : > { %3402 = vmatprep.subr.bf16.mxu0 %v4818_v44  ;;  %3484 = vmatprep.subr.bf16.mxu1 %v4821_v45  ;;  %v4900_v42 = vld [vmem:[%s5660_s15 + $0x4b0] ss:$20 sps:$4 sm:$0xff]  }
 0x373   : > { %v4908_v44 = vld [vmem:[%s5660_s15 + $0x4dc] ss:$20 sps:$4 sm:$0xff]   ;;  %v4911_v45 = vld [vmem:[%s5660_s15 + $0x4e4] ss:$20 sps:$4 sm:$0xff]  }
 0x374   : > { %3394 = vmatmul.mubr.bf16.vlgmr.msra.gmra.mrb[0].mxu0 %v5787_v46  ;;  %3476 = vmatmul.mubr.bf16.vlgmr.msra.gmra.mrb[0].mxu1 %v5787_v46 }
 0x375   : > { %3403 = vmatpush1.bf16.msra.mxu0 %v4816_v47  ;;  %3485 = vmatpush1.bf16.msra.mxu1 %v4819_v48  ;;  %v4906_v47 = vld [vmem:[%s5660_s15 + $0x4d8] ss:$20 sps:$4 sm:$0xff]   ;;  %v4909_v48 = vld [vmem:[%s5660_s15 + $0x4e0] ss:$20 sps:$4 sm:$0xff]  }
 0x376   : > { %3404 = vmatprep.subr.bf16.mxu0 %v4824_v49  ;;  %3486 = vmatprep.subr.bf16.mxu1 %v4827_v50  ;;  %v2304_v49 = vld [vmem:[#allocation3 + $0x10] sm:$0xff] }
 0x377   : > { %3434 = vmatprep.mubr.bf16.mxu0 %v5817_v10  ;;  %3516 = vmatprep.mubr.bf16.mxu1 %v5817_v10  ;;  %v4912_v50 = vld [vmem:[%s5660_s15 + $0x150] ss:$20 sps:$4 sm:$0xff]  }
 0x379   : > { %3405 = vmatpush1.bf16.msra.mxu0 %v4822_v51  ;;  %3487 = vmatpush1.bf16.msra.mxu1 %v4825_v52  ;;  %v4913_v51 = vld [vmem:[%s5660_s15 + $0x3d0] ss:$20 sps:$4 sm:$0xff]   ;;  %v5859_v52 = vpack.c.bf16 %v2304_v49, %v2304_v49 }
 0x37a   : > { %3406 = vmatprep.subr.bf16.mxu0 %v4830_v53  ;;  %3488 = vmatprep.subr.bf16.mxu1 %v4833_v54  ;;  %v4914_v53 = vld [vmem:[%s5660_s15 + $0x10] ss:$20 sps:$4 sm:$0xff]  }
 0x37b   : > { %v4915_v54 = vld [vmem:[%s5660_s15 + $0x290] ss:$20 sps:$4 sm:$0xff]  }
 0x37d   : > { %3407 = vmatpush1.bf16.msra.mxu0 %v4828_v55  ;;  %3489 = vmatpush1.bf16.msra.mxu1 %v4831_v56  ;;  %v4916_v55 = vld [vmem:[%s5660_s15 + $0x178] ss:$20 sps:$4 sm:$0xff]  }
 0x37e   : > { %3408 = vmatprep.subr.bf16.mxu0 %v4836_v57  ;;  %3490 = vmatprep.subr.bf16.mxu1 %v4839_v58  ;;  %v4917_v56 = vld [vmem:[%s5660_s15 + $0x3f8] ss:$20 sps:$4 sm:$0xff]  }
 0x37f   : > { %v4918_v57 = vld [vmem:[%s5660_s15 + $0x38] ss:$20 sps:$4 sm:$0xff]  }
 0x380   : > { %v4919_v58 = vld [vmem:[%s5660_s15 + $0x2b8] ss:$20 sps:$4 sm:$0xff]  }
 0x381   : > { %3409 = vmatpush1.bf16.msra.mxu0 %v4834_v59  ;;  %3491 = vmatpush1.bf16.msra.mxu1 %v4837_v60  ;;  %v4920_v59 = vld [vmem:[%s5660_s15 + $0x1a0] ss:$20 sps:$4 sm:$0xff]  }
 0x382   : > { %3410 = vmatprep.subr.bf16.mxu0 %v4842_v61  ;;  %3492 = vmatprep.subr.bf16.mxu1 %v4845_v62  ;;  %v4921_v60 = vld [vmem:[%s5660_s15 + $0x420] ss:$20 sps:$4 sm:$0xff]  }
 0x383   : > { %v4922_v61 = vld [vmem:[%s5660_s15 + $0x60] ss:$20 sps:$4 sm:$0xff]  }
 0x384   : > { %v4923_v62 = vld [vmem:[%s5660_s15 + $0x2e0] ss:$20 sps:$4 sm:$0xff]  }
 0x385   : > { %3411 = vmatpush1.bf16.msra.mxu0 %v4840_v63  ;;  %3493 = vmatpush1.bf16.msra.mxu1 %v4843_v0  ;;  %v4924_v63 = vld [vmem:[%s5660_s15 + $0x1c8] ss:$20 sps:$4 sm:$0xff]  }
 0x386   : > { %3412 = vmatprep.subr.bf16.mxu0 %v4848_v1  ;;  %3494 = vmatprep.subr.bf16.mxu1 %v4851_v2  ;;  %v4925_v0 = vld [vmem:[%s5660_s15 + $0x448] ss:$20 sps:$4 sm:$0xff]   ;;  %v4928_v2 = vld [vmem:[%s5660_s15 + $0x1f0] ss:$20 sps:$4 sm:$0xff]  }
 0x387   : > { %v4926_v1 = vld [vmem:[%s5660_s15 + $0x88] ss:$20 sps:$4 sm:$0xff]  }
 0x389   : > { %3413 = vmatpush1.bf16.msra.mxu0 %v4846_v3  ;;  %3495 = vmatpush1.bf16.msra.mxu1 %v4849_v4  ;;  %v4929_v3 = vld [vmem:[%s5660_s15 + $0x470] ss:$20 sps:$4 sm:$0xff]  }
 0x38a   : > { %3414 = vmatprep.subr.bf16.mxu0 %v4854_v5  ;;  %3496 = vmatprep.subr.bf16.mxu1 %v4857_v6  ;;  %v4930_v4 = vld [vmem:[%s5660_s15 + $0xb0] ss:$20 sps:$4 sm:$0xff]   ;;  %v4932_v6 = vld [vmem:[%s5660_s15 + $0x218] ss:$20 sps:$4 sm:$0xff]  }
 0x38b   : > { %v4931_v5 = vld [vmem:[%s5660_s15 + $0x330] ss:$20 sps:$4 sm:$0xff]  }
 0x38d   : > { %3415 = vmatpush1.bf16.msra.mxu0 %v4852_v7  ;;  %3497 = vmatpush1.bf16.msra.mxu1 %v4855_v9  ;;  %v4933_v7 = vld [vmem:[%s5660_s15 + $0x498] ss:$20 sps:$4 sm:$0xff]  }
 0x38e   : > { %3416 = vmatprep.subr.bf16.mxu0 %v4860_v11  ;;  %3498 = vmatprep.subr.bf16.mxu1 %v4863_v12  ;;  %v4935_v9 = vld [vmem:[%s5660_s15 + $0x358] ss:$20 sps:$4 sm:$0xff]   ;;  %v4937_v11 = vld [vmem:[%s5660_s15 + $0x4c0] ss:$20 sps:$4 sm:$0xff]  }
 0x38f   : > { %v4938_v12 = vld [vmem:[%s5660_s15 + $0x100] ss:$20 sps:$4 sm:$0xff]  }
 0x391   : > { %3417 = vmatpush1.bf16.msra.mxu0 %v4858_v13  ;;  %3499 = vmatpush1.bf16.msra.mxu1 %v4861_v14  ;;  %v4939_v13 = vld [vmem:[%s5660_s15 + $0x380] ss:$20 sps:$4 sm:$0xff]   ;;  %v4940_v14 = vld [vmem:[%s5660_s15 + $0x268] ss:$20 sps:$4 sm:$0xff]  }
 0x392   : > { %3418 = vmatprep.subr.bf16.mxu0 %v4866_v15  ;;  %3500 = vmatprep.subr.bf16.mxu1 %v4869_v16  ;;  %v4941_v15 = vld [vmem:[%s5660_s15 + $0x4e8] ss:$20 sps:$4 sm:$0xff]  }
 0x393   : > { %v4942_v16 = vld [vmem:[%s5660_s15 + $0x128] ss:$20 sps:$4 sm:$0xff]  }
 0x395   : > { %3419 = vmatpush1.bf16.msra.mxu0 %v4864_v17  ;;  %3501 = vmatpush1.bf16.msra.mxu1 %v4867_v18  ;;  %v4943_v17 = vld [vmem:[%s5660_s15 + $0x3a8] ss:$20 sps:$4 sm:$0xff]   ;;  %v2504_v18 = vlaneseq }
 0x396   : > { %3420 = vmatprep.subr.bf16.mxu0 %v4872_v19  ;;  %3502 = vmatprep.subr.bf16.mxu1 %v4875_v20 }
 0x397   : > { %v2505_v19 = vshrl.u32 %v2504_v18, 7 }
 0x399   : > { %3421 = vmatpush1.bf16.msra.mxu0 %v4870_v21  ;;  %3503 = vmatpush1.bf16.msra.mxu1 %v4873_v22  ;;  %v2506_v20 = vsub.s32 0, %v2505_v19  ;;  %v2514_v21 = vsub.s32 2, %v2505_v19  ;;  %v2502_v22 = vld [vmem:[%s965_s23] sm:$0x1f] }
 0x39a   : > { %3422 = vmatprep.subr.bf16.mxu0 %v4878_v23  ;;  %3504 = vmatprep.subr.bf16.mxu1 %v4881_v24  ;;  %v2510_v23 = vsub.s32 1, %v2505_v19  ;;  %v2518_v24 = vsub.s32 3, %v2505_v19 }
 0x39d   : > { %3423 = vmatpush1.bf16.msra.mxu0 %v4876_v26  ;;  %3505 = vmatpush1.bf16.msra.mxu1 %v4879_v27  ;;  %v2507_v26 = vrot.slane %v2502_v22, %v2506_v20  ;;  %v2515_v27 = vrot.slane %v2502_v22, %v2514_v21 }
 0x39e   : > { %3424 = vmatprep.subr.bf16.mxu0 %v4884_v28  ;;  %3506 = vmatprep.subr.bf16.mxu1 %v4887_v29  ;;  %v2511_v28 = vrot.slane %v2502_v22, %v2510_v23 }
 0x3a1   : > { %3425 = vmatpush1.bf16.msra.mxu0 %v4882_v30  ;;  %3507 = vmatpush1.bf16.msra.mxu1 %v4885_v31 }
 0x3a2   : > { %3426 = vmatprep.subr.bf16.mxu0 %v4890_v32  ;;  %3508 = vmatprep.subr.bf16.mxu1 %v4893_v33 }
 0x3a5   : > { %3427 = vmatpush1.bf16.msra.mxu0 %v4888_v34  ;;  %3509 = vmatpush1.bf16.msra.mxu1 %v4891_v35 }
 0x3a6   : > { %3428 = vmatprep.subr.bf16.mxu0 %v4896_v36  ;;  %3510 = vmatprep.subr.bf16.mxu1 %v4899_v37 }
 0x3a9   : > { %3429 = vmatpush1.bf16.msra.mxu0 %v4894_v38  ;;  %3511 = vmatpush1.bf16.msra.mxu1 %v4897_v39 }
 0x3aa   : > { %3430 = vmatprep.subr.bf16.mxu0 %v4902_v40  ;;  %3512 = vmatprep.subr.bf16.mxu1 %v4905_v41  ;;  %v2522_v41 = vsub.s32 4, %v2505_v19 }
 0x3ad   : > { %3431 = vmatpush1.bf16.msra.mxu0 %v4900_v42  ;;  %3513 = vmatpush1.bf16.msra.mxu1 %v4903_v43 }
 0x3ae   : > { %3432 = vmatprep.subr.bf16.mxu0 %v4908_v44  ;;  %3514 = vmatprep.subr.bf16.mxu1 %v4911_v45  ;;  %v2523_v44 = vrot.slane %v2502_v22, %v2522_v41 }
 0x3b1   : > { %3433 = vmatpush1.bf16.msra.mxu0 %v4906_v47  ;;  %3515 = vmatpush1.bf16.msra.mxu1 %v4909_v48 }
 0x3b2   : > { %4354 = vmatprep.subr.bf16.mxu0 %v4912_v50  ;;  %4376 = vmatprep.subr.bf16.mxu1 %v4913_v51 }
 0x3b4   : > { %3435 = vmatmul.mubr.bf16.vlgmr.msra.gmra.mrb[0].mxu0 %v5859_v52  ;;  %3517 = vmatmul.mubr.bf16.vlgmr.msra.gmra.mrb[0].mxu1 %v5859_v52 }
 0x3b5   : > { %4355 = vmatpush3.bf16.msra.mxu0 %v4914_v53  ;;  %4377 = vmatpush3.bf16.msra.mxu1 %v4915_v54 }
 0x3b6   : > { %4356 = vmatprep.subr.bf16.mxu0 %v4916_v55  ;;  %4378 = vmatprep.subr.bf16.mxu1 %v4917_v56 }
 0x3b7   : > { %3557 = vmatprep.mubr.bf16.mxu0 %v5764_v25  ;;  %3597 = vmatprep.mubr.bf16.mxu1 %v5817_v10  ;;  %v4927_v25 = vld [vmem:[%s5660_s15 + $0x308] ss:$20 sps:$4 sm:$0xff]   ;;  %v4936_v10 = vld [vmem:[%s5660_s15 + $0x240] ss:$20 sps:$4 sm:$0xff]  }
 0x3b9   : > { %4357 = vmatpush3.bf16.msra.mxu0 %v4918_v57  ;;  %4379 = vmatpush3.bf16.msra.mxu1 %v4919_v58 }
 0x3ba   : > { %4358 = vmatprep.subr.bf16.mxu0 %v4920_v59  ;;  %4380 = vmatprep.subr.bf16.mxu1 %v4921_v60 }
 0x3bd   : > { %4359 = vmatpush3.bf16.msra.mxu0 %v4922_v61  ;;  %4381 = vmatpush3.bf16.msra.mxu1 %v4923_v62 }
 0x3be   : > { %4360 = vmatprep.subr.bf16.mxu0 %v4924_v63  ;;  %4382 = vmatprep.subr.bf16.mxu1 %v4925_v0 }
 0x3c1   : > { %4361 = vmatpush3.bf16.msra.mxu0 %v4926_v1  ;;  %4383 = vmatpush3.bf16.msra.mxu1 %v4927_v25 }
 0x3c2   : > { %4362 = vmatprep.subr.bf16.mxu0 %v4928_v2  ;;  %4384 = vmatprep.subr.bf16.mxu1 %v4929_v3 }
 0x3c5   : > { %4363 = vmatpush3.bf16.msra.mxu0 %v4930_v4  ;;  %4385 = vmatpush3.bf16.msra.mxu1 %v4931_v5 }
 0x3c6   : > { %4364 = vmatprep.subr.bf16.mxu0 %v4932_v6  ;;  %4386 = vmatprep.subr.bf16.mxu1 %v4933_v7 }
 0x3c9   : > { %4365 = vmatpush3.bf16.msra.mxu0 %v4934_v8  ;;  %4387 = vmatpush3.bf16.msra.mxu1 %v4935_v9 }
 0x3ca   : > { %4366 = vmatprep.subr.bf16.mxu0 %v4936_v10  ;;  %4388 = vmatprep.subr.bf16.mxu1 %v4937_v11 }
 0x3cd   : > { %4367 = vmatpush3.bf16.msra.mxu0 %v4938_v12  ;;  %4389 = vmatpush3.bf16.msra.mxu1 %v4939_v13 }
 0x3ce   : > { %4368 = vmatprep.subr.bf16.mxu0 %v4940_v14  ;;  %4390 = vmatprep.subr.bf16.mxu1 %v4941_v15 }
 0x3d1   : > { %4369 = vmatpush3.bf16.msra.mxu0 %v4942_v16  ;;  %4391 = vmatpush3.bf16.msra.mxu1 %v4943_v17 }
 0x3d4   : > { %3558 = vmatmul.mubr.bf16.vlgmr.msra.gmra.mrb[4].mxu0 %v5787_v46  ;;  %3598 = vmatmul.mubr.bf16.vlgmr.msra.gmra.mrb[4].mxu1 %v5859_v52  ;;  %v2519_v46 = vrot.slane %v2502_v22, %v2518_v24 }
 0x487   : > { %v3436_v29 = vpop.f32.mrb[0].mxu0  ;;  %v3518_v30 = vpop.f32.mrb[0].mxu1 }
 0x488   : > { %v4410_v31 = vadd.f32 %v3436_v29, %v2507_v26  ;;  %v4412_v32 = vadd.f32 %v3518_v30, %v2515_v27  ;;  %v3438_v33 = vpop.f32.mrb[1].mxu0  ;;  %v3520_v34 = vpop.f32.mrb[1].mxu1 }
 0x489   : > { %v4411_v35 = vadd.f32 %v3438_v33, %v2511_v28  ;;  %v4413_v36 = vadd.f32 %v3520_v34, %v2519_v46  ;;  %v3440_v37 = vpop.f32.mrb[2].mxu0  ;;  %v3522_v38 = vpop.f32.mrb[2].mxu1 }
 0x48a   : > { %3605 = vst [vmem:[%s5658_s18] sm:$0xff] %v4410_v31  ;;  %3607 = vst [vmem:[%s5658_s18 + $0x10] sm:$0xff] %v4412_v32  ;;  %v3441_v39 = vpop.f32.mrb[3].mxu0  ;;  %v3523_v40 = vpop.f32.mrb[3].mxu1 }
 0x48b   : > { %3606 = vst [vmem:[%s5658_s18 + $0x8] sm:$0xff] %v4411_v35  ;;  %3608 = vst [vmem:[%s5658_s18 + $0x18] sm:$0xff] %v4413_v36 }
 0x4a7   : > { %v4370_v42 = vpop.f32.mrb[4].mxu0  ;;  %v4392_v43 = vpop.f32.mrb[4].mxu1 }
 0x4a8   : > { %v4371_v45 = vpop.f32.mrb[5].mxu0  ;;  %v4393_v47 = vpop.f32.mrb[5].mxu1 }
 0x4a9   : > { %v4372_v48 = vadd.f32 %v4371_v45, %v4370_v42  ;;  %v4394_v49 = vadd.f32 %v4393_v47, %v4392_v43  ;;  %v4373_v50 = vpop.f32.mrb[6].mxu0  ;;  %v4395_v51 = vpop.f32.mrb[6].mxu1 }
 0x4aa   : > { %v4374_v52 = vpop.f32.mrb[7].mxu0  ;;  %v4396_v53 = vpop.f32.mrb[7].mxu1 }
 0x4ab   : > { %v3560_v54 = vadd.f32 %v4372_v48, %v2523_v44 }
 0x4ad   : > { %v3600_v55 = vadd.f32 %v4394_v49, %v3560_v54 }
 0x4af   : > { %3609 = vst [vmem:[%s5658_s18 + $0x20] sm:$0xff] %v3600_v55 }
 0x4b0 PF: > { %s5953_s1 = sld [smem:[#allocation13_spill]]  ;;  %s5954_s21 = sld [smem:[#allocation11_spill]] }
 0x4b1   : > { %s5955_s28 = sld [smem:[#allocation12_spill]]  ;;  %p20_p0 = scmp.ge.s32.totalorder %s5131_s8, 8  }
 0x4b2   : > { %s5956_s24 = smov %s5036_s25  ;;  %s5958_s26 = smov %s5044_s27 }
 0x4b3   : > { %s5960_s29 = smov %s5131_s8  ;;  %22 = sbr.rel (!%p20_p0) target bundleno = 8 (0x8), region = 164 }
 0x4b6   : > { %s5957_s25 = smov %s5953_s1  ;;  %s5959_s27 = smov %s5954_s21 }
 0x4ba   :  { %3647 = vsyncpa [#allocation5], 1 }
 0x4bb   :  { %3649 = vsyncpa [#allocation5 + $0x1], 1 }
 0x4bc   :  { %3650 = vsyncpa [#allocation7], 1 }
 0x4bd   :  { %3652 = vsyncpa [#allocation7 + $0x1], 1 }

// kernel: vae_dilo3_forward.7
= control target key start
LH: loop header
LB: loop body
LE: loop exit
PB: predicated region body
PF: predicated region fallthrough
CT: control target
= control target key end

     0   :  { %s4966_s0 = inlined_call_operand.vmem [shape: f32[8,256], index: 0, kind: input, shape index: {}]   ;;  %s4967_s1 = inlined_call_operand.hbm [shape: bf16[256,512], index: 1, kind: input, shape index: {}]   ;;  %s4968_s2 = inlined_call_operand.hbm [shape: f32[1,512], index: 2, kind: input, shape index: {}]   ;;  %s4969_s3 = inlined_call_operand.hbm [shape: bf16[512,512], index: 3, kind: input, shape index: {}]   ;;  %s4970_s4 = inlined_call_operand.hbm [shape: f32[1,512], index: 4, kind: input, shape index: {}]   ;;  %s4971_s5 = inlined_call_operand.hbm [shape: bf16[512,512], index: 5, kind: input, shape index: {}]   ;;  %s4972_s6 = inlined_call_operand.hbm [shape: f32[1,512], index: 6, kind: input, shape index: {}]   ;;  %s4973_s7 = inlined_call_operand.vmem [shape: f32[8,512], index: 7, kind: output, shape index: {}]  }
   0x1   :  { %4981 = sst [smem:[#allocation20_spill]] %s4967_s1 }
   0x2   :  { %4982 = sst [smem:[#allocation21_spill]] %s4968_s2 }
   0x3   :  { %4983 = sst [smem:[#allocation22_spill]] %s4970_s4 }
   0x4   :  { %12 = vsyncpa [#allocation5], 0 }
   0x5   :  { %14 = vsyncpa [#allocation5 + $0x1], 0 }
   0x6   :  { %15 = vsyncpa [#allocation7], 0 }
   0x7   :  { %17 = vsyncpa [#allocation7 + $0x1], 0 }
   0x8   :  { %18 = vsyncpa [#allocation10], 0 }
   0x9   :  { %20 = vsyncpa [#allocation10 + $0x1], 0 }
   0xa   :  { %21 = vsyncpa [#allocation13], 0 }
   0xb   :  { %23 = vsyncpa [#allocation13 + $0x1], 0  ;;  %s4583_s24 = smov 0   ;;  %s4585_s25 = smov 0  }
   0xc   :  { %s4587_s26 = smov 0   ;;  %s4589_s27 = smov 0  }
   0xd LB: > { %s4602_s28 = sadd.s32 4294967295, %s4533_s27   ;;  %s4605_s29 = sadd.s32 1, %s4533_s27   ;;  %s4533_s27 = sphi %s4589_s27, %s5010_s27   ;;  %s4529_s26 = sphi %s4587_s26, %s5009_s26   ;;  %s4525_s25 = sphi %s4585_s25, %s5008_s25   ;;  %s4521_s24 = sphi %s4583_s24, %s5007_s24  }
   0xe   : > { %p54_p0 = scmp.lt.s32.totalorder %s4533_s27, 0  ;;  %p56_p1 = scmp.lt.s32.totalorder %s4605_s29, 0 }
   0xf   : > { %s61_s30 = sadd.s32 1, %s4529_s26  ;;  %p68_p2 = scmp.ne.s32.totalorder %s4529_s26, %s4525_s25 }
  0x10   : > { %s4613_s8 = scalar_select %p54_p0, %s4533_s27, 0 }
  0x11   : > { %s57_s9 = scalar_select %p56_p1, %s4605_s29, 0 }
  0x12   : > { %p69_p3 = scmp.eq.s32.totalorder %s4533_s27, 0  ;;  %p74_p4 = scmp.ne.s32.totalorder %s4525_s25, %s4521_s24 }
  0x13   : > { %s58_s10 = ssub.s32 %s4613_s8, %s57_s9  ;;  %p4974_p5 = scmp.eq.s32.totalorder %s4602_s28, 0 }
  0x14   : > { %p59_p6 = scmp.eq.s32.totalorder %s58_s10, 0  ;;  %p70_p7 = por %p69_p3, %p68_p2 }
  0x15   : > { %p4624_p8 = por %p4974_p5, %p74_p4  ;;  %p3792_p9 = scmp.lt.s32.totalorder %s4533_s27, 3 }
  0x16   : > { %s4629_s12 = scalar_select %p59_p6, %s4529_s26, %s61_s30  }
  0x17   : > { %s4984_s11 = scalar_select %p4624_p8, 1, 0 }
  0x18   : > { %4985 = sst [smem:[#allocation19_spill]] %s4629_s12  ;;  %s4633_s13 = sand.u32 1, %s4529_s26  }
  0x19   : > { %s334_s15 = sand.u32 1, %s4533_s27   ;;  %p4637_p10 = pnand %p3792_p9, %p70_p7 }
  0x1a   : > { %s3350_s17 = sshll.u32 %s4633_s13, 2  ;;  %s3734_s18 = sshll.u32 %s4613_s8, 6 }
  0x1b   : > { %s4986_s16 = scalar_select %p4637_p10, 1, 0 }
  0x1c   : > { %s4987_s2 = sld [smem:[#allocation21_spill]]  ;;  %s338_s22 = scalar_lea.vmem [#allocation6], %s3350_s17 }
  0x1d   : > { %s348_s23 = sshll.u32 %s338_s22, 4  ;;  %p4652_p11 = pnand %p3792_p9, %p69_p3  ;;  %s4648_s23 = int_to_ptr.vmem [resolvable:$true] %s348_s23 }
  0x1e   : > { %s4658_s30 = scalar_lea.sflag [#allocation7], %s334_s15  ;;  %p4976_p13 = pneg %p4637_p10 }
  0x1f   : > { %s4988_s24 = scalar_select %p4652_p11, 1, 0 }
  0x22   : > { %s4646_s21 = scalar_lea.hbm %s4987_s2, %s3734_s18  ;;  %s4316_s18 = scalar_lea.hbm %s4987_s2, 64 }
  0x23   : > { %s4311_s9 = scalar_lea.hbm %s4646_s21, 64  ;;  %p4317_p2 = scmp.lt.u32.totalorder %s4646_s21, %s4987_s2 }
  0x24   : > { %p4312_p12 = scmp.ne.s32.totalorder %s4646_s21, %s4311_s9  ;;  %p4318_p3 = scmp.lt.u32.totalorder %s4316_s18, %s4311_s9 }
  0x25   : > { %p4320_p6 = scmp.lt.u32.totalorder %s4311_s9, %s4646_s21 }
  0x26   : > { %p4314_p0 = pnand %p4976_p13, %p4312_p12  ;;  %p4319_p4 = por %p4318_p3, %p4317_p2 }
  0x28   : > { %p4315_p1 = pneg %p4314_p0  ;;  %p4321_p7 = por %p4320_p6, %p4319_p4 }
  0x2a   : > { %p4322_p9 = pnand %p4321_p7, %p4315_p1 }
  0x2c   : > { %4325 = shalt.err (!%p4322_p9)
}
  0x2d   : > { %s4326_s22 = scalar_lea.vmem %s4648_s23, 64  ;;  %s4535_s10 = smov [#allocation6]  }
  0x2e   : > { %p4327_p12 = scmp.ne.s32.totalorder %s4648_s23, %s4326_s22  ;;  %s4331_s17 = sshll.u32 %s4535_s10, 4  ;;  %s4332_s17 = int_to_ptr.vmem [resolvable:$false] %s4331_s17 }
  0x2f   : > { %s4333_s19 = scalar_lea.vmem %s4332_s17, 128  ;;  %p4334_p8 = scmp.lt.s32.totalorder %s4648_s23, %s4332_s17 }
  0x30   : > { %p4329_p0 = pnand %p4327_p12, %p4976_p13  ;;  %p4335_p2 = scmp.lt.s32.totalorder %s4333_s19, %s4326_s22 }
  0x32   : > { %p4330_p5 = pneg %p4329_p0  ;;  %p4336_p3 = por %p4335_p2, %p4334_p8 }
  0x34   : > { %p4337_p4 = pnand %p4336_p3, %p4330_p5 }
  0x36   : > { %4340 = shalt.err (!%p4337_p4)
}
  0x37   : > { %3779 = dma.hbm_to_vmem [thread:$0]  (!%p4637_p10), %s4646_s21, 64, %s4648_s23, %s4658_s30  }
  0x38   : > { %p3389_p1 = scmp.ge.s32.totalorder %s4533_s27, 1  ;;  %p453_p6 = scmp.lt.s32.totalorder %s4533_s27, 4 }
  0x39   : > { %s4536_s18 = smov [#allocation9]   ;;  %s4694_s22 = scalar_lea.sflag [#allocation10], %s334_s15 }
  0x3a   : > { %p4688_p7 = pnand %p3389_p1, %p453_p6  ;;  %s398_s20 = sshll.u32 %s4536_s18, 4  ;;  %s399_s20 = int_to_ptr.vmem [resolvable:$true] %s398_s20 }
  0x3b   : > { %s4990_s4 = sld [smem:[#allocation22_spill]]  ;;  %p4704_p8 = pneg %p4652_p11 }
  0x3c   : > { %s4989_s9 = scalar_select %p4688_p7, 1, 0 }
  0x41   : > { %s4341_s19 = scalar_lea.hbm %s4990_s4, 64 }
  0x42   : > { %p4342_p5 = scmp.ne.s32.totalorder %s4990_s4, %s4341_s19  ;;  %p4348_p0 = scmp.lt.u32.totalorder %s4341_s19, %s4990_s4 }
  0x44   : > { %p4344_p9 = pnand %p4704_p8, %p4342_p5 }
  0x46   : > { %p4345_p12 = pneg %p4344_p9 }
  0x48   : > { %p4350_p2 = pnand %p4348_p0, %p4345_p12 }
  0x4a   : > { %4353 = shalt.err (!%p4350_p2)
}
  0x4b   : > { %s4354_s23 = scalar_lea.vmem %s399_s20, 64  ;;  %s4361_s2 = scalar_lea.vmem %s399_s20, 128 }
  0x4c   : > { %p4355_p3 = scmp.ne.s32.totalorder %s399_s20, %s4354_s23  ;;  %p4362_p6 = scmp.lt.s32.totalorder %s399_s20, %s399_s20 }
  0x4d   : > { %p4363_p13 = scmp.lt.s32.totalorder %s4361_s2, %s4354_s23 }
  0x4e   : > { %p4357_p4 = pnand %p4355_p3, %p4704_p8 }
  0x4f   : > { %p4364_p7 = por %p4363_p13, %p4362_p6 }
  0x50   : > { %p4358_p1 = pneg %p4357_p4 }
  0x52   : > { %p4365_p10 = pnand %p4364_p7, %p4358_p1 }
  0x54   : > { %4368 = shalt.err (!%p4365_p10)
}
  0x55   : > { %3785 = dma.hbm_to_vmem [thread:$0]  (!%p4652_p11), %s4990_s4, 64, %s399_s20, %s4694_s22  }
  0x56   : > { %s3733_s10 = sshll.u32 %s4613_s8, 8  ;;  %s4992_s17 = sshll.u32 %s4633_s13, 9 }
  0x57   : > { %s315_s19 = scalar_lea.vmem [#allocation4], %s4992_s17  ;;  %s4993_s1 = sld [smem:[#allocation20_spill]] }
  0x58   : > { %s324_s27 = sshll.u32 %s315_s19, 4  ;;  %s312_s14 = scalar_lea.sflag [#allocation5], %s4633_s13  ;;  %s4729_s27 = int_to_ptr.vmem [resolvable:$true] %s324_s27 }
  0x59   : > { %p4994_p13 = scmp.ne.s32.totalorder %s4986_s16, 0 }
  0x5b   : > { %p4995_p7 = pneg %p4994_p13 }
  0x5d   : > { %s4727_s2 = scalar_lea.hbm %s4993_s1, %s3733_s10  ;;  %s4374_s17 = scalar_lea.hbm %s4993_s1, 8192 }
  0x5e   : > { %s4369_s18 = scalar_lea.hbm %s4727_s2, 8192  ;;  %p4375_p12 = scmp.lt.u32.totalorder %s4727_s2, %s4993_s1 }
  0x5f   : > { %p4370_p10 = scmp.ne.s32.totalorder %s4727_s2, %s4369_s18  ;;  %p4376_p0 = scmp.lt.u32.totalorder %s4374_s17, %s4369_s18 }
  0x60   : > { %p4378_p3 = scmp.lt.u32.totalorder %s4369_s18, %s4727_s2 }
  0x61   : > { %p4372_p5 = pnand %p4370_p10, %p4995_p7  ;;  %p4377_p2 = por %p4376_p0, %p4375_p12 }
  0x63   : > { %p4373_p9 = pneg %p4372_p5  ;;  %p4379_p4 = por %p4378_p3, %p4377_p2 }
  0x65   : > { %p4380_p1 = pnand %p4379_p4, %p4373_p9 }
  0x67   : > { %4383 = shalt.err (!%p4380_p1)
}
  0x68   : > { %s4384_s15 = scalar_lea.vmem %s4729_s27, 8192  ;;  %p4996_p10 = pmov %p4995_p7 }
  0x69   : > { %p4385_p6 = scmp.ne.s32.totalorder %s4729_s27, %s4384_s15  ;;  %s4537_s23 = smov [#allocation4]  }
  0x6a   : > { %s4389_s8 = sshll.u32 %s4537_s23, 4  ;;  %s4390_s8 = int_to_ptr.vmem [resolvable:$false] %s4389_s8 }
  0x6b   : > { %p4387_p7 = pnand %p4385_p6, %p4996_p10  ;;  %s4391_s20 = scalar_lea.vmem %s4390_s8, 16384 }
  0x6c   : > { %p4392_p11 = scmp.lt.s32.totalorder %s4729_s27, %s4390_s8  ;;  %p4393_p12 = scmp.lt.s32.totalorder %s4391_s20, %s4384_s15 }
  0x6d   : > { %p4388_p5 = pneg %p4387_p7 }
  0x6e   : > { %p4394_p0 = por %p4393_p12, %p4392_p11 }
  0x70   : > { %p4395_p2 = pnand %p4394_p0, %p4388_p5 }
  0x72   : > { %4398 = shalt.err (!%p4395_p2)
}
  0x73   : > { %s4538_s18 = smov 256   ;;  %s4539_s17 = smov 16  }
  0x74   : > { %3776 = dma.hbm_to_vmem [thread:$0]  (!%p4994_p13), %s4727_s2, 8192, %s4729_s27, %s312_s14, %s4538_s18, %s4538_s18, %s4539_s17  }
  0x75   : > { %s4540_s19 = smov [#allocation8]   ;;  %s4541_s23 = smov [#allocation11]  }
  0x76   : > { %s371_s10 = sshll.u32 %s4540_s19, 4  ;;  %s421_s15 = sshll.u32 %s4541_s23, 4  ;;  %s372_s10 = int_to_ptr.vmem [resolvable:$true] %s371_s10  ;;  %s4760_s15 = int_to_ptr.vmem [resolvable:$true] %s421_s15 }
  0x77   : > { %s4399_s1 = scalar_lea.hbm %s4969_s3, 16384 }
  0x78   : > { %p4400_p11 = scmp.ne.s32.totalorder %s4969_s3, %s4399_s1  ;;  %p4406_p13 = scmp.lt.u32.totalorder %s4399_s1, %s4969_s3 }
  0x7a   : > { %p4402_p9 = pnand %p4400_p11, %p4704_p8 }
  0x7c   : > { %p4403_p3 = pneg %p4402_p9 }
  0x7e   : > { %p4408_p4 = pnand %p4406_p13, %p4403_p3 }
  0x80   : > { %4411 = shalt.err (!%p4408_p4)
}
  0x81   : > { %s4412_s27 = scalar_lea.vmem %s372_s10, 16384  ;;  %s4419_s2 = scalar_lea.vmem %s372_s10, 32768 }
  0x82   : > { %p4413_p1 = scmp.ne.s32.totalorder %s372_s10, %s4412_s27  ;;  %p4420_p7 = scmp.lt.s32.totalorder %s372_s10, %s372_s10 }
  0x83   : > { %p4421_p5 = scmp.lt.s32.totalorder %s4419_s2, %s4412_s27 }
  0x84   : > { %p4415_p6 = pnand %p4413_p1, %p4704_p8 }
  0x85   : > { %p4422_p12 = por %p4421_p5, %p4420_p7 }
  0x86   : > { %p4416_p10 = pneg %p4415_p6 }
  0x88   : > { %p4423_p0 = pnand %p4422_p12, %p4416_p10 }
  0x8a   : > { %4426 = shalt.err (!%p4423_p0)
}
  0x8b   : > { %p4997_p2 = scmp.ne.s32.totalorder %s4988_s24, 0  ;;  %s4427_s19 = scalar_lea.hbm %s4971_s5, 16384 }
  0x8c   : > { %p4428_p11 = scmp.ne.s32.totalorder %s4971_s5, %s4427_s19  ;;  %p4434_p13 = scmp.lt.u32.totalorder %s4427_s19, %s4971_s5 }
  0x8d   : > { %3782 = dma.hbm_to_vmem [thread:$0]  (!%p4997_p2), %s4969_s3, 16384, %s372_s10, %s4658_s30, %s4538_s18, %s4538_s18, %s4539_s17  }
  0x8e   : > { %p4430_p9 = pnand %p4428_p11, %p4704_p8 }
  0x90   : > { %p4431_p3 = pneg %p4430_p9 }
  0x92   : > { %p4436_p4 = pnand %p4434_p13, %p4431_p3 }
  0x94   : > { %4439 = shalt.err (!%p4436_p4)
}
  0x95   : > { %s4440_s30 = scalar_lea.vmem %s4760_s15, 16384  ;;  %s4447_s10 = scalar_lea.vmem %s4760_s15, 32768 }
  0x96   : > { %p4441_p1 = scmp.ne.s32.totalorder %s4760_s15, %s4440_s30  ;;  %p4448_p7 = scmp.lt.s32.totalorder %s4760_s15, %s4760_s15 }
  0x97   : > { %p4449_p5 = scmp.lt.s32.totalorder %s4447_s10, %s4440_s30 }
  0x98   : > { %p4443_p6 = pnand %p4441_p1, %p4704_p8 }
  0x99   : > { %p4450_p12 = por %p4449_p5, %p4448_p7 }
  0x9a   : > { %p4444_p10 = pneg %p4443_p6 }
  0x9c   : > { %p4451_p0 = pnand %p4450_p12, %p4444_p10 }
  0x9e   : > { %4454 = shalt.err (!%p4451_p0)
}
  0x9f   : > { %3788 = dma.hbm_to_vmem [thread:$0]  (!%p4997_p2), %s4971_s5, 16384, %s4760_s15, %s4694_s22, %s4538_s18, %s4538_s18, %s4539_s17  }
  0xa0   : > { %s4542_s2 = smov [#allocation12]   ;;  %s4455_s14 = scalar_lea.hbm %s4972_s6, 64 }
  0xa1   : > { %s448_s1 = sshll.u32 %s4542_s2, 4  ;;  %p4456_p11 = scmp.ne.s32.totalorder %s4972_s6, %s4455_s14  ;;  %s449_s1 = int_to_ptr.vmem [resolvable:$true] %s448_s1 }
  0xa2   : > { %p4462_p13 = scmp.lt.u32.totalorder %s4455_s14, %s4972_s6 }
  0xa3   : > { %p4458_p9 = pnand %p4456_p11, %p4704_p8 }
  0xa5   : > { %p4459_p3 = pneg %p4458_p9 }
  0xa7   : > { %p4464_p4 = pnand %p4462_p13, %p4459_p3 }
  0xa9   : > { %4467 = shalt.err (!%p4464_p4)
}
  0xaa   : > { %s4468_s22 = scalar_lea.vmem %s449_s1, 64  ;;  %s4475_s18 = scalar_lea.vmem %s449_s1, 128 }
  0xab   : > { %p4469_p1 = scmp.ne.s32.totalorder %s449_s1, %s4468_s22  ;;  %p4476_p7 = scmp.lt.s32.totalorder %s449_s1, %s449_s1 }
  0xac   : > { %p4477_p5 = scmp.lt.s32.totalorder %s4475_s18, %s4468_s22 }
  0xad   : > { %p4471_p6 = pnand %p4469_p1, %p4704_p8 }
  0xae   : > { %p4478_p12 = por %p4477_p5, %p4476_p7 }
  0xaf   : > { %p4472_p10 = pneg %p4471_p6 }
  0xb1   : > { %p4479_p0 = pnand %p4478_p12, %p4472_p10 }
  0xb3   : > { %4482 = shalt.err (!%p4479_p0)
}
  0xb4   : > { %3791 = dma.hbm_to_vmem [thread:$0]  (!%p4997_p2), %s4972_s6, 64, %s449_s1, [#allocation13]  }
  0xb5   : > { %p4998_p11 = scmp.ne.s32.totalorder %s4989_s9, 0 }
  0xb6   : > { %s459_s21 = sand.u32 (!%p4998_p11), 1, %s4525_s25   ;;  %p4999_p8 = scmp.ne.s32.totalorder (!%p4998_p11), %s4984_s11, 0 }
  0xb7   : > { %457 = sbr.rel (%p4998_p11) target bundleno = 1184 (0x4a0), region = 48  ;;  %s3390_s13 = sshll.u32 (!%p4998_p11), %s459_s21, 9 }
  0xb8   : > { %s460_s30 = scalar_lea.sflag (!%p4998_p11), [#allocation5], %s459_s21  ;;  %s4833_s10 = scalar_lea.vmem (!%p4998_p11), [#allocation4], %s3390_s13 }
  0xbe   : > { %4500 = dma.done.wait (%p4999_p8), %s460_s30, 8192  }
  0xbf   : > { %4502 = vsyncadd (%p4999_p8), %s460_s30, 4294959104  ;;  %s468_s24 = sand.u32 1, %s4602_s28   ;;  %s3391_s16 = sshll.u32 %s459_s21, 2 }
  0xc0   : > { %s469_s27 = scalar_lea.sflag [#allocation7], %s468_s24  ;;  %s4840_s2 = scalar_lea.vmem [#allocation6], %s3391_s16 }
  0xc1   : > { %4504 = dma.done.wait (%p4999_p8), %s469_s27, 64  }
  0xc2   : > { %4506 = vsyncadd (%p4999_p8), %s469_s27, 4294967232  ;;  %p5000_p2 = scmp.eq.s32.totalorder %s4602_s28, 0 }
  0xc4   : > { %4508 = dma.done.wait (%p5000_p2), %s469_s27, 16384   ;;  %p5001_p9 = pmov %p5000_p2 }
  0xc5   : > { %s487_s9 = scalar_lea.sflag [#allocation10], %s468_s24  ;;  %p5002_p3 = pmov %p5000_p2 }
  0xc6   : > { %4510 = vsyncadd (%p5001_p9), %s469_s27, 4294950912 }
  0xc7   : > { %4512 = dma.done.wait (%p5002_p3), %s487_s9, 16448   ;;  %p5003_p13 = pmov %p5000_p2 }
  0xc8   : > { %p5004_p4 = pmov %p5000_p2 }
  0xc9   : > { %4514 = vsyncadd (%p5003_p13), %s487_s9, 4294950848 }
  0xca   : > { %4516 = dma.done.wait (%p5004_p4), [#allocation13], 64   ;;  %p5005_p1 = pmov %p5000_p2 }
  0xcb   : > { %p3404_p6 = scmp.ge.s32.totalorder %s4602_s28, 1 }
  0xcc   : > { %4518 = vsyncadd (%p5005_p1), [#allocation13], 4294967232  ;;  %v3831_v0 = vld [vmem:[%s4833_s10 + $0x4] ss:$16 sps:$4 sm:$0xff] (!%p3404_p6)   ;;  %v3833_v1 = vld [vmem:[%s4833_s10 + $0xc] ss:$16 sps:$4 sm:$0xff] (!%p3404_p6)  }
  0xcd   : > { %618 = sbr.rel (%p3404_p6) target bundleno = 488 (0x1e8), region = 76  ;;  %1029 = vmatprep.subr.bf16.mxu0 (!%p3404_p6), %v3831_v0  ;;  %v3835_v2 = vld [vmem:[%s4833_s10] ss:$16 sps:$4 sm:$0xff] (!%p3404_p6)   ;;  %v3836_v3 = vld [vmem:[%s4833_s10 + $0x8] ss:$16 sps:$4 sm:$0xff] (!%p3404_p6)   ;;  %1070 = vmatprep.subr.bf16.mxu1 (!%p3404_p6), %v3833_v1  ;;  %s3735_s14 = sshll.u32 (!%p3404_p6), %s4602_s28, 5 }
  0xce   : > { %v3837_v4 = vld [vmem:[%s4833_s10 + $0x24] ss:$16 sps:$4 sm:$0xff] (!%p3404_p6)   ;;  %1030 = vmatpush1.bf16.msra.mxu0 (!%p3404_p6), %v3835_v2  ;;  %1071 = vmatpush1.bf16.msra.mxu1 (!%p3404_p6), %v3836_v3  ;;  %v3839_v5 = vld [vmem:[%s4833_s10 + $0x2c] ss:$16 sps:$4 sm:$0xff] (!%p3404_p6)   ;;  %v3841_v6 = vld [vmem:[%s4833_s10 + $0x20] ss:$16 sps:$4 sm:$0xff] (!%p3404_p6)  }
  0xcf   : > { %1031 = vmatprep.subr.bf16.mxu0 (!%p3404_p6), %v3837_v4  ;;  %v3842_v7 = vld [vmem:[%s4833_s10 + $0x28] ss:$16 sps:$4 sm:$0xff] (!%p3404_p6)   ;;  %1072 = vmatprep.subr.bf16.mxu1 (!%p3404_p6), %v3839_v5  ;;  %v3843_v8 = vld [vmem:[%s4833_s10 + $0x44] ss:$16 sps:$4 sm:$0xff] (!%p3404_p6)   ;;  %v3845_v9 = vld [vmem:[%s4833_s10 + $0x4c] ss:$16 sps:$4 sm:$0xff] (!%p3404_p6)   ;;  %v689_v4 = vlaneseq (!%p3404_p6) }
  0xd0   : > { %v3847_v10 = vld [vmem:[%s4833_s10 + $0x40] ss:$16 sps:$4 sm:$0xff] (!%p3404_p6)   ;;  %v3848_v11 = vld [vmem:[%s4833_s10 + $0x48] ss:$16 sps:$4 sm:$0xff] (!%p3404_p6)   ;;  %v3849_v12 = vld [vmem:[%s4833_s10 + $0x64] ss:$16 sps:$4 sm:$0xff] (!%p3404_p6)  }
  0xd1   : > { %v3851_v13 = vld [vmem:[%s4833_s10 + $0x6c] ss:$16 sps:$4 sm:$0xff] (!%p3404_p6)   ;;  %v3853_v14 = vld [vmem:[%s4833_s10 + $0x60] ss:$16 sps:$4 sm:$0xff] (!%p3404_p6)   ;;  %v3854_v15 = vld [vmem:[%s4833_s10 + $0x68] ss:$16 sps:$4 sm:$0xff] (!%p3404_p6)  }
  0xd2   : > { %1032 = vmatpush1.bf16.msra.mxu0 (!%p3404_p6), %v3841_v6  ;;  %1073 = vmatpush1.bf16.msra.mxu1 (!%p3404_p6), %v3842_v7  ;;  %v3855_v16 = vld [vmem:[%s4833_s10 + $0x84] ss:$16 sps:$4 sm:$0xff] (!%p3404_p6)   ;;  %v3857_v17 = vld [vmem:[%s4833_s10 + $0x8c] ss:$16 sps:$4 sm:$0xff] (!%p3404_p6)   ;;  %v3859_v18 = vld [vmem:[%s4833_s10 + $0x80] ss:$16 sps:$4 sm:$0xff] (!%p3404_p6)  }
  0xd3   : > { %1033 = vmatprep.subr.bf16.mxu0 (!%p3404_p6), %v3843_v8  ;;  %1074 = vmatprep.subr.bf16.mxu1 (!%p3404_p6), %v3845_v9  ;;  %v3860_v19 = vld [vmem:[%s4833_s10 + $0x88] ss:$16 sps:$4 sm:$0xff] (!%p3404_p6)   ;;  %v3861_v20 = vld [vmem:[%s4833_s10 + $0xa4] ss:$16 sps:$4 sm:$0xff] (!%p3404_p6)   ;;  %v3863_v21 = vld [vmem:[%s4833_s10 + $0xac] ss:$16 sps:$4 sm:$0xff] (!%p3404_p6)  }
  0xd4   : > { %v3865_v22 = vld [vmem:[%s4833_s10 + $0xa0] ss:$16 sps:$4 sm:$0xff]   ;;  %v3866_v23 = vld [vmem:[%s4833_s10 + $0xa8] ss:$16 sps:$4 sm:$0xff]   ;;  %v3867_v24 = vld [vmem:[%s4833_s10 + $0xc4] ss:$16 sps:$4 sm:$0xff]  }
  0xd5   : > { %v3869_v25 = vld [vmem:[%s4833_s10 + $0xcc] ss:$16 sps:$4 sm:$0xff]   ;;  %v3871_v26 = vld [vmem:[%s4833_s10 + $0xc0] ss:$16 sps:$4 sm:$0xff]   ;;  %v3872_v27 = vld [vmem:[%s4833_s10 + $0xc8] ss:$16 sps:$4 sm:$0xff]  }
  0xd6   : > { %1034 = vmatpush1.bf16.msra.mxu0 %v3847_v10  ;;  %1075 = vmatpush1.bf16.msra.mxu1 %v3848_v11  ;;  %v3873_v28 = vld [vmem:[%s4833_s10 + $0xe4] ss:$16 sps:$4 sm:$0xff]   ;;  %v3875_v29 = vld [vmem:[%s4833_s10 + $0xec] ss:$16 sps:$4 sm:$0xff]   ;;  %v3877_v30 = vld [vmem:[%s4833_s10 + $0xe0] ss:$16 sps:$4 sm:$0xff]  }
  0xd7   : > { %1035 = vmatprep.subr.bf16.mxu0 %v3849_v12  ;;  %1076 = vmatprep.subr.bf16.mxu1 %v3851_v13  ;;  %v3878_v31 = vld [vmem:[%s4833_s10 + $0xe8] ss:$16 sps:$4 sm:$0xff]   ;;  %v3879_v32 = vld [vmem:[%s4833_s10 + $0x104] ss:$16 sps:$4 sm:$0xff]   ;;  %v3881_v33 = vld [vmem:[%s4833_s10 + $0x10c] ss:$16 sps:$4 sm:$0xff]  }
  0xd8   : > { %v3883_v34 = vld [vmem:[%s4833_s10 + $0x100] ss:$16 sps:$4 sm:$0xff]   ;;  %v3884_v35 = vld [vmem:[%s4833_s10 + $0x108] ss:$16 sps:$4 sm:$0xff]   ;;  %v3885_v36 = vld [vmem:[%s4833_s10 + $0x124] ss:$16 sps:$4 sm:$0xff]  }
  0xd9   : > { %v3887_v37 = vld [vmem:[%s4833_s10 + $0x12c] ss:$16 sps:$4 sm:$0xff]   ;;  %v3889_v38 = vld [vmem:[%s4833_s10 + $0x120] ss:$16 sps:$4 sm:$0xff]   ;;  %v3890_v39 = vld [vmem:[%s4833_s10 + $0x128] ss:$16 sps:$4 sm:$0xff]  }
  0xda   : > { %1036 = vmatpush1.bf16.msra.mxu0 %v3853_v14  ;;  %1077 = vmatpush1.bf16.msra.mxu1 %v3854_v15  ;;  %v3891_v40 = vld [vmem:[%s4833_s10 + $0x144] ss:$16 sps:$4 sm:$0xff]   ;;  %v3893_v41 = vld [vmem:[%s4833_s10 + $0x14c] ss:$16 sps:$4 sm:$0xff]   ;;  %v3895_v42 = vld [vmem:[%s4833_s10 + $0x140] ss:$16 sps:$4 sm:$0xff]  }
  0xdb   : > { %1037 = vmatprep.subr.bf16.mxu0 %v3855_v16  ;;  %1078 = vmatprep.subr.bf16.mxu1 %v3857_v17  ;;  %v3896_v43 = vld [vmem:[%s4833_s10 + $0x148] ss:$16 sps:$4 sm:$0xff]   ;;  %v3897_v44 = vld [vmem:[%s4833_s10 + $0x164] ss:$16 sps:$4 sm:$0xff]   ;;  %v3899_v45 = vld [vmem:[%s4833_s10 + $0x16c] ss:$16 sps:$4 sm:$0xff]  }
  0xdc   : > { %v620_v46 = vld [vmem:[%s4966_s0 + $0x8] sm:$0xff]  ;;  %v3901_v48 = vld [vmem:[%s4833_s10 + $0x160] ss:$16 sps:$4 sm:$0xff]   ;;  %v3903_v50 = vld [vmem:[%s4833_s10 + $0x184] ss:$16 sps:$4 sm:$0xff]   ;;  %v690_v5 = vshrl.u32 %v689_v4, 7 }
  0xdd   : > { %v622_v47 = vpack.c.bf16 %v620_v46, %v620_v46  ;;  %v3902_v49 = vld [vmem:[%s4833_s10 + $0x168] ss:$16 sps:$4 sm:$0xff]   ;;  %v3905_v51 = vld [vmem:[%s4833_s10 + $0x18c] ss:$16 sps:$4 sm:$0xff]   ;;  %v3907_v52 = vld [vmem:[%s4833_s10 + $0x180] ss:$16 sps:$4 sm:$0xff]  }
  0xde   : > { %1038 = vmatpush1.bf16.msra.mxu0 %v3859_v18  ;;  %1079 = vmatpush1.bf16.msra.mxu1 %v3860_v19  ;;  %v3908_v53 = vld [vmem:[%s4833_s10 + $0x188] ss:$16 sps:$4 sm:$0xff]   ;;  %v3909_v54 = vld [vmem:[%s4833_s10 + $0x1a4] ss:$16 sps:$4 sm:$0xff]   ;;  %v3911_v55 = vld [vmem:[%s4833_s10 + $0x1ac] ss:$16 sps:$4 sm:$0xff]  }
  0xdf   : > { %1039 = vmatprep.subr.bf16.mxu0 %v3861_v20  ;;  %1080 = vmatprep.subr.bf16.mxu1 %v3863_v21  ;;  %v3913_v56 = vld [vmem:[%s4833_s10 + $0x1a0] ss:$16 sps:$4 sm:$0xff]   ;;  %v3914_v57 = vld [vmem:[%s4833_s10 + $0x1a8] ss:$16 sps:$4 sm:$0xff]   ;;  %v3915_v58 = vld [vmem:[%s4833_s10 + $0x1c4] ss:$16 sps:$4 sm:$0xff]  }
  0xe0   : > { %1061 = vmatprep.mubr.bf16.mxu0 %v622_v47  ;;  %1102 = vmatprep.mubr.bf16.mxu1 %v622_v47  ;;  %v3917_v59 = vld [vmem:[%s4833_s10 + $0x1cc] ss:$16 sps:$4 sm:$0xff]   ;;  %v3919_v60 = vld [vmem:[%s4833_s10 + $0x1c0] ss:$16 sps:$4 sm:$0xff]   ;;  %v3920_v61 = vld [vmem:[%s4833_s10 + $0x1c8] ss:$16 sps:$4 sm:$0xff]  }
  0xe1   : > { %v3921_v62 = vld [vmem:[%s4833_s10 + $0x1e4] ss:$16 sps:$4 sm:$0xff]   ;;  %v3923_v63 = vld [vmem:[%s4833_s10 + $0x1ec] ss:$16 sps:$4 sm:$0xff]   ;;  %v3925_v0 = vld [vmem:[%s4833_s10 + $0x1e0] ss:$16 sps:$4 sm:$0xff]  }
  0xe2   : > { %1040 = vmatpush1.bf16.msra.mxu0 %v3865_v22  ;;  %1081 = vmatpush1.bf16.msra.mxu1 %v3866_v23  ;;  %v3926_v1 = vld [vmem:[%s4833_s10 + $0x1e8] ss:$16 sps:$4 sm:$0xff]   ;;  %v619_v2 = vld [vmem:[%s4966_s0] sm:$0xff]  ;;  %v691_v6 = vsub.s32 0, %v690_v5  ;;  %v699_v7 = vsub.s32 2, %v690_v5  ;;  %v695_v9 = vsub.s32 1, %v690_v5 }
  0xe3   : > { %1041 = vmatprep.subr.bf16.mxu0 %v3867_v24  ;;  %1082 = vmatprep.subr.bf16.mxu1 %v3869_v25  ;;  %v621_v3 = vpack.c.bf16 %v619_v2, %v619_v2  ;;  %v687_v8 = vld [vmem:[%s4840_s2] sm:$0xf]  ;;  %v703_v10 = vsub.s32 3, %v690_v5  ;;  %s1125_s19 = scalar_lea.vmem [#allocation2], %s3735_s14 }
  0xe4   : > { %v692_v11 = vrot.slane %v687_v8, %v691_v6  ;;  %v700_v12 = vrot.slane %v687_v8, %v699_v7  ;;  %v696_v13 = vrot.slane %v687_v8, %v695_v9 }
  0xe5   : > { %v704_v14 = vrot.slane %v687_v8, %v703_v10 }
  0xe6   : > { %1042 = vmatpush1.bf16.msra.mxu0 %v3871_v26  ;;  %1083 = vmatpush1.bf16.msra.mxu1 %v3872_v27 }
  0xe7   : > { %1043 = vmatprep.subr.bf16.mxu0 %v3873_v28  ;;  %1084 = vmatprep.subr.bf16.mxu1 %v3875_v29 }
  0xea   : > { %1044 = vmatpush1.bf16.msra.mxu0 %v3877_v30  ;;  %1085 = vmatpush1.bf16.msra.mxu1 %v3878_v31 }
  0xeb   : > { %1045 = vmatprep.subr.bf16.mxu0 %v3879_v32  ;;  %1086 = vmatprep.subr.bf16.mxu1 %v3881_v33 }
  0xee   : > { %1046 = vmatpush1.bf16.msra.mxu0 %v3883_v34  ;;  %1087 = vmatpush1.bf16.msra.mxu1 %v3884_v35 }
  0xef   : > { %1047 = vmatprep.subr.bf16.mxu0 %v3885_v36  ;;  %1088 = vmatprep.subr.bf16.mxu1 %v3887_v37 }
  0xf2   : > { %1048 = vmatpush1.bf16.msra.mxu0 %v3889_v38  ;;  %1089 = vmatpush1.bf16.msra.mxu1 %v3890_v39 }
  0xf3   : > { %1049 = vmatprep.subr.bf16.mxu0 %v3891_v40  ;;  %1090 = vmatprep.subr.bf16.mxu1 %v3893_v41 }
  0xf6   : > { %1050 = vmatpush1.bf16.msra.mxu0 %v3895_v42  ;;  %1091 = vmatpush1.bf16.msra.mxu1 %v3896_v43 }
  0xf7   : > { %1051 = vmatprep.subr.bf16.mxu0 %v3897_v44  ;;  %1092 = vmatprep.subr.bf16.mxu1 %v3899_v45 }
  0xfa   : > { %1052 = vmatpush1.bf16.msra.mxu0 %v3901_v48  ;;  %1093 = vmatpush1.bf16.msra.mxu1 %v3902_v49 }
  0xfb   : > { %1053 = vmatprep.subr.bf16.mxu0 %v3903_v50  ;;  %1094 = vmatprep.subr.bf16.mxu1 %v3905_v51 }
  0xfe   : > { %1054 = vmatpush1.bf16.msra.mxu0 %v3907_v52  ;;  %1095 = vmatpush1.bf16.msra.mxu1 %v3908_v53 }
  0xff   : > { %1055 = vmatprep.subr.bf16.mxu0 %v3909_v54  ;;  %1096 = vmatprep.subr.bf16.mxu1 %v3911_v55 }
 0x102   : > { %1056 = vmatpush1.bf16.msra.mxu0 %v3913_v56  ;;  %1097 = vmatpush1.bf16.msra.mxu1 %v3914_v57 }
 0x103   : > { %1057 = vmatprep.subr.bf16.mxu0 %v3915_v58  ;;  %1098 = vmatprep.subr.bf16.mxu1 %v3917_v59 }
 0x106   : > { %1058 = vmatpush1.bf16.msra.mxu0 %v3919_v60  ;;  %1099 = vmatpush1.bf16.msra.mxu1 %v3920_v61 }
 0x107   : > { %1059 = vmatprep.subr.bf16.mxu0 %v3921_v62  ;;  %1100 = vmatprep.subr.bf16.mxu1 %v3923_v63 }
 0x10a   : > { %1060 = vmatpush1.bf16.msra.mxu0 %v3925_v0  ;;  %1101 = vmatpush1.bf16.msra.mxu1 %v3926_v1 }
 0x10d   : > { %1062 = vmatmul.mubr.bf16.vlgmr.msra.gmra.mrb[0].mxu0 %v621_v3  ;;  %1103 = vmatmul.mubr.bf16.vlgmr.msra.gmra.mrb[0].mxu1 %v621_v3 }
 0x1e0   : > { %v1063_v15 = vpop.f32.mrb[0].mxu0  ;;  %v1104_v16 = vpop.f32.mrb[0].mxu1 }
 0x1e1   : > { %v1064_v17 = vadd.f32 %v1063_v15, %v692_v11  ;;  %v1105_v18 = vadd.f32 %v1104_v16, %v700_v12  ;;  %v1065_v19 = vpop.f32.mrb[1].mxu0  ;;  %v1106_v20 = vpop.f32.mrb[1].mxu1 }
 0x1e2   : > { %v1066_v21 = vadd.f32 %v1065_v19, %v696_v13  ;;  %v1107_v22 = vadd.f32 %v1106_v20, %v704_v14  ;;  %v1067_v23 = vpop.f32.mrb[2].mxu0  ;;  %v1108_v24 = vpop.f32.mrb[2].mxu1 }
 0x1e3   : > { %vm1111_vm0 = vcmp.ge.f32.partialorder %v1064_v17, 0.0  ;;  %v1115_v25 = vmul.f32 0.01, %v1064_v17  ;;  %vm1113_vm1 = vcmp.ge.f32.partialorder %v1105_v18, 0.0  ;;  %v1117_v26 = vmul.f32 0.01, %v1105_v18 }
 0x1e4   : > { %vm1112_vm2 = vcmp.ge.f32.partialorder %v1066_v21, 0.0  ;;  %v1116_v27 = vmul.f32 0.01, %v1066_v21  ;;  %vm1114_vm3 = vcmp.ge.f32.partialorder %v1107_v22, 0.0  ;;  %v1118_v28 = vmul.f32 0.01, %v1107_v22 }
 0x1e5   : > { %v1119_v29 = vsel %vm1111_vm0, %v1064_v17, %v1115_v25  ;;  %v1121_v30 = vsel %vm1113_vm1, %v1105_v18, %v1117_v26  ;;  %v1068_v31 = vpop.f32.mrb[3].mxu0  ;;  %v1109_v32 = vpop.f32.mrb[3].mxu1 }
 0x1e6   : > { %1126 = vst [vmem:[%s1125_s19] sm:$0xff] %v1119_v29  ;;  %1128 = vst [vmem:[%s1125_s19 + $0x10] sm:$0xff] %v1121_v30  ;;  %v1120_v33 = vsel %vm1112_vm2, %v1066_v21, %v1116_v27  ;;  %v1122_v34 = vsel %vm1114_vm3, %v1107_v22, %v1118_v28 }
 0x1e7   : > { %1127 = vst [vmem:[%s1125_s19 + $0x8] sm:$0xff] %v1120_v33  ;;  %1129 = vst [vmem:[%s1125_s19 + $0x18] sm:$0xff] %v1122_v34 }
 0x1e8 PF: > { %p1131_p10 = scmp.lt.s32.totalorder %s4602_s28, 2 }
 0x1ea   : > { %p1132_p7 = pnand %p3404_p6, %p1131_p10 }
 0x1eb   : > { %v3927_v35 = vld [vmem:[#allocation8 + $0x4] ss:$16 sps:$4 sm:$0xff] (!%p1132_p7)   ;;  %v3929_v36 = vld [vmem:[#allocation8 + $0xc] ss:$16 sps:$4 sm:$0xff] (!%p1132_p7)   ;;  %v3931_v37 = vld [vmem:[#allocation8] ss:$16 sps:$4 sm:$0xff] (!%p1132_p7)  }
 0x1ec   : > { %1135 = sbr.rel (%p1132_p7) target bundleno = 839 (0x347), region = 80  ;;  %1934 = vmatprep.subr.bf16.mxu0 (!%p1132_p7), %v3927_v35  ;;  %v3932_v38 = vld [vmem:[#allocation8 + $0x8] ss:$16 sps:$4 sm:$0xff] (!%p1132_p7)   ;;  %2016 = vmatprep.subr.bf16.mxu1 (!%p1132_p7), %v3929_v36  ;;  %v3933_v39 = vld [vmem:[#allocation8 + $0x24] ss:$16 sps:$4 sm:$0xff] (!%p1132_p7)   ;;  %s3599_s23 = sadd.s32 (!%p1132_p7), 4294967295, %s4602_s28 }
 0x1ed   : > { %1935 = vmatpush1.bf16.msra.mxu0 (!%p1132_p7), %v3931_v37  ;;  %2017 = vmatpush1.bf16.msra.mxu1 (!%p1132_p7), %v3932_v38  ;;  %v3935_v40 = vld [vmem:[#allocation8 + $0x2c] ss:$16 sps:$4 sm:$0xff] (!%p1132_p7)   ;;  %v3937_v41 = vld [vmem:[#allocation8 + $0x20] ss:$16 sps:$4 sm:$0xff] (!%p1132_p7)   ;;  %v3938_v42 = vld [vmem:[#allocation8 + $0x28] ss:$16 sps:$4 sm:$0xff] (!%p1132_p7)  }
 0x1ee   : > { %1936 = vmatprep.subr.bf16.mxu0 (!%p1132_p7), %v3933_v39  ;;  %2018 = vmatprep.subr.bf16.mxu1 (!%p1132_p7), %v3935_v40  ;;  %v3939_v43 = vld [vmem:[#allocation8 + $0x44] ss:$16 sps:$4 sm:$0xff] (!%p1132_p7)   ;;  %v3941_v44 = vld [vmem:[#allocation8 + $0x4c] ss:$16 sps:$4 sm:$0xff] (!%p1132_p7)   ;;  %v3943_v45 = vld [vmem:[#allocation8 + $0x40] ss:$16 sps:$4 sm:$0xff] (!%p1132_p7)  }
 0x1ef   : > { %v3944_v46 = vld [vmem:[#allocation8 + $0x48] ss:$16 sps:$4 sm:$0xff] (!%p1132_p7)   ;;  %v3945_v47 = vld [vmem:[#allocation8 + $0x64] ss:$16 sps:$4 sm:$0xff] (!%p1132_p7)   ;;  %v3947_v48 = vld [vmem:[#allocation8 + $0x6c] ss:$16 sps:$4 sm:$0xff] (!%p1132_p7)  }
 0x1f0   : > { %v3949_v49 = vld [vmem:[#allocation8 + $0x60] ss:$16 sps:$4 sm:$0xff] (!%p1132_p7)   ;;  %v3950_v50 = vld [vmem:[#allocation8 + $0x68] ss:$16 sps:$4 sm:$0xff] (!%p1132_p7)   ;;  %v3951_v51 = vld [vmem:[#allocation8 + $0x84] ss:$16 sps:$4 sm:$0xff] (!%p1132_p7)  }
 0x1f1   : > { %1937 = vmatpush1.bf16.msra.mxu0 (!%p1132_p7), %v3937_v41  ;;  %2019 = vmatpush1.bf16.msra.mxu1 (!%p1132_p7), %v3938_v42  ;;  %v3953_v52 = vld [vmem:[#allocation8 + $0x8c] ss:$16 sps:$4 sm:$0xff] (!%p1132_p7)   ;;  %v3955_v53 = vld [vmem:[#allocation8 + $0x80] ss:$16 sps:$4 sm:$0xff] (!%p1132_p7)   ;;  %v3956_v54 = vld [vmem:[#allocation8 + $0x88] ss:$16 sps:$4 sm:$0xff] (!%p1132_p7)  }
 0x1f2   : > { %1938 = vmatprep.subr.bf16.mxu0 (!%p1132_p7), %v3939_v43  ;;  %2020 = vmatprep.subr.bf16.mxu1 (!%p1132_p7), %v3941_v44  ;;  %v3957_v55 = vld [vmem:[#allocation8 + $0xa4] ss:$16 sps:$4 sm:$0xff] (!%p1132_p7)   ;;  %v3959_v56 = vld [vmem:[#allocation8 + $0xac] ss:$16 sps:$4 sm:$0xff] (!%p1132_p7)   ;;  %v3961_v57 = vld [vmem:[#allocation8 + $0xa0] ss:$16 sps:$4 sm:$0xff] (!%p1132_p7)  }
 0x1f3   : > { %v3962_v58 = vld [vmem:[#allocation8 + $0xa8] ss:$16 sps:$4 sm:$0xff]   ;;  %v3963_v59 = vld [vmem:[#allocation8 + $0xc4] ss:$16 sps:$4 sm:$0xff]   ;;  %v3965_v60 = vld [vmem:[#allocation8 + $0xcc] ss:$16 sps:$4 sm:$0xff]  }
 0x1f4   : > { %v3967_v61 = vld [vmem:[#allocation8 + $0xc0] ss:$16 sps:$4 sm:$0xff]   ;;  %v3968_v62 = vld [vmem:[#allocation8 + $0xc8] ss:$16 sps:$4 sm:$0xff]   ;;  %v3969_v63 = vld [vmem:[#allocation8 + $0xe4] ss:$16 sps:$4 sm:$0xff]  }
 0x1f5   : > { %1939 = vmatpush1.bf16.msra.mxu0 %v3943_v45  ;;  %2021 = vmatpush1.bf16.msra.mxu1 %v3944_v46  ;;  %v3971_v0 = vld [vmem:[#allocation8 + $0xec] ss:$16 sps:$4 sm:$0xff]   ;;  %v3973_v1 = vld [vmem:[#allocation8 + $0xe0] ss:$16 sps:$4 sm:$0xff]   ;;  %v3974_v2 = vld [vmem:[#allocation8 + $0xe8] ss:$16 sps:$4 sm:$0xff]  }
 0x1f6   : > { %1940 = vmatprep.subr.bf16.mxu0 %v3945_v47  ;;  %2022 = vmatprep.subr.bf16.mxu1 %v3947_v48  ;;  %v3975_v3 = vld [vmem:[#allocation8 + $0x104] ss:$16 sps:$4 sm:$0xff]   ;;  %v3977_v4 = vld [vmem:[#allocation8 + $0x10c] ss:$16 sps:$4 sm:$0xff]   ;;  %v3979_v5 = vld [vmem:[#allocation8 + $0x100] ss:$16 sps:$4 sm:$0xff]  }
 0x1f7   : > { %v3980_v6 = vld [vmem:[#allocation8 + $0x108] ss:$16 sps:$4 sm:$0xff]   ;;  %v3981_v7 = vld [vmem:[#allocation8 + $0x124] ss:$16 sps:$4 sm:$0xff]   ;;  %v3983_v8 = vld [vmem:[#allocation8 + $0x12c] ss:$16 sps:$4 sm:$0xff]  }
 0x1f8   : > { %v3985_v9 = vld [vmem:[#allocation8 + $0x120] ss:$16 sps:$4 sm:$0xff]   ;;  %v3986_v10 = vld [vmem:[#allocation8 + $0x128] ss:$16 sps:$4 sm:$0xff]   ;;  %v3987_v11 = vld [vmem:[#allocation8 + $0x144] ss:$16 sps:$4 sm:$0xff]  }
 0x1f9   : > { %1941 = vmatpush1.bf16.msra.mxu0 %v3949_v49  ;;  %2023 = vmatpush1.bf16.msra.mxu1 %v3950_v50  ;;  %v3989_v12 = vld [vmem:[#allocation8 + $0x14c] ss:$16 sps:$4 sm:$0xff]   ;;  %v3991_v13 = vld [vmem:[#allocation8 + $0x140] ss:$16 sps:$4 sm:$0xff]   ;;  %v3992_v14 = vld [vmem:[#allocation8 + $0x148] ss:$16 sps:$4 sm:$0xff]  }
 0x1fa   : > { %1942 = vmatprep.subr.bf16.mxu0 %v3951_v51  ;;  %2024 = vmatprep.subr.bf16.mxu1 %v3953_v52  ;;  %v3993_v15 = vld [vmem:[#allocation8 + $0x164] ss:$16 sps:$4 sm:$0xff]   ;;  %v3995_v16 = vld [vmem:[#allocation8 + $0x16c] ss:$16 sps:$4 sm:$0xff]   ;;  %v3997_v18 = vld [vmem:[#allocation8 + $0x160] ss:$16 sps:$4 sm:$0xff]  }
 0x1fb   : > { %v1137_v17 = vld [vmem:[#allocation2 + $0x8] sm:$0xff]  ;;  %v3998_v20 = vld [vmem:[#allocation8 + $0x168] ss:$16 sps:$4 sm:$0xff]   ;;  %v4001_v22 = vld [vmem:[#allocation8 + $0x18c] ss:$16 sps:$4 sm:$0xff]   ;;  %s3736_s8 = sshll.u32 %s3599_s23, 5 }
 0x1fc   : > { %v1141_v19 = vpack.c.bf16 %v1137_v17, %v1137_v17  ;;  %v3999_v21 = vld [vmem:[#allocation8 + $0x184] ss:$16 sps:$4 sm:$0xff]   ;;  %v4003_v23 = vld [vmem:[#allocation8 + $0x180] ss:$16 sps:$4 sm:$0xff]   ;;  %v4004_v24 = vld [vmem:[#allocation8 + $0x188] ss:$16 sps:$4 sm:$0xff]  }
 0x1fd   : > { %1943 = vmatpush1.bf16.msra.mxu0 %v3955_v53  ;;  %2025 = vmatpush1.bf16.msra.mxu1 %v3956_v54  ;;  %v4005_v25 = vld [vmem:[#allocation8 + $0x1a4] ss:$16 sps:$4 sm:$0xff]   ;;  %v4007_v26 = vld [vmem:[#allocation8 + $0x1ac] ss:$16 sps:$4 sm:$0xff]   ;;  %v4009_v27 = vld [vmem:[#allocation8 + $0x1a0] ss:$16 sps:$4 sm:$0xff]  }
 0x1fe   : > { %1944 = vmatprep.subr.bf16.mxu0 %v3957_v55  ;;  %2026 = vmatprep.subr.bf16.mxu1 %v3959_v56  ;;  %v4010_v28 = vld [vmem:[#allocation8 + $0x1a8] ss:$16 sps:$4 sm:$0xff]   ;;  %v4011_v29 = vld [vmem:[#allocation8 + $0x1c4] ss:$16 sps:$4 sm:$0xff]   ;;  %v4013_v30 = vld [vmem:[#allocation8 + $0x1cc] ss:$16 sps:$4 sm:$0xff]  }
 0x1ff   : > { %1966 = vmatprep.mubr.bf16.mxu0 %v1141_v19  ;;  %2048 = vmatprep.mubr.bf16.mxu1 %v1141_v19  ;;  %v4015_v31 = vld [vmem:[#allocation8 + $0x1c0] ss:$16 sps:$4 sm:$0xff]   ;;  %v4016_v32 = vld [vmem:[#allocation8 + $0x1c8] ss:$16 sps:$4 sm:$0xff]   ;;  %v4017_v33 = vld [vmem:[#allocation8 + $0x1e4] ss:$16 sps:$4 sm:$0xff]  }
 0x200   : > { %v4019_v34 = vld [vmem:[#allocation8 + $0x1ec] ss:$16 sps:$4 sm:$0xff]   ;;  %v4021_v35 = vld [vmem:[#allocation8 + $0x1e0] ss:$16 sps:$4 sm:$0xff]   ;;  %v4022_v36 = vld [vmem:[#allocation8 + $0x1e8] ss:$16 sps:$4 sm:$0xff]  }
 0x201   : > { %1945 = vmatpush1.bf16.msra.mxu0 %v3961_v57  ;;  %2027 = vmatpush1.bf16.msra.mxu1 %v3962_v58  ;;  %v1136_v37 = vld [vmem:[#allocation2] sm:$0xff]  ;;  %v4025_v38 = vld [vmem:[#allocation8 + $0x204] ss:$16 sps:$4 sm:$0xff]   ;;  %v4023_v41 = vld [vmem:[#allocation8 + $0x200] ss:$16 sps:$4 sm:$0xff]   ;;  %s2113_s20 = scalar_lea.vmem [#allocation3], %s3736_s8 }
 0x202   : > { %1946 = vmatprep.subr.bf16.mxu0 %v3963_v59  ;;  %2028 = vmatprep.subr.bf16.mxu1 %v3965_v60  ;;  %v4028_v39 = vld [vmem:[#allocation8 + $0x20c] ss:$16 sps:$4 sm:$0xff]   ;;  %v1140_v40 = vpack.c.bf16 %v1136_v37, %v1136_v37  ;;  %v4026_v42 = vld [vmem:[#allocation8 + $0x208] ss:$16 sps:$4 sm:$0xff]   ;;  %v4031_v43 = vld [vmem:[#allocation8 + $0x224] ss:$16 sps:$4 sm:$0xff]  }
 0x203   : > { %v4034_v44 = vld [vmem:[#allocation8 + $0x22c] ss:$16 sps:$4 sm:$0xff]   ;;  %v4029_v45 = vld [vmem:[#allocation8 + $0x220] ss:$16 sps:$4 sm:$0xff]   ;;  %v4032_v46 = vld [vmem:[#allocation8 + $0x228] ss:$16 sps:$4 sm:$0xff]  }
 0x204   : > { %v4037_v47 = vld [vmem:[#allocation8 + $0x244] ss:$16 sps:$4 sm:$0xff]   ;;  %v4040_v48 = vld [vmem:[#allocation8 + $0x24c] ss:$16 sps:$4 sm:$0xff]   ;;  %v4035_v49 = vld [vmem:[#allocation8 + $0x240] ss:$16 sps:$4 sm:$0xff]  }
 0x205   : > { %1947 = vmatpush1.bf16.msra.mxu0 %v3967_v61  ;;  %2029 = vmatpush1.bf16.msra.mxu1 %v3968_v62  ;;  %v4038_v50 = vld [vmem:[#allocation8 + $0x248] ss:$16 sps:$4 sm:$0xff]   ;;  %v4043_v51 = vld [vmem:[#allocation8 + $0x264] ss:$16 sps:$4 sm:$0xff]   ;;  %v4046_v52 = vld [vmem:[#allocation8 + $0x26c] ss:$16 sps:$4 sm:$0xff]  }
 0x206   : > { %1948 = vmatprep.subr.bf16.mxu0 %v3969_v63  ;;  %2030 = vmatprep.subr.bf16.mxu1 %v3971_v0  ;;  %v4041_v53 = vld [vmem:[#allocation8 + $0x260] ss:$16 sps:$4 sm:$0xff]   ;;  %v4044_v54 = vld [vmem:[#allocation8 + $0x268] ss:$16 sps:$4 sm:$0xff]   ;;  %v4049_v55 = vld [vmem:[#allocation8 + $0x284] ss:$16 sps:$4 sm:$0xff]  }
 0x207   : > { %v4052_v56 = vld [vmem:[#allocation8 + $0x28c] ss:$16 sps:$4 sm:$0xff]   ;;  %v4047_v57 = vld [vmem:[#allocation8 + $0x280] ss:$16 sps:$4 sm:$0xff]   ;;  %v4050_v58 = vld [vmem:[#allocation8 + $0x288] ss:$16 sps:$4 sm:$0xff]  }
 0x208   : > { %v4055_v59 = vld [vmem:[#allocation8 + $0x2a4] ss:$16 sps:$4 sm:$0xff]   ;;  %v4058_v60 = vld [vmem:[#allocation8 + $0x2ac] ss:$16 sps:$4 sm:$0xff]   ;;  %v4053_v61 = vld [vmem:[#allocation8 + $0x2a0] ss:$16 sps:$4 sm:$0xff]  }
 0x209   : > { %1949 = vmatpush1.bf16.msra.mxu0 %v3973_v1  ;;  %2031 = vmatpush1.bf16.msra.mxu1 %v3974_v2  ;;  %v4056_v62 = vld [vmem:[#allocation8 + $0x2a8] ss:$16 sps:$4 sm:$0xff]   ;;  %v4061_v63 = vld [vmem:[#allocation8 + $0x2c4] ss:$16 sps:$4 sm:$0xff]   ;;  %v4064_v0 = vld [vmem:[#allocation8 + $0x2cc] ss:$16 sps:$4 sm:$0xff]  }
 0x20a   : > { %1950 = vmatprep.subr.bf16.mxu0 %v3975_v3  ;;  %2032 = vmatprep.subr.bf16.mxu1 %v3977_v4  ;;  %v1139_v1 = vld [vmem:[#allocation2 + $0x18] sm:$0xff]  ;;  %v4062_v4 = vld [vmem:[#allocation8 + $0x2c8] ss:$16 sps:$4 sm:$0xff]  }
 0x20b   : > { %v1143_v2 = vpack.c.bf16 %v1139_v1, %v1139_v1  ;;  %v4059_v3 = vld [vmem:[#allocation8 + $0x2c0] ss:$16 sps:$4 sm:$0xff]   ;;  %v4085_v17 = vld [vmem:[#allocation8 + $0x344] ss:$16 sps:$4 sm:$0xff]  }
 0x20c   : > { %v4083_v19 = vld [vmem:[#allocation8 + $0x340] ss:$16 sps:$4 sm:$0xff]   ;;  %v4115_v37 = vld [vmem:[#allocation8 + $0x3e4] ss:$16 sps:$4 sm:$0xff]  }
 0x20d   : > { %1951 = vmatpush1.bf16.msra.mxu0 %v3979_v5  ;;  %2033 = vmatpush1.bf16.msra.mxu1 %v3980_v6  ;;  %v4067_v5 = vld [vmem:[#allocation8 + $0x2e4] ss:$16 sps:$4 sm:$0xff]   ;;  %v4070_v6 = vld [vmem:[#allocation8 + $0x2ec] ss:$16 sps:$4 sm:$0xff]  }
 0x20e   : > { %1952 = vmatprep.subr.bf16.mxu0 %v3981_v7  ;;  %2034 = vmatprep.subr.bf16.mxu1 %v3983_v8  ;;  %v4065_v7 = vld [vmem:[#allocation8 + $0x2e0] ss:$16 sps:$4 sm:$0xff]   ;;  %v4068_v8 = vld [vmem:[#allocation8 + $0x2e8] ss:$16 sps:$4 sm:$0xff]  }
 0x211   : > { %1953 = vmatpush1.bf16.msra.mxu0 %v3985_v9  ;;  %2035 = vmatpush1.bf16.msra.mxu1 %v3986_v10  ;;  %v4073_v9 = vld [vmem:[#allocation8 + $0x304] ss:$16 sps:$4 sm:$0xff]   ;;  %v4076_v10 = vld [vmem:[#allocation8 + $0x30c] ss:$16 sps:$4 sm:$0xff]  }
 0x212   : > { %1954 = vmatprep.subr.bf16.mxu0 %v3987_v11  ;;  %2036 = vmatprep.subr.bf16.mxu1 %v3989_v12  ;;  %v4071_v11 = vld [vmem:[#allocation8 + $0x300] ss:$16 sps:$4 sm:$0xff]   ;;  %v4074_v12 = vld [vmem:[#allocation8 + $0x308] ss:$16 sps:$4 sm:$0xff]  }
 0x215   : > { %1955 = vmatpush1.bf16.msra.mxu0 %v3991_v13  ;;  %2037 = vmatpush1.bf16.msra.mxu1 %v3992_v14  ;;  %v4079_v13 = vld [vmem:[#allocation8 + $0x324] ss:$16 sps:$4 sm:$0xff]   ;;  %v4082_v14 = vld [vmem:[#allocation8 + $0x32c] ss:$16 sps:$4 sm:$0xff]  }
 0x216   : > { %1956 = vmatprep.subr.bf16.mxu0 %v3993_v15  ;;  %2038 = vmatprep.subr.bf16.mxu1 %v3995_v16  ;;  %v4077_v15 = vld [vmem:[#allocation8 + $0x320] ss:$16 sps:$4 sm:$0xff]   ;;  %v4080_v16 = vld [vmem:[#allocation8 + $0x328] ss:$16 sps:$4 sm:$0xff]  }
 0x219   : > { %1957 = vmatpush1.bf16.msra.mxu0 %v3997_v18  ;;  %2039 = vmatpush1.bf16.msra.mxu1 %v3998_v20  ;;  %v4088_v18 = vld [vmem:[#allocation8 + $0x34c] ss:$16 sps:$4 sm:$0xff]   ;;  %v4086_v20 = vld [vmem:[#allocation8 + $0x348] ss:$16 sps:$4 sm:$0xff]  }
 0x21a   : > { %1958 = vmatprep.subr.bf16.mxu0 %v3999_v21  ;;  %2040 = vmatprep.subr.bf16.mxu1 %v4001_v22  ;;  %v4091_v21 = vld [vmem:[#allocation8 + $0x364] ss:$16 sps:$4 sm:$0xff]   ;;  %v4094_v22 = vld [vmem:[#allocation8 + $0x36c] ss:$16 sps:$4 sm:$0xff]  }
 0x21d   : > { %1959 = vmatpush1.bf16.msra.mxu0 %v4003_v23  ;;  %2041 = vmatpush1.bf16.msra.mxu1 %v4004_v24  ;;  %v4089_v23 = vld [vmem:[#allocation8 + $0x360] ss:$16 sps:$4 sm:$0xff]   ;;  %v4092_v24 = vld [vmem:[#allocation8 + $0x368] ss:$16 sps:$4 sm:$0xff]  }
 0x21e   : > { %1960 = vmatprep.subr.bf16.mxu0 %v4005_v25  ;;  %2042 = vmatprep.subr.bf16.mxu1 %v4007_v26  ;;  %v4097_v25 = vld [vmem:[#allocation8 + $0x384] ss:$16 sps:$4 sm:$0xff]   ;;  %v4100_v26 = vld [vmem:[#allocation8 + $0x38c] ss:$16 sps:$4 sm:$0xff]  }
 0x221   : > { %1961 = vmatpush1.bf16.msra.mxu0 %v4009_v27  ;;  %2043 = vmatpush1.bf16.msra.mxu1 %v4010_v28  ;;  %v4095_v27 = vld [vmem:[#allocation8 + $0x380] ss:$16 sps:$4 sm:$0xff]   ;;  %v4098_v28 = vld [vmem:[#allocation8 + $0x388] ss:$16 sps:$4 sm:$0xff]  }
 0x222   : > { %1962 = vmatprep.subr.bf16.mxu0 %v4011_v29  ;;  %2044 = vmatprep.subr.bf16.mxu1 %v4013_v30  ;;  %v4103_v29 = vld [vmem:[#allocation8 + $0x3a4] ss:$16 sps:$4 sm:$0xff]   ;;  %v4106_v30 = vld [vmem:[#allocation8 + $0x3ac] ss:$16 sps:$4 sm:$0xff]  }
 0x225   : > { %1963 = vmatpush1.bf16.msra.mxu0 %v4015_v31  ;;  %2045 = vmatpush1.bf16.msra.mxu1 %v4016_v32  ;;  %v4101_v31 = vld [vmem:[#allocation8 + $0x3a0] ss:$16 sps:$4 sm:$0xff]   ;;  %v4104_v32 = vld [vmem:[#allocation8 + $0x3a8] ss:$16 sps:$4 sm:$0xff]  }
 0x226   : > { %1964 = vmatprep.subr.bf16.mxu0 %v4017_v33  ;;  %2046 = vmatprep.subr.bf16.mxu1 %v4019_v34  ;;  %v4109_v33 = vld [vmem:[#allocation8 + $0x3c4] ss:$16 sps:$4 sm:$0xff]   ;;  %v4112_v34 = vld [vmem:[#allocation8 + $0x3cc] ss:$16 sps:$4 sm:$0xff]  }
 0x229   : > { %1965 = vmatpush1.bf16.msra.mxu0 %v4021_v35  ;;  %2047 = vmatpush1.bf16.msra.mxu1 %v4022_v36  ;;  %v4107_v35 = vld [vmem:[#allocation8 + $0x3c0] ss:$16 sps:$4 sm:$0xff]   ;;  %v4110_v36 = vld [vmem:[#allocation8 + $0x3c8] ss:$16 sps:$4 sm:$0xff]  }
 0x22a   : > { %1975 = vmatprep.subr.bf16.mxu0 %v4025_v38  ;;  %2057 = vmatprep.subr.bf16.mxu1 %v4028_v39  ;;  %v4118_v38 = vld [vmem:[#allocation8 + $0x3ec] ss:$16 sps:$4 sm:$0xff]   ;;  %v4113_v39 = vld [vmem:[#allocation8 + $0x3e0] ss:$16 sps:$4 sm:$0xff]  }
 0x22c   : > { %1967 = vmatmul.mubr.bf16.vlgmr.msra.gmra.mrb[0].mxu0 %v1140_v40  ;;  %2049 = vmatmul.mubr.bf16.vlgmr.msra.gmra.mrb[0].mxu1 %v1140_v40  ;;  %v4116_v40 = vld [vmem:[#allocation8 + $0x3e8] ss:$16 sps:$4 sm:$0xff]  }
 0x22d   : > { %1976 = vmatpush1.bf16.msra.mxu0 %v4023_v41  ;;  %2058 = vmatpush1.bf16.msra.mxu1 %v4026_v42  ;;  %v1138_v41 = vld [vmem:[#allocation2 + $0x10] sm:$0xff] }
 0x22e   : > { %1977 = vmatprep.subr.bf16.mxu0 %v4031_v43  ;;  %2059 = vmatprep.subr.bf16.mxu1 %v4034_v44  ;;  %v1142_v42 = vpack.c.bf16 %v1138_v41, %v1138_v41  ;;  %v1274_v43 = vlaneseq }
 0x22f   : > { %2007 = vmatprep.mubr.bf16.mxu0 %v1143_v2  ;;  %2089 = vmatprep.mubr.bf16.mxu1 %v1143_v2 }
 0x230   : > { %v1275_v44 = vshrl.u32 %v1274_v43, 7 }
 0x231   : > { %1978 = vmatpush1.bf16.msra.mxu0 %v4029_v45  ;;  %2060 = vmatpush1.bf16.msra.mxu1 %v4032_v46 }
 0x232   : > { %1979 = vmatprep.subr.bf16.mxu0 %v4037_v47  ;;  %2061 = vmatprep.subr.bf16.mxu1 %v4040_v48  ;;  %v1276_v45 = vsub.s32 0, %v1275_v44  ;;  %v1284_v46 = vsub.s32 2, %v1275_v44  ;;  %v1272_v47 = vld [vmem:[#allocation9] sm:$0xf]  ;;  %v1280_v48 = vsub.s32 1, %v1275_v44 }
 0x235   : > { %1980 = vmatpush1.bf16.msra.mxu0 %v4035_v49  ;;  %2062 = vmatpush1.bf16.msra.mxu1 %v4038_v50  ;;  %v1288_v49 = vsub.s32 3, %v1275_v44  ;;  %v1277_v50 = vrot.slane %v1272_v47, %v1276_v45 }
 0x236   : > { %1981 = vmatprep.subr.bf16.mxu0 %v4043_v51  ;;  %2063 = vmatprep.subr.bf16.mxu1 %v4046_v52  ;;  %v1285_v51 = vrot.slane %v1272_v47, %v1284_v46  ;;  %v1281_v52 = vrot.slane %v1272_v47, %v1280_v48 }
 0x239   : > { %1982 = vmatpush1.bf16.msra.mxu0 %v4041_v53  ;;  %2064 = vmatpush1.bf16.msra.mxu1 %v4044_v54  ;;  %v1289_v53 = vrot.slane %v1272_v47, %v1288_v49 }
 0x23a   : > { %1983 = vmatprep.subr.bf16.mxu0 %v4049_v55  ;;  %2065 = vmatprep.subr.bf16.mxu1 %v4052_v56 }
 0x23d   : > { %1984 = vmatpush1.bf16.msra.mxu0 %v4047_v57  ;;  %2066 = vmatpush1.bf16.msra.mxu1 %v4050_v58 }
 0x23e   : > { %1985 = vmatprep.subr.bf16.mxu0 %v4055_v59  ;;  %2067 = vmatprep.subr.bf16.mxu1 %v4058_v60 }
 0x241   : > { %1986 = vmatpush1.bf16.msra.mxu0 %v4053_v61  ;;  %2068 = vmatpush1.bf16.msra.mxu1 %v4056_v62 }
 0x242   : > { %1987 = vmatprep.subr.bf16.mxu0 %v4061_v63  ;;  %2069 = vmatprep.subr.bf16.mxu1 %v4064_v0 }
 0x245   : > { %1988 = vmatpush1.bf16.msra.mxu0 %v4059_v3  ;;  %2070 = vmatpush1.bf16.msra.mxu1 %v4062_v4 }
 0x246   : > { %1989 = vmatprep.subr.bf16.mxu0 %v4067_v5  ;;  %2071 = vmatprep.subr.bf16.mxu1 %v4070_v6 }
 0x249   : > { %1990 = vmatpush1.bf16.msra.mxu0 %v4065_v7  ;;  %2072 = vmatpush1.bf16.msra.mxu1 %v4068_v8 }
 0x24a   : > { %1991 = vmatprep.subr.bf16.mxu0 %v4073_v9  ;;  %2073 = vmatprep.subr.bf16.mxu1 %v4076_v10 }
 0x24d   : > { %1992 = vmatpush1.bf16.msra.mxu0 %v4071_v11  ;;  %2074 = vmatpush1.bf16.msra.mxu1 %v4074_v12 }
 0x24e   : > { %1993 = vmatprep.subr.bf16.mxu0 %v4079_v13  ;;  %2075 = vmatprep.subr.bf16.mxu1 %v4082_v14 }
 0x251   : > { %1994 = vmatpush1.bf16.msra.mxu0 %v4077_v15  ;;  %2076 = vmatpush1.bf16.msra.mxu1 %v4080_v16 }
 0x252   : > { %1995 = vmatprep.subr.bf16.mxu0 %v4085_v17  ;;  %2077 = vmatprep.subr.bf16.mxu1 %v4088_v18 }
 0x255   : > { %1996 = vmatpush1.bf16.msra.mxu0 %v4083_v19  ;;  %2078 = vmatpush1.bf16.msra.mxu1 %v4086_v20 }
 0x256   : > { %1997 = vmatprep.subr.bf16.mxu0 %v4091_v21  ;;  %2079 = vmatprep.subr.bf16.mxu1 %v4094_v22 }
 0x259   : > { %1998 = vmatpush1.bf16.msra.mxu0 %v4089_v23  ;;  %2080 = vmatpush1.bf16.msra.mxu1 %v4092_v24 }
 0x25a   : > { %1999 = vmatprep.subr.bf16.mxu0 %v4097_v25  ;;  %2081 = vmatprep.subr.bf16.mxu1 %v4100_v26 }
 0x25d   : > { %2000 = vmatpush1.bf16.msra.mxu0 %v4095_v27  ;;  %2082 = vmatpush1.bf16.msra.mxu1 %v4098_v28 }
 0x25e   : > { %2001 = vmatprep.subr.bf16.mxu0 %v4103_v29  ;;  %2083 = vmatprep.subr.bf16.mxu1 %v4106_v30 }
 0x261   : > { %2002 = vmatpush1.bf16.msra.mxu0 %v4101_v31  ;;  %2084 = vmatpush1.bf16.msra.mxu1 %v4104_v32 }
 0x262   : > { %2003 = vmatprep.subr.bf16.mxu0 %v4109_v33  ;;  %2085 = vmatprep.subr.bf16.mxu1 %v4112_v34 }
 0x265   : > { %2004 = vmatpush1.bf16.msra.mxu0 %v4107_v35  ;;  %2086 = vmatpush1.bf16.msra.mxu1 %v4110_v36 }
 0x266   : > { %2005 = vmatprep.subr.bf16.mxu0 %v4115_v37  ;;  %2087 = vmatprep.subr.bf16.mxu1 %v4118_v38 }
 0x269   : > { %2006 = vmatpush1.bf16.msra.mxu0 %v4113_v39  ;;  %2088 = vmatpush1.bf16.msra.mxu1 %v4116_v40 }
 0x26c   : > { %2008 = vmatmul.mubr.bf16.vlgmr.msra.gmra.mrb[0].mxu0 %v1142_v42  ;;  %2090 = vmatmul.mubr.bf16.vlgmr.msra.gmra.mrb[0].mxu1 %v1142_v42 }
 0x33f   : > { %v2009_v54 = vpop.f32.mrb[0].mxu0  ;;  %v2091_v55 = vpop.f32.mrb[0].mxu1 }
 0x340   : > { %v3737_v56 = vadd.f32 %v2009_v54, %v1277_v50  ;;  %v3739_v57 = vadd.f32 %v2091_v55, %v1285_v51  ;;  %v2011_v58 = vpop.f32.mrb[1].mxu0  ;;  %v2093_v59 = vpop.f32.mrb[1].mxu1 }
 0x341   : > { %v3738_v60 = vadd.f32 %v2011_v58, %v1281_v52  ;;  %v3740_v61 = vadd.f32 %v2093_v59, %v1289_v53  ;;  %v2013_v62 = vpop.f32.mrb[2].mxu0  ;;  %v2095_v63 = vpop.f32.mrb[2].mxu1 }
 0x342   : > { %vm2098_vm4 = vcmp.ge.f32.partialorder %v3737_v56, 0.0  ;;  %v2102_v0 = vmul.f32 0.01, %v3737_v56  ;;  %vm2100_vm5 = vcmp.ge.f32.partialorder %v3739_v57, 0.0  ;;  %v2104_v1 = vmul.f32 0.01, %v3739_v57 }
 0x343   : > { %vm2099_vm6 = vcmp.ge.f32.partialorder %v3738_v60, 0.0  ;;  %v2103_v2 = vmul.f32 0.01, %v3738_v60  ;;  %vm2101_vm7 = vcmp.ge.f32.partialorder %v3740_v61, 0.0  ;;  %v2105_v3 = vmul.f32 0.01, %v3740_v61 }
 0x344   : > { %v2106_v4 = vsel %vm2098_vm4, %v3737_v56, %v2102_v0  ;;  %v2108_v5 = vsel %vm2100_vm5, %v3739_v57, %v2104_v1  ;;  %v2014_v6 = vpop.f32.mrb[3].mxu0  ;;  %v2096_v7 = vpop.f32.mrb[3].mxu1 }
 0x345   : > { %2114 = vst [vmem:[%s2113_s20] sm:$0xff] %v2106_v4  ;;  %2116 = vst [vmem:[%s2113_s20 + $0x10] sm:$0xff] %v2108_v5  ;;  %v2107_v8 = vsel %vm2099_vm6, %v3738_v60, %v2103_v2  ;;  %v2109_v9 = vsel %vm2101_vm7, %v3740_v61, %v2105_v3 }
 0x346   : > { %2115 = vst [vmem:[%s2113_s20 + $0x8] sm:$0xff] %v2107_v8  ;;  %2117 = vst [vmem:[%s2113_s20 + $0x18] sm:$0xff] %v2109_v9 }
 0x347 PF: > { %2121 = sbr.rel (%p1131_p10) target bundleno = 1184 (0x4a0), region = 84  ;;  %v4119_v10 = vld [vmem:[#allocation11 + $0x4] ss:$16 sps:$4 sm:$0xff] (!%p1131_p10)   ;;  %v4121_v11 = vld [vmem:[#allocation11 + $0xc] ss:$16 sps:$4 sm:$0xff] (!%p1131_p10)  }
 0x348   : > { %2920 = vmatprep.subr.bf16.mxu0 (!%p1131_p10), %v4119_v10  ;;  %v4123_v12 = vld [vmem:[#allocation11] ss:$16 sps:$4 sm:$0xff] (!%p1131_p10)   ;;  %v4124_v13 = vld [vmem:[#allocation11 + $0x8] ss:$16 sps:$4 sm:$0xff] (!%p1131_p10)   ;;  %3002 = vmatprep.subr.bf16.mxu1 (!%p1131_p10), %v4121_v11  ;;  %v4125_v14 = vld [vmem:[#allocation11 + $0x24] ss:$16 sps:$4 sm:$0xff] (!%p1131_p10)  }
 0x349   : > { %2921 = vmatpush1.bf16.msra.mxu0 (!%p1131_p10), %v4123_v12  ;;  %3003 = vmatpush1.bf16.msra.mxu1 (!%p1131_p10), %v4124_v13  ;;  %v4127_v15 = vld [vmem:[#allocation11 + $0x2c] ss:$16 sps:$4 sm:$0xff] (!%p1131_p10)   ;;  %v4129_v16 = vld [vmem:[#allocation11 + $0x20] ss:$16 sps:$4 sm:$0xff] (!%p1131_p10)   ;;  %v4130_v17 = vld [vmem:[#allocation11 + $0x28] ss:$16 sps:$4 sm:$0xff] (!%p1131_p10)  }
 0x34a   : > { %2922 = vmatprep.subr.bf16.mxu0 (!%p1131_p10), %v4125_v14  ;;  %3004 = vmatprep.subr.bf16.mxu1 (!%p1131_p10), %v4127_v15  ;;  %v4131_v18 = vld [vmem:[#allocation11 + $0x44] ss:$16 sps:$4 sm:$0xff] (!%p1131_p10)   ;;  %v4133_v19 = vld [vmem:[#allocation11 + $0x4c] ss:$16 sps:$4 sm:$0xff] (!%p1131_p10)   ;;  %v4135_v20 = vld [vmem:[#allocation11 + $0x40] ss:$16 sps:$4 sm:$0xff] (!%p1131_p10)  }
 0x34b   : > { %v4136_v21 = vld [vmem:[#allocation11 + $0x48] ss:$16 sps:$4 sm:$0xff] (!%p1131_p10)   ;;  %v4137_v22 = vld [vmem:[#allocation11 + $0x64] ss:$16 sps:$4 sm:$0xff] (!%p1131_p10)   ;;  %v4139_v23 = vld [vmem:[#allocation11 + $0x6c] ss:$16 sps:$4 sm:$0xff] (!%p1131_p10)  }
 0x34c   : > { %v4141_v24 = vld [vmem:[#allocation11 + $0x60] ss:$16 sps:$4 sm:$0xff] (!%p1131_p10)   ;;  %v4142_v25 = vld [vmem:[#allocation11 + $0x68] ss:$16 sps:$4 sm:$0xff] (!%p1131_p10)   ;;  %v4143_v26 = vld [vmem:[#allocation11 + $0x84] ss:$16 sps:$4 sm:$0xff] (!%p1131_p10)  }
 0x34d   : > { %2923 = vmatpush1.bf16.msra.mxu0 (!%p1131_p10), %v4129_v16  ;;  %3005 = vmatpush1.bf16.msra.mxu1 (!%p1131_p10), %v4130_v17  ;;  %v4145_v27 = vld [vmem:[#allocation11 + $0x8c] ss:$16 sps:$4 sm:$0xff] (!%p1131_p10)   ;;  %v4147_v28 = vld [vmem:[#allocation11 + $0x80] ss:$16 sps:$4 sm:$0xff] (!%p1131_p10)   ;;  %v4148_v29 = vld [vmem:[#allocation11 + $0x88] ss:$16 sps:$4 sm:$0xff] (!%p1131_p10)  }
 0x34e   : > { %2924 = vmatprep.subr.bf16.mxu0 %v4131_v18  ;;  %3006 = vmatprep.subr.bf16.mxu1 %v4133_v19  ;;  %v4149_v30 = vld [vmem:[#allocation11 + $0xa4] ss:$16 sps:$4 sm:$0xff]   ;;  %v4151_v31 = vld [vmem:[#allocation11 + $0xac] ss:$16 sps:$4 sm:$0xff]   ;;  %v4153_v32 = vld [vmem:[#allocation11 + $0xa0] ss:$16 sps:$4 sm:$0xff]  }
 0x34f   : > { %v4154_v33 = vld [vmem:[#allocation11 + $0xa8] ss:$16 sps:$4 sm:$0xff]   ;;  %v4155_v34 = vld [vmem:[#allocation11 + $0xc4] ss:$16 sps:$4 sm:$0xff]   ;;  %v4157_v35 = vld [vmem:[#allocation11 + $0xcc] ss:$16 sps:$4 sm:$0xff]  }
 0x350   : > { %v4159_v36 = vld [vmem:[#allocation11 + $0xc0] ss:$16 sps:$4 sm:$0xff]   ;;  %v4160_v37 = vld [vmem:[#allocation11 + $0xc8] ss:$16 sps:$4 sm:$0xff]   ;;  %v4161_v38 = vld [vmem:[#allocation11 + $0xe4] ss:$16 sps:$4 sm:$0xff]  }
 0x351   : > { %2925 = vmatpush1.bf16.msra.mxu0 %v4135_v20  ;;  %3007 = vmatpush1.bf16.msra.mxu1 %v4136_v21  ;;  %v4163_v39 = vld [vmem:[#allocation11 + $0xec] ss:$16 sps:$4 sm:$0xff]   ;;  %v4165_v40 = vld [vmem:[#allocation11 + $0xe0] ss:$16 sps:$4 sm:$0xff]   ;;  %v4166_v41 = vld [vmem:[#allocation11 + $0xe8] ss:$16 sps:$4 sm:$0xff]  }
 0x352   : > { %2926 = vmatprep.subr.bf16.mxu0 %v4137_v22  ;;  %3008 = vmatprep.subr.bf16.mxu1 %v4139_v23  ;;  %v4167_v42 = vld [vmem:[#allocation11 + $0x104] ss:$16 sps:$4 sm:$0xff]   ;;  %v4169_v43 = vld [vmem:[#allocation11 + $0x10c] ss:$16 sps:$4 sm:$0xff]   ;;  %v4171_v44 = vld [vmem:[#allocation11 + $0x100] ss:$16 sps:$4 sm:$0xff]  }
 0x353   : > { %v4172_v45 = vld [vmem:[#allocation11 + $0x108] ss:$16 sps:$4 sm:$0xff]   ;;  %v4173_v46 = vld [vmem:[#allocation11 + $0x124] ss:$16 sps:$4 sm:$0xff]   ;;  %v4175_v47 = vld [vmem:[#allocation11 + $0x12c] ss:$16 sps:$4 sm:$0xff]  }
 0x354   : > { %v4177_v48 = vld [vmem:[#allocation11 + $0x120] ss:$16 sps:$4 sm:$0xff]   ;;  %v4178_v49 = vld [vmem:[#allocation11 + $0x128] ss:$16 sps:$4 sm:$0xff]   ;;  %v4179_v50 = vld [vmem:[#allocation11 + $0x144] ss:$16 sps:$4 sm:$0xff]  }
 0x355   : > { %2927 = vmatpush1.bf16.msra.mxu0 %v4141_v24  ;;  %3009 = vmatpush1.bf16.msra.mxu1 %v4142_v25  ;;  %v4181_v51 = vld [vmem:[#allocation11 + $0x14c] ss:$16 sps:$4 sm:$0xff]   ;;  %v4183_v52 = vld [vmem:[#allocation11 + $0x140] ss:$16 sps:$4 sm:$0xff]   ;;  %v4184_v53 = vld [vmem:[#allocation11 + $0x148] ss:$16 sps:$4 sm:$0xff]  }
 0x356   : > { %2928 = vmatprep.subr.bf16.mxu0 %v4143_v26  ;;  %3010 = vmatprep.subr.bf16.mxu1 %v4145_v27  ;;  %v4185_v54 = vld [vmem:[#allocation11 + $0x164] ss:$16 sps:$4 sm:$0xff]   ;;  %v4187_v55 = vld [vmem:[#allocation11 + $0x16c] ss:$16 sps:$4 sm:$0xff]   ;;  %v4189_v57 = vld [vmem:[#allocation11 + $0x160] ss:$16 sps:$4 sm:$0xff]  }
 0x357   : > { %v2123_v56 = vld [vmem:[#allocation3 + $0x8] sm:$0xff]  ;;  %v4191_v60 = vld [vmem:[#allocation11 + $0x184] ss:$16 sps:$4 sm:$0xff]   ;;  %v4195_v62 = vld [vmem:[#allocation11 + $0x180] ss:$16 sps:$4 sm:$0xff]  }
 0x358   : > { %v2127_v58 = vpack.c.bf16 %v2123_v56, %v2123_v56  ;;  %v4190_v59 = vld [vmem:[#allocation11 + $0x168] ss:$16 sps:$4 sm:$0xff]   ;;  %v4193_v61 = vld [vmem:[#allocation11 + $0x18c] ss:$16 sps:$4 sm:$0xff]   ;;  %v4197_v0 = vld [vmem:[#allocation11 + $0x1a4] ss:$16 sps:$4 sm:$0xff]  }
 0x359   : > { %2929 = vmatpush1.bf16.msra.mxu0 %v4147_v28  ;;  %3011 = vmatpush1.bf16.msra.mxu1 %v4148_v29  ;;  %v4196_v63 = vld [vmem:[#allocation11 + $0x188] ss:$16 sps:$4 sm:$0xff]   ;;  %v4199_v1 = vld [vmem:[#allocation11 + $0x1ac] ss:$16 sps:$4 sm:$0xff]   ;;  %v4201_v2 = vld [vmem:[#allocation11 + $0x1a0] ss:$16 sps:$4 sm:$0xff]  }
 0x35a   : > { %2930 = vmatprep.subr.bf16.mxu0 %v4149_v30  ;;  %3012 = vmatprep.subr.bf16.mxu1 %v4151_v31  ;;  %v4202_v3 = vld [vmem:[#allocation11 + $0x1a8] ss:$16 sps:$4 sm:$0xff]   ;;  %v4203_v4 = vld [vmem:[#allocation11 + $0x1c4] ss:$16 sps:$4 sm:$0xff]   ;;  %v4205_v5 = vld [vmem:[#allocation11 + $0x1cc] ss:$16 sps:$4 sm:$0xff]  }
 0x35b   : > { %2952 = vmatprep.mubr.bf16.mxu0 %v2127_v58  ;;  %3034 = vmatprep.mubr.bf16.mxu1 %v2127_v58  ;;  %v4207_v6 = vld [vmem:[#allocation11 + $0x1c0] ss:$16 sps:$4 sm:$0xff]   ;;  %v4208_v7 = vld [vmem:[#allocation11 + $0x1c8] ss:$16 sps:$4 sm:$0xff]   ;;  %v4209_v8 = vld [vmem:[#allocation11 + $0x1e4] ss:$16 sps:$4 sm:$0xff]  }
 0x35c   : > { %v4211_v9 = vld [vmem:[#allocation11 + $0x1ec] ss:$16 sps:$4 sm:$0xff]   ;;  %v4213_v10 = vld [vmem:[#allocation11 + $0x1e0] ss:$16 sps:$4 sm:$0xff]   ;;  %v4214_v11 = vld [vmem:[#allocation11 + $0x1e8] ss:$16 sps:$4 sm:$0xff]  }
 0x35d   : > { %2931 = vmatpush1.bf16.msra.mxu0 %v4153_v32  ;;  %3013 = vmatpush1.bf16.msra.mxu1 %v4154_v33  ;;  %v2122_v12 = vld [vmem:[#allocation3] sm:$0xff]  ;;  %v4220_v14 = vld [vmem:[#allocation11 + $0x20c] ss:$16 sps:$4 sm:$0xff]   ;;  %v4218_v17 = vld [vmem:[#allocation11 + $0x208] ss:$16 sps:$4 sm:$0xff]  }
 0x35e   : > { %2932 = vmatprep.subr.bf16.mxu0 %v4155_v34  ;;  %3014 = vmatprep.subr.bf16.mxu1 %v4157_v35  ;;  %v4217_v13 = vld [vmem:[#allocation11 + $0x204] ss:$16 sps:$4 sm:$0xff]   ;;  %v2126_v15 = vpack.c.bf16 %v2122_v12, %v2122_v12  ;;  %v4215_v16 = vld [vmem:[#allocation11 + $0x200] ss:$16 sps:$4 sm:$0xff]   ;;  %v4226_v19 = vld [vmem:[#allocation11 + $0x22c] ss:$16 sps:$4 sm:$0xff]  }
 0x35f   : > { %v4223_v18 = vld [vmem:[#allocation11 + $0x224] ss:$16 sps:$4 sm:$0xff]   ;;  %v4221_v20 = vld [vmem:[#allocation11 + $0x220] ss:$16 sps:$4 sm:$0xff]   ;;  %v4224_v21 = vld [vmem:[#allocation11 + $0x228] ss:$16 sps:$4 sm:$0xff]  }
 0x360   : > { %v4229_v22 = vld [vmem:[#allocation11 + $0x244] ss:$16 sps:$4 sm:$0xff]   ;;  %v4232_v23 = vld [vmem:[#allocation11 + $0x24c] ss:$16 sps:$4 sm:$0xff]   ;;  %v4227_v24 = vld [vmem:[#allocation11 + $0x240] ss:$16 sps:$4 sm:$0xff]  }
 0x361   : > { %2933 = vmatpush1.bf16.msra.mxu0 %v4159_v36  ;;  %3015 = vmatpush1.bf16.msra.mxu1 %v4160_v37  ;;  %v4230_v25 = vld [vmem:[#allocation11 + $0x248] ss:$16 sps:$4 sm:$0xff]   ;;  %v4235_v26 = vld [vmem:[#allocation11 + $0x264] ss:$16 sps:$4 sm:$0xff]   ;;  %v4238_v27 = vld [vmem:[#allocation11 + $0x26c] ss:$16 sps:$4 sm:$0xff]  }
 0x362   : > { %2934 = vmatprep.subr.bf16.mxu0 %v4161_v38  ;;  %3016 = vmatprep.subr.bf16.mxu1 %v4163_v39  ;;  %v4233_v28 = vld [vmem:[#allocation11 + $0x260] ss:$16 sps:$4 sm:$0xff]   ;;  %v4236_v29 = vld [vmem:[#allocation11 + $0x268] ss:$16 sps:$4 sm:$0xff]   ;;  %v4241_v30 = vld [vmem:[#allocation11 + $0x284] ss:$16 sps:$4 sm:$0xff]  }
 0x363   : > { %v4244_v31 = vld [vmem:[#allocation11 + $0x28c] ss:$16 sps:$4 sm:$0xff]   ;;  %v4239_v32 = vld [vmem:[#allocation11 + $0x280] ss:$16 sps:$4 sm:$0xff]   ;;  %v4242_v33 = vld [vmem:[#allocation11 + $0x288] ss:$16 sps:$4 sm:$0xff]  }
 0x364   : > { %v4247_v34 = vld [vmem:[#allocation11 + $0x2a4] ss:$16 sps:$4 sm:$0xff]   ;;  %v4250_v35 = vld [vmem:[#allocation11 + $0x2ac] ss:$16 sps:$4 sm:$0xff]   ;;  %v4245_v36 = vld [vmem:[#allocation11 + $0x2a0] ss:$16 sps:$4 sm:$0xff]  }
 0x365   : > { %2935 = vmatpush1.bf16.msra.mxu0 %v4165_v40  ;;  %3017 = vmatpush1.bf16.msra.mxu1 %v4166_v41  ;;  %v4248_v37 = vld [vmem:[#allocation11 + $0x2a8] ss:$16 sps:$4 sm:$0xff]   ;;  %v4253_v38 = vld [vmem:[#allocation11 + $0x2c4] ss:$16 sps:$4 sm:$0xff]   ;;  %v4256_v39 = vld [vmem:[#allocation11 + $0x2cc] ss:$16 sps:$4 sm:$0xff]  }
 0x366   : > { %2936 = vmatprep.subr.bf16.mxu0 %v4167_v42  ;;  %3018 = vmatprep.subr.bf16.mxu1 %v4169_v43  ;;  %v2125_v40 = vld [vmem:[#allocation3 + $0x18] sm:$0xff]  ;;  %v4251_v42 = vld [vmem:[#allocation11 + $0x2c0] ss:$16 sps:$4 sm:$0xff]   ;;  %v4277_v56 = vld [vmem:[#allocation11 + $0x344] ss:$16 sps:$4 sm:$0xff]  }
 0x367   : > { %v2129_v41 = vpack.c.bf16 %v2125_v40, %v2125_v40  ;;  %v4254_v43 = vld [vmem:[#allocation11 + $0x2c8] ss:$16 sps:$4 sm:$0xff]   ;;  %v4275_v58 = vld [vmem:[#allocation11 + $0x340] ss:$16 sps:$4 sm:$0xff]   ;;  %v4307_v12 = vld [vmem:[#allocation11 + $0x3e4] ss:$16 sps:$4 sm:$0xff]  }
 0x369   : > { %2937 = vmatpush1.bf16.msra.mxu0 %v4171_v44  ;;  %3019 = vmatpush1.bf16.msra.mxu1 %v4172_v45  ;;  %v4259_v44 = vld [vmem:[#allocation11 + $0x2e4] ss:$16 sps:$4 sm:$0xff]   ;;  %v4262_v45 = vld [vmem:[#allocation11 + $0x2ec] ss:$16 sps:$4 sm:$0xff]  }
 0x36a   : > { %2938 = vmatprep.subr.bf16.mxu0 %v4173_v46  ;;  %3020 = vmatprep.subr.bf16.mxu1 %v4175_v47  ;;  %v4257_v46 = vld [vmem:[#allocation11 + $0x2e0] ss:$16 sps:$4 sm:$0xff]   ;;  %v4260_v47 = vld [vmem:[#allocation11 + $0x2e8] ss:$16 sps:$4 sm:$0xff]  }
 0x36d   : > { %2939 = vmatpush1.bf16.msra.mxu0 %v4177_v48  ;;  %3021 = vmatpush1.bf16.msra.mxu1 %v4178_v49  ;;  %v4265_v48 = vld [vmem:[#allocation11 + $0x304] ss:$16 sps:$4 sm:$0xff]   ;;  %v4268_v49 = vld [vmem:[#allocation11 + $0x30c] ss:$16 sps:$4 sm:$0xff]  }
 0x36e   : > { %2940 = vmatprep.subr.bf16.mxu0 %v4179_v50  ;;  %3022 = vmatprep.subr.bf16.mxu1 %v4181_v51  ;;  %v4263_v50 = vld [vmem:[#allocation11 + $0x300] ss:$16 sps:$4 sm:$0xff]   ;;  %v4266_v51 = vld [vmem:[#allocation11 + $0x308] ss:$16 sps:$4 sm:$0xff]  }
 0x371   : > { %2941 = vmatpush1.bf16.msra.mxu0 %v4183_v52  ;;  %3023 = vmatpush1.bf16.msra.mxu1 %v4184_v53  ;;  %v4271_v52 = vld [vmem:[#allocation11 + $0x324] ss:$16 sps:$4 sm:$0xff]   ;;  %v4274_v53 = vld [vmem:[#allocation11 + $0x32c] ss:$16 sps:$4 sm:$0xff]  }
 0x372   : > { %2942 = vmatprep.subr.bf16.mxu0 %v4185_v54  ;;  %3024 = vmatprep.subr.bf16.mxu1 %v4187_v55  ;;  %v4269_v54 = vld [vmem:[#allocation11 + $0x320] ss:$16 sps:$4 sm:$0xff]   ;;  %v4272_v55 = vld [vmem:[#allocation11 + $0x328] ss:$16 sps:$4 sm:$0xff]  }
 0x375   : > { %2943 = vmatpush1.bf16.msra.mxu0 %v4189_v57  ;;  %3025 = vmatpush1.bf16.msra.mxu1 %v4190_v59  ;;  %v4280_v57 = vld [vmem:[#allocation11 + $0x34c] ss:$16 sps:$4 sm:$0xff]   ;;  %v4278_v59 = vld [vmem:[#allocation11 + $0x348] ss:$16 sps:$4 sm:$0xff]  }
 0x376   : > { %2944 = vmatprep.subr.bf16.mxu0 %v4191_v60  ;;  %3026 = vmatprep.subr.bf16.mxu1 %v4193_v61  ;;  %v4283_v60 = vld [vmem:[#allocation11 + $0x364] ss:$16 sps:$4 sm:$0xff]   ;;  %v4286_v61 = vld [vmem:[#allocation11 + $0x36c] ss:$16 sps:$4 sm:$0xff]  }
 0x379   : > { %2945 = vmatpush1.bf16.msra.mxu0 %v4195_v62  ;;  %3027 = vmatpush1.bf16.msra.mxu1 %v4196_v63  ;;  %v4281_v62 = vld [vmem:[#allocation11 + $0x360] ss:$16 sps:$4 sm:$0xff]   ;;  %v4284_v63 = vld [vmem:[#allocation11 + $0x368] ss:$16 sps:$4 sm:$0xff]  }
 0x37a   : > { %2946 = vmatprep.subr.bf16.mxu0 %v4197_v0  ;;  %3028 = vmatprep.subr.bf16.mxu1 %v4199_v1  ;;  %v4289_v0 = vld [vmem:[#allocation11 + $0x384] ss:$16 sps:$4 sm:$0xff]   ;;  %v4292_v1 = vld [vmem:[#allocation11 + $0x38c] ss:$16 sps:$4 sm:$0xff]  }
 0x37d   : > { %2947 = vmatpush1.bf16.msra.mxu0 %v4201_v2  ;;  %3029 = vmatpush1.bf16.msra.mxu1 %v4202_v3  ;;  %v4287_v2 = vld [vmem:[#allocation11 + $0x380] ss:$16 sps:$4 sm:$0xff]   ;;  %v4290_v3 = vld [vmem:[#allocation11 + $0x388] ss:$16 sps:$4 sm:$0xff]  }
 0x37e   : > { %2948 = vmatprep.subr.bf16.mxu0 %v4203_v4  ;;  %3030 = vmatprep.subr.bf16.mxu1 %v4205_v5  ;;  %v4295_v4 = vld [vmem:[#allocation11 + $0x3a4] ss:$16 sps:$4 sm:$0xff]   ;;  %v4298_v5 = vld [vmem:[#allocation11 + $0x3ac] ss:$16 sps:$4 sm:$0xff]  }
 0x381   : > { %2949 = vmatpush1.bf16.msra.mxu0 %v4207_v6  ;;  %3031 = vmatpush1.bf16.msra.mxu1 %v4208_v7  ;;  %v4293_v6 = vld [vmem:[#allocation11 + $0x3a0] ss:$16 sps:$4 sm:$0xff]   ;;  %v4296_v7 = vld [vmem:[#allocation11 + $0x3a8] ss:$16 sps:$4 sm:$0xff]  }
 0x382   : > { %2950 = vmatprep.subr.bf16.mxu0 %v4209_v8  ;;  %3032 = vmatprep.subr.bf16.mxu1 %v4211_v9  ;;  %v4301_v8 = vld [vmem:[#allocation11 + $0x3c4] ss:$16 sps:$4 sm:$0xff]   ;;  %v4304_v9 = vld [vmem:[#allocation11 + $0x3cc] ss:$16 sps:$4 sm:$0xff]  }
 0x385   : > { %2951 = vmatpush1.bf16.msra.mxu0 %v4213_v10  ;;  %3033 = vmatpush1.bf16.msra.mxu1 %v4214_v11  ;;  %v4299_v10 = vld [vmem:[#allocation11 + $0x3c0] ss:$16 sps:$4 sm:$0xff]   ;;  %v4302_v11 = vld [vmem:[#allocation11 + $0x3c8] ss:$16 sps:$4 sm:$0xff]  }
 0x386   : > { %2961 = vmatprep.subr.bf16.mxu0 %v4217_v13  ;;  %3043 = vmatprep.subr.bf16.mxu1 %v4220_v14  ;;  %v4310_v13 = vld [vmem:[#allocation11 + $0x3ec] ss:$16 sps:$4 sm:$0xff]   ;;  %v4305_v14 = vld [vmem:[#allocation11 + $0x3e0] ss:$16 sps:$4 sm:$0xff]  }
 0x388   : > { %2953 = vmatmul.mubr.bf16.vlgmr.msra.gmra.mrb[0].mxu0 %v2126_v15  ;;  %3035 = vmatmul.mubr.bf16.vlgmr.msra.gmra.mrb[0].mxu1 %v2126_v15  ;;  %v4308_v15 = vld [vmem:[#allocation11 + $0x3e8] ss:$16 sps:$4 sm:$0xff]  }
 0x389   : > { %2962 = vmatpush1.bf16.msra.mxu0 %v4215_v16  ;;  %3044 = vmatpush1.bf16.msra.mxu1 %v4218_v17  ;;  %v2124_v16 = vld [vmem:[#allocation3 + $0x10] sm:$0xff] }
 0x38a   : > { %2963 = vmatprep.subr.bf16.mxu0 %v4223_v18  ;;  %3045 = vmatprep.subr.bf16.mxu1 %v4226_v19  ;;  %v2128_v17 = vpack.c.bf16 %v2124_v16, %v2124_v16  ;;  %v2260_v18 = vlaneseq }
 0x38b   : > { %2993 = vmatprep.mubr.bf16.mxu0 %v2129_v41  ;;  %3075 = vmatprep.mubr.bf16.mxu1 %v2129_v41 }
 0x38c   : > { %v2261_v19 = vshrl.u32 %v2260_v18, 7 }
 0x38d   : > { %2964 = vmatpush1.bf16.msra.mxu0 %v4221_v20  ;;  %3046 = vmatpush1.bf16.msra.mxu1 %v4224_v21 }
 0x38e   : > { %2965 = vmatprep.subr.bf16.mxu0 %v4229_v22  ;;  %3047 = vmatprep.subr.bf16.mxu1 %v4232_v23  ;;  %v2262_v20 = vsub.s32 0, %v2261_v19  ;;  %v2270_v21 = vsub.s32 2, %v2261_v19  ;;  %v2258_v22 = vld [vmem:[#allocation12] sm:$0xf]  ;;  %v2266_v23 = vsub.s32 1, %v2261_v19 }
 0x391   : > { %2966 = vmatpush1.bf16.msra.mxu0 %v4227_v24  ;;  %3048 = vmatpush1.bf16.msra.mxu1 %v4230_v25  ;;  %v2274_v24 = vsub.s32 3, %v2261_v19  ;;  %v2263_v25 = vrot.slane %v2258_v22, %v2262_v20 }
 0x392   : > { %2967 = vmatprep.subr.bf16.mxu0 %v4235_v26  ;;  %3049 = vmatprep.subr.bf16.mxu1 %v4238_v27  ;;  %v2271_v26 = vrot.slane %v2258_v22, %v2270_v21  ;;  %v2267_v27 = vrot.slane %v2258_v22, %v2266_v23 }
 0x395   : > { %2968 = vmatpush1.bf16.msra.mxu0 %v4233_v28  ;;  %3050 = vmatpush1.bf16.msra.mxu1 %v4236_v29  ;;  %v2275_v28 = vrot.slane %v2258_v22, %v2274_v24 }
 0x396   : > { %2969 = vmatprep.subr.bf16.mxu0 %v4241_v30  ;;  %3051 = vmatprep.subr.bf16.mxu1 %v4244_v31 }
 0x399   : > { %2970 = vmatpush1.bf16.msra.mxu0 %v4239_v32  ;;  %3052 = vmatpush1.bf16.msra.mxu1 %v4242_v33 }
 0x39a   : > { %2971 = vmatprep.subr.bf16.mxu0 %v4247_v34  ;;  %3053 = vmatprep.subr.bf16.mxu1 %v4250_v35 }
 0x39d   : > { %2972 = vmatpush1.bf16.msra.mxu0 %v4245_v36  ;;  %3054 = vmatpush1.bf16.msra.mxu1 %v4248_v37 }
 0x39e   : > { %2973 = vmatprep.subr.bf16.mxu0 %v4253_v38  ;;  %3055 = vmatprep.subr.bf16.mxu1 %v4256_v39 }
 0x3a1   : > { %2974 = vmatpush1.bf16.msra.mxu0 %v4251_v42  ;;  %3056 = vmatpush1.bf16.msra.mxu1 %v4254_v43 }
 0x3a2   : > { %2975 = vmatprep.subr.bf16.mxu0 %v4259_v44  ;;  %3057 = vmatprep.subr.bf16.mxu1 %v4262_v45 }
 0x3a5   : > { %2976 = vmatpush1.bf16.msra.mxu0 %v4257_v46  ;;  %3058 = vmatpush1.bf16.msra.mxu1 %v4260_v47 }
 0x3a6   : > { %2977 = vmatprep.subr.bf16.mxu0 %v4265_v48  ;;  %3059 = vmatprep.subr.bf16.mxu1 %v4268_v49 }
 0x3a9   : > { %2978 = vmatpush1.bf16.msra.mxu0 %v4263_v50  ;;  %3060 = vmatpush1.bf16.msra.mxu1 %v4266_v51 }
 0x3aa   : > { %2979 = vmatprep.subr.bf16.mxu0 %v4271_v52  ;;  %3061 = vmatprep.subr.bf16.mxu1 %v4274_v53 }
 0x3ad   : > { %2980 = vmatpush1.bf16.msra.mxu0 %v4269_v54  ;;  %3062 = vmatpush1.bf16.msra.mxu1 %v4272_v55 }
 0x3ae   : > { %2981 = vmatprep.subr.bf16.mxu0 %v4277_v56  ;;  %3063 = vmatprep.subr.bf16.mxu1 %v4280_v57 }
 0x3b1   : > { %2982 = vmatpush1.bf16.msra.mxu0 %v4275_v58  ;;  %3064 = vmatpush1.bf16.msra.mxu1 %v4278_v59 }
 0x3b2   : > { %2983 = vmatprep.subr.bf16.mxu0 %v4283_v60  ;;  %3065 = vmatprep.subr.bf16.mxu1 %v4286_v61 }
 0x3b5   : > { %2984 = vmatpush1.bf16.msra.mxu0 %v4281_v62  ;;  %3066 = vmatpush1.bf16.msra.mxu1 %v4284_v63 }
 0x3b6   : > { %2985 = vmatprep.subr.bf16.mxu0 %v4289_v0  ;;  %3067 = vmatprep.subr.bf16.mxu1 %v4292_v1 }
 0x3b9   : > { %2986 = vmatpush1.bf16.msra.mxu0 %v4287_v2  ;;  %3068 = vmatpush1.bf16.msra.mxu1 %v4290_v3 }
 0x3ba   : > { %2987 = vmatprep.subr.bf16.mxu0 %v4295_v4  ;;  %3069 = vmatprep.subr.bf16.mxu1 %v4298_v5 }
 0x3bd   : > { %2988 = vmatpush1.bf16.msra.mxu0 %v4293_v6  ;;  %3070 = vmatpush1.bf16.msra.mxu1 %v4296_v7 }
 0x3be   : > { %2989 = vmatprep.subr.bf16.mxu0 %v4301_v8  ;;  %3071 = vmatprep.subr.bf16.mxu1 %v4304_v9 }
 0x3c1   : > { %2990 = vmatpush1.bf16.msra.mxu0 %v4299_v10  ;;  %3072 = vmatpush1.bf16.msra.mxu1 %v4302_v11 }
 0x3c2   : > { %2991 = vmatprep.subr.bf16.mxu0 %v4307_v12  ;;  %3073 = vmatprep.subr.bf16.mxu1 %v4310_v13 }
 0x3c5   : > { %2992 = vmatpush1.bf16.msra.mxu0 %v4305_v14  ;;  %3074 = vmatpush1.bf16.msra.mxu1 %v4308_v15 }
 0x3c8   : > { %2994 = vmatmul.mubr.bf16.vlgmr.msra.gmra.mrb[0].mxu0 %v2128_v17  ;;  %3076 = vmatmul.mubr.bf16.vlgmr.msra.gmra.mrb[0].mxu1 %v2128_v17 }
 0x49b   : > { %v2995_v29 = vpop.f32.mrb[0].mxu0  ;;  %v3077_v30 = vpop.f32.mrb[0].mxu1 }
 0x49c   : > { %v3749_v31 = vadd.f32 %v2995_v29, %v2263_v25  ;;  %v3751_v32 = vadd.f32 %v3077_v30, %v2271_v26  ;;  %v2997_v33 = vpop.f32.mrb[1].mxu0  ;;  %v3079_v34 = vpop.f32.mrb[1].mxu1 }
 0x49d   : > { %v3750_v35 = vadd.f32 %v2997_v33, %v2267_v27  ;;  %v3752_v36 = vadd.f32 %v3079_v34, %v2275_v28  ;;  %v2999_v37 = vpop.f32.mrb[2].mxu0  ;;  %v3081_v38 = vpop.f32.mrb[2].mxu1 }
 0x49e   : > { %3084 = vst [vmem:[%s4973_s7] sm:$0xff] %v3749_v31  ;;  %3086 = vst [vmem:[%s4973_s7 + $0x10] sm:$0xff] %v3751_v32  ;;  %v3000_v39 = vpop.f32.mrb[3].mxu0  ;;  %v3082_v40 = vpop.f32.mrb[3].mxu1 }
 0x49f   : > { %3085 = vst [vmem:[%s4973_s7 + $0x8] sm:$0xff] %v3750_v35  ;;  %3087 = vst [vmem:[%s4973_s7 + $0x18] sm:$0xff] %v3752_v36 }
 0x4a0 PF: > { %s5006_s10 = sld [smem:[#allocation19_spill]]  ;;  %p26_p5 = scmp.ge.s32.totalorder %s4605_s29, 5  }
 0x4a1   : > { %s5007_s24 = smov %s4525_s25  ;;  %s5008_s25 = smov %s4529_s26 }
 0x4a2   : > { %s5010_s27 = smov %s4605_s29  ;;  %28 = sbr.rel (!%p26_p5) target bundleno = 13 (0xd), region = 163 }
 0x4a6   : > { %s5009_s26 = smov %s5006_s10 }
 0x4a9   :  { %3125 = vsyncpa [#allocation5], 1 }
 0x4aa   :  { %3127 = vsyncpa [#allocation5 + $0x1], 1 }
 0x4ab   :  { %3128 = vsyncpa [#allocation7], 1 }
 0x4ac   :  { %3130 = vsyncpa [#allocation7 + $0x1], 1 }
 0x4ad   :  { %3131 = vsyncpa [#allocation10], 1 }
 0x4ae   :  { %3133 = vsyncpa [#allocation10 + $0x1], 1 }
 0x4af   :  { %3134 = vsyncpa [#allocation13], 1 }
 0x4b0   :  { %3136 = vsyncpa [#allocation13 + $0x1], 1 }

// kernel: vae_dilo3_forward.8
= control target key start
LH: loop header
LB: loop body
LE: loop exit
PB: predicated region body
PF: predicated region fallthrough
CT: control target
= control target key end

     0   :  { %s3275_s24 = smov 0   ;;  %s3942_s0 = inlined_call_operand.vmem [shape: f32[8,128], index: 0, kind: input, shape index: {}]   ;;  %s3943_s1 = inlined_call_operand.vmem [shape: bf16[128,512], index: 1, kind: input, shape index: {}]   ;;  %s3944_s2 = inlined_call_operand.vmem [shape: f32[1,512], index: 2, kind: input, shape index: {}]   ;;  %s3945_s3 = inlined_call_operand.vmem [shape: bf16[512,512], index: 3, kind: input, shape index: {}]   ;;  %s3946_s4 = inlined_call_operand.vmem [shape: f32[1,512], index: 4, kind: input, shape index: {}]   ;;  %s3947_s5 = inlined_call_operand.vmem [shape: bf16[512,256], index: 5, kind: input, shape index: {}]   ;;  %s3948_s6 = inlined_call_operand.vmem [shape: f32[1,256], index: 6, kind: input, shape index: {}]   ;;  %s3949_s7 = inlined_call_operand.vmem [shape: f32[8,256], index: 7, kind: output, shape index: {}]  }
   0x1 LB: > { %s3281_s25 = sadd.s32 4294967295, %s3232_s24   ;;  %p2580_p0 = scmp.ge.s32.totalorder %s3232_s24, 1  ;;  %s3232_s24 = sphi %s3275_s24, %s17_s24  }
   0x2   : > { %p396_p1 = scmp.lt.s32.totalorder %s3232_s24, 4 }
   0x4   : > { %p397_p2 = pnand %p2580_p0, %p396_p1 }
   0x5   : > { %p479_p3 = scmp.lt.s32.totalorder (!%p397_p2), %s3281_s25, 0  ;;  %p2622_p5 = scmp.ge.s32.totalorder (!%p397_p2), %s3281_s25, 1 }
   0x6   : > { %400 = sbr.rel (%p397_p2) target bundleno = 935 (0x3a7), region = 48 }
   0xd   : > { %s480_s26 = scalar_select %p479_p3, %s3281_s25, 0 }
   0xe   : > { %580 = sbr.rel (%p2622_p5) target bundleno = 273 (0x111), region = 52  ;;  %v3234_v2 = vmov (!%p2622_p5), 0   ;;  %v581_v33 = vld [vmem:[%s3942_s0] sm:$0xff] (!%p2622_p5)  ;;  %v617_v35 = vlaneseq (!%p2622_p5)  ;;  %s2855_s16 = sshll.u32 (!%p2622_p5), %s3281_s25, 5 }
   0xf   : > { %s2581_s27 = sshll.u32 %s480_s26, 2  ;;  %829 = vmatprep.mubr.bf16.mxu0 (!%p2622_p5), %v3234_v2  ;;  %870 = vmatprep.mubr.bf16.mxu1 (!%p2622_p5), %v3234_v2  ;;  %v582_v34 = vpack.c.bf16 (!%p2622_p5), %v581_v33, %v581_v33  ;;  %s893_s17 = scalar_lea.vmem (!%p2622_p5), [#allocation2], %s2855_s16 }
  0x10   : > { %p482_p4 = scmp.lt.s32.totalorder %s2581_s27, 3  ;;  %v618_v36 = vshrl.u32 (!%p2622_p5), %v617_v35, 7 }
  0x12   : > { %s3951_s27 = smov (!%p482_p4, %s2581_s27), 3  ;;  %v619_v37 = vsub.s32 (!%p2622_p5), 0, %v618_v36  ;;  %v627_v38 = vsub.s32 (!%p2622_p5), 2, %v618_v36  ;;  %v623_v40 = vsub.s32 (!%p2622_p5), 1, %v618_v36  ;;  %v631_v41 = vsub.s32 (!%p2622_p5), 3, %v618_v36 }
  0x13   : > { %s2582_s28 = sshll.u32 %s3951_s27, 2  ;;  %s494_s8 = scalar_lea.vmem %s3944_s2, %s3951_s27 }
  0x14   : > { %s3297_s11 = scalar_lea.vmem %s3943_s1, %s2582_s28  ;;  %v615_v39 = vld [vmem:[%s494_s8] sm:$0xf] (!%p2622_p5) }
  0x15   : > { %v2882_v0 = vld [vmem:[%s3297_s11 + $0x4] ss:$16 sps:$4 sm:$0xff]   ;;  %v2884_v1 = vld [vmem:[%s3297_s11 + $0xc] ss:$16 sps:$4 sm:$0xff]   ;;  %v2886_v3 = vld [vmem:[%s3297_s11] ss:$16 sps:$4 sm:$0xff]   ;;  %v620_v42 = vrot.slane %v615_v39, %v619_v37  ;;  %v628_v43 = vrot.slane %v615_v39, %v627_v38  ;;  %v624_v44 = vrot.slane %v615_v39, %v623_v40  ;;  %v632_v45 = vrot.slane %v615_v39, %v631_v41 }
  0x16   : > { %797 = vmatprep.subr.bf16.mxu0 %v2882_v0  ;;  %v2887_v4 = vld [vmem:[%s3297_s11 + $0x8] ss:$16 sps:$4 sm:$0xff]   ;;  %838 = vmatprep.subr.bf16.mxu1 %v2884_v1  ;;  %v2888_v5 = vld [vmem:[%s3297_s11 + $0x24] ss:$16 sps:$4 sm:$0xff]   ;;  %v2890_v6 = vld [vmem:[%s3297_s11 + $0x2c] ss:$16 sps:$4 sm:$0xff]  }
  0x17   : > { %798 = vmatpush1.bf16.msra.mxu0 %v2886_v3  ;;  %839 = vmatpush1.bf16.msra.mxu1 %v2887_v4  ;;  %v2892_v7 = vld [vmem:[%s3297_s11 + $0x20] ss:$16 sps:$4 sm:$0xff]   ;;  %v2893_v8 = vld [vmem:[%s3297_s11 + $0x28] ss:$16 sps:$4 sm:$0xff]   ;;  %v2894_v9 = vld [vmem:[%s3297_s11 + $0x44] ss:$16 sps:$4 sm:$0xff]  }
  0x18   : > { %799 = vmatprep.subr.bf16.mxu0 %v2888_v5  ;;  %840 = vmatprep.subr.bf16.mxu1 %v2890_v6  ;;  %v2896_v10 = vld [vmem:[%s3297_s11 + $0x4c] ss:$16 sps:$4 sm:$0xff]   ;;  %v2898_v11 = vld [vmem:[%s3297_s11 + $0x40] ss:$16 sps:$4 sm:$0xff]   ;;  %v2899_v12 = vld [vmem:[%s3297_s11 + $0x48] ss:$16 sps:$4 sm:$0xff]  }
  0x19   : > { %v2900_v13 = vld [vmem:[%s3297_s11 + $0x64] ss:$16 sps:$4 sm:$0xff]   ;;  %v2902_v14 = vld [vmem:[%s3297_s11 + $0x6c] ss:$16 sps:$4 sm:$0xff]   ;;  %v2904_v15 = vld [vmem:[%s3297_s11 + $0x60] ss:$16 sps:$4 sm:$0xff]  }
  0x1a   : > { %v2905_v16 = vld [vmem:[%s3297_s11 + $0x68] ss:$16 sps:$4 sm:$0xff]   ;;  %v2906_v17 = vld [vmem:[%s3297_s11 + $0x84] ss:$16 sps:$4 sm:$0xff]   ;;  %v2908_v18 = vld [vmem:[%s3297_s11 + $0x8c] ss:$16 sps:$4 sm:$0xff]  }
  0x1b   : > { %800 = vmatpush1.bf16.msra.mxu0 %v2892_v7  ;;  %841 = vmatpush1.bf16.msra.mxu1 %v2893_v8  ;;  %v2910_v19 = vld [vmem:[%s3297_s11 + $0x80] ss:$16 sps:$4 sm:$0xff]   ;;  %v2911_v20 = vld [vmem:[%s3297_s11 + $0x88] ss:$16 sps:$4 sm:$0xff]   ;;  %v2912_v21 = vld [vmem:[%s3297_s11 + $0xa4] ss:$16 sps:$4 sm:$0xff]  }
  0x1c   : > { %801 = vmatprep.subr.bf16.mxu0 %v2894_v9  ;;  %842 = vmatprep.subr.bf16.mxu1 %v2896_v10  ;;  %v2914_v22 = vld [vmem:[%s3297_s11 + $0xac] ss:$16 sps:$4 sm:$0xff]   ;;  %v2916_v23 = vld [vmem:[%s3297_s11 + $0xa0] ss:$16 sps:$4 sm:$0xff]   ;;  %v2917_v24 = vld [vmem:[%s3297_s11 + $0xa8] ss:$16 sps:$4 sm:$0xff]  }
  0x1d   : > { %v2918_v25 = vld [vmem:[%s3297_s11 + $0xc4] ss:$16 sps:$4 sm:$0xff]   ;;  %v2920_v26 = vld [vmem:[%s3297_s11 + $0xcc] ss:$16 sps:$4 sm:$0xff]   ;;  %v2922_v27 = vld [vmem:[%s3297_s11 + $0xc0] ss:$16 sps:$4 sm:$0xff]  }
  0x1e   : > { %v2923_v28 = vld [vmem:[%s3297_s11 + $0xc8] ss:$16 sps:$4 sm:$0xff]   ;;  %v2924_v29 = vld [vmem:[%s3297_s11 + $0xe4] ss:$16 sps:$4 sm:$0xff]   ;;  %v2926_v30 = vld [vmem:[%s3297_s11 + $0xec] ss:$16 sps:$4 sm:$0xff]  }
  0x1f   : > { %802 = vmatpush1.bf16.msra.mxu0 %v2898_v11  ;;  %843 = vmatpush1.bf16.msra.mxu1 %v2899_v12  ;;  %v2928_v31 = vld [vmem:[%s3297_s11 + $0xe0] ss:$16 sps:$4 sm:$0xff]   ;;  %v2929_v32 = vld [vmem:[%s3297_s11 + $0xe8] ss:$16 sps:$4 sm:$0xff]  }
  0x20   : > { %803 = vmatprep.subr.bf16.mxu0 %v2900_v13  ;;  %844 = vmatprep.subr.bf16.mxu1 %v2902_v14 }
  0x23   : > { %804 = vmatpush1.bf16.msra.mxu0 %v2904_v15  ;;  %845 = vmatpush1.bf16.msra.mxu1 %v2905_v16 }
  0x24   : > { %805 = vmatprep.subr.bf16.mxu0 %v2906_v17  ;;  %846 = vmatprep.subr.bf16.mxu1 %v2908_v18 }
  0x27   : > { %806 = vmatpush1.bf16.msra.mxu0 %v2910_v19  ;;  %847 = vmatpush1.bf16.msra.mxu1 %v2911_v20 }
  0x28   : > { %807 = vmatprep.subr.bf16.mxu0 %v2912_v21  ;;  %848 = vmatprep.subr.bf16.mxu1 %v2914_v22 }
  0x2b   : > { %808 = vmatpush1.bf16.msra.mxu0 %v2916_v23  ;;  %849 = vmatpush1.bf16.msra.mxu1 %v2917_v24 }
  0x2c   : > { %809 = vmatprep.subr.bf16.mxu0 %v2918_v25  ;;  %850 = vmatprep.subr.bf16.mxu1 %v2920_v26 }
  0x2f   : > { %810 = vmatpush1.bf16.msra.mxu0 %v2922_v27  ;;  %851 = vmatpush1.bf16.msra.mxu1 %v2923_v28 }
  0x30   : > { %811 = vmatprep.subr.bf16.mxu0 %v2924_v29  ;;  %852 = vmatprep.subr.bf16.mxu1 %v2926_v30 }
  0x33   : > { %812 = vmatpush1.bf16.msra.mxu0 %v2928_v31  ;;  %853 = vmatpush1.bf16.msra.mxu1 %v2929_v32 }
  0x36   : > { %830 = vmatmul.mubr.bf16.vlgmr.msra.gmra.mrb[0].mxu0 %v582_v34  ;;  %871 = vmatmul.mubr.bf16.vlgmr.msra.gmra.mrb[0].mxu1 %v582_v34 }
 0x109   : > { %v831_v46 = vpop.f32.mrb[0].mxu0  ;;  %v872_v47 = vpop.f32.mrb[0].mxu1 }
 0x10a   : > { %v832_v48 = vadd.f32 %v831_v46, %v620_v42  ;;  %v873_v49 = vadd.f32 %v872_v47, %v628_v43  ;;  %v833_v50 = vpop.f32.mrb[1].mxu0  ;;  %v874_v51 = vpop.f32.mrb[1].mxu1 }
 0x10b   : > { %v834_v52 = vadd.f32 %v833_v50, %v624_v44  ;;  %v875_v53 = vadd.f32 %v874_v51, %v632_v45  ;;  %v835_v54 = vpop.f32.mrb[2].mxu0  ;;  %v876_v55 = vpop.f32.mrb[2].mxu1 }
 0x10c   : > { %vm879_vm0 = vcmp.ge.f32.partialorder %v832_v48, 0.0  ;;  %v883_v56 = vmul.f32 0.01, %v832_v48  ;;  %vm881_vm1 = vcmp.ge.f32.partialorder %v873_v49, 0.0  ;;  %v885_v57 = vmul.f32 0.01, %v873_v49 }
 0x10d   : > { %vm880_vm2 = vcmp.ge.f32.partialorder %v834_v52, 0.0  ;;  %v884_v58 = vmul.f32 0.01, %v834_v52  ;;  %vm882_vm3 = vcmp.ge.f32.partialorder %v875_v53, 0.0  ;;  %v886_v59 = vmul.f32 0.01, %v875_v53 }
 0x10e   : > { %v887_v60 = vsel %vm879_vm0, %v832_v48, %v883_v56  ;;  %v889_v61 = vsel %vm881_vm1, %v873_v49, %v885_v57  ;;  %v836_v62 = vpop.f32.mrb[3].mxu0  ;;  %v877_v63 = vpop.f32.mrb[3].mxu1 }
 0x10f   : > { %894 = vst [vmem:[%s893_s17] sm:$0xff] %v887_v60  ;;  %896 = vst [vmem:[%s893_s17 + $0x10] sm:$0xff] %v889_v61  ;;  %v888_v0 = vsel %vm880_vm2, %v834_v52, %v884_v58  ;;  %v890_v1 = vsel %vm882_vm3, %v875_v53, %v886_v59 }
 0x110   : > { %895 = vst [vmem:[%s893_s17 + $0x8] sm:$0xff] %v888_v0  ;;  %897 = vst [vmem:[%s893_s17 + $0x18] sm:$0xff] %v890_v1 }
 0x111 PF: > { %p899_p6 = scmp.lt.s32.totalorder %s3281_s25, 2 }
 0x113   : > { %p900_p7 = pnand %p2622_p5, %p899_p6 }
 0x114   : > { %v2930_v2 = vld [vmem:[%s3945_s3 + $0x4] ss:$16 sps:$4 sm:$0xff] (!%p900_p7)   ;;  %v2932_v3 = vld [vmem:[%s3945_s3 + $0xc] ss:$16 sps:$4 sm:$0xff] (!%p900_p7)   ;;  %v2934_v4 = vld [vmem:[%s3945_s3] ss:$16 sps:$4 sm:$0xff] (!%p900_p7)  }
 0x115   : > { %903 = sbr.rel (%p900_p7) target bundleno = 624 (0x270), region = 56  ;;  %1702 = vmatprep.subr.bf16.mxu0 (!%p900_p7), %v2930_v2  ;;  %v2935_v5 = vld [vmem:[%s3945_s3 + $0x8] ss:$16 sps:$4 sm:$0xff] (!%p900_p7)   ;;  %1784 = vmatprep.subr.bf16.mxu1 (!%p900_p7), %v2932_v3  ;;  %v2936_v6 = vld [vmem:[%s3945_s3 + $0x24] ss:$16 sps:$4 sm:$0xff] (!%p900_p7)   ;;  %s2785_s26 = sadd.s32 (!%p900_p7), 4294967295, %s3281_s25 }
 0x116   : > { %1703 = vmatpush1.bf16.msra.mxu0 (!%p900_p7), %v2934_v4  ;;  %1785 = vmatpush1.bf16.msra.mxu1 (!%p900_p7), %v2935_v5  ;;  %v2938_v7 = vld [vmem:[%s3945_s3 + $0x2c] ss:$16 sps:$4 sm:$0xff] (!%p900_p7)   ;;  %v2940_v8 = vld [vmem:[%s3945_s3 + $0x20] ss:$16 sps:$4 sm:$0xff] (!%p900_p7)   ;;  %v2941_v9 = vld [vmem:[%s3945_s3 + $0x28] ss:$16 sps:$4 sm:$0xff] (!%p900_p7)  }
 0x117   : > { %1704 = vmatprep.subr.bf16.mxu0 (!%p900_p7), %v2936_v6  ;;  %1786 = vmatprep.subr.bf16.mxu1 (!%p900_p7), %v2938_v7  ;;  %v2942_v10 = vld [vmem:[%s3945_s3 + $0x44] ss:$16 sps:$4 sm:$0xff] (!%p900_p7)   ;;  %v2944_v11 = vld [vmem:[%s3945_s3 + $0x4c] ss:$16 sps:$4 sm:$0xff] (!%p900_p7)   ;;  %v2946_v12 = vld [vmem:[%s3945_s3 + $0x40] ss:$16 sps:$4 sm:$0xff] (!%p900_p7)  }
 0x118   : > { %v2947_v13 = vld [vmem:[%s3945_s3 + $0x48] ss:$16 sps:$4 sm:$0xff] (!%p900_p7)   ;;  %v2948_v14 = vld [vmem:[%s3945_s3 + $0x64] ss:$16 sps:$4 sm:$0xff] (!%p900_p7)   ;;  %v2950_v15 = vld [vmem:[%s3945_s3 + $0x6c] ss:$16 sps:$4 sm:$0xff] (!%p900_p7)  }
 0x119   : > { %v2952_v16 = vld [vmem:[%s3945_s3 + $0x60] ss:$16 sps:$4 sm:$0xff] (!%p900_p7)   ;;  %v2953_v17 = vld [vmem:[%s3945_s3 + $0x68] ss:$16 sps:$4 sm:$0xff] (!%p900_p7)   ;;  %v2954_v18 = vld [vmem:[%s3945_s3 + $0x84] ss:$16 sps:$4 sm:$0xff] (!%p900_p7)  }
 0x11a   : > { %1705 = vmatpush1.bf16.msra.mxu0 (!%p900_p7), %v2940_v8  ;;  %1787 = vmatpush1.bf16.msra.mxu1 (!%p900_p7), %v2941_v9  ;;  %v2956_v19 = vld [vmem:[%s3945_s3 + $0x8c] ss:$16 sps:$4 sm:$0xff] (!%p900_p7)   ;;  %v2958_v20 = vld [vmem:[%s3945_s3 + $0x80] ss:$16 sps:$4 sm:$0xff] (!%p900_p7)   ;;  %v2959_v21 = vld [vmem:[%s3945_s3 + $0x88] ss:$16 sps:$4 sm:$0xff] (!%p900_p7)  }
 0x11b   : > { %1706 = vmatprep.subr.bf16.mxu0 (!%p900_p7), %v2942_v10  ;;  %1788 = vmatprep.subr.bf16.mxu1 (!%p900_p7), %v2944_v11  ;;  %v2960_v22 = vld [vmem:[%s3945_s3 + $0xa4] ss:$16 sps:$4 sm:$0xff] (!%p900_p7)   ;;  %v2962_v23 = vld [vmem:[%s3945_s3 + $0xac] ss:$16 sps:$4 sm:$0xff] (!%p900_p7)   ;;  %v2964_v24 = vld [vmem:[%s3945_s3 + $0xa0] ss:$16 sps:$4 sm:$0xff] (!%p900_p7)  }
 0x11c   : > { %v2965_v25 = vld [vmem:[%s3945_s3 + $0xa8] ss:$16 sps:$4 sm:$0xff]   ;;  %v2966_v26 = vld [vmem:[%s3945_s3 + $0xc4] ss:$16 sps:$4 sm:$0xff]   ;;  %v2968_v27 = vld [vmem:[%s3945_s3 + $0xcc] ss:$16 sps:$4 sm:$0xff]  }
 0x11d   : > { %v2970_v28 = vld [vmem:[%s3945_s3 + $0xc0] ss:$16 sps:$4 sm:$0xff]   ;;  %v2971_v29 = vld [vmem:[%s3945_s3 + $0xc8] ss:$16 sps:$4 sm:$0xff]   ;;  %v2972_v30 = vld [vmem:[%s3945_s3 + $0xe4] ss:$16 sps:$4 sm:$0xff]  }
 0x11e   : > { %1707 = vmatpush1.bf16.msra.mxu0 %v2946_v12  ;;  %1789 = vmatpush1.bf16.msra.mxu1 %v2947_v13  ;;  %v2974_v31 = vld [vmem:[%s3945_s3 + $0xec] ss:$16 sps:$4 sm:$0xff]   ;;  %v2976_v32 = vld [vmem:[%s3945_s3 + $0xe0] ss:$16 sps:$4 sm:$0xff]   ;;  %v2977_v33 = vld [vmem:[%s3945_s3 + $0xe8] ss:$16 sps:$4 sm:$0xff]  }
 0x11f   : > { %1708 = vmatprep.subr.bf16.mxu0 %v2948_v14  ;;  %1790 = vmatprep.subr.bf16.mxu1 %v2950_v15  ;;  %v2978_v34 = vld [vmem:[%s3945_s3 + $0x104] ss:$16 sps:$4 sm:$0xff]   ;;  %v2980_v35 = vld [vmem:[%s3945_s3 + $0x10c] ss:$16 sps:$4 sm:$0xff]   ;;  %v2982_v36 = vld [vmem:[%s3945_s3 + $0x100] ss:$16 sps:$4 sm:$0xff]  }
 0x120   : > { %v2983_v37 = vld [vmem:[%s3945_s3 + $0x108] ss:$16 sps:$4 sm:$0xff]   ;;  %v2984_v38 = vld [vmem:[%s3945_s3 + $0x124] ss:$16 sps:$4 sm:$0xff]   ;;  %v2986_v39 = vld [vmem:[%s3945_s3 + $0x12c] ss:$16 sps:$4 sm:$0xff]  }
 0x121   : > { %v2988_v40 = vld [vmem:[%s3945_s3 + $0x120] ss:$16 sps:$4 sm:$0xff]   ;;  %v2989_v41 = vld [vmem:[%s3945_s3 + $0x128] ss:$16 sps:$4 sm:$0xff]   ;;  %v2990_v42 = vld [vmem:[%s3945_s3 + $0x144] ss:$16 sps:$4 sm:$0xff]  }
 0x122   : > { %1709 = vmatpush1.bf16.msra.mxu0 %v2952_v16  ;;  %1791 = vmatpush1.bf16.msra.mxu1 %v2953_v17  ;;  %v2992_v43 = vld [vmem:[%s3945_s3 + $0x14c] ss:$16 sps:$4 sm:$0xff]   ;;  %v2994_v44 = vld [vmem:[%s3945_s3 + $0x140] ss:$16 sps:$4 sm:$0xff]   ;;  %v2995_v45 = vld [vmem:[%s3945_s3 + $0x148] ss:$16 sps:$4 sm:$0xff]  }
 0x123   : > { %1710 = vmatprep.subr.bf16.mxu0 %v2954_v18  ;;  %1792 = vmatprep.subr.bf16.mxu1 %v2956_v19  ;;  %v2996_v46 = vld [vmem:[%s3945_s3 + $0x164] ss:$16 sps:$4 sm:$0xff]   ;;  %v2998_v47 = vld [vmem:[%s3945_s3 + $0x16c] ss:$16 sps:$4 sm:$0xff]   ;;  %v3000_v49 = vld [vmem:[%s3945_s3 + $0x160] ss:$16 sps:$4 sm:$0xff]  }
 0x124   : > { %v905_v48 = vld [vmem:[#allocation2 + $0x8] sm:$0xff]  ;;  %v3002_v52 = vld [vmem:[%s3945_s3 + $0x184] ss:$16 sps:$4 sm:$0xff]   ;;  %v3006_v54 = vld [vmem:[%s3945_s3 + $0x180] ss:$16 sps:$4 sm:$0xff]   ;;  %s2856_s27 = sshll.u32 %s2785_s26, 5 }
 0x125   : > { %v909_v50 = vpack.c.bf16 %v905_v48, %v905_v48  ;;  %v3001_v51 = vld [vmem:[%s3945_s3 + $0x168] ss:$16 sps:$4 sm:$0xff]   ;;  %v3004_v53 = vld [vmem:[%s3945_s3 + $0x18c] ss:$16 sps:$4 sm:$0xff]   ;;  %v3008_v56 = vld [vmem:[%s3945_s3 + $0x1a4] ss:$16 sps:$4 sm:$0xff]  }
 0x126   : > { %1711 = vmatpush1.bf16.msra.mxu0 %v2958_v20  ;;  %1793 = vmatpush1.bf16.msra.mxu1 %v2959_v21  ;;  %v3007_v55 = vld [vmem:[%s3945_s3 + $0x188] ss:$16 sps:$4 sm:$0xff]   ;;  %v3010_v57 = vld [vmem:[%s3945_s3 + $0x1ac] ss:$16 sps:$4 sm:$0xff]   ;;  %v3012_v58 = vld [vmem:[%s3945_s3 + $0x1a0] ss:$16 sps:$4 sm:$0xff]  }
 0x127   : > { %1712 = vmatprep.subr.bf16.mxu0 %v2960_v22  ;;  %1794 = vmatprep.subr.bf16.mxu1 %v2962_v23  ;;  %v3013_v59 = vld [vmem:[%s3945_s3 + $0x1a8] ss:$16 sps:$4 sm:$0xff]   ;;  %v3014_v60 = vld [vmem:[%s3945_s3 + $0x1c4] ss:$16 sps:$4 sm:$0xff]   ;;  %v3016_v61 = vld [vmem:[%s3945_s3 + $0x1cc] ss:$16 sps:$4 sm:$0xff]  }
 0x128   : > { %1734 = vmatprep.mubr.bf16.mxu0 %v909_v50  ;;  %1816 = vmatprep.mubr.bf16.mxu1 %v909_v50  ;;  %v3018_v62 = vld [vmem:[%s3945_s3 + $0x1c0] ss:$16 sps:$4 sm:$0xff]   ;;  %v3019_v63 = vld [vmem:[%s3945_s3 + $0x1c8] ss:$16 sps:$4 sm:$0xff]   ;;  %v3020_v0 = vld [vmem:[%s3945_s3 + $0x1e4] ss:$16 sps:$4 sm:$0xff]  }
 0x129   : > { %v3022_v1 = vld [vmem:[%s3945_s3 + $0x1ec] ss:$16 sps:$4 sm:$0xff]   ;;  %v3024_v2 = vld [vmem:[%s3945_s3 + $0x1e0] ss:$16 sps:$4 sm:$0xff]   ;;  %v3025_v3 = vld [vmem:[%s3945_s3 + $0x1e8] ss:$16 sps:$4 sm:$0xff]  }
 0x12a   : > { %1713 = vmatpush1.bf16.msra.mxu0 %v2964_v24  ;;  %1795 = vmatpush1.bf16.msra.mxu1 %v2965_v25  ;;  %v904_v4 = vld [vmem:[#allocation2] sm:$0xff]  ;;  %v3031_v6 = vld [vmem:[%s3945_s3 + $0x20c] ss:$16 sps:$4 sm:$0xff]   ;;  %v3029_v9 = vld [vmem:[%s3945_s3 + $0x208] ss:$16 sps:$4 sm:$0xff]   ;;  %s1881_s28 = scalar_lea.vmem [#allocation3], %s2856_s27 }
 0x12b   : > { %1714 = vmatprep.subr.bf16.mxu0 %v2966_v26  ;;  %1796 = vmatprep.subr.bf16.mxu1 %v2968_v27  ;;  %v3028_v5 = vld [vmem:[%s3945_s3 + $0x204] ss:$16 sps:$4 sm:$0xff]   ;;  %v908_v7 = vpack.c.bf16 %v904_v4, %v904_v4  ;;  %v3026_v8 = vld [vmem:[%s3945_s3 + $0x200] ss:$16 sps:$4 sm:$0xff]   ;;  %v3037_v11 = vld [vmem:[%s3945_s3 + $0x22c] ss:$16 sps:$4 sm:$0xff]  }
 0x12c   : > { %v3034_v10 = vld [vmem:[%s3945_s3 + $0x224] ss:$16 sps:$4 sm:$0xff]   ;;  %v3032_v12 = vld [vmem:[%s3945_s3 + $0x220] ss:$16 sps:$4 sm:$0xff]   ;;  %v3035_v13 = vld [vmem:[%s3945_s3 + $0x228] ss:$16 sps:$4 sm:$0xff]  }
 0x12d   : > { %v3040_v14 = vld [vmem:[%s3945_s3 + $0x244] ss:$16 sps:$4 sm:$0xff]   ;;  %v3043_v15 = vld [vmem:[%s3945_s3 + $0x24c] ss:$16 sps:$4 sm:$0xff]   ;;  %v3038_v16 = vld [vmem:[%s3945_s3 + $0x240] ss:$16 sps:$4 sm:$0xff]  }
 0x12e   : > { %1715 = vmatpush1.bf16.msra.mxu0 %v2970_v28  ;;  %1797 = vmatpush1.bf16.msra.mxu1 %v2971_v29  ;;  %v3041_v17 = vld [vmem:[%s3945_s3 + $0x248] ss:$16 sps:$4 sm:$0xff]   ;;  %v3046_v18 = vld [vmem:[%s3945_s3 + $0x264] ss:$16 sps:$4 sm:$0xff]   ;;  %v3049_v19 = vld [vmem:[%s3945_s3 + $0x26c] ss:$16 sps:$4 sm:$0xff]  }
 0x12f   : > { %1716 = vmatprep.subr.bf16.mxu0 %v2972_v30  ;;  %1798 = vmatprep.subr.bf16.mxu1 %v2974_v31  ;;  %v3044_v20 = vld [vmem:[%s3945_s3 + $0x260] ss:$16 sps:$4 sm:$0xff]   ;;  %v3047_v21 = vld [vmem:[%s3945_s3 + $0x268] ss:$16 sps:$4 sm:$0xff]   ;;  %v3052_v22 = vld [vmem:[%s3945_s3 + $0x284] ss:$16 sps:$4 sm:$0xff]  }
 0x130   : > { %v3055_v23 = vld [vmem:[%s3945_s3 + $0x28c] ss:$16 sps:$4 sm:$0xff]   ;;  %v3050_v24 = vld [vmem:[%s3945_s3 + $0x280] ss:$16 sps:$4 sm:$0xff]   ;;  %v3053_v25 = vld [vmem:[%s3945_s3 + $0x288] ss:$16 sps:$4 sm:$0xff]  }
 0x131   : > { %v3058_v26 = vld [vmem:[%s3945_s3 + $0x2a4] ss:$16 sps:$4 sm:$0xff]   ;;  %v3061_v27 = vld [vmem:[%s3945_s3 + $0x2ac] ss:$16 sps:$4 sm:$0xff]   ;;  %v3056_v28 = vld [vmem:[%s3945_s3 + $0x2a0] ss:$16 sps:$4 sm:$0xff]  }
 0x132   : > { %1717 = vmatpush1.bf16.msra.mxu0 %v2976_v32  ;;  %1799 = vmatpush1.bf16.msra.mxu1 %v2977_v33  ;;  %v3059_v29 = vld [vmem:[%s3945_s3 + $0x2a8] ss:$16 sps:$4 sm:$0xff]   ;;  %v3064_v30 = vld [vmem:[%s3945_s3 + $0x2c4] ss:$16 sps:$4 sm:$0xff]   ;;  %v3067_v31 = vld [vmem:[%s3945_s3 + $0x2cc] ss:$16 sps:$4 sm:$0xff]  }
 0x133   : > { %1718 = vmatprep.subr.bf16.mxu0 %v2978_v34  ;;  %1800 = vmatprep.subr.bf16.mxu1 %v2980_v35  ;;  %v907_v32 = vld [vmem:[#allocation2 + $0x18] sm:$0xff]  ;;  %v3062_v34 = vld [vmem:[%s3945_s3 + $0x2c0] ss:$16 sps:$4 sm:$0xff]   ;;  %v3088_v48 = vld [vmem:[%s3945_s3 + $0x344] ss:$16 sps:$4 sm:$0xff]  }
 0x134   : > { %v911_v33 = vpack.c.bf16 %v907_v32, %v907_v32  ;;  %v3065_v35 = vld [vmem:[%s3945_s3 + $0x2c8] ss:$16 sps:$4 sm:$0xff]   ;;  %v3086_v50 = vld [vmem:[%s3945_s3 + $0x340] ss:$16 sps:$4 sm:$0xff]   ;;  %v3118_v4 = vld [vmem:[%s3945_s3 + $0x3e4] ss:$16 sps:$4 sm:$0xff]  }
 0x136   : > { %1719 = vmatpush1.bf16.msra.mxu0 %v2982_v36  ;;  %1801 = vmatpush1.bf16.msra.mxu1 %v2983_v37  ;;  %v3070_v36 = vld [vmem:[%s3945_s3 + $0x2e4] ss:$16 sps:$4 sm:$0xff]   ;;  %v3073_v37 = vld [vmem:[%s3945_s3 + $0x2ec] ss:$16 sps:$4 sm:$0xff]  }
 0x137   : > { %1720 = vmatprep.subr.bf16.mxu0 %v2984_v38  ;;  %1802 = vmatprep.subr.bf16.mxu1 %v2986_v39  ;;  %v3068_v38 = vld [vmem:[%s3945_s3 + $0x2e0] ss:$16 sps:$4 sm:$0xff]   ;;  %v3071_v39 = vld [vmem:[%s3945_s3 + $0x2e8] ss:$16 sps:$4 sm:$0xff]  }
 0x13a   : > { %1721 = vmatpush1.bf16.msra.mxu0 %v2988_v40  ;;  %1803 = vmatpush1.bf16.msra.mxu1 %v2989_v41  ;;  %v3076_v40 = vld [vmem:[%s3945_s3 + $0x304] ss:$16 sps:$4 sm:$0xff]   ;;  %v3079_v41 = vld [vmem:[%s3945_s3 + $0x30c] ss:$16 sps:$4 sm:$0xff]  }
 0x13b   : > { %1722 = vmatprep.subr.bf16.mxu0 %v2990_v42  ;;  %1804 = vmatprep.subr.bf16.mxu1 %v2992_v43  ;;  %v3074_v42 = vld [vmem:[%s3945_s3 + $0x300] ss:$16 sps:$4 sm:$0xff]   ;;  %v3077_v43 = vld [vmem:[%s3945_s3 + $0x308] ss:$16 sps:$4 sm:$0xff]  }
 0x13e   : > { %1723 = vmatpush1.bf16.msra.mxu0 %v2994_v44  ;;  %1805 = vmatpush1.bf16.msra.mxu1 %v2995_v45  ;;  %v3082_v44 = vld [vmem:[%s3945_s3 + $0x324] ss:$16 sps:$4 sm:$0xff]   ;;  %v3085_v45 = vld [vmem:[%s3945_s3 + $0x32c] ss:$16 sps:$4 sm:$0xff]  }
 0x13f   : > { %1724 = vmatprep.subr.bf16.mxu0 %v2996_v46  ;;  %1806 = vmatprep.subr.bf16.mxu1 %v2998_v47  ;;  %v3080_v46 = vld [vmem:[%s3945_s3 + $0x320] ss:$16 sps:$4 sm:$0xff]   ;;  %v3083_v47 = vld [vmem:[%s3945_s3 + $0x328] ss:$16 sps:$4 sm:$0xff]  }
 0x142   : > { %1725 = vmatpush1.bf16.msra.mxu0 %v3000_v49  ;;  %1807 = vmatpush1.bf16.msra.mxu1 %v3001_v51  ;;  %v3091_v49 = vld [vmem:[%s3945_s3 + $0x34c] ss:$16 sps:$4 sm:$0xff]   ;;  %v3089_v51 = vld [vmem:[%s3945_s3 + $0x348] ss:$16 sps:$4 sm:$0xff]  }
 0x143   : > { %1726 = vmatprep.subr.bf16.mxu0 %v3002_v52  ;;  %1808 = vmatprep.subr.bf16.mxu1 %v3004_v53  ;;  %v3094_v52 = vld [vmem:[%s3945_s3 + $0x364] ss:$16 sps:$4 sm:$0xff]   ;;  %v3097_v53 = vld [vmem:[%s3945_s3 + $0x36c] ss:$16 sps:$4 sm:$0xff]  }
 0x146   : > { %1727 = vmatpush1.bf16.msra.mxu0 %v3006_v54  ;;  %1809 = vmatpush1.bf16.msra.mxu1 %v3007_v55  ;;  %v3092_v54 = vld [vmem:[%s3945_s3 + $0x360] ss:$16 sps:$4 sm:$0xff]   ;;  %v3095_v55 = vld [vmem:[%s3945_s3 + $0x368] ss:$16 sps:$4 sm:$0xff]  }
 0x147   : > { %1728 = vmatprep.subr.bf16.mxu0 %v3008_v56  ;;  %1810 = vmatprep.subr.bf16.mxu1 %v3010_v57  ;;  %v3100_v56 = vld [vmem:[%s3945_s3 + $0x384] ss:$16 sps:$4 sm:$0xff]   ;;  %v3103_v57 = vld [vmem:[%s3945_s3 + $0x38c] ss:$16 sps:$4 sm:$0xff]  }
 0x14a   : > { %1729 = vmatpush1.bf16.msra.mxu0 %v3012_v58  ;;  %1811 = vmatpush1.bf16.msra.mxu1 %v3013_v59  ;;  %v3098_v58 = vld [vmem:[%s3945_s3 + $0x380] ss:$16 sps:$4 sm:$0xff]   ;;  %v3101_v59 = vld [vmem:[%s3945_s3 + $0x388] ss:$16 sps:$4 sm:$0xff]  }
 0x14b   : > { %1730 = vmatprep.subr.bf16.mxu0 %v3014_v60  ;;  %1812 = vmatprep.subr.bf16.mxu1 %v3016_v61  ;;  %v3106_v60 = vld [vmem:[%s3945_s3 + $0x3a4] ss:$16 sps:$4 sm:$0xff]   ;;  %v3109_v61 = vld [vmem:[%s3945_s3 + $0x3ac] ss:$16 sps:$4 sm:$0xff]  }
 0x14e   : > { %1731 = vmatpush1.bf16.msra.mxu0 %v3018_v62  ;;  %1813 = vmatpush1.bf16.msra.mxu1 %v3019_v63  ;;  %v3104_v62 = vld [vmem:[%s3945_s3 + $0x3a0] ss:$16 sps:$4 sm:$0xff]   ;;  %v3107_v63 = vld [vmem:[%s3945_s3 + $0x3a8] ss:$16 sps:$4 sm:$0xff]  }
 0x14f   : > { %1732 = vmatprep.subr.bf16.mxu0 %v3020_v0  ;;  %1814 = vmatprep.subr.bf16.mxu1 %v3022_v1  ;;  %v3112_v0 = vld [vmem:[%s3945_s3 + $0x3c4] ss:$16 sps:$4 sm:$0xff]   ;;  %v3115_v1 = vld [vmem:[%s3945_s3 + $0x3cc] ss:$16 sps:$4 sm:$0xff]  }
 0x152   : > { %1733 = vmatpush1.bf16.msra.mxu0 %v3024_v2  ;;  %1815 = vmatpush1.bf16.msra.mxu1 %v3025_v3  ;;  %v3110_v2 = vld [vmem:[%s3945_s3 + $0x3c0] ss:$16 sps:$4 sm:$0xff]   ;;  %v3113_v3 = vld [vmem:[%s3945_s3 + $0x3c8] ss:$16 sps:$4 sm:$0xff]  }
 0x153   : > { %1743 = vmatprep.subr.bf16.mxu0 %v3028_v5  ;;  %1825 = vmatprep.subr.bf16.mxu1 %v3031_v6  ;;  %v3121_v5 = vld [vmem:[%s3945_s3 + $0x3ec] ss:$16 sps:$4 sm:$0xff]   ;;  %v3116_v6 = vld [vmem:[%s3945_s3 + $0x3e0] ss:$16 sps:$4 sm:$0xff]  }
 0x155   : > { %1735 = vmatmul.mubr.bf16.vlgmr.msra.gmra.mrb[0].mxu0 %v908_v7  ;;  %1817 = vmatmul.mubr.bf16.vlgmr.msra.gmra.mrb[0].mxu1 %v908_v7  ;;  %v3119_v7 = vld [vmem:[%s3945_s3 + $0x3e8] ss:$16 sps:$4 sm:$0xff]  }
 0x156   : > { %1744 = vmatpush1.bf16.msra.mxu0 %v3026_v8  ;;  %1826 = vmatpush1.bf16.msra.mxu1 %v3029_v9  ;;  %v906_v8 = vld [vmem:[#allocation2 + $0x10] sm:$0xff] }
 0x157   : > { %1745 = vmatprep.subr.bf16.mxu0 %v3034_v10  ;;  %1827 = vmatprep.subr.bf16.mxu1 %v3037_v11  ;;  %v910_v9 = vpack.c.bf16 %v906_v8, %v906_v8  ;;  %v1042_v10 = vlaneseq }
 0x158   : > { %1775 = vmatprep.mubr.bf16.mxu0 %v911_v33  ;;  %1857 = vmatprep.mubr.bf16.mxu1 %v911_v33 }
 0x159   : > { %v1043_v11 = vshrl.u32 %v1042_v10, 7 }
 0x15a   : > { %1746 = vmatpush1.bf16.msra.mxu0 %v3032_v12  ;;  %1828 = vmatpush1.bf16.msra.mxu1 %v3035_v13 }
 0x15b   : > { %1747 = vmatprep.subr.bf16.mxu0 %v3040_v14  ;;  %1829 = vmatprep.subr.bf16.mxu1 %v3043_v15  ;;  %v1044_v12 = vsub.s32 0, %v1043_v11  ;;  %v1052_v13 = vsub.s32 2, %v1043_v11  ;;  %v1040_v14 = vld [vmem:[%s3946_s4] sm:$0xf]  ;;  %v1048_v15 = vsub.s32 1, %v1043_v11 }
 0x15e   : > { %1748 = vmatpush1.bf16.msra.mxu0 %v3038_v16  ;;  %1830 = vmatpush1.bf16.msra.mxu1 %v3041_v17  ;;  %v1056_v16 = vsub.s32 3, %v1043_v11  ;;  %v1045_v17 = vrot.slane %v1040_v14, %v1044_v12 }
 0x15f   : > { %1749 = vmatprep.subr.bf16.mxu0 %v3046_v18  ;;  %1831 = vmatprep.subr.bf16.mxu1 %v3049_v19  ;;  %v1053_v18 = vrot.slane %v1040_v14, %v1052_v13  ;;  %v1049_v19 = vrot.slane %v1040_v14, %v1048_v15 }
 0x162   : > { %1750 = vmatpush1.bf16.msra.mxu0 %v3044_v20  ;;  %1832 = vmatpush1.bf16.msra.mxu1 %v3047_v21  ;;  %v1057_v20 = vrot.slane %v1040_v14, %v1056_v16 }
 0x163   : > { %1751 = vmatprep.subr.bf16.mxu0 %v3052_v22  ;;  %1833 = vmatprep.subr.bf16.mxu1 %v3055_v23 }
 0x166   : > { %1752 = vmatpush1.bf16.msra.mxu0 %v3050_v24  ;;  %1834 = vmatpush1.bf16.msra.mxu1 %v3053_v25 }
 0x167   : > { %1753 = vmatprep.subr.bf16.mxu0 %v3058_v26  ;;  %1835 = vmatprep.subr.bf16.mxu1 %v3061_v27 }
 0x16a   : > { %1754 = vmatpush1.bf16.msra.mxu0 %v3056_v28  ;;  %1836 = vmatpush1.bf16.msra.mxu1 %v3059_v29 }
 0x16b   : > { %1755 = vmatprep.subr.bf16.mxu0 %v3064_v30  ;;  %1837 = vmatprep.subr.bf16.mxu1 %v3067_v31 }
 0x16e   : > { %1756 = vmatpush1.bf16.msra.mxu0 %v3062_v34  ;;  %1838 = vmatpush1.bf16.msra.mxu1 %v3065_v35 }
 0x16f   : > { %1757 = vmatprep.subr.bf16.mxu0 %v3070_v36  ;;  %1839 = vmatprep.subr.bf16.mxu1 %v3073_v37 }
 0x172   : > { %1758 = vmatpush1.bf16.msra.mxu0 %v3068_v38  ;;  %1840 = vmatpush1.bf16.msra.mxu1 %v3071_v39 }
 0x173   : > { %1759 = vmatprep.subr.bf16.mxu0 %v3076_v40  ;;  %1841 = vmatprep.subr.bf16.mxu1 %v3079_v41 }
 0x176   : > { %1760 = vmatpush1.bf16.msra.mxu0 %v3074_v42  ;;  %1842 = vmatpush1.bf16.msra.mxu1 %v3077_v43 }
 0x177   : > { %1761 = vmatprep.subr.bf16.mxu0 %v3082_v44  ;;  %1843 = vmatprep.subr.bf16.mxu1 %v3085_v45 }
 0x17a   : > { %1762 = vmatpush1.bf16.msra.mxu0 %v3080_v46  ;;  %1844 = vmatpush1.bf16.msra.mxu1 %v3083_v47 }
 0x17b   : > { %1763 = vmatprep.subr.bf16.mxu0 %v3088_v48  ;;  %1845 = vmatprep.subr.bf16.mxu1 %v3091_v49 }
 0x17e   : > { %1764 = vmatpush1.bf16.msra.mxu0 %v3086_v50  ;;  %1846 = vmatpush1.bf16.msra.mxu1 %v3089_v51 }
 0x17f   : > { %1765 = vmatprep.subr.bf16.mxu0 %v3094_v52  ;;  %1847 = vmatprep.subr.bf16.mxu1 %v3097_v53 }
 0x182   : > { %1766 = vmatpush1.bf16.msra.mxu0 %v3092_v54  ;;  %1848 = vmatpush1.bf16.msra.mxu1 %v3095_v55 }
 0x183   : > { %1767 = vmatprep.subr.bf16.mxu0 %v3100_v56  ;;  %1849 = vmatprep.subr.bf16.mxu1 %v3103_v57 }
 0x186   : > { %1768 = vmatpush1.bf16.msra.mxu0 %v3098_v58  ;;  %1850 = vmatpush1.bf16.msra.mxu1 %v3101_v59 }
 0x187   : > { %1769 = vmatprep.subr.bf16.mxu0 %v3106_v60  ;;  %1851 = vmatprep.subr.bf16.mxu1 %v3109_v61 }
 0x18a   : > { %1770 = vmatpush1.bf16.msra.mxu0 %v3104_v62  ;;  %1852 = vmatpush1.bf16.msra.mxu1 %v3107_v63 }
 0x18b   : > { %1771 = vmatprep.subr.bf16.mxu0 %v3112_v0  ;;  %1853 = vmatprep.subr.bf16.mxu1 %v3115_v1 }
 0x18e   : > { %1772 = vmatpush1.bf16.msra.mxu0 %v3110_v2  ;;  %1854 = vmatpush1.bf16.msra.mxu1 %v3113_v3 }
 0x18f   : > { %1773 = vmatprep.subr.bf16.mxu0 %v3118_v4  ;;  %1855 = vmatprep.subr.bf16.mxu1 %v3121_v5 }
 0x192   : > { %1774 = vmatpush1.bf16.msra.mxu0 %v3116_v6  ;;  %1856 = vmatpush1.bf16.msra.mxu1 %v3119_v7 }
 0x195   : > { %1776 = vmatmul.mubr.bf16.vlgmr.msra.gmra.mrb[0].mxu0 %v910_v9  ;;  %1858 = vmatmul.mubr.bf16.vlgmr.msra.gmra.mrb[0].mxu1 %v910_v9 }
 0x268   : > { %v1777_v21 = vpop.f32.mrb[0].mxu0  ;;  %v1859_v22 = vpop.f32.mrb[0].mxu1 }
 0x269   : > { %v2857_v23 = vadd.f32 %v1777_v21, %v1045_v17  ;;  %v2859_v24 = vadd.f32 %v1859_v22, %v1053_v18  ;;  %v1779_v25 = vpop.f32.mrb[1].mxu0  ;;  %v1861_v26 = vpop.f32.mrb[1].mxu1 }
 0x26a   : > { %v2858_v27 = vadd.f32 %v1779_v25, %v1049_v19  ;;  %v2860_v28 = vadd.f32 %v1861_v26, %v1057_v20  ;;  %v1781_v29 = vpop.f32.mrb[2].mxu0  ;;  %v1863_v30 = vpop.f32.mrb[2].mxu1 }
 0x26b   : > { %vm1866_vm4 = vcmp.ge.f32.partialorder %v2857_v23, 0.0  ;;  %v1870_v31 = vmul.f32 0.01, %v2857_v23  ;;  %vm1868_vm5 = vcmp.ge.f32.partialorder %v2859_v24, 0.0  ;;  %v1872_v32 = vmul.f32 0.01, %v2859_v24 }
 0x26c   : > { %vm1867_vm6 = vcmp.ge.f32.partialorder %v2858_v27, 0.0  ;;  %v1871_v33 = vmul.f32 0.01, %v2858_v27  ;;  %vm1869_vm7 = vcmp.ge.f32.partialorder %v2860_v28, 0.0  ;;  %v1873_v34 = vmul.f32 0.01, %v2860_v28 }
 0x26d   : > { %v1874_v35 = vsel %vm1866_vm4, %v2857_v23, %v1870_v31  ;;  %v1876_v36 = vsel %vm1868_vm5, %v2859_v24, %v1872_v32  ;;  %v1782_v37 = vpop.f32.mrb[3].mxu0  ;;  %v1864_v38 = vpop.f32.mrb[3].mxu1 }
 0x26e   : > { %1882 = vst [vmem:[%s1881_s28] sm:$0xff] %v1874_v35  ;;  %1884 = vst [vmem:[%s1881_s28 + $0x10] sm:$0xff] %v1876_v36  ;;  %v1875_v39 = vsel %vm1867_vm6, %v2858_v27, %v1871_v33  ;;  %v1877_v40 = vsel %vm1869_vm7, %v2860_v28, %v1873_v34 }
 0x26f   : > { %1883 = vst [vmem:[%s1881_s28 + $0x8] sm:$0xff] %v1875_v39  ;;  %1885 = vst [vmem:[%s1881_s28 + $0x18] sm:$0xff] %v1877_v40 }
 0x270 PF: > { %1889 = sbr.rel (%p899_p6) target bundleno = 935 (0x3a7), region = 60  ;;  %v3122_v41 = vld [vmem:[%s3947_s5 + $0x4] ss:$8 sps:$4 sm:$0xff] (!%p899_p6)   ;;  %v3126_v43 = vld [vmem:[%s3947_s5] ss:$8 sps:$4 sm:$0xff] (!%p899_p6)  }
 0x271   : > { %v3124_v42 = vld [vmem:[%s3947_s5 + $0x104] ss:$8 sps:$4 sm:$0xff] (!%p899_p6)   ;;  %2294 = vmatprep.subr.bf16.mxu1 (!%p899_p6), %v3122_v41  ;;  %v3127_v44 = vld [vmem:[%s3947_s5 + $0x100] ss:$8 sps:$4 sm:$0xff] (!%p899_p6)   ;;  %v3128_v45 = vld [vmem:[%s3947_s5 + $0x14] ss:$8 sps:$4 sm:$0xff] (!%p899_p6)  }
 0x272   : > { %2335 = vmatprep.subr.bf16.mxu0 (!%p899_p6), %v3124_v42  ;;  %2295 = vmatpush1.bf16.msra.mxu1 (!%p899_p6), %v3126_v43  ;;  %v3130_v46 = vld [vmem:[%s3947_s5 + $0x114] ss:$8 sps:$4 sm:$0xff] (!%p899_p6)   ;;  %v3132_v47 = vld [vmem:[%s3947_s5 + $0x10] ss:$8 sps:$4 sm:$0xff] (!%p899_p6)   ;;  %v3134_v49 = vld [vmem:[%s3947_s5 + $0x24] ss:$8 sps:$4 sm:$0xff] (!%p899_p6)  }
 0x273   : > { %2336 = vmatpush1.bf16.msra.mxu0 (!%p899_p6), %v3127_v44  ;;  %2296 = vmatprep.subr.bf16.mxu1 (!%p899_p6), %v3128_v45  ;;  %v3133_v48 = vld [vmem:[%s3947_s5 + $0x110] ss:$8 sps:$4 sm:$0xff] (!%p899_p6)   ;;  %v3136_v50 = vld [vmem:[%s3947_s5 + $0x124] ss:$8 sps:$4 sm:$0xff] (!%p899_p6)   ;;  %v3138_v51 = vld [vmem:[%s3947_s5 + $0x20] ss:$8 sps:$4 sm:$0xff] (!%p899_p6)  }
 0x274   : > { %2337 = vmatprep.subr.bf16.mxu0 (!%p899_p6), %v3130_v46  ;;  %v3139_v52 = vld [vmem:[%s3947_s5 + $0x120] ss:$8 sps:$4 sm:$0xff] (!%p899_p6)   ;;  %v3140_v53 = vld [vmem:[%s3947_s5 + $0x34] ss:$8 sps:$4 sm:$0xff] (!%p899_p6)   ;;  %v3144_v55 = vld [vmem:[%s3947_s5 + $0x30] ss:$8 sps:$4 sm:$0xff] (!%p899_p6)  }
 0x275   : > { %v3142_v54 = vld [vmem:[%s3947_s5 + $0x134] ss:$8 sps:$4 sm:$0xff] (!%p899_p6)   ;;  %v3145_v56 = vld [vmem:[%s3947_s5 + $0x130] ss:$8 sps:$4 sm:$0xff] (!%p899_p6)   ;;  %v3146_v57 = vld [vmem:[%s3947_s5 + $0x44] ss:$8 sps:$4 sm:$0xff] (!%p899_p6)  }
 0x276   : > { %2297 = vmatpush1.bf16.msra.mxu1 (!%p899_p6), %v3132_v47  ;;  %v3148_v58 = vld [vmem:[%s3947_s5 + $0x144] ss:$8 sps:$4 sm:$0xff] (!%p899_p6)   ;;  %v3150_v59 = vld [vmem:[%s3947_s5 + $0x40] ss:$8 sps:$4 sm:$0xff] (!%p899_p6)   ;;  %v3152_v61 = vld [vmem:[%s3947_s5 + $0x54] ss:$8 sps:$4 sm:$0xff] (!%p899_p6)  }
 0x277   : > { %2338 = vmatpush1.bf16.msra.mxu0 %v3133_v48  ;;  %2298 = vmatprep.subr.bf16.mxu1 %v3134_v49  ;;  %v3151_v60 = vld [vmem:[%s3947_s5 + $0x140] ss:$8 sps:$4 sm:$0xff]   ;;  %v3154_v62 = vld [vmem:[%s3947_s5 + $0x154] ss:$8 sps:$4 sm:$0xff]   ;;  %v3156_v63 = vld [vmem:[%s3947_s5 + $0x50] ss:$8 sps:$4 sm:$0xff]   ;;  %v1964_v49 = vlaneseq }
 0x278   : > { %2339 = vmatprep.subr.bf16.mxu0 %v3136_v50  ;;  %v3157_v0 = vld [vmem:[%s3947_s5 + $0x150] ss:$8 sps:$4 sm:$0xff]   ;;  %v3158_v1 = vld [vmem:[%s3947_s5 + $0x64] ss:$8 sps:$4 sm:$0xff]   ;;  %v3162_v3 = vld [vmem:[%s3947_s5 + $0x60] ss:$8 sps:$4 sm:$0xff]  }
 0x279   : > { %v3160_v2 = vld [vmem:[%s3947_s5 + $0x164] ss:$8 sps:$4 sm:$0xff]   ;;  %v3163_v4 = vld [vmem:[%s3947_s5 + $0x160] ss:$8 sps:$4 sm:$0xff]   ;;  %v3164_v5 = vld [vmem:[%s3947_s5 + $0x74] ss:$8 sps:$4 sm:$0xff]  }
 0x27a   : > { %2299 = vmatpush1.bf16.msra.mxu1 %v3138_v51  ;;  %v3166_v6 = vld [vmem:[%s3947_s5 + $0x174] ss:$8 sps:$4 sm:$0xff]   ;;  %v3168_v7 = vld [vmem:[%s3947_s5 + $0x70] ss:$8 sps:$4 sm:$0xff]   ;;  %v3170_v9 = vld [vmem:[%s3947_s5 + $0x84] ss:$8 sps:$4 sm:$0xff]  }
 0x27b   : > { %2340 = vmatpush1.bf16.msra.mxu0 %v3139_v52  ;;  %2300 = vmatprep.subr.bf16.mxu1 %v3140_v53  ;;  %v3169_v8 = vld [vmem:[%s3947_s5 + $0x170] ss:$8 sps:$4 sm:$0xff]   ;;  %v3172_v10 = vld [vmem:[%s3947_s5 + $0x184] ss:$8 sps:$4 sm:$0xff]   ;;  %v3174_v11 = vld [vmem:[%s3947_s5 + $0x80] ss:$8 sps:$4 sm:$0xff]  }
 0x27c   : > { %2341 = vmatprep.subr.bf16.mxu0 %v3142_v54  ;;  %v3175_v12 = vld [vmem:[%s3947_s5 + $0x180] ss:$8 sps:$4 sm:$0xff]   ;;  %v3176_v13 = vld [vmem:[%s3947_s5 + $0x94] ss:$8 sps:$4 sm:$0xff]   ;;  %v3180_v15 = vld [vmem:[%s3947_s5 + $0x90] ss:$8 sps:$4 sm:$0xff]  }
 0x27d   : > { %v3178_v14 = vld [vmem:[%s3947_s5 + $0x194] ss:$8 sps:$4 sm:$0xff]   ;;  %v3181_v16 = vld [vmem:[%s3947_s5 + $0x190] ss:$8 sps:$4 sm:$0xff]   ;;  %v3182_v17 = vld [vmem:[%s3947_s5 + $0xa4] ss:$8 sps:$4 sm:$0xff]  }
 0x27e   : > { %2301 = vmatpush1.bf16.msra.mxu1 %v3144_v55  ;;  %v3184_v18 = vld [vmem:[%s3947_s5 + $0x1a4] ss:$8 sps:$4 sm:$0xff]   ;;  %v3186_v19 = vld [vmem:[%s3947_s5 + $0xa0] ss:$8 sps:$4 sm:$0xff]   ;;  %v3188_v21 = vld [vmem:[%s3947_s5 + $0xb4] ss:$8 sps:$4 sm:$0xff]  }
 0x27f   : > { %2342 = vmatpush1.bf16.msra.mxu0 %v3145_v56  ;;  %2302 = vmatprep.subr.bf16.mxu1 %v3146_v57  ;;  %v3187_v20 = vld [vmem:[%s3947_s5 + $0x1a0] ss:$8 sps:$4 sm:$0xff]   ;;  %v3190_v22 = vld [vmem:[%s3947_s5 + $0x1b4] ss:$8 sps:$4 sm:$0xff]   ;;  %v3192_v26 = vld [vmem:[%s3947_s5 + $0xb0] ss:$8 sps:$4 sm:$0xff]  }
 0x280   : > { %2343 = vmatprep.subr.bf16.mxu0 %v3148_v58  ;;  %v1891_v23 = vld [vmem:[#allocation3 + $0x8] sm:$0xff]  ;;  %v1893_v25 = vld [vmem:[#allocation3 + $0x18] sm:$0xff]  ;;  %v1890_v45 = vld [vmem:[#allocation3] sm:$0xff]  ;;  %v1965_v50 = vshrl.u32 %v1964_v49, 7 }
 0x281   : > { %v1895_v24 = vpack.c.bf16 %v1891_v23, %v1891_v23  ;;  %v3193_v27 = vld [vmem:[%s3947_s5 + $0x1b0] ss:$8 sps:$4 sm:$0xff]   ;;  %v1897_v28 = vpack.c.bf16 %v1893_v25, %v1893_v25  ;;  %v3194_v29 = vld [vmem:[%s3947_s5 + $0xc4] ss:$8 sps:$4 sm:$0xff]   ;;  %v3198_v31 = vld [vmem:[%s3947_s5 + $0xc0] ss:$8 sps:$4 sm:$0xff]   ;;  %v1894_v47 = vpack.c.bf16 %v1890_v45, %v1890_v45 }
 0x282   : > { %2303 = vmatpush1.bf16.msra.mxu1 %v3150_v59  ;;  %v3196_v30 = vld [vmem:[%s3947_s5 + $0x1c4] ss:$8 sps:$4 sm:$0xff]   ;;  %v3199_v32 = vld [vmem:[%s3947_s5 + $0x1c0] ss:$8 sps:$4 sm:$0xff]   ;;  %v3200_v33 = vld [vmem:[%s3947_s5 + $0xd4] ss:$8 sps:$4 sm:$0xff]  }
 0x283   : > { %2344 = vmatpush1.bf16.msra.mxu0 %v3151_v60  ;;  %2304 = vmatprep.subr.bf16.mxu1 %v3152_v61  ;;  %v3202_v34 = vld [vmem:[%s3947_s5 + $0x1d4] ss:$8 sps:$4 sm:$0xff]   ;;  %v3204_v35 = vld [vmem:[%s3947_s5 + $0xd0] ss:$8 sps:$4 sm:$0xff]   ;;  %v3206_v37 = vld [vmem:[%s3947_s5 + $0xe4] ss:$8 sps:$4 sm:$0xff]  }
 0x284   : > { %2345 = vmatprep.subr.bf16.mxu0 %v3154_v62  ;;  %2326 = vmatprep.mubr.bf16.mxu1 %v1895_v24  ;;  %v3205_v36 = vld [vmem:[%s3947_s5 + $0x1d0] ss:$8 sps:$4 sm:$0xff]   ;;  %v3208_v38 = vld [vmem:[%s3947_s5 + $0x1e4] ss:$8 sps:$4 sm:$0xff]   ;;  %v3210_v39 = vld [vmem:[%s3947_s5 + $0xe0] ss:$8 sps:$4 sm:$0xff]  }
 0x285   : > { %2367 = vmatprep.mubr.bf16.mxu0 %v1897_v28  ;;  %v3211_v40 = vld [vmem:[%s3947_s5 + $0x1e0] ss:$8 sps:$4 sm:$0xff]   ;;  %v3212_v41 = vld [vmem:[%s3947_s5 + $0xf4] ss:$8 sps:$4 sm:$0xff]   ;;  %v3216_v43 = vld [vmem:[%s3947_s5 + $0xf0] ss:$8 sps:$4 sm:$0xff]  }
 0x286   : > { %2305 = vmatpush1.bf16.msra.mxu1 %v3156_v63  ;;  %v3214_v42 = vld [vmem:[%s3947_s5 + $0x1f4] ss:$8 sps:$4 sm:$0xff]   ;;  %v3217_v44 = vld [vmem:[%s3947_s5 + $0x1f0] ss:$8 sps:$4 sm:$0xff]   ;;  %v1966_v51 = vsub.s32 0, %v1965_v50  ;;  %v1970_v53 = vsub.s32 1, %v1965_v50 }
 0x287   : > { %2346 = vmatpush1.bf16.msra.mxu0 %v3157_v0  ;;  %2306 = vmatprep.subr.bf16.mxu1 %v3158_v1  ;;  %v1892_v46 = vld [vmem:[#allocation3 + $0x10] sm:$0xff]  ;;  %v1962_v52 = vld [vmem:[%s3948_s6] sm:$0x3] }
 0x288   : > { %2347 = vmatprep.subr.bf16.mxu0 %v3160_v2  ;;  %v1896_v48 = vpack.c.bf16 %v1892_v46, %v1892_v46  ;;  %v1967_v54 = vrot.slane %v1962_v52, %v1966_v51  ;;  %v1971_v55 = vrot.slane %v1962_v52, %v1970_v53 }
 0x28a   : > { %2307 = vmatpush1.bf16.msra.mxu1 %v3162_v3 }
 0x28b   : > { %2348 = vmatpush1.bf16.msra.mxu0 %v3163_v4  ;;  %2308 = vmatprep.subr.bf16.mxu1 %v3164_v5 }
 0x28c   : > { %2349 = vmatprep.subr.bf16.mxu0 %v3166_v6 }
 0x28e   : > { %2309 = vmatpush1.bf16.msra.mxu1 %v3168_v7 }
 0x28f   : > { %2350 = vmatpush1.bf16.msra.mxu0 %v3169_v8  ;;  %2310 = vmatprep.subr.bf16.mxu1 %v3170_v9 }
 0x290   : > { %2351 = vmatprep.subr.bf16.mxu0 %v3172_v10 }
 0x292   : > { %2311 = vmatpush1.bf16.msra.mxu1 %v3174_v11 }
 0x293   : > { %2352 = vmatpush1.bf16.msra.mxu0 %v3175_v12  ;;  %2312 = vmatprep.subr.bf16.mxu1 %v3176_v13 }
 0x294   : > { %2353 = vmatprep.subr.bf16.mxu0 %v3178_v14 }
 0x296   : > { %2313 = vmatpush1.bf16.msra.mxu1 %v3180_v15 }
 0x297   : > { %2354 = vmatpush1.bf16.msra.mxu0 %v3181_v16  ;;  %2314 = vmatprep.subr.bf16.mxu1 %v3182_v17 }
 0x298   : > { %2355 = vmatprep.subr.bf16.mxu0 %v3184_v18 }
 0x29a   : > { %2315 = vmatpush1.bf16.msra.mxu1 %v3186_v19 }
 0x29b   : > { %2356 = vmatpush1.bf16.msra.mxu0 %v3187_v20  ;;  %2316 = vmatprep.subr.bf16.mxu1 %v3188_v21 }
 0x29c   : > { %2357 = vmatprep.subr.bf16.mxu0 %v3190_v22 }
 0x29e   : > { %2317 = vmatpush1.bf16.msra.mxu1 %v3192_v26 }
 0x29f   : > { %2358 = vmatpush1.bf16.msra.mxu0 %v3193_v27  ;;  %2318 = vmatprep.subr.bf16.mxu1 %v3194_v29 }
 0x2a0   : > { %2359 = vmatprep.subr.bf16.mxu0 %v3196_v30 }
 0x2a2   : > { %2319 = vmatpush1.bf16.msra.mxu1 %v3198_v31 }
 0x2a3   : > { %2360 = vmatpush1.bf16.msra.mxu0 %v3199_v32  ;;  %2320 = vmatprep.subr.bf16.mxu1 %v3200_v33 }
 0x2a4   : > { %2361 = vmatprep.subr.bf16.mxu0 %v3202_v34 }
 0x2a6   : > { %2321 = vmatpush1.bf16.msra.mxu1 %v3204_v35 }
 0x2a7   : > { %2362 = vmatpush1.bf16.msra.mxu0 %v3205_v36  ;;  %2322 = vmatprep.subr.bf16.mxu1 %v3206_v37 }
 0x2a8   : > { %2363 = vmatprep.subr.bf16.mxu0 %v3208_v38 }
 0x2aa   : > { %2323 = vmatpush1.bf16.msra.mxu1 %v3210_v39 }
 0x2ab   : > { %2364 = vmatpush1.bf16.msra.mxu0 %v3211_v40  ;;  %2324 = vmatprep.subr.bf16.mxu1 %v3212_v41 }
 0x2ac   : > { %2365 = vmatprep.subr.bf16.mxu0 %v3214_v42 }
 0x2ae   : > { %2325 = vmatpush1.bf16.msra.mxu1 %v3216_v43 }
 0x2af   : > { %2366 = vmatpush1.bf16.msra.mxu0 %v3217_v44 }
 0x2b1   : > { %2327 = vmatmul.mubr.bf16.vlgmr.msra.gmra.mrb[0].mxu1 %v1894_v47 }
 0x2b2   : > { %2368 = vmatmul.mubr.bf16.vlgmr.msra.gmra.mrb[0].mxu0 %v1896_v48 }
 0x384   : > { %v2328_v56 = vpop.f32.mrb[0].mxu1 }
 0x385   : > { %v2369_v57 = vpop.f32.mrb[0].mxu0  ;;  %v2329_v58 = vadd.f32 %v2328_v56, %v1967_v54  ;;  %v2330_v59 = vpop.f32.mrb[1].mxu1 }
 0x386   : > { %v2371_v60 = vpop.f32.mrb[1].mxu0  ;;  %v2331_v61 = vadd.f32 %v2330_v59, %v1971_v55  ;;  %v2332_v62 = vpop.f32.mrb[2].mxu1 }
 0x387   : > { %v2373_v63 = vpop.f32.mrb[2].mxu0  ;;  %v2370_v0 = vadd.f32 %v2369_v57, %v2329_v58  ;;  %v2333_v1 = vpop.f32.mrb[3].mxu1 }
 0x388   : > { %v2374_v2 = vpop.f32.mrb[3].mxu0  ;;  %v2372_v3 = vadd.f32 %v2371_v60, %v2331_v61 }
 0x389   : > { %v2376_v4 = vsub.f32 0.0, %v2370_v0 }
 0x38a   : > { %v2377_v5 = vsub.f32 0.0, %v2372_v3 }
 0x38b   : > { %v2378_v6 = vmul.f32 1.442695, %v2376_v4 }
 0x38c   : > { %v2380_v7 = vmul.f32 1.442695, %v2377_v5 }
 0x38d   : > { %3218 = vpow2.f32 %v2378_v6 }
 0x38e   : > { %3220 = vpow2.f32 %v2380_v7 }
 0x397   : > { %v3219_v8 = vpop.eup %3218 }
 0x398   : > { %v3221_v9 = vpop.eup %3220  ;;  %v2382_v10 = vadd.f32 1.0, %v3219_v8 }
 0x399   : > { %v2383_v11 = vadd.f32 1.0, %v3221_v9 }
 0x39a   : > { %3222 = vrcp.f32 %v2382_v10 }
 0x39b   : > { %3224 = vrcp.f32 %v2383_v11 }
 0x3a4   : > { %v3223_v12 = vpop.eup %3222 }
 0x3a5   : > { %v3225_v13 = vpop.eup %3224  ;;  %2388 = vst [vmem:[%s3949_s7] sm:$0xff] %v3223_v12 }
 0x3a6   : > { %2389 = vst [vmem:[%s3949_s7 + $0x8] sm:$0xff] %v3225_v13 }
 0x3a7 PF: > { %s17_s24 = sadd.s32 1, %s3232_s24  }
 0x3a8   : > { %p14_p8 = scmp.ge.s32.totalorder %s17_s24, 5  }
 0x3aa   :  { %16 = sbr.rel (!%p14_p8) target bundleno = 1 (0x1), region = 107 }

// kernel: vae_dilo3_forward.11
= control target key start
LH: loop header
LB: loop body
LE: loop exit
PB: predicated region body
PF: predicated region fallthrough
CT: control target
= control target key end

     0   :  { %v87_v0 = vlaneseq  ;;  %v842_v2 = vmov 1966171168   ;;  %vm521_vm0 = vcmask 1041408   ;;  %vm669_vm1 = vcmask 80896   ;;  %s1236_s4 = inlined_call_operand.vmem [shape: f32[8,128], index: 4, kind: input, shape index: {}]   ;;  %s1237_s5 = inlined_call_operand.vmem [shape: f32[8,128], index: 5, kind: input, shape index: {}]   ;;  %s1238_s7 = inlined_call_operand.vmem [shape: f32[8,10,128], index: 7, kind: input, shape index: {}]   ;;  %s1239_s6 = inlined_call_operand.vmem [shape: f32[8,10,128], index: 6, kind: input, shape index: {}]   ;;  %s1240_s3 = inlined_call_operand.vmem [shape: f32[8,128], index: 3, kind: input, shape index: {}]   ;;  %s1241_s0 = inlined_call_operand.vmem [shape: f32[8,256], index: 0, kind: input, shape index: {}]   ;;  %s1242_s1 = inlined_call_operand.vmem [shape: f32[8,256], index: 1, kind: input, shape index: {}]   ;;  %s1243_s2 = inlined_call_operand.vmem [shape: f32[8,128], index: 2, kind: input, shape index: {}]   ;;  %s1244_s8 = inlined_call_operand.vmem [shape: f32[8,10], index: 8, kind: input, shape index: {}]   ;;  %s1245_s9 = inlined_call_operand.vmem [shape: f32[1,128], index: 9, kind: output, shape index: {}]  }
   0x1   :  { %v81_v1 = vld [vmem:[%s1236_s4] sm:$0xff]  ;;  %v85_v3 = vunpack.c.l.s4 %v842_v2  ;;  %v208_v7 = vld [vmem:[%s1238_s7 + $0x48] sm:$0x3]  ;;  %v914_v15 = vld [vmem:[%s1238_s7 + $0x10] sm:$0xff]  ;;  %vm588_vm2 = vcmask 130112   ;;  %vm653_vm3 = vcmask 1041409  }
   0x2   :  { %v132_v4 = vld [vmem:[%s1237_s5] sm:$0xff]  ;;  %v900_v5 = vshrl.u32 %v87_v0, 7  ;;  %v83_v10 = vcombine.high %v81_v1, %v81_v1  ;;  %v432_v13 = vsub.f32 0.0, %v208_v7  ;;  %v425_v18 = vsub.f32 0.0, %v914_v15  ;;  %v192_v38 = vld [vmem:[%s1239_s6 + $0x48] sm:$0x3] }
   0x3   :  { %v199_v6 = vld [vmem:[%s1238_s7] sm:$0xff]  ;;  %v86_v8 = vunpack.c.0.s8 %v85_v3  ;;  %v134_v12 = vcombine.high %v132_v4, %v132_v4  ;;  %v950_v33 = vadd.f32 -1.0, %v208_v7  ;;  %v973_v43 = vadd.f32 -1.0, %v914_v15  ;;  %v200_v48 = vld [vmem:[%s1238_s7 + $0x8] sm:$0x3]  ;;  %v185_v57 = vld [vmem:[%s1239_s6 + $0x10] sm:$0xff] }
   0x4   :  { %v423_v9 = vsub.f32 0.0, %v199_v6  ;;  %v207_v11 = vld [vmem:[%s1238_s7 + $0x40] sm:$0xff]  ;;  %v921_v19 = vsub.s32 0, %v900_v5  ;;  %v457_v20 = vmul.f32 1.442695, %v432_v13  ;;  %v928_v25 = vadd.f32 -1.0, %v199_v6 }
   0x5   :  { %v431_v14 = vsub.f32 0.0, %v207_v11  ;;  %v917_v16 = vsub.s32 %v86_v8, %v900_v5  ;;  %v443_v30 = vmul.f32 1.442695, %v425_v18  ;;  %v183_v31 = vld [vmem:[%s1239_s6] sm:$0xff]  ;;  %v961_v39 = vadd.f32 -1.0, %v207_v11 }
   0x6   :  { %v439_v17 = vmul.f32 1.442695, %v423_v9  ;;  %v191_v46 = vld [vmem:[%s1239_s6 + $0x40] sm:$0xff]  ;;  %v988_v52 = vadd.f32 -1.0, %v200_v48  ;;  %v184_v58 = vld [vmem:[%s1239_s6 + $0x8] sm:$0x3] }
   0x7   :  { %v455_v21 = vmul.f32 1.442695, %v431_v14  ;;  %v90_v22 = vrot.slane %v81_v1, %v917_v16  ;;  %v141_v23 = vrot.slane %v132_v4, %v917_v16  ;;  %v926_v24 = vrot.slane %v83_v10, %v917_v16 }
   0x8   :  { %774 = vpow2.f32 %v439_v17  ;;  %v931_v26 = vrot.slane %v134_v12, %v917_v16  ;;  %v202_v12 = vld [vmem:[%s1238_s7 + $0x18] sm:$0x3]  ;;  %vm655_vm4 = vcmask 1042434   ;;  %vm657_vm5 = vcmask 1043459  }
   0x9   :  { %776 = vpow2.f32 %v457_v20  ;;  %v934_v27 = vrot.slane %v90_v22, %v917_v16  ;;  %v937_v28 = vrot.slane %v141_v23, %v917_v16  ;;  %v941_v29 = vrot.slane %v926_v24, %v917_v16  ;;  %v186_v20 = vld [vmem:[%s1239_s6 + $0x18] sm:$0x3] }
   0xa   :  { %v948_v32 = vrot.slane %v931_v26, %v917_v16  ;;  %v98_v34 = vcombine.high %v90_v22, %v90_v22  ;;  %v149_v35 = vcombine.high %v141_v23, %v141_v23  ;;  %778 = vpow2.f32 %v455_v21 }
   0xb   :  { %v218_v36 = vrot.slane %v934_v27, %v921_v19  ;;  %v956_v37 = vrot.slane %v937_v28, %v921_v19  ;;  %v234_v40 = vrot.slane %v941_v29, %v921_v19  ;;  %780 = vpow2.f32 %v443_v30 }
   0xc   :  { %v967_v41 = vrot.slane %v948_v32, %v921_v19  ;;  %v970_v42 = vrot.slane %v98_v34, %v917_v16  ;;  %v980_v47 = vrot.slane %v149_v35, %v917_v16  ;;  %v179_v49 = vcombine.high %v937_v28, %v937_v28 }
   0xd   :  { %v255_v44 = vsub.f32 %v183_v31, %v218_v36  ;;  %v343_v45 = vsub.f32 %v956_v37, %v199_v6  ;;  %v264_v50 = vsub.f32 %v192_v38, %v234_v40  ;;  %v327_v53 = vsub.f32 %v928_v25, %v956_v37 }
   0xe   :  { %v352_v51 = vsub.f32 %v967_v41, %v208_v7  ;;  %v128_v55 = vcombine.high %v934_v27, %v934_v27  ;;  %v351_v56 = vsub.f32 %v967_v41, %v207_v11  ;;  %v263_v61 = vsub.f32 %v191_v46, %v234_v40 }
   0xf   :  { %v359_v54 = vmul.f32 1.442695, %v343_v45  ;;  %v407_v59 = vmul.f32 %v255_v44, %v255_v44  ;;  %v222_v62 = vrot.slane %v970_v42, %v921_v19  ;;  %v416_v1 = vmul.f32 %v264_v50, %v264_v50 }
  0x10   :  { %v377_v60 = vmul.f32 1.442695, %v352_v51  ;;  %v375_v2 = vmul.f32 1.442695, %v351_v56  ;;  %v1005_v3 = vrot.slane %v980_v47, %v921_v19  ;;  %v256_v7 = vsub.f32 %v184_v58, %v218_v36 }
  0x11   :  { %782 = vpow2.f32 %v359_v54  ;;  %v257_v6 = vsub.f32 %v185_v57, %v222_v62  ;;  %v344_v8 = vsub.f32 %v956_v37, %v200_v48  ;;  %v336_v9 = vsub.f32 %v950_v33, %v967_v41  ;;  %v204_v33 = vld [vmem:[%s1238_s7 + $0x28] sm:$0x3] }
  0x12   :  { %v775_v63 = vpop.eup %774  ;;  %784 = vpow2.f32 %v377_v60  ;;  %v335_v10 = vsub.f32 %v961_v39, %v967_v41  ;;  %v345_v11 = vsub.f32 %v1005_v3, %v914_v15  ;;  %v415_v14 = vmul.f32 %v263_v61, %v263_v61  ;;  %v203_v39 = vld [vmem:[%s1238_s7 + $0x20] sm:$0xff]  ;;  %v188_v54 = vld [vmem:[%s1239_s6 + $0x28] sm:$0x3] }
  0x13   :  { %v777_v4 = vpop.eup %776  ;;  %786 = vpow2.f32 %v375_v2  ;;  %v471_v13 = vmul.f32 %v775_v63, %v407_v59  ;;  %v328_v17 = vsub.f32 %v988_v52, %v956_v37  ;;  %v361_v18 = vmul.f32 1.442695, %v344_v8 }
  0x14   :  { %v779_v21 = vpop.eup %778  ;;  %v480_v22 = vmul.f32 %v777_v4, %v416_v1  ;;  %v363_v23 = vmul.f32 1.442695, %v345_v11  ;;  %v409_v27 = vmul.f32 %v257_v6, %v257_v6  ;;  %v424_v28 = vsub.f32 0.0, %v200_v48  ;;  %v187_v6 = vld [vmem:[%s1239_s6 + $0x20] sm:$0xff] }
  0x15   :  { %788 = vpow2.f32 %v361_v18  ;;  %v1022_v15 = vadd.f32 -1.0, %v202_v12  ;;  %v346_v30 = vsub.f32 %v1005_v3, %v202_v12  ;;  %v426_v31 = vsub.f32 0.0, %v202_v12  ;;  %v781_v34 = vpop.eup %780 }
  0x16   :  { %v329_v35 = vsub.f32 %v973_v43, %v1005_v3  ;;  %790 = vpow2.f32 %v363_v23  ;;  %v441_v36 = vmul.f32 1.442695, %v424_v28  ;;  %v258_v38 = vsub.f32 %v186_v20, %v222_v62 }
  0x17   :  { %v479_v40 = vmul.f32 %v779_v21, %v415_v14  ;;  %v408_v41 = vmul.f32 %v256_v7, %v256_v7  ;;  %v365_v44 = vmul.f32 1.442695, %v346_v30  ;;  %v445_v45 = vmul.f32 1.442695, %v426_v31 }
  0x18   :  { %792 = vpow2.f32 %v441_v36  ;;  %v226_v46 = vrot.slane %v128_v55, %v921_v19  ;;  %v1035_v48 = vrot.slane %v179_v49, %v921_v19  ;;  %v428_v50 = vsub.f32 0.0, %v204_v33 }
  0x19   :  { %v473_v43 = vmul.f32 %v781_v34, %v409_v27  ;;  %v330_v51 = vsub.f32 %v1022_v15, %v1005_v3  ;;  %794 = vpow2.f32 %v365_v44  ;;  %v427_v56 = vsub.f32 0.0, %v203_v39 }
  0x1a   :  { %v410_v58 = vmul.f32 %v258_v38, %v258_v38  ;;  %796 = vpow2.f32 %v445_v45  ;;  %v348_v59 = vsub.f32 %v1035_v48, %v204_v33  ;;  %v449_v55 = vmul.f32 1.442695, %v428_v50 }
  0x1b   :  { %v783_v57 = vpop.eup %782  ;;  %v1046_v61 = vadd.f32 -1.0, %v204_v33  ;;  %v1048_v62 = vadd.f32 -1.0, %v203_v39  ;;  %v347_v63 = vsub.f32 %v1035_v48, %v203_v39  ;;  %v260_v3 = vsub.f32 %v188_v54, %v226_v46 }
  0x1c   :  { %v785_v60 = vpop.eup %784  ;;  %v391_v49 = vadd.f32 %v783_v57, %v327_v53  ;;  %v369_v4 = vmul.f32 1.442695, %v348_v59  ;;  %798 = vpow2.f32 %v449_v55  ;;  %v447_v25 = vmul.f32 1.442695, %v427_v56 }
  0x1d   :  { %v787_v1 = vpop.eup %786  ;;  %v400_v2 = vadd.f32 %v785_v60, %v336_v9  ;;  %v367_v11 = vmul.f32 1.442695, %v347_v63  ;;  %v99_v12 = vcombine.high %v926_v24, %v926_v24  ;;  %v150_v14 = vcombine.high %v931_v26, %v931_v26  ;;  %v210_v9 = vld [vmem:[%s1238_s7 + $0x58] sm:$0x3] }
  0x1e   :  { %v487_v7 = vadd.f32 %v471_v13, %v391_v49  ;;  %v399_v8 = vadd.f32 %v787_v1, %v335_v10  ;;  %800 = vpow2.f32 %v369_v4  ;;  %v259_v23 = vsub.f32 %v187_v6, %v226_v46  ;;  %v209_v10 = vld [vmem:[%s1238_s7 + $0x50] sm:$0xff] }
  0x1f   :  { %v496_v53 = vadd.f32 %v480_v22, %v400_v2  ;;  %v789_v18 = vpop.eup %788  ;;  %802 = vpow2.f32 %v367_v11  ;;  %v1068_v26 = vrot.slane %v99_v12, %v917_v16  ;;  %v1071_v15 = vrot.slane %v150_v14, %v917_v16  ;;  %v212_v11 = vld [vmem:[%s1238_s7 + $0x68] sm:$0x3] }
  0x20   :  { %v503_v20 = vmul.f32 0.5, %v487_v7  ;;  %v495_v21 = vadd.f32 %v479_v40, %v399_v8  ;;  %v791_v13 = vpop.eup %790  ;;  %v392_v24 = vadd.f32 %v789_v18, %v328_v17  ;;  %804 = vpow2.f32 %v447_v25 }
  0x21   :  { %v512_v22 = vmul.f32 0.5, %v496_v53  ;;  %v393_v28 = vadd.f32 %v791_v13, %v329_v35  ;;  %v434_v30 = vsub.f32 0.0, %v210_v9  ;;  %v332_v34 = vsub.f32 %v1046_v61, %v1035_v48 }
  0x22   :  { %519 = vadd.xlane.f32.xlu0 %v503_v20  ;;  %v511_v27 = vmul.f32 0.5, %v495_v21  ;;  %v793_v31 = vpop.eup %792  ;;  %v412_v36 = vmul.f32 %v260_v3, %v260_v3  ;;  %v433_v37 = vsub.f32 0.0, %v209_v10  ;;  %v1078_v39 = vrot.slane %v1071_v15, %v921_v19 }
  0x23   :  { %v542_v33 = vsel %vm521_vm0, %v512_v22, 0.0  ;;  %v795_v52 = vpop.eup %794  ;;  %v489_v17 = vadd.f32 %v473_v43, %v393_v28  ;;  %v472_v38 = vmul.f32 %v793_v31, %v408_v41  ;;  %v461_v35 = vmul.f32 1.442695, %v434_v30  ;;  %v194_v41 = vld [vmem:[%s1239_s6 + $0x58] sm:$0x3] }
  0x24   :  { %543 = vadd.xlane.f32.xlu1 %v542_v33  ;;  %v797_v16 = vpop.eup %796  ;;  %v394_v40 = vadd.f32 %v795_v52, %v330_v51  ;;  %v331_v44 = vsub.f32 %v1048_v62, %v1035_v48  ;;  %v238_v45 = vrot.slane %v1068_v26, %v921_v19  ;;  %v459_v46 = vmul.f32 1.442695, %v433_v37  ;;  %v195_v33 = vld [vmem:[%s1239_s6 + $0x60] sm:$0xff] }
  0x25   :  { %v505_v50 = vmul.f32 0.5, %v489_v17  ;;  %v488_v54 = vadd.f32 %v472_v38, %v392_v24  ;;  %v474_v56 = vmul.f32 %v797_v16, %v410_v58  ;;  %v411_v43 = vmul.f32 %v259_v23, %v259_v23  ;;  %v193_v58 = vld [vmem:[%s1239_s6 + $0x50] sm:$0xff]  ;;  %v196_v24 = vld [vmem:[%s1239_s6 + $0x68] sm:$0x3]  ;;  %v206_v17 = vld [vmem:[%s1238_s7 + $0x38] sm:$0x3] }
  0x26   :  { %540 = vadd.xlane.f32.xlu0 %v511_v27  ;;  %v799_v57 = vpop.eup %798  ;;  %v1087_v59 = vadd.f32 -1.0, %v210_v9  ;;  %v354_v51 = vsub.f32 %v1078_v39, %v210_v9  ;;  %806 = vpow2.f32 %v461_v35  ;;  %v1090_v48 = vadd.f32 -1.0, %v209_v10 }
  0x27   :  { %v504_v55 = vmul.f32 0.5, %v488_v54  ;;  %v490_v60 = vadd.f32 %v474_v56, %v394_v40  ;;  %v476_v49 = vmul.f32 %v799_v57, %v412_v36  ;;  %v353_v61 = vsub.f32 %v1078_v39, %v209_v10  ;;  %v211_v10 = vld [vmem:[%s1238_s7 + $0x60] sm:$0xff] }
  0x28   :  { %525 = vadd.xlane.f32.xlu1 %v505_v50  ;;  %v801_v62 = vpop.eup %800  ;;  %v266_v63 = vsub.f32 %v194_v41, %v238_v45  ;;  %v381_v1 = vmul.f32 1.442695, %v354_v51  ;;  %808 = vpow2.f32 %v459_v46  ;;  %v129_v2 = vcombine.high %v941_v29, %v941_v29  ;;  %v205_v50 = vld [vmem:[%s1238_s7 + $0x30] sm:$0xff] }
  0x29   :  { %v803_v3 = vpop.eup %802  ;;  %v522_v4 = vsel %vm521_vm0, %v504_v55, 0.0  ;;  %v506_v6 = vmul.f32 0.5, %v490_v60  ;;  %v396_v7 = vadd.f32 %v801_v62, %v332_v34  ;;  %v379_v8 = vmul.f32 1.442695, %v353_v61 }
  0x2a   :  { %v805_v25 = vpop.eup %804  ;;  %523 = vadd.xlane.f32.xlu0 %v522_v4  ;;  %v395_v53 = vadd.f32 %v803_v3, %v331_v44  ;;  %810 = vpow2.f32 %v381_v1  ;;  %v265_v12 = vsub.f32 %v193_v58, %v238_v45  ;;  %v180_v14 = vcombine.high %v948_v32, %v948_v32  ;;  %v190_v3 = vld [vmem:[%s1239_s6 + $0x38] sm:$0x3] }
  0x2b   :  { %v527_v29 = vsel %vm521_vm0, %v506_v6, 0.0  ;;  %v492_v9 = vadd.f32 %v476_v49, %v396_v7  ;;  %v475_v18 = vmul.f32 %v805_v25, %v411_v43  ;;  %812 = vpow2.f32 %v379_v8 }
  0x2c   :  { %528 = vadd.xlane.f32.xlu1 %v527_v29  ;;  %v242_v20 = vrot.slane %v129_v2, %v921_v19  ;;  %v1107_v21 = vrot.slane %v180_v14, %v921_v19  ;;  %v436_v23 = vsub.f32 0.0, %v212_v11  ;;  %v338_v32 = vsub.f32 %v1087_v59, %v1078_v39  ;;  %v214_v29 = vld [vmem:[%s1238_s7 + $0x78] sm:$0x3] }
  0x2d   :  { %v508_v13 = vmul.f32 0.5, %v492_v9  ;;  %v491_v22 = vadd.f32 %v475_v18, %v395_v53  ;;  %v418_v27 = vmul.f32 %v266_v63, %v266_v63  ;;  %v337_v28 = vsub.f32 %v1090_v48, %v1078_v39 }
  0x2e   :  { %v356_v30 = vsub.f32 %v1107_v21, %v212_v11  ;;  %v465_v31 = vmul.f32 1.442695, %v436_v23  ;;  %v417_v37 = vmul.f32 %v265_v12, %v265_v12  ;;  %v355_v52 = vsub.f32 %v1107_v21, %v211_v10  ;;  %v189_v23 = vld [vmem:[%s1239_s6 + $0x30] sm:$0xff] }
  0x2f   :  { %v532_v34 = vsel %vm521_vm0, %v508_v13, 0.0  ;;  %v507_v36 = vmul.f32 0.5, %v491_v22  ;;  %v268_v39 = vsub.f32 %v196_v24, %v242_v20  ;;  %v435_v16 = vsub.f32 0.0, %v211_v10 }
  0x30   :  { %v807_v38 = vpop.eup %806  ;;  %533 = vadd.xlane.f32.xlu1 %v532_v34  ;;  %v385_v35 = vmul.f32 1.442695, %v356_v30  ;;  %814 = vpow2.f32 %v465_v31  ;;  %v284_v40 = vadd.f32 -1.0, %v212_v11  ;;  %v267_v44 = vsub.f32 %v195_v33, %v242_v20 }
  0x31   :  { %530 = vadd.xlane.f32.xlu0 %v507_v36  ;;  %v383_v45 = vmul.f32 1.442695, %v355_v52  ;;  %v181_v46 = vcombine.high %v980_v47, %v980_v47  ;;  %v463_v56 = vmul.f32 1.442695, %v435_v16  ;;  %v130_v43 = vcombine.high %v970_v42, %v970_v42 }
  0x32   :  { %v809_v54 = vpop.eup %808  ;;  %816 = vpow2.f32 %v385_v35  ;;  %v430_v41 = vsub.f32 0.0, %v206_v17  ;;  %v482_v57 = vmul.f32 %v807_v38, %v418_v27  ;;  %v283_v59 = vadd.f32 -1.0, %v211_v10  ;;  %v213_v10 = vld [vmem:[%s1238_s7 + $0x70] sm:$0xff] }
  0x33   :  { %818 = vpow2.f32 %v383_v45  ;;  %v1136_v51 = vrot.slane %v181_v46, %v921_v19  ;;  %v481_v55 = vmul.f32 %v809_v54, %v417_v37  ;;  %v429_v60 = vsub.f32 0.0, %v205_v50  ;;  %v198_v46 = vld [vmem:[%s1239_s6 + $0x78] sm:$0x3] }
  0x34   :  { %v811_v48 = vpop.eup %810  ;;  %820 = vpow2.f32 %v463_v56  ;;  %v453_v47 = vmul.f32 1.442695, %v430_v41  ;;  %v340_v63 = vsub.f32 %v284_v40, %v1107_v21  ;;  %v230_v42 = vrot.slane %v130_v43, %v921_v19 }
  0x35   :  { %v813_v49 = vpop.eup %812  ;;  %v402_v58 = vadd.f32 %v811_v48, %v338_v32  ;;  %v350_v61 = vsub.f32 %v1136_v51, %v206_v17  ;;  %v420_v2 = vmul.f32 %v268_v39, %v268_v39  ;;  %v349_v6 = vsub.f32 %v1136_v51, %v205_v50 }
  0x36   :  { %v401_v62 = vadd.f32 %v813_v49, %v337_v28  ;;  %822 = vpow2.f32 %v453_v47  ;;  %v339_v8 = vsub.f32 %v283_v59, %v1107_v21  ;;  %v419_v11 = vmul.f32 %v267_v44, %v267_v44 }
  0x37   :  { %v498_v1 = vadd.f32 %v482_v57, %v402_v58  ;;  %v373_v4 = vmul.f32 1.442695, %v350_v61  ;;  %v451_v25 = vmul.f32 1.442695, %v429_v60  ;;  %v371_v12 = vmul.f32 1.442695, %v349_v6 }
  0x38   :  { %v497_v7 = vadd.f32 %v481_v55, %v401_v62  ;;  %v182_v14 = vcombine.high %v1071_v15, %v1071_v15  ;;  %v262_v20 = vsub.f32 %v190_v3, %v230_v42  ;;  %v131_v21 = vcombine.high %v1068_v26, %v1068_v26  ;;  %v197_v61 = vld [vmem:[%s1239_s6 + $0x70] sm:$0xff] }
  0x39   :  { %v514_v53 = vmul.f32 0.5, %v498_v1  ;;  %824 = vpow2.f32 %v373_v4  ;;  %v278_v24 = vadd.f32 -1.0, %v206_v17  ;;  %v277_v27 = vadd.f32 -1.0, %v205_v50 }
  0x3a   :  { %v815_v9 = vpop.eup %814  ;;  %v513_v18 = vmul.f32 0.5, %v497_v7  ;;  %826 = vpow2.f32 %v451_v25  ;;  %v1161_v22 = vrot.slane %v182_v14, %v921_v19  ;;  %v438_v28 = vsub.f32 0.0, %v214_v29 }
  0x3b   :  { %v547_v15 = vsel %vm521_vm0, %v514_v53, 0.0  ;;  %v484_v13 = vmul.f32 %v815_v9, %v420_v2  ;;  %828 = vpow2.f32 %v371_v12  ;;  %v261_v26 = vsub.f32 %v189_v23, %v230_v42 }
  0x3c   :  { %v817_v32 = vpop.eup %816  ;;  %548 = vadd.xlane.f32.xlu1 %v547_v15  ;;  %545 = vadd.xlane.f32.xlu0 %v513_v18  ;;  %v358_v33 = vsub.f32 %v1161_v22, %v214_v29  ;;  %v357_v34 = vsub.f32 %v1161_v22, %v213_v10  ;;  %v414_v52 = vmul.f32 %v262_v20, %v262_v20  ;;  %v469_v39 = vmul.f32 1.442695, %v438_v28  ;;  %v32_v28 = vld [vmem:[%s1242_s1] sm:$0xff] }
  0x3d   :  { %v819_v30 = vpop.eup %818  ;;  %v404_v31 = vadd.f32 %v817_v32, %v340_v63  ;;  %v246_v38 = vrot.slane %v131_v21, %v921_v19  ;;  %v334_v45 = vsub.f32 %v278_v24, %v1136_v51  ;;  %v437_v50 = vsub.f32 0.0, %v213_v10 }
  0x3e   :  { %v821_v36 = vpop.eup %820  ;;  %v403_v37 = vadd.f32 %v819_v30, %v339_v8  ;;  %v389_v40 = vmul.f32 1.442695, %v358_v33  ;;  %v387_v44 = vmul.f32 1.442695, %v357_v34  ;;  %830 = vpow2.f32 %v469_v39  ;;  %v33_v30 = vld [vmem:[%s1242_s1 + $0x8] sm:$0xff] }
  0x3f   :  { %v500_v35 = vadd.f32 %v484_v13, %v404_v31  ;;  %v483_v16 = vmul.f32 %v821_v36, %v419_v11  ;;  %v413_v43 = vmul.f32 %v261_v26, %v261_v26  ;;  %v333_v19 = vsub.f32 %v277_v27, %v1136_v51  ;;  %v34_v31 = vld [vmem:[%s1241_s0] sm:$0xff]  ;;  %v35_v26 = vld [vmem:[%s1241_s0 + $0x8] sm:$0xff] }
  0x40   :  { %v823_v17 = vpop.eup %822  ;;  %832 = vpow2.f32 %v389_v40  ;;  %v467_v57 = vmul.f32 1.442695, %v437_v50  ;;  %v270_v47 = vsub.f32 %v198_v46, %v246_v38  ;;  %v286_v58 = vadd.f32 -1.0, %v214_v29  ;;  %v57_v36 = vld [vmem:[%s1243_s2] sm:$0xff] }
  0x41   :  { %v516_v54 = vmul.f32 0.5, %v500_v35  ;;  %v499_v56 = vadd.f32 %v483_v16, %v403_v37  ;;  %v478_v41 = vmul.f32 %v823_v17, %v414_v52  ;;  %834 = vpow2.f32 %v387_v44 }
  0x42   :  { %836 = vpow2.f32 %v467_v57  ;;  %v285_v51 = vadd.f32 -1.0, %v213_v10  ;;  %v422_v2 = vmul.f32 %v270_v47, %v270_v47  ;;  %v269_v3 = vsub.f32 %v197_v61, %v246_v38 }
  0x43   :  { %v825_v59 = vpop.eup %824  ;;  %v552_v48 = vsel %vm521_vm0, %v516_v54, 0.0  ;;  %v515_v55 = vmul.f32 0.5, %v499_v56  ;;  %v342_v7 = vsub.f32 %v286_v58, %v1161_v22  ;;  %v36_v33 = vsub.f32 %v32_v28, %v34_v31 }
  0x44   :  { %v827_v60 = vpop.eup %826  ;;  %553 = vadd.xlane.f32.xlu1 %v552_v48  ;;  %v398_v49 = vadd.f32 %v825_v59, %v334_v45  ;;  %v341_v8 = vsub.f32 %v285_v51, %v1161_v22  ;;  %v421_v29 = vmul.f32 %v269_v3, %v269_v3  ;;  %v58_v22 = vld [vmem:[%s1240_s3] sm:$0xff]  ;;  %v37_v34 = vsub.f32 %v33_v30, %v35_v26 }
  0x45   :  { %v829_v62 = vpop.eup %828  ;;  %550 = vadd.xlane.f32.xlu0 %v515_v55  ;;  %v477_v63 = vmul.f32 %v827_v60, %v413_v43  ;;  %v62_v27 = vmul.f32 1.442695, %v58_v22  ;;  %v38_v37 = vmul.f32 %v36_v33, %v36_v33  ;;  %v59_v52 = vadd.f32 1.0, %v58_v22  ;;  %v1200_v45 = vld [vmem:[%s1244_s8] sm:$0xff] }
  0x46   :  { %v494_v42 = vadd.f32 %v478_v41, %v398_v49  ;;  %v397_v1 = vadd.f32 %v829_v62, %v333_v19  ;;  %v60_v38 = vmul.f32 %v57_v36, %v57_v36  ;;  %v39_v39 = vmul.f32 %v37_v34, %v37_v34 }
  0x47   :  { %838 = vpow2.f32 %v62_v27  ;;  %v710_v46 = vsel %vm669_vm1, %v1200_v45, -inf  ;;  %v686_v41 = vsel %vm669_vm1, %v1200_v45, 0.0  ;;  %v1207_v49 = vand.u32 127, %v87_v0 }
  0x48   :  { %v510_v4 = vmul.f32 0.5, %v494_v42  ;;  %v493_v6 = vadd.f32 %v477_v63, %v397_v1  ;;  %v831_v11 = vpop.eup %830  ;;  %v61_v35 = vsub.f32 %v59_v52, %v60_v38  ;;  %v40_v40 = vadd.f32 %v39_v39, %v38_v37 }
  0x49   :  { %v486_v14 = vmul.f32 %v831_v11, %v422_v2  ;;  %v687_v19 = vrot.slane %v686_v41, 4  ;;  %v583_v63 = vadd.s32 4294967288, %v1207_v49  ;;  %v581_v42 = vsub.s32 %v1207_v49, %v900_v5 }
  0x4a   :  { %v537_v25 = vsel %vm521_vm0, %v510_v4, 0.0  ;;  %v509_v53 = vmul.f32 0.5, %v493_v6  ;;  %v833_v12 = vpop.eup %832  ;;  %vm659_vm6 = vcmask 1044484   ;;  %vm661_vm7 = vcmask 1045509  }
  0x4b   :  { %538 = vadd.xlane.f32.xlu1 %v537_v25  ;;  %v835_v9 = vpop.eup %834  ;;  %v406_v18 = vadd.f32 %v833_v12, %v342_v7  ;;  %v688_v48 = vadd.f32 %v687_v19, %v686_v41  ;;  %v586_v1 = vsub.s32 %v583_v63, %v900_v5  ;;  %vm663_vm8 = vcmask 1046534  }
  0x4c   :  { %535 = vadd.xlane.f32.xlu0 %v509_v53  ;;  %v405_v20 = vadd.f32 %v835_v9, %v341_v8  ;;  %v837_v23 = vpop.eup %836  ;;  %vm665_vm9 = vcmask 1047559   ;;  %vm43_vm10 = vcmask 7168   ;;  %vm699_vm11 = vcmask 73728  }
  0x4d   :  { %v502_v21 = vadd.f32 %v486_v14, %v406_v18  ;;  %v485_v10 = vmul.f32 %v837_v23, %v421_v29  ;;  %v689_v47 = vrot.slane %v688_v48, 2  ;;  %vm731_vm12 = vcmp.eq.s32.totalorder %v1207_v49, 0 }
  0x4e   :  { %vm735_vm13 = vcmp.eq.s32.totalorder %v1207_v49, 1  ;;  %vm739_vm14 = vcmp.eq.s32.totalorder %v1207_v49, 2  ;;  %vm743_vm15 = vcmp.eq.s32.totalorder %v1207_v49, 3 }
  0x4f   :  { %v518_v15 = vmul.f32 0.5, %v502_v21  ;;  %v501_v13 = vadd.f32 %v485_v10, %v405_v20  ;;  %v690_v58 = vadd.f32 %v689_v47, %v688_v48 }
  0x51   :  { %v557_v32 = vsel %vm521_vm0, %v518_v15, 0.0  ;;  %v517_v24 = vmul.f32 0.5, %v501_v13  ;;  %v839_v16 = vpop.eup %838  ;;  %v691_v51 = vrot.slane %v690_v58, 1  ;;  %vm747_vm0 = vcmp.eq.s32.totalorder %v1207_v49, 4 }
  0x52   :  { %558 = vadd.xlane.f32.xlu1 %v557_v32  ;;  %v64_v44 = vsub.f32 %v61_v35, %v839_v16 }
  0x53   :  { %555 = vadd.xlane.f32.xlu0 %v517_v24  ;;  %v692_v3 = vadd.f32 %v691_v51, %v690_v58 }
  0x54   :  { %v65_v17 = vmul.f32 -0.5, %v64_v44 }
  0x55   :  { %v694_v53 = vmul.f32 0.125, %v692_v3 }
  0x56   :  { %66 = vadd.xlane.f32.xlu1 %v65_v17 }
  0x57   :  { %41 = vadd.xlane.f32.xlu0 %v40_v40  ;;  %840 = vlog2.f32 %v694_v53 }
  0x5a   :  { %711 = vmax.xlane.f32.xlu1 %v710_v46 }
  0x61   :  { %v841_v35 = vpop.eup %840 }
  0x62   :  { %v696_v17 = vmul.f32 0.6931472, %v841_v35 }
  0xaf   :  { %v520_v54 = vpop.xlane.xlu0 %519 }
  0xb0   :  { %v582_v0 = vrot.slane %v520_v54, %v581_v42 }
  0xb1   :  { %v544_v50 = vpop.xlane.xlu1 %543 }
  0xb2   :  { %v624_v21 = vrot.slane %v544_v50, %v586_v1  ;;  %v760_v50 = vadd.f32 2.3025851, %v696_v17 }
  0xb3   :  { %v541_v43 = vpop.xlane.xlu0 %540 }
  0xb4   :  { %v620_v9 = vrot.slane %v541_v43, %v581_v42  ;;  %v698_v43 = vmul.f32 %v760_v50, %v694_v53 }
  0xb5   :  { %v526_v56 = vpop.xlane.xlu1 %525 }
  0xb6   :  { %v593_v25 = vrot.slane %v526_v56, %v581_v42  ;;  %v625_v24 = vsel %vm588_vm2, %v624_v21, %v620_v9 }
  0xb7   :  { %v524_v59 = vpop.xlane.xlu0 %523 }
  0xb8   :  { %v587_v6 = vrot.slane %v524_v59, %v586_v1 }
  0xb9   :  { %v529_v57 = vpop.xlane.xlu1 %528 }
  0xba   :  { %v597_v7 = vrot.slane %v529_v57, %v586_v1  ;;  %v589_v12 = vsel %vm588_vm2, %v587_v6, %v582_v0  ;;  %v700_v57 = vsel %vm699_vm11, %v698_v43, 0.0 }
  0xbc   :  { %v598_v14 = vsel %vm588_vm2, %v597_v7, %v593_v25 }
  0xbd   :  { %v534_v55 = vpop.xlane.xlu1 %533  ;;  %v654_v10 = vsel %vm653_vm3, %v598_v14, %v589_v12 }
  0xbe   :  { %v531_v60 = vpop.xlane.xlu0 %530  ;;  %v606_v8 = vrot.slane %v534_v55, %v586_v1 }
  0xbf   :  { %v602_v11 = vrot.slane %v531_v60, %v581_v42 }
  0xc1   :  { %v607_v5 = vsel %vm588_vm2, %v606_v8, %v602_v11 }
  0xc2   :  { %v656_v32 = vsel %vm655_vm4, %v607_v5, %v654_v10 }
  0xc9   :  { %v549_v61 = vpop.xlane.xlu1 %548  ;;  %v546_v62 = vpop.xlane.xlu0 %545 }
  0xca   :  { %v633_v15 = vrot.slane %v549_v61, %v586_v1  ;;  %v629_v13 = vrot.slane %v546_v62, %v581_v42 }
  0xcc   :  { %v634_v26 = vsel %vm588_vm2, %v633_v15, %v629_v13 }
  0xd1   :  { %v554_v2 = vpop.xlane.xlu1 %553 }
  0xd2   :  { %v551_v4 = vpop.xlane.xlu0 %550  ;;  %v642_v28 = vrot.slane %v554_v2, %v586_v1 }
  0xd3   :  { %v638_v30 = vrot.slane %v551_v4, %v581_v42 }
  0xd5   :  { %v643_v37 = vsel %vm588_vm2, %v642_v28, %v638_v30 }
  0xd8   :  { %v539_v29 = vpop.xlane.xlu1 %538 }
  0xd9   :  { %v615_v18 = vrot.slane %v539_v29, %v586_v1  ;;  %v536_v20 = vpop.xlane.xlu0 %535 }
  0xda   :  { %v611_v23 = vrot.slane %v536_v20, %v581_v42 }
  0xdc   :  { %v616_v22 = vsel %vm588_vm2, %v615_v18, %v611_v23 }
  0xdd   :  { %v658_v27 = vsel %vm657_vm5, %v616_v22, %v656_v32 }
  0xde   :  { %v660_v31 = vsel %vm659_vm6, %v625_v24, %v658_v27 }
  0xdf   :  { %v559_v33 = vpop.xlane.xlu1 %558  ;;  %v662_v34 = vsel %vm661_vm7, %v634_v26, %v660_v31 }
  0xe0   :  { %v651_v36 = vrot.slane %v559_v33, %v586_v1  ;;  %v556_v52 = vpop.xlane.xlu0 %555  ;;  %v664_v39 = vsel %vm663_vm8, %v643_v37, %v662_v34 }
  0xe1   :  { %v647_v38 = vrot.slane %v556_v52, %v581_v42 }
  0xe3   :  { %v652_v16 = vsel %vm588_vm2, %v651_v36, %v647_v38  ;;  %v67_v41 = vpop.xlane.xlu1 %66 }
  0xe4   :  { %v666_v40 = vsel %vm665_vm9, %v652_v16, %v664_v39  ;;  %v42_v54 = vpop.xlane.xlu0 %41  ;;  %v68_v19 = vsel %vm43_vm10, %v67_v41, 0.0 }
  0xe5   :  { %v668_v44 = vmul.f32 %v666_v40, %v1200_v45  ;;  %v44_v56 = vsel %vm43_vm10, %v42_v54, 0.0  ;;  %69 = vadd.xlane.f32.xlu1 %v68_v19 }
  0xe7   :  { %v670_v46 = vsel %vm669_vm1, %v668_v44, 0.0  ;;  %v712_v45 = vpop.xlane.xlu1 %711  ;;  %vm751_vm1 = vcmp.eq.s32.totalorder %v1207_v49, 5 }
  0xe8   :  { %671 = vadd.xlane.f32.xlu0 %v670_v46  ;;  %v713_v55 = vsel %vm43_vm10, %v712_v45, 0.0 }
  0xe9   :  { %701 = vadd.xlane.f32.xlu1 %v700_v57 }
  0xec   :  { %45 = vadd.xlane.f32.xlu0 %v44_v56 }
 0x172   :  { %v70_v61 = vpop.xlane.xlu1 %69 }
 0x173   :  { %v71_v62 = vrot.slane %v70_v61, 4 }
 0x175   :  { %v672_v59 = vpop.xlane.xlu0 %671  ;;  %v72_v51 = vadd.f32 %v71_v62, %v70_v61 }
 0x176   :  { %v673_v48 = vsel %vm43_vm10, %v672_v59, 0.0  ;;  %v702_v8 = vpop.xlane.xlu1 %701 }
 0x177   :  { %674 = vadd.xlane.f32.xlu0 %v673_v48  ;;  %v73_v1 = vrot.slane %v72_v51, 2  ;;  %v703_v11 = vrot.slane %v702_v8, 4 }
 0x179   :  { %v46_v47 = vpop.xlane.xlu0 %45  ;;  %v74_v3 = vadd.f32 %v73_v1, %v72_v51  ;;  %v704_v0 = vadd.f32 %v703_v11, %v702_v8 }
 0x17a   :  { %v47_v60 = vrot.slane %v46_v47, 4 }
 0x17b   :  { %714 = vadd.xlane.f32.xlu0 %v713_v55  ;;  %v75_v6 = vrot.slane %v74_v3, 1  ;;  %v705_v25 = vrot.slane %v704_v0, 2 }
 0x17c   :  { %v48_v58 = vadd.f32 %v47_v60, %v46_v47 }
 0x17d   :  { %v76_v7 = vadd.f32 %v75_v6, %v74_v3  ;;  %v706_v29 = vadd.f32 %v705_v25, %v704_v0 }
 0x17e   :  { %v49_v63 = vrot.slane %v48_v58, 2 }
 0x17f   :  { %v707_v21 = vrot.slane %v706_v29, 1 }
 0x180   :  { %v50_v42 = vadd.f32 %v49_v63, %v48_v58 }
 0x181   :  { %v708_v22 = vadd.f32 %v707_v21, %v706_v29 }
 0x182   :  { %v51_v2 = vrot.slane %v50_v42, 1 }
 0x184   :  { %v52_v4 = vadd.f32 %v51_v2, %v50_v42 }
 0x186   :  { %761 = vpush %v52_v4 }
 0x187   :  { %763 = vpush %v76_v7 }
 0x1b7   :  { %s762_s0 = spop %761 }
 0x1b8   :  { %s764_s2 = spop %763  ;;  %s56_s8 = smul.f32 0.125, %s762_s0 }
 0x1b9   :  { %s80_s17 = smul.f32 0.125, %s764_s2 }
 0x1ba   :  { %v732_v28 = vstv %s56_s8 }
 0x1bb   :  { %v740_v30 = vstv %s80_s17  ;;  %v733_v26 = vsel %vm731_vm12, %v732_v28, 0.0 }
 0x1bc   :  { %v741_v37 = vsel %vm739_vm14, %v740_v30, 0.0 }
 0x204   :  { %v675_v53 = vpop.xlane.xlu0 %674 }
 0x205   :  { %v676_v12 = vrot.slane %v675_v53, 4 }
 0x207   :  { %v677_v14 = vadd.f32 %v676_v12, %v675_v53 }
 0x208   :  { %v715_v9 = vpop.xlane.xlu0 %714 }
 0x209   :  { %v678_v5 = vrot.slane %v677_v14, 2  ;;  %v716_v18 = vrot.slane %v715_v9, 4 }
 0x20b   :  { %v717_v20 = vadd.f32 %v716_v18, %v715_v9  ;;  %v679_v23 = vadd.f32 %v678_v5, %v677_v14 }
 0x20d   :  { %v718_v10 = vrot.slane %v717_v20, 2  ;;  %v680_v15 = vrot.slane %v679_v23, 1 }
 0x20f   :  { %v719_v13 = vadd.f32 %v718_v10, %v717_v20  ;;  %v681_v32 = vadd.f32 %v680_v15, %v679_v23 }
 0x211   :  { %765 = vpush %v681_v32  ;;  %v720_v24 = vrot.slane %v719_v13, 1 }
 0x212   :  { %767 = vpush %v708_v22 }
 0x213   :  { %v721_v27 = vadd.f32 %v720_v24, %v719_v13 }
 0x215   :  { %769 = vpush %v721_v27 }
 0x242   :  { %s766_s5 = spop %765 }
 0x243   :  { %s685_s18 = smul.f32 0.125, %s766_s5  ;;  %s768_s19 = spop %767 }
 0x244   :  { %s729_s21 = smul.f32 10.0, %s768_s19  ;;  %v744_v36 = vstv %s768_s19 }
 0x245   :  { %s727_s20 = sadd.f32 %s685_s18, %s56_s8  ;;  %v736_v31 = vstv %s685_s18  ;;  %v745_v38 = vsel %vm743_vm15, %v744_v36, 0.0 }
 0x246   :  { %v737_v33 = vsel %vm735_vm13, %v736_v31, 0.0  ;;  %s770_s22 = spop %769 }
 0x247   :  { %s728_s23 = sadd.f32 %s727_s20, %s80_s17  ;;  %v738_v34 = vadd.f32 %v737_v33, %v733_v26  ;;  %s725_s24 = smul.f32 0.125, %s770_s22 }
 0x249   :  { %s730_s7 = sadd.f32 %s729_s21, %s728_s23  ;;  %v742_v52 = vadd.f32 %v741_v37, %v738_v34 }
 0x24a   :  { %s726_s25 = ssub.f32 0.0, %s725_s24 }
 0x24b   :  { %v746_v39 = vadd.f32 %v745_v38, %v742_v52  ;;  %v752_v35 = vstv %s730_s7 }
 0x24c   :  { %v748_v16 = vstv %s726_s25  ;;  %v753_v17 = vsel %vm751_vm1, %v752_v35, 0.0 }
 0x24d   :  { %v749_v40 = vsel %vm747_vm0, %v748_v16, 0.0 }
 0x24e   :  { %v750_v44 = vadd.f32 %v749_v40, %v746_v39 }
 0x250   :  { %v754_v46 = vadd.f32 %v753_v17, %v750_v44 }
 0x252   :  { %755 = vst [vmem:[%s1245_s9] sm:$0x1] %v754_v46 }

</bundles_post_ra>
